<compile_context>
chip_gen: v6e
topology: v6e:2x2x1
jax: 0.10.0
libtpu: 0.0.40
codegen_flags: <defaults>
</compile_context>

<pallas_src>
import jax
import jax.numpy as jnp
from jax import lax
from jax.experimental import pallas as pl
from jax.experimental.pallas import tpu as pltpu


# ----------------------------------------------------------------------------
# Fused kernel: backbone + unrolled RNN decode + per-step cross-entropy loss.
# Caption token ids live in SMEM via scalar prefetch (dynamic target indexing).
# ----------------------------------------------------------------------------
def _make_captioner_kernel(num_steps):
    def kernel(cap_ref,                                                 # SMEM: caption ids
               patch_ref, wconv_ref, bconv_ref, wfc_ref, bfc_ref,       # backbone inputs
               embwih_ref, whh_ref, brnn_ref, wout_ref, bout_ref,       # decoder inputs
               loss_ref):                                               # output (1,1)
        # ---------------- backbone ----------------
        # conv as matmul on im2col patches: (P, 32) @ (32, F) -> (P, F), f32 accumulation
        feat = jnp.dot(patch_ref[...], wconv_ref[...],
                       preferred_element_type=jnp.float32) + bconv_ref[...]
        feat = jnp.maximum(feat, 0.0)                       # ReLU
        pooled = jnp.mean(feat, axis=0, keepdims=True)      # global average pool -> (1, F)
        # fc: (1, F) @ (F, 256), bf16 weights, f32 accumulation.  hidden = out.squeeze(0)
        hidden0 = (jnp.dot(pooled.astype(wfc_ref.dtype), wfc_ref[...],
                           preferred_element_type=jnp.float32) + bfc_ref[...])

        # ---------------- decoder ----------------
        V = embwih_ref.shape[0]
        idx = lax.broadcasted_iota(jnp.int32, (1, V), 1)

        def step(i, carry):
            h, onehot, acc = carry
            target = cap_ref[i + 1]                         # target_index = caption[i + 1]

            # fused embedding + RNNCell input projection: onehot @ (emb @ W_ih^T)
            # RNNCell (tanh): h' = tanh(x W_ih^T + h W_hh^T + (b_ih + b_hh))
            pre = (jnp.dot(onehot, embwih_ref[...], preferred_element_type=jnp.float32)
                   + jnp.dot(h, whh_ref[...], preferred_element_type=jnp.float32)
                   + brnn_ref[...])
            h_new = jnp.tanh(pre)

            # output layer + softmax over vocab (dim=0 of the 1-D logits in the reference)
            logits = jnp.dot(h_new, wout_ref[...],
                             preferred_element_type=jnp.float32) + bout_ref[...]
            m = jnp.max(logits, axis=-1, keepdims=True)
            e = jnp.exp(logits - m)
            probs = e * pl.reciprocal(jnp.sum(e, axis=-1, keepdims=True), approx=True)

            # greedy argmax -> one-hot of next word id (first max wins on ties)
            pmax = jnp.max(probs, axis=-1, keepdims=True)
            cand = jnp.where(probs >= pmax, idx, V)
            amin = jnp.min(cand, axis=-1, keepdims=True)
            onehot_new = (idx == amin).astype(jnp.float32)

            # CrossEntropyLoss applied to probs (exactly like the reference):
            #   loss_i = logsumexp(probs) - probs[target]     (reuse pmax = max(probs))
            lse = pmax + jnp.log(jnp.sum(jnp.exp(probs - pmax), axis=-1, keepdims=True))
            picked = jnp.sum(jnp.where(idx == target, probs, 0.0),
                             axis=-1, keepdims=True)
            return h_new, onehot_new, acc + (lse - picked)

        init = (hidden0,                                            # hidden = backbone features
                (idx == cap_ref[0]).astype(jnp.float32),            # current_word_id = caption[0]
                jnp.zeros((1, 1), jnp.float32))
        _, _, acc = lax.fori_loop(0, num_steps, step, init, unroll=True)
        loss_ref[...] = acc

    return kernel


def custom_resnet_forward(caption, patches, w_conv, b_conv, w_fc, b_fc,
                          emb_wih, w_hh_t, bias_rnn, w_out_t, b_out, num_steps):
    """Single pallas_call covering the whole forward pass. Returns the scalar loss."""
    def full(shape):
        return pl.BlockSpec(shape, lambda i, cap: tuple(0 for _ in shape))

    # VMEM budget (all resident, compiler may double-buffer): ~3 MiB << scoped default on
    # every generation (and << v7x's 64 MiB physical VMEM); no vmem_limit override needed.
    out = pl.pallas_call(
        _make_captioner_kernel(num_steps),
        out_shape=jax.ShapeDtypeStruct((1, 1), jnp.float32),
        grid_spec=pltpu.PrefetchScalarGridSpec(
            num_scalar_prefetch=1,              # caption ids -> SMEM
            grid=(1,),
            in_specs=[
                full(patches.shape),            # im2col patches (bf16)
                full(w_conv.shape),             # conv weight (bf16, K padded to 32)
                full(b_conv.shape),             # conv bias (f32)
                full(w_fc.shape),               # fc weight (bf16)
                full(b_fc.shape),               # fc bias (f32)
                full(emb_wih.shape),            # emb @ W_ih^T (fused, f32)
                full(w_hh_t.shape),             # W_hh^T (f32)
                full(bias_rnn.shape),           # b_ih + b_hh (folded)
                full(w_out_t.shape),            # W_out^T
                full(b_out.shape),              # b_out
            ],
            out_specs=full((1, 1)),
        ),
        compiler_params=pltpu.CompilerParams(dimension_semantics=("arbitrary",)),
    )(caption, patches, w_conv, b_conv, w_fc, b_fc,
      emb_wih, w_hh_t, bias_rnn, w_out_t, b_out)
    return out[0, 0]


# ----------------------------------------------------------------------------
# Host glue
# ----------------------------------------------------------------------------
def im2col_3x3(image):
    """(1, C, H, W) NCHW, 3x3, stride 1, pad 1 -> (H*W, C*9)."""
    _, C, H, W = image.shape
    xp = jnp.pad(image, ((0, 0), (0, 0), (1, 1), (1, 1)))
    cols = []
    for c in range(C):
        for dy in range(3):
            for dx in range(3):
                cols.append(xp[0, c, dy:dy + H, dx:dx + W])   # (H, W)
    cols = jnp.stack(cols, axis=-1)                           # (H, W, C*9)
    return cols.reshape(H * W, C * 9)


def reference_loss(patches_bf16, w_conv_bf16, b_conv, w_fc_bf16, b_fc,
                   emb_wih, w_hh_t, bias_rnn, w_out_t, b_out, caption_ids, num_steps):
    """Pure-JAX reference mirroring the PyTorch forward (same bf16 folds as the kernel)."""
    feat = jnp.maximum(
        jnp.dot(patches_bf16, w_conv_bf16, preferred_element_type=jnp.float32) + b_conv, 0.0)
    pooled = jnp.mean(feat, axis=0, keepdims=True)
    h = (jnp.dot(pooled.astype(jnp.bfloat16), w_fc_bf16,
                 preferred_element_type=jnp.float32) + b_fc)[0]
    word = int(caption_ids[0])
    total = 0.0
    for i in range(num_steps):
        target = int(caption_ids[i + 1])
        pre = emb_wih[word] + h @ w_hh_t + bias_rnn[0]
        h = jnp.tanh(pre)
        logits = h @ w_out_t + b_out[0]
        probs = jax.nn.softmax(logits)
        word = int(jnp.argmax(probs))
        m = jnp.max(probs)
        lse = m + jnp.log(jnp.sum(jnp.exp(probs - m)))
        total += float(lse - probs[target])
    return total


if __name__ == "__main__":
    # vocabulary (chartoidx / idxtochar)
    chars = (['<start>', '<end>', '<pad>']
             + [chr(ord('a') + i) for i in range(26)]
             + ['.', ' ', "'"])[:32]
    chartoidx = {c: i for i, c in enumerate(chars)}
    idxtochar = {i: c for i, c in enumerate(chars)}
    V = len(chartoidx)        # 32  (output_layer / embedding rows)
    E = 10                    # nn.Embedding(V, 10)
    HID = 256                 # RNNCell hidden / fc out
    FEAT = 2048               # backbone feature dim feeding fc (Linear(2048, 256))

    key = jax.random.PRNGKey(0)
    ks = jax.random.split(key, 11)

    # parameters (deterministic, stored transposed so kernels do straight matmuls)
    w_conv  = 0.10 * jax.random.normal(ks[0], (27, FEAT), jnp.float32)   # conv 3x3, 3->2048 (im2col)
    b_conv  = 0.10 * jax.random.normal(ks[1], (1, FEAT), jnp.float32)
    w_fc    = 0.02 * jax.random.normal(ks[2], (FEAT, HID), jnp.float32)  # Linear(2048,256)^T
    b_fc    = 0.02 * jax.random.normal(ks[3], (1, HID), jnp.float32)
    emb     = 0.50 * jax.random.normal(ks[4], (V, E), jnp.float32)       # Embedding(V,10)
    w_ih_t  = 0.10 * jax.random.normal(ks[5], (E, HID), jnp.float32)     # RNNCell W_ih^T
    w_hh_t  = 0.10 * jax.random.normal(ks[6], (HID, HID), jnp.float32)   # RNNCell W_hh^T
    b_ih    = 0.10 * jax.random.normal(ks[7], (1, HID), jnp.float32)
    b_hh    = 0.10 * jax.random.normal(ks[8], (1, HID), jnp.float32)
    w_out_t = 0.10 * jax.random.normal(ks[9], (HID, V), jnp.float32)     # Linear(256,V)^T
    b_out   = 0.10 * jax.random.normal(ks[10], (1, V), jnp.float32)

    # host-side folds for the kernel
    w_conv_p = jnp.pad(w_conv, ((0, 5), (0, 0))).astype(jnp.bfloat16)    # K: 27 -> 32, bf16
    w_fc_bf  = w_fc.astype(jnp.bfloat16)                                 # bf16 weight slab
    emb_wih  = jnp.dot(emb, w_ih_t)        # (V, HID): fused embedding + input projection
    bias_rnn = b_ih + b_hh                 # folded RNNCell bias

    # inputs
    image = jax.random.normal(jax.random.PRNGKey(1), (1, 3, 16, 16), jnp.float32)  # NCHW
    caption_ids = [chartoidx['<start>'], chartoidx['h'], chartoidx['e'],
                   chartoidx['l'], chartoidx['l'], chartoidx['o'],
                   chartoidx['<end>'], chartoidx['<pad>'], chartoidx['<pad>'],
                   chartoidx['<pad>']]
    caption = jnp.asarray(caption_ids, dtype=jnp.int32)

    # host-side loop-length computation. The reference checks the *previous* iteration's
    # target before breaking, so steps i = 0 .. end_pos-1 run with targets caption[1..end_pos]
    # (the step whose target is '<end>' IS scored).
    end_pos = next(j for j in range(1, len(caption_ids))
                   if idxtochar[caption_ids[j]] == '<end>')
    num_steps = end_pos

    # forward pass (single fused Pallas kernel)
    patches = im2col_3x3(image)                                          # (256, 27)
    patches = jnp.pad(patches, ((0, 0), (0, 5))).astype(jnp.bfloat16)    # (256, 32) aligned, bf16
    final_loss = custom_resnet_forward(caption, patches, w_conv_p, b_conv, w_fc_bf, b_fc,
                                       emb_wih, w_hh_t, bias_rnn, w_out_t, b_out, num_steps)
    final_loss = jax.block_until_ready(final_loss)
    assert bool(jnp.isfinite(final_loss))

    # pure-JAX reference check (loose tolerance covers bf16/EUP-approx differences)
    ref = reference_loss(patches, w_conv_p, b_conv, w_fc_bf, b_fc,
                         emb_wih, w_hh_t, bias_rnn, w_out_t, b_out, caption_ids, num_steps)
    rel = abs(float(final_loss) - ref) / max(1.0, abs(ref))
    assert rel < 2e-2, (float(final_loss), ref, rel)

    print("KERNEL_OK")
</pallas_src>

<mosaic_0001>
module attributes {stable_mosaic.version = 11 : i64} {
  func.func @kernel(%arg0: i32, %arg1: memref<10xi32, #tpu.memory_space<smem>>, %arg2: memref<256x32xbf16, #tpu.memory_space<vmem>>, %arg3: memref<32x2048xbf16, #tpu.memory_space<vmem>>, %arg4: memref<1x2048xf32, #tpu.memory_space<vmem>>, %arg5: memref<2048x256xbf16, #tpu.memory_space<vmem>>, %arg6: memref<1x256xf32, #tpu.memory_space<vmem>>, %arg7: memref<32x256xf32, #tpu.memory_space<vmem>>, %arg8: memref<256x256xf32, #tpu.memory_space<vmem>>, %arg9: memref<1x256xf32, #tpu.memory_space<vmem>>, %arg10: memref<256x32xf32, #tpu.memory_space<vmem>>, %arg11: memref<1x32xf32, #tpu.memory_space<vmem>>, %arg12: memref<1x1xf32, #tpu.memory_space<vmem>>) attributes {dimension_semantics = [#tpu.dimension_semantics<arbitrary>], iteration_bounds = array<i64: 1>, scalar_prefetch = 1 : i64, scratch_operands = 0 : i64, tpu.core_type = #tpu.core_type<tc>, window_params = [{pipeline_mode = #tpu.pipeline_mode<synchronous>, transform_indices = @transform_0, window_bounds = array<i64: 256, 32>}, {pipeline_mode = #tpu.pipeline_mode<synchronous>, transform_indices = @transform_1, window_bounds = array<i64: 32, 2048>}, {pipeline_mode = #tpu.pipeline_mode<synchronous>, transform_indices = @transform_2, window_bounds = array<i64: 1, 2048>}, {pipeline_mode = #tpu.pipeline_mode<synchronous>, transform_indices = @transform_3, window_bounds = array<i64: 2048, 256>}, {pipeline_mode = #tpu.pipeline_mode<synchronous>, transform_indices = @transform_4, window_bounds = array<i64: 1, 256>}, {pipeline_mode = #tpu.pipeline_mode<synchronous>, transform_indices = @transform_5, window_bounds = array<i64: 32, 256>}, {pipeline_mode = #tpu.pipeline_mode<synchronous>, transform_indices = @transform_6, window_bounds = array<i64: 256, 256>}, {pipeline_mode = #tpu.pipeline_mode<synchronous>, transform_indices = @transform_7, window_bounds = array<i64: 1, 256>}, {pipeline_mode = #tpu.pipeline_mode<synchronous>, transform_indices = @transform_8, window_bounds = array<i64: 256, 32>}, {pipeline_mode = #tpu.pipeline_mode<synchronous>, transform_indices = @transform_9, window_bounds = array<i64: 1, 32>}, {pipeline_mode = #tpu.pipeline_mode<synchronous>, transform_indices = @transform_10, window_bounds = array<i64: 1, 1>}]} {
    %c0 = arith.constant 0 : index
    %c0_0 = arith.constant 0 : index
    %0 = vector.load %arg2[%c0, %c0_0] : memref<256x32xbf16, #tpu.memory_space<vmem>>, vector<256x32xbf16>
    %c0_1 = arith.constant 0 : index
    %c0_2 = arith.constant 0 : index
    %1 = vector.load %arg3[%c0_1, %c0_2] : memref<32x2048xbf16, #tpu.memory_space<vmem>>, vector<32x2048xbf16>
    %cst = arith.constant dense<0.000000e+00> : vector<256x2048xf32>
    %2 = tpu.matmul %0, %1, %cst {dimension_numbers = #tpu.dot_dimension_numbers<[1], [0], [0], [1], [0, 0, 1, 1], [], []>} : vector<256x32xbf16>, vector<32x2048xbf16>, vector<256x2048xf32> -> vector<256x2048xf32>
    %c0_3 = arith.constant 0 : index
    %c0_4 = arith.constant 0 : index
    %3 = vector.load %arg4[%c0_3, %c0_4] : memref<1x2048xf32, #tpu.memory_space<vmem>>, vector<1x2048xf32>
    %4 = vector.broadcast %3 : vector<1x2048xf32> to vector<256x2048xf32>
    %5 = arith.addf %2, %4 : vector<256x2048xf32>
    %cst_5 = arith.constant 0.000000e+00 : f32
    %6 = vector.broadcast %cst_5 : f32 to vector<256x2048xf32>
    %7 = arith.maximumf %5, %6 : vector<256x2048xf32>
    %cst_6 = arith.constant dense<0.000000e+00> : vector<2048xf32>
    %8 = vector.multi_reduction <add>, %7, %cst_6 [0] : vector<256x2048xf32> to vector<2048xf32>
    %9 = vector.shape_cast %8 : vector<2048xf32> to vector<1x2048xf32>
    %cst_7 = arith.constant 2.560000e+02 : f32
    %10 = vector.broadcast %cst_7 : f32 to vector<1x2048xf32>
    %11 = arith.divf %9, %10 : vector<1x2048xf32>
    %12 = arith.truncf %11 : vector<1x2048xf32> to vector<1x2048xbf16>
    %c0_8 = arith.constant 0 : index
    %c0_9 = arith.constant 0 : index
    %13 = vector.load %arg5[%c0_8, %c0_9] : memref<2048x256xbf16, #tpu.memory_space<vmem>>, vector<2048x256xbf16>
    %cst_10 = arith.constant dense<0.000000e+00> : vector<1x256xf32>
    %14 = tpu.matmul %12, %13, %cst_10 {dimension_numbers = #tpu.dot_dimension_numbers<[1], [0], [0], [1], [0, 0, 1, 1], [], []>} : vector<1x2048xbf16>, vector<2048x256xbf16>, vector<1x256xf32> -> vector<1x256xf32>
    %c0_11 = arith.constant 0 : index
    %c0_12 = arith.constant 0 : index
    %15 = vector.load %arg6[%c0_11, %c0_12] : memref<1x256xf32, #tpu.memory_space<vmem>>, vector<1x256xf32>
    %16 = arith.addf %14, %15 : vector<1x256xf32>
    %17 = tpu.iota {dimensions = array<i32: 1>} : vector<1x32xi32>
    %c0_13 = arith.constant 0 : index
    %18 = memref.load %arg1[%c0_13] : memref<10xi32, #tpu.memory_space<smem>>
    %19 = vector.broadcast %18 : i32 to vector<1x32xi32>
    %20 = arith.cmpi eq, %17, %19 : vector<1x32xi32>
    %21 = arith.extui %20 : vector<1x32xi1> to vector<1x32xi32>
    %22 = arith.sitofp %21 : vector<1x32xi32> to vector<1x32xf32>
    %cst_14 = arith.constant 0.000000e+00 : f32
    %23 = vector.broadcast %cst_14 : f32 to vector<1x1xf32>
    %c0_i32 = arith.constant 0 : i32
    %c1_i32 = arith.constant 1 : i32
    %24 = arith.addi %c0_i32, %c1_i32 : i32
    %25 = arith.index_cast %24 : i32 to index
    %26 = memref.load %arg1[%25] : memref<10xi32, #tpu.memory_space<smem>>
    %c0_15 = arith.constant 0 : index
    %c0_16 = arith.constant 0 : index
    %27 = vector.load %arg7[%c0_15, %c0_16] : memref<32x256xf32, #tpu.memory_space<vmem>>, vector<32x256xf32>
    %cst_17 = arith.constant dense<0.000000e+00> : vector<1x256xf32>
    %28 = tpu.matmul %22, %27, %cst_17 {dimension_numbers = #tpu.dot_dimension_numbers<[1], [0], [0], [1], [0, 0, 1, 1], [], []>} : vector<1x32xf32>, vector<32x256xf32>, vector<1x256xf32> -> vector<1x256xf32>
    %c0_18 = arith.constant 0 : index
    %c0_19 = arith.constant 0 : index
    %29 = vector.load %arg8[%c0_18, %c0_19] : memref<256x256xf32, #tpu.memory_space<vmem>>, vector<256x256xf32>
    %cst_20 = arith.constant dense<0.000000e+00> : vector<1x256xf32>
    %30 = tpu.matmul %16, %29, %cst_20 {dimension_numbers = #tpu.dot_dimension_numbers<[1], [0], [0], [1], [0, 0, 1, 1], [], []>} : vector<1x256xf32>, vector<256x256xf32>, vector<1x256xf32> -> vector<1x256xf32>
    %31 = arith.addf %28, %30 : vector<1x256xf32>
    %c0_21 = arith.constant 0 : index
    %c0_22 = arith.constant 0 : index
    %32 = vector.load %arg9[%c0_21, %c0_22] : memref<1x256xf32, #tpu.memory_space<vmem>>, vector<1x256xf32>
    %33 = arith.addf %31, %32 : vector<1x256xf32>
    %34 = math.tanh %33 : vector<1x256xf32>
    %c0_23 = arith.constant 0 : index
    %c0_24 = arith.constant 0 : index
    %35 = vector.load %arg10[%c0_23, %c0_24] : memref<256x32xf32, #tpu.memory_space<vmem>>, vector<256x32xf32>
    %cst_25 = arith.constant dense<0.000000e+00> : vector<1x32xf32>
    %36 = tpu.matmul %34, %35, %cst_25 {dimension_numbers = #tpu.dot_dimension_numbers<[1], [0], [0], [1], [0, 0, 1, 1], [], []>} : vector<1x256xf32>, vector<256x32xf32>, vector<1x32xf32> -> vector<1x32xf32>
    %c0_26 = arith.constant 0 : index
    %c0_27 = arith.constant 0 : index
    %37 = vector.load %arg11[%c0_26, %c0_27] : memref<1x32xf32, #tpu.memory_space<vmem>>, vector<1x32xf32>
    %38 = arith.addf %36, %37 : vector<1x32xf32>
    %cst_28 = arith.constant dense<0xFF800000> : vector<1xf32>
    %39 = vector.multi_reduction <maximumf>, %38, %cst_28 [1] : vector<1x32xf32> to vector<1xf32>
    %40 = vector.shape_cast %39 : vector<1xf32> to vector<1x1xf32>
    %41 = vector.broadcast %40 : vector<1x1xf32> to vector<1x32xf32>
    %42 = arith.subf %38, %41 : vector<1x32xf32>
    %43 = math.exp %42 : vector<1x32xf32>
    %cst_29 = arith.constant dense<0.000000e+00> : vector<1xf32>
    %44 = vector.multi_reduction <add>, %43, %cst_29 [1] : vector<1x32xf32> to vector<1xf32>
    %45 = vector.shape_cast %44 : vector<1xf32> to vector<1x1xf32>
    %46 = tpu.reciprocal %45 {approx = true} : vector<1x1xf32> -> vector<1x1xf32>
    %47 = vector.broadcast %46 : vector<1x1xf32> to vector<1x32xf32>
    %48 = arith.mulf %43, %47 : vector<1x32xf32>
    %cst_30 = arith.constant dense<0xFF800000> : vector<1xf32>
    %49 = vector.multi_reduction <maximumf>, %48, %cst_30 [1] : vector<1x32xf32> to vector<1xf32>
    %50 = vector.shape_cast %49 : vector<1xf32> to vector<1x1xf32>
    %51 = vector.broadcast %50 : vector<1x1xf32> to vector<1x32xf32>
    %52 = arith.cmpf oge, %48, %51 : vector<1x32xf32>
    %c32_i32 = arith.constant 32 : i32
    %53 = vector.broadcast %c32_i32 : i32 to vector<1x32xi32>
    %54 = arith.select %52, %17, %53 : vector<1x32xi1>, vector<1x32xi32>
    %cst_31 = arith.constant dense<2147483647> : vector<1xi32>
    %55 = vector.multi_reduction <minsi>, %54, %cst_31 [1] : vector<1x32xi32> to vector<1xi32>
    %56 = vector.shape_cast %55 : vector<1xi32> to vector<1x1xi32>
    %57 = vector.broadcast %56 : vector<1x1xi32> to vector<1x32xi32>
    %58 = arith.cmpi eq, %17, %57 : vector<1x32xi32>
    %59 = arith.extui %58 : vector<1x32xi1> to vector<1x32xi32>
    %60 = arith.sitofp %59 : vector<1x32xi32> to vector<1x32xf32>
    %61 = vector.broadcast %50 : vector<1x1xf32> to vector<1x32xf32>
    %62 = arith.subf %48, %61 : vector<1x32xf32>
    %63 = math.exp %62 : vector<1x32xf32>
    %cst_32 = arith.constant dense<0.000000e+00> : vector<1xf32>
    %64 = vector.multi_reduction <add>, %63, %cst_32 [1] : vector<1x32xf32> to vector<1xf32>
    %65 = vector.shape_cast %64 : vector<1xf32> to vector<1x1xf32>
    %66 = math.log %65 : vector<1x1xf32>
    %67 = arith.addf %50, %66 : vector<1x1xf32>
    %68 = vector.broadcast %26 : i32 to vector<1x32xi32>
    %69 = arith.cmpi eq, %17, %68 : vector<1x32xi32>
    %cst_33 = arith.constant 0.000000e+00 : f32
    %70 = vector.broadcast %cst_33 : f32 to vector<1x32xf32>
    %71 = arith.select %69, %48, %70 : vector<1x32xi1>, vector<1x32xf32>
    %cst_34 = arith.constant dense<0.000000e+00> : vector<1xf32>
    %72 = vector.multi_reduction <add>, %71, %cst_34 [1] : vector<1x32xf32> to vector<1xf32>
    %73 = vector.shape_cast %72 : vector<1xf32> to vector<1x1xf32>
    %74 = arith.subf %67, %73 : vector<1x1xf32>
    %75 = arith.addf %23, %74 : vector<1x1xf32>
    %c1_i32_35 = arith.constant 1 : i32
    %c1_i32_36 = arith.constant 1 : i32
    %76 = arith.addi %c1_i32_35, %c1_i32_36 : i32
    %77 = arith.index_cast %76 : i32 to index
    %78 = memref.load %arg1[%77] : memref<10xi32, #tpu.memory_space<smem>>
    %c0_37 = arith.constant 0 : index
    %c0_38 = arith.constant 0 : index
    %79 = vector.load %arg7[%c0_37, %c0_38] : memref<32x256xf32, #tpu.memory_space<vmem>>, vector<32x256xf32>
    %cst_39 = arith.constant dense<0.000000e+00> : vector<1x256xf32>
    %80 = tpu.matmul %60, %79, %cst_39 {dimension_numbers = #tpu.dot_dimension_numbers<[1], [0], [0], [1], [0, 0, 1, 1], [], []>} : vector<1x32xf32>, vector<32x256xf32>, vector<1x256xf32> -> vector<1x256xf32>
    %c0_40 = arith.constant 0 : index
    %c0_41 = arith.constant 0 : index
    %81 = vector.load %arg8[%c0_40, %c0_41] : memref<256x256xf32, #tpu.memory_space<vmem>>, vector<256x256xf32>
    %cst_42 = arith.constant dense<0.000000e+00> : vector<1x256xf32>
    %82 = tpu.matmul %34, %81, %cst_42 {dimension_numbers = #tpu.dot_dimension_numbers<[1], [0], [0], [1], [0, 0, 1, 1], [], []>} : vector<1x256xf32>, vector<256x256xf32>, vector<1x256xf32> -> vector<1x256xf32>
    %83 = arith.addf %80, %82 : vector<1x256xf32>
    %c0_43 = arith.constant 0 : index
    %c0_44 = arith.constant 0 : index
    %84 = vector.load %arg9[%c0_43, %c0_44] : memref<1x256xf32, #tpu.memory_space<vmem>>, vector<1x256xf32>
    %85 = arith.addf %83, %84 : vector<1x256xf32>
    %86 = math.tanh %85 : vector<1x256xf32>
    %c0_45 = arith.constant 0 : index
    %c0_46 = arith.constant 0 : index
    %87 = vector.load %arg10[%c0_45, %c0_46] : memref<256x32xf32, #tpu.memory_space<vmem>>, vector<256x32xf32>
    %cst_47 = arith.constant dense<0.000000e+00> : vector<1x32xf32>
    %88 = tpu.matmul %86, %87, %cst_47 {dimension_numbers = #tpu.dot_dimension_numbers<[1], [0], [0], [1], [0, 0, 1, 1], [], []>} : vector<1x256xf32>, vector<256x32xf32>, vector<1x32xf32> -> vector<1x32xf32>
    %c0_48 = arith.constant 0 : index
    %c0_49 = arith.constant 0 : index
    %89 = vector.load %arg11[%c0_48, %c0_49] : memref<1x32xf32, #tpu.memory_space<vmem>>, vector<1x32xf32>
    %90 = arith.addf %88, %89 : vector<1x32xf32>
    %cst_50 = arith.constant dense<0xFF800000> : vector<1xf32>
    %91 = vector.multi_reduction <maximumf>, %90, %cst_50 [1] : vector<1x32xf32> to vector<1xf32>
    %92 = vector.shape_cast %91 : vector<1xf32> to vector<1x1xf32>
    %93 = vector.broadcast %92 : vector<1x1xf32> to vector<1x32xf32>
    %94 = arith.subf %90, %93 : vector<1x32xf32>
    %95 = math.exp %94 : vector<1x32xf32>
    %cst_51 = arith.constant dense<0.000000e+00> : vector<1xf32>
    %96 = vector.multi_reduction <add>, %95, %cst_51 [1] : vector<1x32xf32> to vector<1xf32>
    %97 = vector.shape_cast %96 : vector<1xf32> to vector<1x1xf32>
    %98 = tpu.reciprocal %97 {approx = true} : vector<1x1xf32> -> vector<1x1xf32>
    %99 = vector.broadcast %98 : vector<1x1xf32> to vector<1x32xf32>
    %100 = arith.mulf %95, %99 : vector<1x32xf32>
    %cst_52 = arith.constant dense<0xFF800000> : vector<1xf32>
    %101 = vector.multi_reduction <maximumf>, %100, %cst_52 [1] : vector<1x32xf32> to vector<1xf32>
    %102 = vector.shape_cast %101 : vector<1xf32> to vector<1x1xf32>
    %103 = vector.broadcast %102 : vector<1x1xf32> to vector<1x32xf32>
    %104 = arith.cmpf oge, %100, %103 : vector<1x32xf32>
    %c32_i32_53 = arith.constant 32 : i32
    %105 = vector.broadcast %c32_i32_53 : i32 to vector<1x32xi32>
    %106 = arith.select %104, %17, %105 : vector<1x32xi1>, vector<1x32xi32>
    %cst_54 = arith.constant dense<2147483647> : vector<1xi32>
    %107 = vector.multi_reduction <minsi>, %106, %cst_54 [1] : vector<1x32xi32> to vector<1xi32>
    %108 = vector.shape_cast %107 : vector<1xi32> to vector<1x1xi32>
    %109 = vector.broadcast %108 : vector<1x1xi32> to vector<1x32xi32>
    %110 = arith.cmpi eq, %17, %109 : vector<1x32xi32>
    %111 = arith.extui %110 : vector<1x32xi1> to vector<1x32xi32>
    %112 = arith.sitofp %111 : vector<1x32xi32> to vector<1x32xf32>
    %113 = vector.broadcast %102 : vector<1x1xf32> to vector<1x32xf32>
    %114 = arith.subf %100, %113 : vector<1x32xf32>
    %115 = math.exp %114 : vector<1x32xf32>
    %cst_55 = arith.constant dense<0.000000e+00> : vector<1xf32>
    %116 = vector.multi_reduction <add>, %115, %cst_55 [1] : vector<1x32xf32> to vector<1xf32>
    %117 = vector.shape_cast %116 : vector<1xf32> to vector<1x1xf32>
    %118 = math.log %117 : vector<1x1xf32>
    %119 = arith.addf %102, %118 : vector<1x1xf32>
    %120 = vector.broadcast %78 : i32 to vector<1x32xi32>
    %121 = arith.cmpi eq, %17, %120 : vector<1x32xi32>
    %cst_56 = arith.constant 0.000000e+00 : f32
    %122 = vector.broadcast %cst_56 : f32 to vector<1x32xf32>
    %123 = arith.select %121, %100, %122 : vector<1x32xi1>, vector<1x32xf32>
    %cst_57 = arith.constant dense<0.000000e+00> : vector<1xf32>
    %124 = vector.multi_reduction <add>, %123, %cst_57 [1] : vector<1x32xf32> to vector<1xf32>
    %125 = vector.shape_cast %124 : vector<1xf32> to vector<1x1xf32>
    %126 = arith.subf %119, %125 : vector<1x1xf32>
    %127 = arith.addf %75, %126 : vector<1x1xf32>
    %c2_i32 = arith.constant 2 : i32
    %c1_i32_58 = arith.constant 1 : i32
    %128 = arith.addi %c2_i32, %c1_i32_58 : i32
    %129 = arith.index_cast %128 : i32 to index
    %130 = memref.load %arg1[%129] : memref<10xi32, #tpu.memory_space<smem>>
    %c0_59 = arith.constant 0 : index
    %c0_60 = arith.constant 0 : index
    %131 = vector.load %arg7[%c0_59, %c0_60] : memref<32x256xf32, #tpu.memory_space<vmem>>, vector<32x256xf32>
    %cst_61 = arith.constant dense<0.000000e+00> : vector<1x256xf32>
    %132 = tpu.matmul %112, %131, %cst_61 {dimension_numbers = #tpu.dot_dimension_numbers<[1], [0], [0], [1], [0, 0, 1, 1], [], []>} : vector<1x32xf32>, vector<32x256xf32>, vector<1x256xf32> -> vector<1x256xf32>
    %c0_62 = arith.constant 0 : index
    %c0_63 = arith.constant 0 : index
    %133 = vector.load %arg8[%c0_62, %c0_63] : memref<256x256xf32, #tpu.memory_space<vmem>>, vector<256x256xf32>
    %cst_64 = arith.constant dense<0.000000e+00> : vector<1x256xf32>
    %134 = tpu.matmul %86, %133, %cst_64 {dimension_numbers = #tpu.dot_dimension_numbers<[1], [0], [0], [1], [0, 0, 1, 1], [], []>} : vector<1x256xf32>, vector<256x256xf32>, vector<1x256xf32> -> vector<1x256xf32>
    %135 = arith.addf %132, %134 : vector<1x256xf32>
    %c0_65 = arith.constant 0 : index
    %c0_66 = arith.constant 0 : index
    %136 = vector.load %arg9[%c0_65, %c0_66] : memref<1x256xf32, #tpu.memory_space<vmem>>, vector<1x256xf32>
    %137 = arith.addf %135, %136 : vector<1x256xf32>
    %138 = math.tanh %137 : vector<1x256xf32>
    %c0_67 = arith.constant 0 : index
    %c0_68 = arith.constant 0 : index
    %139 = vector.load %arg10[%c0_67, %c0_68] : memref<256x32xf32, #tpu.memory_space<vmem>>, vector<256x32xf32>
    %cst_69 = arith.constant dense<0.000000e+00> : vector<1x32xf32>
    %140 = tpu.matmul %138, %139, %cst_69 {dimension_numbers = #tpu.dot_dimension_numbers<[1], [0], [0], [1], [0, 0, 1, 1], [], []>} : vector<1x256xf32>, vector<256x32xf32>, vector<1x32xf32> -> vector<1x32xf32>
    %c0_70 = arith.constant 0 : index
    %c0_71 = arith.constant 0 : index
    %141 = vector.load %arg11[%c0_70, %c0_71] : memref<1x32xf32, #tpu.memory_space<vmem>>, vector<1x32xf32>
    %142 = arith.addf %140, %141 : vector<1x32xf32>
    %cst_72 = arith.constant dense<0xFF800000> : vector<1xf32>
    %143 = vector.multi_reduction <maximumf>, %142, %cst_72 [1] : vector<1x32xf32> to vector<1xf32>
    %144 = vector.shape_cast %143 : vector<1xf32> to vector<1x1xf32>
    %145 = vector.broadcast %144 : vector<1x1xf32> to vector<1x32xf32>
    %146 = arith.subf %142, %145 : vector<1x32xf32>
    %147 = math.exp %146 : vector<1x32xf32>
    %cst_73 = arith.constant dense<0.000000e+00> : vector<1xf32>
    %148 = vector.multi_reduction <add>, %147, %cst_73 [1] : vector<1x32xf32> to vector<1xf32>
    %149 = vector.shape_cast %148 : vector<1xf32> to vector<1x1xf32>
    %150 = tpu.reciprocal %149 {approx = true} : vector<1x1xf32> -> vector<1x1xf32>
    %151 = vector.broadcast %150 : vector<1x1xf32> to vector<1x32xf32>
    %152 = arith.mulf %147, %151 : vector<1x32xf32>
    %cst_74 = arith.constant dense<0xFF800000> : vector<1xf32>
    %153 = vector.multi_reduction <maximumf>, %152, %cst_74 [1] : vector<1x32xf32> to vector<1xf32>
    %154 = vector.shape_cast %153 : vector<1xf32> to vector<1x1xf32>
    %155 = vector.broadcast %154 : vector<1x1xf32> to vector<1x32xf32>
    %156 = arith.cmpf oge, %152, %155 : vector<1x32xf32>
    %c32_i32_75 = arith.constant 32 : i32
    %157 = vector.broadcast %c32_i32_75 : i32 to vector<1x32xi32>
    %158 = arith.select %156, %17, %157 : vector<1x32xi1>, vector<1x32xi32>
    %cst_76 = arith.constant dense<2147483647> : vector<1xi32>
    %159 = vector.multi_reduction <minsi>, %158, %cst_76 [1] : vector<1x32xi32> to vector<1xi32>
    %160 = vector.shape_cast %159 : vector<1xi32> to vector<1x1xi32>
    %161 = vector.broadcast %160 : vector<1x1xi32> to vector<1x32xi32>
    %162 = arith.cmpi eq, %17, %161 : vector<1x32xi32>
    %163 = arith.extui %162 : vector<1x32xi1> to vector<1x32xi32>
    %164 = arith.sitofp %163 : vector<1x32xi32> to vector<1x32xf32>
    %165 = vector.broadcast %154 : vector<1x1xf32> to vector<1x32xf32>
    %166 = arith.subf %152, %165 : vector<1x32xf32>
    %167 = math.exp %166 : vector<1x32xf32>
    %cst_77 = arith.constant dense<0.000000e+00> : vector<1xf32>
    %168 = vector.multi_reduction <add>, %167, %cst_77 [1] : vector<1x32xf32> to vector<1xf32>
    %169 = vector.shape_cast %168 : vector<1xf32> to vector<1x1xf32>
    %170 = math.log %169 : vector<1x1xf32>
    %171 = arith.addf %154, %170 : vector<1x1xf32>
    %172 = vector.broadcast %130 : i32 to vector<1x32xi32>
    %173 = arith.cmpi eq, %17, %172 : vector<1x32xi32>
    %cst_78 = arith.constant 0.000000e+00 : f32
    %174 = vector.broadcast %cst_78 : f32 to vector<1x32xf32>
    %175 = arith.select %173, %152, %174 : vector<1x32xi1>, vector<1x32xf32>
    %cst_79 = arith.constant dense<0.000000e+00> : vector<1xf32>
    %176 = vector.multi_reduction <add>, %175, %cst_79 [1] : vector<1x32xf32> to vector<1xf32>
    %177 = vector.shape_cast %176 : vector<1xf32> to vector<1x1xf32>
    %178 = arith.subf %171, %177 : vector<1x1xf32>
    %179 = arith.addf %127, %178 : vector<1x1xf32>
    %c3_i32 = arith.constant 3 : i32
    %c1_i32_80 = arith.constant 1 : i32
    %180 = arith.addi %c3_i32, %c1_i32_80 : i32
    %181 = arith.index_cast %180 : i32 to index
    %182 = memref.load %arg1[%181] : memref<10xi32, #tpu.memory_space<smem>>
    %c0_81 = arith.constant 0 : index
    %c0_82 = arith.constant 0 : index
    %183 = vector.load %arg7[%c0_81, %c0_82] : memref<32x256xf32, #tpu.memory_space<vmem>>, vector<32x256xf32>
    %cst_83 = arith.constant dense<0.000000e+00> : vector<1x256xf32>
    %184 = tpu.matmul %164, %183, %cst_83 {dimension_numbers = #tpu.dot_dimension_numbers<[1], [0], [0], [1], [0, 0, 1, 1], [], []>} : vector<1x32xf32>, vector<32x256xf32>, vector<1x256xf32> -> vector<1x256xf32>
    %c0_84 = arith.constant 0 : index
    %c0_85 = arith.constant 0 : index
    %185 = vector.load %arg8[%c0_84, %c0_85] : memref<256x256xf32, #tpu.memory_space<vmem>>, vector<256x256xf32>
    %cst_86 = arith.constant dense<0.000000e+00> : vector<1x256xf32>
    %186 = tpu.matmul %138, %185, %cst_86 {dimension_numbers = #tpu.dot_dimension_numbers<[1], [0], [0], [1], [0, 0, 1, 1], [], []>} : vector<1x256xf32>, vector<256x256xf32>, vector<1x256xf32> -> vector<1x256xf32>
    %187 = arith.addf %184, %186 : vector<1x256xf32>
    %c0_87 = arith.constant 0 : index
    %c0_88 = arith.constant 0 : index
    %188 = vector.load %arg9[%c0_87, %c0_88] : memref<1x256xf32, #tpu.memory_space<vmem>>, vector<1x256xf32>
    %189 = arith.addf %187, %188 : vector<1x256xf32>
    %190 = math.tanh %189 : vector<1x256xf32>
    %c0_89 = arith.constant 0 : index
    %c0_90 = arith.constant 0 : index
    %191 = vector.load %arg10[%c0_89, %c0_90] : memref<256x32xf32, #tpu.memory_space<vmem>>, vector<256x32xf32>
    %cst_91 = arith.constant dense<0.000000e+00> : vector<1x32xf32>
    %192 = tpu.matmul %190, %191, %cst_91 {dimension_numbers = #tpu.dot_dimension_numbers<[1], [0], [0], [1], [0, 0, 1, 1], [], []>} : vector<1x256xf32>, vector<256x32xf32>, vector<1x32xf32> -> vector<1x32xf32>
    %c0_92 = arith.constant 0 : index
    %c0_93 = arith.constant 0 : index
    %193 = vector.load %arg11[%c0_92, %c0_93] : memref<1x32xf32, #tpu.memory_space<vmem>>, vector<1x32xf32>
    %194 = arith.addf %192, %193 : vector<1x32xf32>
    %cst_94 = arith.constant dense<0xFF800000> : vector<1xf32>
    %195 = vector.multi_reduction <maximumf>, %194, %cst_94 [1] : vector<1x32xf32> to vector<1xf32>
    %196 = vector.shape_cast %195 : vector<1xf32> to vector<1x1xf32>
    %197 = vector.broadcast %196 : vector<1x1xf32> to vector<1x32xf32>
    %198 = arith.subf %194, %197 : vector<1x32xf32>
    %199 = math.exp %198 : vector<1x32xf32>
    %cst_95 = arith.constant dense<0.000000e+00> : vector<1xf32>
    %200 = vector.multi_reduction <add>, %199, %cst_95 [1] : vector<1x32xf32> to vector<1xf32>
    %201 = vector.shape_cast %200 : vector<1xf32> to vector<1x1xf32>
    %202 = tpu.reciprocal %201 {approx = true} : vector<1x1xf32> -> vector<1x1xf32>
    %203 = vector.broadcast %202 : vector<1x1xf32> to vector<1x32xf32>
    %204 = arith.mulf %199, %203 : vector<1x32xf32>
    %cst_96 = arith.constant dense<0xFF800000> : vector<1xf32>
    %205 = vector.multi_reduction <maximumf>, %204, %cst_96 [1] : vector<1x32xf32> to vector<1xf32>
    %206 = vector.shape_cast %205 : vector<1xf32> to vector<1x1xf32>
    %207 = vector.broadcast %206 : vector<1x1xf32> to vector<1x32xf32>
    %208 = arith.cmpf oge, %204, %207 : vector<1x32xf32>
    %c32_i32_97 = arith.constant 32 : i32
    %209 = vector.broadcast %c32_i32_97 : i32 to vector<1x32xi32>
    %210 = arith.select %208, %17, %209 : vector<1x32xi1>, vector<1x32xi32>
    %cst_98 = arith.constant dense<2147483647> : vector<1xi32>
    %211 = vector.multi_reduction <minsi>, %210, %cst_98 [1] : vector<1x32xi32> to vector<1xi32>
    %212 = vector.shape_cast %211 : vector<1xi32> to vector<1x1xi32>
    %213 = vector.broadcast %212 : vector<1x1xi32> to vector<1x32xi32>
    %214 = arith.cmpi eq, %17, %213 : vector<1x32xi32>
    %215 = arith.extui %214 : vector<1x32xi1> to vector<1x32xi32>
    %216 = arith.sitofp %215 : vector<1x32xi32> to vector<1x32xf32>
    %217 = vector.broadcast %206 : vector<1x1xf32> to vector<1x32xf32>
    %218 = arith.subf %204, %217 : vector<1x32xf32>
    %219 = math.exp %218 : vector<1x32xf32>
    %cst_99 = arith.constant dense<0.000000e+00> : vector<1xf32>
    %220 = vector.multi_reduction <add>, %219, %cst_99 [1] : vector<1x32xf32> to vector<1xf32>
    %221 = vector.shape_cast %220 : vector<1xf32> to vector<1x1xf32>
    %222 = math.log %221 : vector<1x1xf32>
    %223 = arith.addf %206, %222 : vector<1x1xf32>
    %224 = vector.broadcast %182 : i32 to vector<1x32xi32>
    %225 = arith.cmpi eq, %17, %224 : vector<1x32xi32>
    %cst_100 = arith.constant 0.000000e+00 : f32
    %226 = vector.broadcast %cst_100 : f32 to vector<1x32xf32>
    %227 = arith.select %225, %204, %226 : vector<1x32xi1>, vector<1x32xf32>
    %cst_101 = arith.constant dense<0.000000e+00> : vector<1xf32>
    %228 = vector.multi_reduction <add>, %227, %cst_101 [1] : vector<1x32xf32> to vector<1xf32>
    %229 = vector.shape_cast %228 : vector<1xf32> to vector<1x1xf32>
    %230 = arith.subf %223, %229 : vector<1x1xf32>
    %231 = arith.addf %179, %230 : vector<1x1xf32>
    %c4_i32 = arith.constant 4 : i32
    %c1_i32_102 = arith.constant 1 : i32
    %232 = arith.addi %c4_i32, %c1_i32_102 : i32
    %233 = arith.index_cast %232 : i32 to index
    %234 = memref.load %arg1[%233] : memref<10xi32, #tpu.memory_space<smem>>
    %c0_103 = arith.constant 0 : index
    %c0_104 = arith.constant 0 : index
    %235 = vector.load %arg7[%c0_103, %c0_104] : memref<32x256xf32, #tpu.memory_space<vmem>>, vector<32x256xf32>
    %cst_105 = arith.constant dense<0.000000e+00> : vector<1x256xf32>
    %236 = tpu.matmul %216, %235, %cst_105 {dimension_numbers = #tpu.dot_dimension_numbers<[1], [0], [0], [1], [0, 0, 1, 1], [], []>} : vector<1x32xf32>, vector<32x256xf32>, vector<1x256xf32> -> vector<1x256xf32>
    %c0_106 = arith.constant 0 : index
    %c0_107 = arith.constant 0 : index
    %237 = vector.load %arg8[%c0_106, %c0_107] : memref<256x256xf32, #tpu.memory_space<vmem>>, vector<256x256xf32>
    %cst_108 = arith.constant dense<0.000000e+00> : vector<1x256xf32>
    %238 = tpu.matmul %190, %237, %cst_108 {dimension_numbers = #tpu.dot_dimension_numbers<[1], [0], [0], [1], [0, 0, 1, 1], [], []>} : vector<1x256xf32>, vector<256x256xf32>, vector<1x256xf32> -> vector<1x256xf32>
    %239 = arith.addf %236, %238 : vector<1x256xf32>
    %c0_109 = arith.constant 0 : index
    %c0_110 = arith.constant 0 : index
    %240 = vector.load %arg9[%c0_109, %c0_110] : memref<1x256xf32, #tpu.memory_space<vmem>>, vector<1x256xf32>
    %241 = arith.addf %239, %240 : vector<1x256xf32>
    %242 = math.tanh %241 : vector<1x256xf32>
    %c0_111 = arith.constant 0 : index
    %c0_112 = arith.constant 0 : index
    %243 = vector.load %arg10[%c0_111, %c0_112] : memref<256x32xf32, #tpu.memory_space<vmem>>, vector<256x32xf32>
    %cst_113 = arith.constant dense<0.000000e+00> : vector<1x32xf32>
    %244 = tpu.matmul %242, %243, %cst_113 {dimension_numbers = #tpu.dot_dimension_numbers<[1], [0], [0], [1], [0, 0, 1, 1], [], []>} : vector<1x256xf32>, vector<256x32xf32>, vector<1x32xf32> -> vector<1x32xf32>
    %c0_114 = arith.constant 0 : index
    %c0_115 = arith.constant 0 : index
    %245 = vector.load %arg11[%c0_114, %c0_115] : memref<1x32xf32, #tpu.memory_space<vmem>>, vector<1x32xf32>
    %246 = arith.addf %244, %245 : vector<1x32xf32>
    %cst_116 = arith.constant dense<0xFF800000> : vector<1xf32>
    %247 = vector.multi_reduction <maximumf>, %246, %cst_116 [1] : vector<1x32xf32> to vector<1xf32>
    %248 = vector.shape_cast %247 : vector<1xf32> to vector<1x1xf32>
    %249 = vector.broadcast %248 : vector<1x1xf32> to vector<1x32xf32>
    %250 = arith.subf %246, %249 : vector<1x32xf32>
    %251 = math.exp %250 : vector<1x32xf32>
    %cst_117 = arith.constant dense<0.000000e+00> : vector<1xf32>
    %252 = vector.multi_reduction <add>, %251, %cst_117 [1] : vector<1x32xf32> to vector<1xf32>
    %253 = vector.shape_cast %252 : vector<1xf32> to vector<1x1xf32>
    %254 = tpu.reciprocal %253 {approx = true} : vector<1x1xf32> -> vector<1x1xf32>
    %255 = vector.broadcast %254 : vector<1x1xf32> to vector<1x32xf32>
    %256 = arith.mulf %251, %255 : vector<1x32xf32>
    %cst_118 = arith.constant dense<0xFF800000> : vector<1xf32>
    %257 = vector.multi_reduction <maximumf>, %256, %cst_118 [1] : vector<1x32xf32> to vector<1xf32>
    %258 = vector.shape_cast %257 : vector<1xf32> to vector<1x1xf32>
    %259 = vector.broadcast %258 : vector<1x1xf32> to vector<1x32xf32>
    %260 = arith.cmpf oge, %256, %259 : vector<1x32xf32>
    %c32_i32_119 = arith.constant 32 : i32
    %261 = vector.broadcast %c32_i32_119 : i32 to vector<1x32xi32>
    %262 = arith.select %260, %17, %261 : vector<1x32xi1>, vector<1x32xi32>
    %cst_120 = arith.constant dense<2147483647> : vector<1xi32>
    %263 = vector.multi_reduction <minsi>, %262, %cst_120 [1] : vector<1x32xi32> to vector<1xi32>
    %264 = vector.shape_cast %263 : vector<1xi32> to vector<1x1xi32>
    %265 = vector.broadcast %264 : vector<1x1xi32> to vector<1x32xi32>
    %266 = arith.cmpi eq, %17, %265 : vector<1x32xi32>
    %267 = arith.extui %266 : vector<1x32xi1> to vector<1x32xi32>
    %268 = arith.sitofp %267 : vector<1x32xi32> to vector<1x32xf32>
    %269 = vector.broadcast %258 : vector<1x1xf32> to vector<1x32xf32>
    %270 = arith.subf %256, %269 : vector<1x32xf32>
    %271 = math.exp %270 : vector<1x32xf32>
    %cst_121 = arith.constant dense<0.000000e+00> : vector<1xf32>
    %272 = vector.multi_reduction <add>, %271, %cst_121 [1] : vector<1x32xf32> to vector<1xf32>
    %273 = vector.shape_cast %272 : vector<1xf32> to vector<1x1xf32>
    %274 = math.log %273 : vector<1x1xf32>
    %275 = arith.addf %258, %274 : vector<1x1xf32>
    %276 = vector.broadcast %234 : i32 to vector<1x32xi32>
    %277 = arith.cmpi eq, %17, %276 : vector<1x32xi32>
    %cst_122 = arith.constant 0.000000e+00 : f32
    %278 = vector.broadcast %cst_122 : f32 to vector<1x32xf32>
    %279 = arith.select %277, %256, %278 : vector<1x32xi1>, vector<1x32xf32>
    %cst_123 = arith.constant dense<0.000000e+00> : vector<1xf32>
    %280 = vector.multi_reduction <add>, %279, %cst_123 [1] : vector<1x32xf32> to vector<1xf32>
    %281 = vector.shape_cast %280 : vector<1xf32> to vector<1x1xf32>
    %282 = arith.subf %275, %281 : vector<1x1xf32>
    %283 = arith.addf %231, %282 : vector<1x1xf32>
    %c5_i32 = arith.constant 5 : i32
    %c1_i32_124 = arith.constant 1 : i32
    %284 = arith.addi %c5_i32, %c1_i32_124 : i32
    %285 = arith.index_cast %284 : i32 to index
    %286 = memref.load %arg1[%285] : memref<10xi32, #tpu.memory_space<smem>>
    %c0_125 = arith.constant 0 : index
    %c0_126 = arith.constant 0 : index
    %287 = vector.load %arg7[%c0_125, %c0_126] : memref<32x256xf32, #tpu.memory_space<vmem>>, vector<32x256xf32>
    %cst_127 = arith.constant dense<0.000000e+00> : vector<1x256xf32>
    %288 = tpu.matmul %268, %287, %cst_127 {dimension_numbers = #tpu.dot_dimension_numbers<[1], [0], [0], [1], [0, 0, 1, 1], [], []>} : vector<1x32xf32>, vector<32x256xf32>, vector<1x256xf32> -> vector<1x256xf32>
    %c0_128 = arith.constant 0 : index
    %c0_129 = arith.constant 0 : index
    %289 = vector.load %arg8[%c0_128, %c0_129] : memref<256x256xf32, #tpu.memory_space<vmem>>, vector<256x256xf32>
    %cst_130 = arith.constant dense<0.000000e+00> : vector<1x256xf32>
    %290 = tpu.matmul %242, %289, %cst_130 {dimension_numbers = #tpu.dot_dimension_numbers<[1], [0], [0], [1], [0, 0, 1, 1], [], []>} : vector<1x256xf32>, vector<256x256xf32>, vector<1x256xf32> -> vector<1x256xf32>
    %291 = arith.addf %288, %290 : vector<1x256xf32>
    %c0_131 = arith.constant 0 : index
    %c0_132 = arith.constant 0 : index
    %292 = vector.load %arg9[%c0_131, %c0_132] : memref<1x256xf32, #tpu.memory_space<vmem>>, vector<1x256xf32>
    %293 = arith.addf %291, %292 : vector<1x256xf32>
    %294 = math.tanh %293 : vector<1x256xf32>
    %c0_133 = arith.constant 0 : index
    %c0_134 = arith.constant 0 : index
    %295 = vector.load %arg10[%c0_133, %c0_134] : memref<256x32xf32, #tpu.memory_space<vmem>>, vector<256x32xf32>
    %cst_135 = arith.constant dense<0.000000e+00> : vector<1x32xf32>
    %296 = tpu.matmul %294, %295, %cst_135 {dimension_numbers = #tpu.dot_dimension_numbers<[1], [0], [0], [1], [0, 0, 1, 1], [], []>} : vector<1x256xf32>, vector<256x32xf32>, vector<1x32xf32> -> vector<1x32xf32>
    %c0_136 = arith.constant 0 : index
    %c0_137 = arith.constant 0 : index
    %297 = vector.load %arg11[%c0_136, %c0_137] : memref<1x32xf32, #tpu.memory_space<vmem>>, vector<1x32xf32>
    %298 = arith.addf %296, %297 : vector<1x32xf32>
    %cst_138 = arith.constant dense<0xFF800000> : vector<1xf32>
    %299 = vector.multi_reduction <maximumf>, %298, %cst_138 [1] : vector<1x32xf32> to vector<1xf32>
    %300 = vector.shape_cast %299 : vector<1xf32> to vector<1x1xf32>
    %301 = vector.broadcast %300 : vector<1x1xf32> to vector<1x32xf32>
    %302 = arith.subf %298, %301 : vector<1x32xf32>
    %303 = math.exp %302 : vector<1x32xf32>
    %cst_139 = arith.constant dense<0.000000e+00> : vector<1xf32>
    %304 = vector.multi_reduction <add>, %303, %cst_139 [1] : vector<1x32xf32> to vector<1xf32>
    %305 = vector.shape_cast %304 : vector<1xf32> to vector<1x1xf32>
    %306 = tpu.reciprocal %305 {approx = true} : vector<1x1xf32> -> vector<1x1xf32>
    %307 = vector.broadcast %306 : vector<1x1xf32> to vector<1x32xf32>
    %308 = arith.mulf %303, %307 : vector<1x32xf32>
    %cst_140 = arith.constant dense<0xFF800000> : vector<1xf32>
    %309 = vector.multi_reduction <maximumf>, %308, %cst_140 [1] : vector<1x32xf32> to vector<1xf32>
    %310 = vector.shape_cast %309 : vector<1xf32> to vector<1x1xf32>
    %311 = vector.broadcast %310 : vector<1x1xf32> to vector<1x32xf32>
    %312 = arith.cmpf oge, %308, %311 : vector<1x32xf32>
    %c32_i32_141 = arith.constant 32 : i32
    %313 = vector.broadcast %c32_i32_141 : i32 to vector<1x32xi32>
    %314 = arith.select %312, %17, %313 : vector<1x32xi1>, vector<1x32xi32>
    %cst_142 = arith.constant dense<2147483647> : vector<1xi32>
    %315 = vector.multi_reduction <minsi>, %314, %cst_142 [1] : vector<1x32xi32> to vector<1xi32>
    %316 = vector.shape_cast %315 : vector<1xi32> to vector<1x1xi32>
    %317 = vector.broadcast %316 : vector<1x1xi32> to vector<1x32xi32>
    %318 = arith.cmpi eq, %17, %317 : vector<1x32xi32>
    %319 = arith.extui %318 : vector<1x32xi1> to vector<1x32xi32>
    %320 = arith.sitofp %319 : vector<1x32xi32> to vector<1x32xf32>
    %321 = vector.broadcast %310 : vector<1x1xf32> to vector<1x32xf32>
    %322 = arith.subf %308, %321 : vector<1x32xf32>
    %323 = math.exp %322 : vector<1x32xf32>
    %cst_143 = arith.constant dense<0.000000e+00> : vector<1xf32>
    %324 = vector.multi_reduction <add>, %323, %cst_143 [1] : vector<1x32xf32> to vector<1xf32>
    %325 = vector.shape_cast %324 : vector<1xf32> to vector<1x1xf32>
    %326 = math.log %325 : vector<1x1xf32>
    %327 = arith.addf %310, %326 : vector<1x1xf32>
    %328 = vector.broadcast %286 : i32 to vector<1x32xi32>
    %329 = arith.cmpi eq, %17, %328 : vector<1x32xi32>
    %cst_144 = arith.constant 0.000000e+00 : f32
    %330 = vector.broadcast %cst_144 : f32 to vector<1x32xf32>
    %331 = arith.select %329, %308, %330 : vector<1x32xi1>, vector<1x32xf32>
    %cst_145 = arith.constant dense<0.000000e+00> : vector<1xf32>
    %332 = vector.multi_reduction <add>, %331, %cst_145 [1] : vector<1x32xf32> to vector<1xf32>
    %333 = vector.shape_cast %332 : vector<1xf32> to vector<1x1xf32>
    %334 = arith.subf %327, %333 : vector<1x1xf32>
    %335 = arith.addf %283, %334 : vector<1x1xf32>
    %c6_i32 = arith.constant 6 : i32
    %c0_146 = arith.constant 0 : index
    %c0_147 = arith.constant 0 : index
    %336 = vector.load %arg12[%c0_146, %c0_147] : memref<1x1xf32, #tpu.memory_space<vmem>>, vector<1x1xf32>
    tpu.vector_store %arg12[%c0_146, %c0_147], %335 {strides = array<i32>} : memref<1x1xf32, #tpu.memory_space<vmem>>, vector<1x1xf32>,
    return
  }
  func.func @transform_0(%arg0: i32, %arg1: memref<10xi32, #tpu.memory_space<smem>>) -> (i32, i32) {
    %c0_i32 = arith.constant 0 : i32
    %c0_i32_0 = arith.constant 0 : i32
    %c0_i32_1 = arith.constant 0 : i32
    return %c0_i32, %c0_i32_0 : i32, i32
  }
  func.func @transform_1(%arg0: i32, %arg1: memref<10xi32, #tpu.memory_space<smem>>) -> (i32, i32) {
    %c0_i32 = arith.constant 0 : i32
    %c0_i32_0 = arith.constant 0 : i32
    %c0_i32_1 = arith.constant 0 : i32
    return %c0_i32, %c0_i32_0 : i32, i32
  }
  func.func @transform_2(%arg0: i32, %arg1: memref<10xi32, #tpu.memory_space<smem>>) -> (i32, i32) {
    %c0_i32 = arith.constant 0 : i32
    %c0_i32_0 = arith.constant 0 : i32
    %c0_i32_1 = arith.constant 0 : i32
    return %c0_i32, %c0_i32_0 : i32, i32
  }
  func.func @transform_3(%arg0: i32, %arg1: memref<10xi32, #tpu.memory_space<smem>>) -> (i32, i32) {
    %c0_i32 = arith.constant 0 : i32
    %c0_i32_0 = arith.constant 0 : i32
    %c0_i32_1 = arith.constant 0 : i32
    return %c0_i32, %c0_i32_0 : i32, i32
  }
  func.func @transform_4(%arg0: i32, %arg1: memref<10xi32, #tpu.memory_space<smem>>) -> (i32, i32) {
    %c0_i32 = arith.constant 0 : i32
    %c0_i32_0 = arith.constant 0 : i32
    %c0_i32_1 = arith.constant 0 : i32
    return %c0_i32, %c0_i32_0 : i32, i32
  }
  func.func @transform_5(%arg0: i32, %arg1: memref<10xi32, #tpu.memory_space<smem>>) -> (i32, i32) {
    %c0_i32 = arith.constant 0 : i32
    %c0_i32_0 = arith.constant 0 : i32
    %c0_i32_1 = arith.constant 0 : i32
    return %c0_i32, %c0_i32_0 : i32, i32
  }
  func.func @transform_6(%arg0: i32, %arg1: memref<10xi32, #tpu.memory_space<smem>>) -> (i32, i32) {
    %c0_i32 = arith.constant 0 : i32
    %c0_i32_0 = arith.constant 0 : i32
    %c0_i32_1 = arith.constant 0 : i32
    return %c0_i32, %c0_i32_0 : i32, i32
  }
  func.func @transform_7(%arg0: i32, %arg1: memref<10xi32, #tpu.memory_space<smem>>) -> (i32, i32) {
    %c0_i32 = arith.constant 0 : i32
    %c0_i32_0 = arith.constant 0 : i32
    %c0_i32_1 = arith.constant 0 : i32
    return %c0_i32, %c0_i32_0 : i32, i32
  }
  func.func @transform_8(%arg0: i32, %arg1: memref<10xi32, #tpu.memory_space<smem>>) -> (i32, i32) {
    %c0_i32 = arith.constant 0 : i32
    %c0_i32_0 = arith.constant 0 : i32
    %c0_i32_1 = arith.constant 0 : i32
    return %c0_i32, %c0_i32_0 : i32, i32
  }
  func.func @transform_9(%arg0: i32, %arg1: memref<10xi32, #tpu.memory_space<smem>>) -> (i32, i32) {
    %c0_i32 = arith.constant 0 : i32
    %c0_i32_0 = arith.constant 0 : i32
    %c0_i32_1 = arith.constant 0 : i32
    return %c0_i32, %c0_i32_0 : i32, i32
  }
  func.func @transform_10(%arg0: i32, %arg1: memref<10xi32, #tpu.memory_space<smem>>) -> (i32, i32) {
    %c0_i32 = arith.constant 0 : i32
    %c0_i32_0 = arith.constant 0 : i32
    %c0_i32_1 = arith.constant 0 : i32
    return %c0_i32, %c0_i32_0 : i32, i32
  }
}

</mosaic_0001>

<bundles_post_ra>
// kernel: tpu_custom_call.1
= control target key start
LH: loop header
LB: loop body
LE: loop exit
PB: predicated region body
PF: predicated region fallthrough
CT: control target
= control target key end

     0   :  { %s11592_s0 = inlined_call_operand.vmem [shape: s32[10], index: 0, kind: input, shape index: {}]   ;;  %s11593_s1 = inlined_call_operand.vmem [shape: bf16[256,32], index: 1, kind: input, shape index: {}]   ;;  %s11594_s2 = inlined_call_operand.vmem [shape: bf16[32,2048], index: 2, kind: input, shape index: {}]   ;;  %s11595_s3 = inlined_call_operand.vmem [shape: f32[1,2048], index: 3, kind: input, shape index: {}]   ;;  %s11596_s4 = inlined_call_operand.hbm [shape: bf16[2048,256], index: 4, kind: input, shape index: {}]   ;;  %s11597_s5 = inlined_call_operand.vmem [shape: f32[1,256], index: 5, kind: input, shape index: {}]   ;;  %s11598_s6 = inlined_call_operand.vmem [shape: f32[32,256], index: 6, kind: input, shape index: {}]   ;;  %s11599_s7 = inlined_call_operand.hbm [shape: f32[256,256], index: 7, kind: input, shape index: {}]   ;;  %s11600_s8 = inlined_call_operand.vmem [shape: f32[1,256], index: 8, kind: input, shape index: {}]   ;;  %s11601_s9 = inlined_call_operand.vmem [shape: f32[256,32], index: 9, kind: input, shape index: {}]   ;;  %s11602_s10 = inlined_call_operand.vmem [shape: f32[1,32], index: 10, kind: input, shape index: {}]   ;;  %s11603_s11 = inlined_call_operand.hbm [shape: f32[1,1], index: 11, kind: output, shape index: {}]  }
   0x1   :  { %s16_s19 = sshll.u32 %s11592_s0, 4  ;;  %s17_s19 = int_to_ptr.vmem [resolvable:$true] %s16_s19 }
   0x2   :  { %s8096_s20 = scalar_lea.vmem %s17_s19, 16  ;;  %p8101_p1 = scmp.lt.s32.totalorder %s17_s19, %s17_s19 }
   0x3   :  { %p8097_p0 = scmp.ne.s32.totalorder %s17_s19, %s8096_s20  ;;  %p8102_p2 = scmp.lt.s32.totalorder %s8096_s20, %s8096_s20 }
   0x5   :  { %p8103_p3 = por %p8102_p2, %p8101_p1 }
   0x7   :  { %p8104_p4 = pnand %p8103_p3, %p8097_p0 }
   0x9   :  { %8107 = shalt.err (!%p8104_p4)  }
   0xa   :  { %s8176_s21 = smov [#allocation3]  }
   0xb   :  { %19 = dma.vmem_to_smem %s17_s19, 16, %s8176_s21, [#allocation2] }
   0xc   :  { %8168 = dma.done.wait [#allocation2], 16 }
   0xd   :  { %8169 = vsyncadd [#allocation2], 4294967280 }
   0xe   :  { %21 = sfence }
   0xf   :  { %22 = vsyncpa [#allocation5], 0 }
  0x10   :  { %23 = vsyncpa [#allocation8], 0 }
  0x11   :  { %24 = vsyncpa [#allocation6], 0  ;;  %s8177_s22 = smov [#allocation4]  }
  0x12   :  { %s36_s23 = sshll.u32 %s8177_s22, 4  ;;  %s37_s23 = int_to_ptr.vmem [resolvable:$true] %s36_s23 }
  0x13   :  { %s8116_s0 = scalar_lea.vmem %s37_s23, 32768  ;;  %p8121_p6 = scmp.lt.s32.totalorder %s37_s23, %s37_s23 }
  0x14   :  { %p8117_p5 = scmp.ne.s32.totalorder %s37_s23, %s8116_s0  ;;  %p8122_p7 = scmp.lt.s32.totalorder %s8116_s0, %s8116_s0 }
  0x16   :  { %p8123_p8 = por %p8122_p7, %p8121_p6 }
  0x18   :  { %p8124_p9 = pnand %p8123_p8, %p8117_p5 }
  0x1a   :  { %8127 = shalt.err (!%p8124_p9)
}
  0x1b   :  { %s8178_s24 = smov 128   ;;  %s8179_s25 = smov 8  }
  0x1c   :  { %42 = dma.hbm_to_vmem [thread:$0]  %s11596_s4, 32768, %s37_s23, [#allocation5], %s8178_s24, %s8178_s24, %s8179_s25  }
  0x1d   :  { %s8180_s28 = smov [#allocation7]  }
  0x1e   :  { %s52_s29 = sshll.u32 %s8180_s28, 4  ;;  %s53_s29 = int_to_ptr.vmem [resolvable:$true] %s52_s29 }
  0x1f   :  { %s8136_s30 = scalar_lea.vmem %s53_s29, 8192  ;;  %p8141_p11 = scmp.lt.s32.totalorder %s53_s29, %s53_s29 }
  0x20   :  { %p8137_p10 = scmp.ne.s32.totalorder %s53_s29, %s8136_s30  ;;  %p8142_p12 = scmp.lt.s32.totalorder %s8136_s30, %s8136_s30 }
  0x22   :  { %p8143_p13 = por %p8142_p12, %p8141_p11 }
  0x24   :  { %p8144_p0 = pnand %p8143_p13, %p8137_p10 }
  0x26   :  { %8147 = shalt.err (!%p8144_p0)
}
  0x27   :  { %s8181_s12 = smov 256   ;;  %s8182_s13 = smov 16  }
  0x28   :  { %58 = dma.hbm_to_vmem [thread:$0]  %s11599_s7, 8192, %s53_s29, [#allocation8], %s8181_s12, %s8181_s12, %s8182_s13  }
  0x29   :  { %8170 = dma.done.wait [#allocation5], 32768  }
  0x2a   :  { %8171 = vsyncadd [#allocation5], 4294934528 }
  0x2b   :  { %8172 = dma.done.wait [#allocation8], 8192  }
  0x2c   :  { %8173 = vsyncadd [#allocation8], 4294959104  ;;  %v8183_v0 = vmov 0   ;;  %v120_v1 = vld [vmem:[%s11594_s2 + $0x80] sm:$0xff]  ;;  %v121_v3 = vld [vmem:[%s11594_s2 + $0x88] sm:$0xff]  ;;  %vm460_vm0 = vcmask 261120  }
  0x2d   :  { %541 = vmatprep.mubr.bf16.mxu0 %v8183_v0  ;;  %734 = vmatprep.mubr.bf16.mxu1 %v8183_v0  ;;  %v128_v2 = vld [vmem:[%s11594_s2 + $0xc0] sm:$0xff]  ;;  %v129_v5 = vld [vmem:[%s11594_s2 + $0xc8] sm:$0xff]  ;;  %v122_v15 = vld [vmem:[%s11594_s2 + $0x90] sm:$0xff]  ;;  %s5068_s18 = sld [smem:[#allocation3]]  ;;  %vm5410_vm2 = vcmask 253952   ;;  %s8185_s30 = smov [#allocation9]  }
  0x2e   :  { %v6848_v4 = vcombine.high %v120_v1, %v128_v2  ;;  %v6847_v6 = vcombine.low %v120_v1, %v128_v2  ;;  %v104_v7 = vld [vmem:[%s11594_s2] sm:$0xff]  ;;  %v6850_v9 = vcombine.high %v121_v3, %v129_v5  ;;  %v6849_v10 = vcombine.low %v121_v3, %v129_v5  ;;  %v105_v12 = vld [vmem:[%s11594_s2 + $0x8] sm:$0xff]  ;;  %v130_v17 = vld [vmem:[%s11594_s2 + $0xd0] sm:$0xff]  ;;  %s7254_s26 = sld [smem:[#allocation3 + $0x3]]  ;;  %s6805_s12 = sshll.u32 %s8185_s30, 4  ;;  %s6806_s12 = int_to_ptr.vmem [resolvable:$true] %s6805_s12 }
  0x2f   :  { %v112_v8 = vld [vmem:[%s11594_s2 + $0x40] sm:$0xff]  ;;  %v113_v13 = vld [vmem:[%s11594_s2 + $0x48] sm:$0xff]  ;;  %v123_v18 = vld [vmem:[%s11594_s2 + $0x98] sm:$0xff]  ;;  %v6852_v21 = vcombine.high %v122_v15, %v130_v17  ;;  %v6851_v24 = vcombine.low %v122_v15, %v130_v17  ;;  %s7251_s27 = sld [smem:[#allocation3 + $0x2]]  ;;  %s8148_s13 = scalar_lea.vmem %s6806_s12, 16 }
  0x30   :  { %v6832_v11 = vcombine.high %v104_v7, %v112_v8  ;;  %521 = vmatprep.subr.bf16.mxu0 %v6848_v4  ;;  %v6834_v14 = vcombine.high %v105_v12, %v113_v13  ;;  %714 = vmatprep.subr.bf16.mxu1 %v6850_v9  ;;  %v6831_v16 = vcombine.low %v104_v7, %v112_v8  ;;  %v131_v19 = vld [vmem:[%s11594_s2 + $0xd8] sm:$0xff]  ;;  %v8296_v23 = vld [vmem:[%s11593_s1] sm:$0xff]   ;;  %v106_v26 = vld [vmem:[%s11594_s2 + $0x10] sm:$0xff]  ;;  %s7257_s28 = sld [smem:[#allocation3 + $0x4]]  ;;  %p8149_p1 = scmp.ne.s32.totalorder %s6806_s12, %s8148_s13 }
  0x31   :  { %522 = vmatpush1.bf16.msra.mxu0 %v6847_v6  ;;  %715 = vmatpush1.bf16.msra.mxu1 %v6849_v10  ;;  %v6833_v20 = vcombine.low %v105_v12, %v113_v13  ;;  %v6854_v22 = vcombine.high %v123_v18, %v131_v19  ;;  %v6853_v25 = vcombine.low %v123_v18, %v131_v19  ;;  %v114_v27 = vld [vmem:[%s11594_s2 + $0x50] sm:$0xff]  ;;  %v107_v28 = vld [vmem:[%s11594_s2 + $0x18] sm:$0xff]  ;;  %v8319_v32 = vld [vmem:[%s11593_s1 + $0x8] sm:$0xff]   ;;  %v11604_v10 = vlaneseq  ;;  %s7263_s29 = sld [smem:[#allocation3 + $0x6]]  ;;  %s8152_s14 = scalar_lea.vmem %s6806_s12, 32 }
  0x32   :  { %523 = vmatprep.subr.bf16.mxu0 %v6832_v11  ;;  %716 = vmatprep.subr.bf16.mxu1 %v6834_v14  ;;  %v6835_v29 = vcombine.low %v106_v26, %v114_v27  ;;  %v6836_v30 = vcombine.high %v106_v26, %v114_v27  ;;  %v115_v31 = vld [vmem:[%s11594_s2 + $0x58] sm:$0xff]  ;;  %v8330_v35 = vld [vmem:[%s11593_s1 + $0x10] sm:$0xff]   ;;  %v8335_v36 = vld [vmem:[%s11594_s2 + $0xa0] sm:$0xff]  ;;  %p8153_p2 = scmp.lt.s32.totalorder %s6806_s12, %s6806_s12  ;;  %p8154_p3 = scmp.lt.s32.totalorder %s8152_s14, %s8148_s13 }
  0x33   :  { %v6837_v33 = vcombine.low %v107_v28, %v115_v31  ;;  %v6838_v34 = vcombine.high %v107_v28, %v115_v31  ;;  %v8340_v37 = vld [vmem:[%s11594_s2 + $0xe0] sm:$0xff]  ;;  %v8349_v40 = vld [vmem:[%s11594_s2 + $0xa8] sm:$0xff]  ;;  %v8369_v44 = vld [vmem:[%s11593_s1 + $0x18] sm:$0xff]   ;;  %v8598_v11 = vshrl.u32 %v11604_v10, 7 }
  0x34   :  { %v6855_v38 = vcombine.low %v8335_v36, %v8340_v37  ;;  %v6856_v39 = vcombine.high %v8335_v36, %v8340_v37  ;;  %v8354_v41 = vld [vmem:[%s11594_s2 + $0xe8] sm:$0xff]  ;;  %v8380_v45 = vld [vmem:[%s11593_s1 + $0x20] sm:$0xff]   ;;  %v8402_v47 = vld [vmem:[%s11593_s1 + $0x30] sm:$0xff]   ;;  %p8155_p4 = por %p8154_p3, %p8153_p2 }
  0x35   :  { %524 = vmatpush1.bf16.msra.mxu0 %v6831_v16  ;;  %717 = vmatpush1.bf16.msra.mxu1 %v6833_v20  ;;  %v6857_v42 = vcombine.low %v8349_v40, %v8354_v41  ;;  %v6858_v43 = vcombine.high %v8349_v40, %v8354_v41  ;;  %v8391_v46 = vld [vmem:[%s11593_s1 + $0x28] sm:$0xff]   ;;  %v8413_v48 = vld [vmem:[%s11593_s1 + $0x38] sm:$0xff]   ;;  %v8424_v49 = vld [vmem:[%s11593_s1 + $0x40] sm:$0xff]   ;;  %v8607_v12 = vsub.s32 0, %v8598_v11  ;;  %v150_v14 = vsub.s32 2, %v8598_v11 }
  0x36   :  { %907 = vmatprep.subr.bf16.mxu0 %v6852_v21  ;;  %1100 = vmatprep.subr.bf16.mxu1 %v6854_v22  ;;  %v8435_v50 = vld [vmem:[%s11593_s1 + $0x48] sm:$0xff]   ;;  %v8446_v51 = vld [vmem:[%s11593_s1 + $0x50] sm:$0xff]   ;;  %v8457_v52 = vld [vmem:[%s11593_s1 + $0x58] sm:$0xff]   ;;  %v8614_v15 = vsub.s32 1, %v8598_v11  ;;  %v154_v16 = vsub.s32 3, %v8598_v11  ;;  %p8156_p5 = pnand %p8155_p4, %p8149_p1 }
  0x37   :  { %v8468_v53 = vld [vmem:[%s11593_s1 + $0x60] sm:$0xff]   ;;  %v8479_v54 = vld [vmem:[%s11593_s1 + $0x68] sm:$0xff]   ;;  %v8490_v55 = vld [vmem:[%s11593_s1 + $0x70] sm:$0xff]   ;;  %11863 = vst [vmem:[#allocation14_spill] sm:$0xff] %v8607_v12 }
  0x38   :  { %6863 = vmatmul.mubr.msk.bf16.vlgmr.msra.gmra.mxu0 %vm460_vm0, %v8296_v23  ;;  %6879 = vmatmul.mubr.msk.bf16.vlgmr.msra.gmra.mxu1 %vm460_vm0, %v8296_v23  ;;  %v8501_v56 = vld [vmem:[%s11593_s1 + $0x78] sm:$0xff]   ;;  %v108_v57 = vld [vmem:[%s11594_s2 + $0x20] sm:$0xff]  ;;  %v109_v59 = vld [vmem:[%s11594_s2 + $0x28] sm:$0xff]  ;;  %11864 = vst [vmem:[#allocation15_spill] sm:$0xff] %v8614_v15 }
  0x39   :  { %908 = vmatpush1.bf16.msra.mxu0 %v6851_v24  ;;  %1101 = vmatpush1.bf16.msra.mxu1 %v6853_v25  ;;  %v116_v58 = vld [vmem:[%s11594_s2 + $0x60] sm:$0xff]  ;;  %v117_v60 = vld [vmem:[%s11594_s2 + $0x68] sm:$0xff]  ;;  %v8536_v2 = vld [vmem:[%s11594_s2 + $0xb0] sm:$0xff] }
  0x3a   :  { %551 = vmatprep.mubr.bf16.mxu0 %v8183_v0  ;;  %744 = vmatprep.mubr.bf16.mxu1 %v8183_v0  ;;  %v6840_v61 = vcombine.high %v108_v57, %v116_v58  ;;  %v6842_v62 = vcombine.high %v109_v59, %v117_v60  ;;  %v6839_v63 = vcombine.low %v108_v57, %v116_v58  ;;  %v8541_v3 = vld [vmem:[%s11594_s2 + $0xf0] sm:$0xff]  ;;  %v8552_v6 = vld [vmem:[%s11594_s2 + $0xb8] sm:$0xff]  ;;  %v136_v13 = vld [vmem:[%s11595_s3] sm:$0xff] }
  0x3b   :  { %909 = vmatprep.subr.bf16.mxu0 %v6836_v30  ;;  %1102 = vmatprep.subr.bf16.mxu1 %v6838_v34  ;;  %v6841_v1 = vcombine.low %v109_v59, %v117_v60  ;;  %v6859_v4 = vcombine.low %v8536_v2, %v8541_v3  ;;  %v6860_v5 = vcombine.high %v8536_v2, %v8541_v3  ;;  %v8557_v7 = vld [vmem:[%s11594_s2 + $0xf8] sm:$0xff] }
  0x3c   :  { %v6861_v8 = vcombine.low %v8552_v6, %v8557_v7  ;;  %v6862_v9 = vcombine.high %v8552_v6, %v8557_v7  ;;  %v8618_v17 = vrot.slane %v136_v13, %v8607_v12  ;;  %v8622_v19 = vrot.slane %v136_v13, %v150_v14 }
  0x3d   :  { %910 = vmatpush1.bf16.msra.mxu0 %v6835_v29  ;;  %1103 = vmatpush1.bf16.msra.mxu1 %v6837_v33  ;;  %v8629_v21 = vrot.slane %v136_v13, %v8614_v15 }
  0x3e   :  { %1293 = vmatprep.subr.bf16.mxu0 %v6856_v39  ;;  %1486 = vmatprep.subr.bf16.mxu1 %v6858_v43 }
  0x40   :  { %6864 = vmatmul.mubr.msk.bf16.gmra.mxu0 %vm460_vm0, %v8319_v32  ;;  %6880 = vmatmul.mubr.msk.bf16.gmra.mxu1 %vm460_vm0, %v8319_v32 }
  0x41   :  { %561 = vmatprep.mubr.bf16.mxu0 %v8183_v0  ;;  %754 = vmatprep.mubr.bf16.mxu1 %v8183_v0 }
  0x48   :  { %6865 = vmatmul.mubr.msk.bf16.gmra.mxu0 %vm460_vm0, %v8330_v35  ;;  %6881 = vmatmul.mubr.msk.bf16.gmra.mxu1 %vm460_vm0, %v8330_v35 }
  0x49   :  { %571 = vmatprep.mubr.bf16.mxu0 %v8183_v0  ;;  %764 = vmatprep.mubr.bf16.mxu1 %v8183_v0 }
  0x50   :  { %6866 = vmatmul.mubr.msk.bf16.gmra.mxu0 %vm460_vm0, %v8369_v44  ;;  %6882 = vmatmul.mubr.msk.bf16.gmra.mxu1 %vm460_vm0, %v8369_v44 }
  0x51   :  { %581 = vmatprep.mubr.bf16.mxu0 %v8183_v0  ;;  %774 = vmatprep.mubr.bf16.mxu1 %v8183_v0 }
  0x58   :  { %6867 = vmatmul.mubr.msk.bf16.gmra.mxu0 %vm460_vm0, %v8380_v45  ;;  %6883 = vmatmul.mubr.msk.bf16.gmra.mxu1 %vm460_vm0, %v8380_v45 }
  0x59   :  { %591 = vmatprep.mubr.bf16.mxu0 %v8183_v0  ;;  %784 = vmatprep.mubr.bf16.mxu1 %v8183_v0 }
  0x60   :  { %6868 = vmatmul.mubr.msk.bf16.gmra.mxu0 %vm460_vm0, %v8391_v46  ;;  %6884 = vmatmul.mubr.msk.bf16.gmra.mxu1 %vm460_vm0, %v8391_v46 }
  0x61   :  { %601 = vmatprep.mubr.bf16.mxu0 %v8183_v0  ;;  %794 = vmatprep.mubr.bf16.mxu1 %v8183_v0 }
  0x68   :  { %6869 = vmatmul.mubr.msk.bf16.gmra.mxu0 %vm460_vm0, %v8402_v47  ;;  %6885 = vmatmul.mubr.msk.bf16.gmra.mxu1 %vm460_vm0, %v8402_v47 }
  0x69   :  { %611 = vmatprep.mubr.bf16.mxu0 %v8183_v0  ;;  %804 = vmatprep.mubr.bf16.mxu1 %v8183_v0 }
  0x70   :  { %6870 = vmatmul.mubr.msk.bf16.gmra.mxu0 %vm460_vm0, %v8413_v48  ;;  %6886 = vmatmul.mubr.msk.bf16.gmra.mxu1 %vm460_vm0, %v8413_v48 }
  0x71   :  { %621 = vmatprep.mubr.bf16.mxu0 %v8183_v0  ;;  %814 = vmatprep.mubr.bf16.mxu1 %v8183_v0 }
  0x78   :  { %6871 = vmatmul.mubr.msk.bf16.gmra.mxu0 %vm460_vm0, %v8424_v49  ;;  %6887 = vmatmul.mubr.msk.bf16.gmra.mxu1 %vm460_vm0, %v8424_v49 }
  0x79   :  { %631 = vmatprep.mubr.bf16.mxu0 %v8183_v0  ;;  %824 = vmatprep.mubr.bf16.mxu1 %v8183_v0 }
  0x80   :  { %6872 = vmatmul.mubr.msk.bf16.gmra.mxu0 %vm460_vm0, %v8435_v50  ;;  %6888 = vmatmul.mubr.msk.bf16.gmra.mxu1 %vm460_vm0, %v8435_v50 }
  0x81   :  { %641 = vmatprep.mubr.bf16.mxu0 %v8183_v0  ;;  %834 = vmatprep.mubr.bf16.mxu1 %v8183_v0 }
  0x88   :  { %6873 = vmatmul.mubr.msk.bf16.gmra.mxu0 %vm460_vm0, %v8446_v51  ;;  %6889 = vmatmul.mubr.msk.bf16.gmra.mxu1 %vm460_vm0, %v8446_v51 }
  0x89   :  { %651 = vmatprep.mubr.bf16.mxu0 %v8183_v0  ;;  %844 = vmatprep.mubr.bf16.mxu1 %v8183_v0 }
  0x90   :  { %6874 = vmatmul.mubr.msk.bf16.gmra.mxu0 %vm460_vm0, %v8457_v52  ;;  %6890 = vmatmul.mubr.msk.bf16.gmra.mxu1 %vm460_vm0, %v8457_v52 }
  0x91   :  { %661 = vmatprep.mubr.bf16.mxu0 %v8183_v0  ;;  %854 = vmatprep.mubr.bf16.mxu1 %v8183_v0 }
  0x98   :  { %6875 = vmatmul.mubr.msk.bf16.gmra.mxu0 %vm460_vm0, %v8468_v53  ;;  %6891 = vmatmul.mubr.msk.bf16.gmra.mxu1 %vm460_vm0, %v8468_v53 }
  0x99   :  { %671 = vmatprep.mubr.bf16.mxu0 %v8183_v0  ;;  %864 = vmatprep.mubr.bf16.mxu1 %v8183_v0 }
  0xa0   :  { %6876 = vmatmul.mubr.msk.bf16.gmra.mxu0 %vm460_vm0, %v8479_v54  ;;  %6892 = vmatmul.mubr.msk.bf16.gmra.mxu1 %vm460_vm0, %v8479_v54 }
  0xa1   :  { %681 = vmatprep.mubr.bf16.mxu0 %v8183_v0  ;;  %874 = vmatprep.mubr.bf16.mxu1 %v8183_v0 }
  0xa8   :  { %6877 = vmatmul.mubr.msk.bf16.gmra.mxu0 %vm460_vm0, %v8490_v55  ;;  %6893 = vmatmul.mubr.msk.bf16.gmra.mxu1 %vm460_vm0, %v8490_v55 }
  0xa9   :  { %691 = vmatprep.mubr.bf16.mxu0 %v8183_v0  ;;  %884 = vmatprep.mubr.bf16.mxu1 %v8183_v0 }
  0xb0   :  { %6878 = vmatmul.mubr.msk.bf16.gmra.mxu0 %vm460_vm0, %v8501_v56  ;;  %6894 = vmatmul.mubr.msk.bf16.gmra.mxu1 %vm460_vm0, %v8501_v56 }
  0xb1   :  { %927 = vmatprep.mubr.bf16.mxu0 %v8183_v0  ;;  %1120 = vmatprep.mubr.bf16.mxu1 %v8183_v0 }
  0xb8   :  { %6895 = vmatmul.mubr.msk.bf16.vlgmr.msra.gmra.mxu0 %vm460_vm0, %v8296_v23  ;;  %6911 = vmatmul.mubr.msk.bf16.vlgmr.msra.gmra.mxu1 %vm460_vm0, %v8296_v23  ;;  %v8634_v23 = vrot.slane %v136_v13, %v154_v16 }
  0xb9   :  { %1294 = vmatpush1.bf16.msra.mxu0 %v6855_v38  ;;  %1487 = vmatpush1.bf16.msra.mxu1 %v6857_v42 }
  0xba   :  { %937 = vmatprep.mubr.bf16.mxu0 %v8183_v0  ;;  %1130 = vmatprep.mubr.bf16.mxu1 %v8183_v0 }
  0xbb   :  { %1295 = vmatprep.subr.bf16.mxu0 %v6840_v61  ;;  %1488 = vmatprep.subr.bf16.mxu1 %v6842_v62 }
  0xbd   :  { %1296 = vmatpush1.bf16.msra.mxu0 %v6839_v63  ;;  %1489 = vmatpush1.bf16.msra.mxu1 %v6841_v1 }
  0xbe   :  { %1679 = vmatprep.subr.bf16.mxu0 %v6860_v5  ;;  %1872 = vmatprep.subr.bf16.mxu1 %v6862_v9 }
  0xc0   :  { %6896 = vmatmul.mubr.msk.bf16.gmra.mxu0 %vm460_vm0, %v8319_v32  ;;  %6912 = vmatmul.mubr.msk.bf16.gmra.mxu1 %vm460_vm0, %v8319_v32 }
  0xc1   :  { %947 = vmatprep.mubr.bf16.mxu0 %v8183_v0  ;;  %1140 = vmatprep.mubr.bf16.mxu1 %v8183_v0 }
  0xc8   :  { %6897 = vmatmul.mubr.msk.bf16.gmra.mxu0 %vm460_vm0, %v8330_v35  ;;  %6913 = vmatmul.mubr.msk.bf16.gmra.mxu1 %vm460_vm0, %v8330_v35 }
  0xc9   :  { %957 = vmatprep.mubr.bf16.mxu0 %v8183_v0  ;;  %1150 = vmatprep.mubr.bf16.mxu1 %v8183_v0 }
  0xd0   :  { %6898 = vmatmul.mubr.msk.bf16.gmra.mxu0 %vm460_vm0, %v8369_v44  ;;  %6914 = vmatmul.mubr.msk.bf16.gmra.mxu1 %vm460_vm0, %v8369_v44 }
  0xd1   :  { %967 = vmatprep.mubr.bf16.mxu0 %v8183_v0  ;;  %1160 = vmatprep.mubr.bf16.mxu1 %v8183_v0 }
  0xd8   :  { %6899 = vmatmul.mubr.msk.bf16.gmra.mxu0 %vm460_vm0, %v8380_v45  ;;  %6915 = vmatmul.mubr.msk.bf16.gmra.mxu1 %vm460_vm0, %v8380_v45 }
  0xd9   :  { %977 = vmatprep.mubr.bf16.mxu0 %v8183_v0  ;;  %1170 = vmatprep.mubr.bf16.mxu1 %v8183_v0 }
  0xe0   :  { %6900 = vmatmul.mubr.msk.bf16.gmra.mxu0 %vm460_vm0, %v8391_v46  ;;  %6916 = vmatmul.mubr.msk.bf16.gmra.mxu1 %vm460_vm0, %v8391_v46 }
  0xe1   :  { %987 = vmatprep.mubr.bf16.mxu0 %v8183_v0  ;;  %1180 = vmatprep.mubr.bf16.mxu1 %v8183_v0 }
  0xe8   :  { %6901 = vmatmul.mubr.msk.bf16.gmra.mxu0 %vm460_vm0, %v8402_v47  ;;  %6917 = vmatmul.mubr.msk.bf16.gmra.mxu1 %vm460_vm0, %v8402_v47 }
  0xe9   :  { %997 = vmatprep.mubr.bf16.mxu0 %v8183_v0  ;;  %1190 = vmatprep.mubr.bf16.mxu1 %v8183_v0 }
  0xf0   :  { %6902 = vmatmul.mubr.msk.bf16.gmra.mxu0 %vm460_vm0, %v8413_v48  ;;  %6918 = vmatmul.mubr.msk.bf16.gmra.mxu1 %vm460_vm0, %v8413_v48 }
  0xf1   :  { %1007 = vmatprep.mubr.bf16.mxu0 %v8183_v0  ;;  %1200 = vmatprep.mubr.bf16.mxu1 %v8183_v0 }
  0xf8   :  { %v543_v18 = vpop.f32.mrf.mxu0  ;;  %6903 = vmatmul.mubr.msk.bf16.gmra.mxu0 %vm460_vm0, %v8424_v49  ;;  %v736_v20 = vpop.f32.mrf.mxu1  ;;  %6919 = vmatmul.mubr.msk.bf16.gmra.mxu1 %vm460_vm0, %v8424_v49 }
  0xf9   :  { %1017 = vmatprep.mubr.bf16.mxu0 %v8183_v0  ;;  %1210 = vmatprep.mubr.bf16.mxu1 %v8183_v0  ;;  %v544_v24 = vadd.f32 %v543_v18, %v8618_v17  ;;  %v737_v26 = vadd.f32 %v736_v20, %v8622_v19 }
  0xfa   :  { %v545_v22 = vpop.f32.mrf.mxu0  ;;  %v738_v25 = vpop.f32.mrf.mxu1 }
  0xfb   :  { %v546_v28 = vadd.f32 %v545_v22, %v8629_v21  ;;  %v739_v31 = vadd.f32 %v738_v25, %v8634_v23  ;;  %v2053_v34 = vmax.f32 %v544_v24, 0.0  ;;  %v2055_v38 = vmax.f32 %v737_v26, 0.0 }
  0xfc   :  { %v547_v27 = vpop.f32.mrf.mxu0  ;;  %v740_v30 = vpop.f32.mrf.mxu1 }
  0xfd   :  { %v548_v29 = vadd.f32 %v547_v27, %v8618_v17  ;;  %v741_v32 = vadd.f32 %v740_v30, %v8622_v19  ;;  %v2054_v42 = vmax.f32 %v546_v28, 0.0  ;;  %v2056_v47 = vmax.f32 %v739_v31, 0.0 }
  0xfe   :  { %v549_v33 = vpop.f32.mrf.mxu0  ;;  %v742_v37 = vpop.f32.mrf.mxu1 }
  0xff   :  { %v2069_v35 = vmax.f32 %v548_v29, 0.0  ;;  %v550_v36 = vadd.f32 %v549_v33, %v8629_v21  ;;  %v2071_v39 = vmax.f32 %v741_v32, 0.0  ;;  %v743_v40 = vadd.f32 %v742_v37, %v8634_v23 }
 0x100   :  { %v553_v41 = vpop.f32.mrf.mxu0  ;;  %6904 = vmatmul.mubr.msk.bf16.gmra.mxu0 %vm460_vm0, %v8435_v50  ;;  %v746_v46 = vpop.f32.mrf.mxu1  ;;  %6920 = vmatmul.mubr.msk.bf16.gmra.mxu1 %vm460_vm0, %v8435_v50 }
 0x101   :  { %v2565_v43 = vadd.f32 %v2069_v35, %v2053_v34  ;;  %v2070_v44 = vmax.f32 %v550_v36, 0.0  ;;  %v554_v45 = vadd.f32 %v553_v41, %v8618_v17  ;;  %1027 = vmatprep.mubr.bf16.mxu0 %v8183_v0  ;;  %v2639_v48 = vadd.f32 %v2071_v39, %v2055_v38  ;;  %1220 = vmatprep.mubr.bf16.mxu1 %v8183_v0 }
 0x102   :  { %v2072_v49 = vmax.f32 %v743_v40, 0.0  ;;  %v747_v57 = vadd.f32 %v746_v46, %v8622_v19  ;;  %v555_v58 = vpop.f32.mrf.mxu0  ;;  %v748_v62 = vpop.f32.mrf.mxu1 }
 0x103   :  { %v2602_v59 = vadd.f32 %v2070_v44, %v2054_v42  ;;  %v2085_v60 = vmax.f32 %v554_v45, 0.0  ;;  %v556_v61 = vadd.f32 %v555_v58, %v8629_v21  ;;  %v749_v5 = vadd.f32 %v748_v62, %v8634_v23 }
 0x104   :  { %v2676_v63 = vadd.f32 %v2072_v49, %v2056_v47  ;;  %v2087_v1 = vmax.f32 %v747_v57, 0.0  ;;  %v557_v50 = vpop.f32.mrf.mxu0  ;;  %v750_v20 = vpop.f32.mrf.mxu1 }
 0x105   :  { %v2566_v9 = vadd.f32 %v2565_v43, %v2085_v60  ;;  %v2086_v13 = vmax.f32 %v556_v61, 0.0  ;;  %v558_v18 = vadd.f32 %v557_v50, %v8618_v17  ;;  %v2088_v24 = vmax.f32 %v749_v5, 0.0 }
 0x106   :  { %v2640_v22 = vadd.f32 %v2639_v48, %v2087_v1  ;;  %v751_v25 = vadd.f32 %v750_v20, %v8622_v19  ;;  %v559_v26 = vpop.f32.mrf.mxu0  ;;  %v752_v30 = vpop.f32.mrf.mxu1 }
 0x107   :  { %v2603_v27 = vadd.f32 %v2602_v59, %v2086_v13  ;;  %v2101_v28 = vmax.f32 %v558_v18, 0.0  ;;  %v560_v29 = vadd.f32 %v559_v26, %v8629_v21  ;;  %v2677_v31 = vadd.f32 %v2676_v63, %v2088_v24 }
 0x108   :  { %v2103_v32 = vmax.f32 %v751_v25, 0.0  ;;  %v753_v33 = vadd.f32 %v752_v30, %v8634_v23  ;;  %v563_v34 = vpop.f32.mrf.mxu0  ;;  %6905 = vmatmul.mubr.msk.bf16.gmra.mxu0 %vm460_vm0, %v8446_v51  ;;  %v756_v38 = vpop.f32.mrf.mxu1  ;;  %6921 = vmatmul.mubr.msk.bf16.gmra.mxu1 %vm460_vm0, %v8446_v51 }
 0x109   :  { %v2567_v35 = vadd.f32 %v2566_v9, %v2101_v28  ;;  %v2102_v36 = vmax.f32 %v560_v29, 0.0  ;;  %v564_v37 = vadd.f32 %v563_v34, %v8618_v17  ;;  %1037 = vmatprep.mubr.bf16.mxu0 %v8183_v0  ;;  %v757_v41 = vadd.f32 %v756_v38, %v8622_v19  ;;  %1230 = vmatprep.mubr.bf16.mxu1 %v8183_v0 }
 0x10a   :  { %v2641_v39 = vadd.f32 %v2640_v22, %v2103_v32  ;;  %v2104_v40 = vmax.f32 %v753_v33, 0.0  ;;  %v565_v42 = vpop.f32.mrf.mxu0  ;;  %v758_v46 = vpop.f32.mrf.mxu1 }
 0x10b   :  { %v2604_v43 = vadd.f32 %v2603_v27, %v2102_v36  ;;  %v2117_v44 = vmax.f32 %v564_v37, 0.0  ;;  %v566_v45 = vadd.f32 %v565_v42, %v8629_v21  ;;  %v2119_v48 = vmax.f32 %v757_v41, 0.0 }
 0x10c   :  { %v2678_v47 = vadd.f32 %v2677_v31, %v2104_v40  ;;  %v759_v49 = vadd.f32 %v758_v46, %v8634_v23  ;;  %v567_v57 = vpop.f32.mrf.mxu0  ;;  %v760_v60 = vpop.f32.mrf.mxu1 }
 0x10d   :  { %v2568_v51 = vadd.f32 %v2567_v35, %v2117_v44  ;;  %v2118_v58 = vmax.f32 %v566_v45, 0.0  ;;  %v568_v59 = vadd.f32 %v567_v57, %v8618_v17  ;;  %v2642_v61 = vadd.f32 %v2641_v39, %v2119_v48 }
 0x10e   :  { %v2120_v62 = vmax.f32 %v759_v49, 0.0  ;;  %v761_v63 = vadd.f32 %v760_v60, %v8622_v19  ;;  %v569_v1 = vpop.f32.mrf.mxu0  ;;  %v762_v13 = vpop.f32.mrf.mxu1 }
 0x10f   :  { %v2605_v5 = vadd.f32 %v2604_v43, %v2118_v58  ;;  %v2133_v50 = vmax.f32 %v568_v59, 0.0  ;;  %v570_v9 = vadd.f32 %v569_v1, %v8629_v21  ;;  %v763_v22 = vadd.f32 %v762_v13, %v8634_v23 }
 0x110   :  { %v2679_v18 = vadd.f32 %v2678_v47, %v2120_v62  ;;  %v2135_v20 = vmax.f32 %v761_v63, 0.0  ;;  %v573_v24 = vpop.f32.mrf.mxu0  ;;  %6906 = vmatmul.mubr.msk.bf16.gmra.mxu0 %vm460_vm0, %v8457_v52  ;;  %v766_v28 = vpop.f32.mrf.mxu1  ;;  %6922 = vmatmul.mubr.msk.bf16.gmra.mxu1 %vm460_vm0, %v8457_v52 }
 0x111   :  { %v2569_v25 = vadd.f32 %v2568_v51, %v2133_v50  ;;  %v2134_v26 = vmax.f32 %v570_v9, 0.0  ;;  %v574_v27 = vadd.f32 %v573_v24, %v8618_v17  ;;  %1047 = vmatprep.mubr.bf16.mxu0 %v8183_v0  ;;  %v2136_v30 = vmax.f32 %v763_v22, 0.0  ;;  %1240 = vmatprep.mubr.bf16.mxu1 %v8183_v0 }
 0x112   :  { %v2643_v29 = vadd.f32 %v2642_v61, %v2135_v20  ;;  %v767_v31 = vadd.f32 %v766_v28, %v8622_v19  ;;  %v575_v32 = vpop.f32.mrf.mxu0  ;;  %v768_v36 = vpop.f32.mrf.mxu1 }
 0x113   :  { %v2606_v33 = vadd.f32 %v2605_v5, %v2134_v26  ;;  %v2149_v34 = vmax.f32 %v574_v27, 0.0  ;;  %v576_v35 = vadd.f32 %v575_v32, %v8629_v21  ;;  %v2680_v37 = vadd.f32 %v2679_v18, %v2136_v30 }
 0x114   :  { %v2151_v38 = vmax.f32 %v767_v31, 0.0  ;;  %v769_v39 = vadd.f32 %v768_v36, %v8634_v23  ;;  %v577_v40 = vpop.f32.mrf.mxu0  ;;  %v770_v43 = vpop.f32.mrf.mxu1 }
 0x115   :  { %v2570_v52 = vadd.f32 %v2569_v25, %v2149_v34  ;;  %v2150_v41 = vmax.f32 %v576_v35, 0.0  ;;  %v578_v42 = vadd.f32 %v577_v40, %v8618_v17  ;;  %v771_v46 = vadd.f32 %v770_v43, %v8622_v19 }
 0x116   :  { %v2644_v44 = vadd.f32 %v2643_v29, %v2151_v38  ;;  %v2152_v45 = vmax.f32 %v769_v39, 0.0  ;;  %v579_v47 = vpop.f32.mrf.mxu0  ;;  %v772_v51 = vpop.f32.mrf.mxu1 }
 0x117   :  { %v2607_v48 = vadd.f32 %v2606_v33, %v2150_v41  ;;  %v2165_v49 = vmax.f32 %v578_v42, 0.0  ;;  %v580_v57 = vadd.f32 %v579_v47, %v8629_v21  ;;  %v2167_v59 = vmax.f32 %v771_v46, 0.0 }
 0x118   :  { %v2681_v58 = vadd.f32 %v2680_v37, %v2152_v45  ;;  %v773_v60 = vadd.f32 %v772_v51, %v8634_v23  ;;  %v583_v61 = vpop.f32.mrf.mxu0  ;;  %6907 = vmatmul.mubr.msk.bf16.gmra.mxu0 %vm460_vm0, %v8468_v53  ;;  %v776_v5 = vpop.f32.mrf.mxu1  ;;  %6923 = vmatmul.mubr.msk.bf16.gmra.mxu1 %vm460_vm0, %v8468_v53 }
 0x119   :  { %v2571_v62 = vadd.f32 %v2570_v52, %v2165_v49  ;;  %v2166_v63 = vmax.f32 %v580_v57, 0.0  ;;  %v584_v1 = vadd.f32 %v583_v61, %v8618_v17  ;;  %1057 = vmatprep.mubr.bf16.mxu0 %v8183_v0  ;;  %v2645_v50 = vadd.f32 %v2644_v44, %v2167_v59  ;;  %1250 = vmatprep.mubr.bf16.mxu1 %v8183_v0 }
 0x11a   :  { %v2168_v9 = vmax.f32 %v773_v60, 0.0  ;;  %v777_v13 = vadd.f32 %v776_v5, %v8622_v19  ;;  %v585_v18 = vpop.f32.mrf.mxu0  ;;  %v778_v25 = vpop.f32.mrf.mxu1 }
 0x11b   :  { %v2608_v20 = vadd.f32 %v2607_v48, %v2166_v63  ;;  %v2181_v22 = vmax.f32 %v584_v1, 0.0  ;;  %v586_v24 = vadd.f32 %v585_v18, %v8629_v21  ;;  %v779_v28 = vadd.f32 %v778_v25, %v8634_v23 }
 0x11c   :  { %v2682_v26 = vadd.f32 %v2681_v58, %v2168_v9  ;;  %v2183_v27 = vmax.f32 %v777_v13, 0.0  ;;  %v587_v29 = vpop.f32.mrf.mxu0  ;;  %v780_v32 = vpop.f32.mrf.mxu1 }
 0x11d   :  { %v2572_v53 = vadd.f32 %v2571_v62, %v2181_v22  ;;  %v2182_v30 = vmax.f32 %v586_v24, 0.0  ;;  %v588_v31 = vadd.f32 %v587_v29, %v8618_v17  ;;  %v2184_v34 = vmax.f32 %v779_v28, 0.0 }
 0x11e   :  { %v2646_v33 = vadd.f32 %v2645_v50, %v2183_v27  ;;  %v781_v35 = vadd.f32 %v780_v32, %v8622_v19  ;;  %v589_v36 = vpop.f32.mrf.mxu0  ;;  %v782_v40 = vpop.f32.mrf.mxu1 }
 0x11f   :  { %v2609_v37 = vadd.f32 %v2608_v20, %v2182_v30  ;;  %v2197_v38 = vmax.f32 %v588_v31, 0.0  ;;  %v590_v39 = vadd.f32 %v589_v36, %v8629_v21  ;;  %v2683_v52 = vadd.f32 %v2682_v26, %v2184_v34 }
 0x120   :  { %v2199_v41 = vmax.f32 %v781_v35, 0.0  ;;  %v783_v42 = vadd.f32 %v782_v40, %v8634_v23  ;;  %v593_v43 = vpop.f32.mrf.mxu0  ;;  %6908 = vmatmul.mubr.msk.bf16.gmra.mxu0 %vm460_vm0, %v8479_v54  ;;  %v786_v47 = vpop.f32.mrf.mxu1  ;;  %6924 = vmatmul.mubr.msk.bf16.gmra.mxu1 %vm460_vm0, %v8479_v54 }
 0x121   :  { %v2573_v44 = vadd.f32 %v2572_v53, %v2197_v38  ;;  %v2198_v45 = vmax.f32 %v590_v39, 0.0  ;;  %v594_v46 = vadd.f32 %v593_v43, %v8618_v17  ;;  %1067 = vmatprep.mubr.bf16.mxu0 %v8183_v0  ;;  %v787_v57 = vadd.f32 %v786_v47, %v8622_v19  ;;  %1260 = vmatprep.mubr.bf16.mxu1 %v8183_v0 }
 0x122   :  { %v2647_v48 = vadd.f32 %v2646_v33, %v2199_v41  ;;  %v2200_v49 = vmax.f32 %v783_v42, 0.0  ;;  %v595_v51 = vpop.f32.mrf.mxu0  ;;  %v788_v61 = vpop.f32.mrf.mxu1 }
 0x123   :  { %v2610_v58 = vadd.f32 %v2609_v37, %v2198_v45  ;;  %v2213_v59 = vmax.f32 %v594_v46, 0.0  ;;  %v596_v60 = vadd.f32 %v595_v51, %v8629_v21  ;;  %v2215_v63 = vmax.f32 %v787_v57, 0.0 }
 0x124   :  { %v2684_v62 = vadd.f32 %v2683_v52, %v2200_v49  ;;  %v789_v1 = vadd.f32 %v788_v61, %v8634_v23  ;;  %v597_v5 = vpop.f32.mrf.mxu0  ;;  %v790_v13 = vpop.f32.mrf.mxu1 }
 0x125   :  { %v2574_v54 = vadd.f32 %v2573_v44, %v2213_v59  ;;  %v2214_v50 = vmax.f32 %v596_v60, 0.0  ;;  %v598_v9 = vadd.f32 %v597_v5, %v8618_v17  ;;  %v2648_v18 = vadd.f32 %v2647_v48, %v2215_v63 }
 0x126   :  { %v2216_v20 = vmax.f32 %v789_v1, 0.0  ;;  %v791_v22 = vadd.f32 %v790_v13, %v8622_v19  ;;  %v599_v24 = vpop.f32.mrf.mxu0  ;;  %v792_v28 = vpop.f32.mrf.mxu1 }
 0x127   :  { %v2611_v25 = vadd.f32 %v2610_v58, %v2214_v50  ;;  %v2229_v26 = vmax.f32 %v598_v9, 0.0  ;;  %v600_v27 = vadd.f32 %v599_v24, %v8629_v21  ;;  %v793_v30 = vadd.f32 %v792_v28, %v8634_v23 }
 0x128   :  { %v2685_v29 = vadd.f32 %v2684_v62, %v2216_v20  ;;  %v2231_v53 = vmax.f32 %v791_v22, 0.0  ;;  %v603_v31 = vpop.f32.mrf.mxu0  ;;  %6909 = vmatmul.mubr.msk.bf16.gmra.mxu0 %vm460_vm0, %v8490_v55  ;;  %v796_v35 = vpop.f32.mrf.mxu1  ;;  %6925 = vmatmul.mubr.msk.bf16.gmra.mxu1 %vm460_vm0, %v8490_v55 }
 0x129   :  { %v2575_v32 = vadd.f32 %v2574_v54, %v2229_v26  ;;  %v2230_v33 = vmax.f32 %v600_v27, 0.0  ;;  %v604_v34 = vadd.f32 %v603_v31, %v8618_v17  ;;  %1077 = vmatprep.mubr.bf16.mxu0 %v8183_v0  ;;  %v2232_v37 = vmax.f32 %v793_v30, 0.0  ;;  %1270 = vmatprep.mubr.bf16.mxu1 %v8183_v0 }
 0x12a   :  { %v2649_v36 = vadd.f32 %v2648_v18, %v2231_v53  ;;  %v797_v38 = vadd.f32 %v796_v35, %v8622_v19  ;;  %v605_v39 = vpop.f32.mrf.mxu0  ;;  %v798_v42 = vpop.f32.mrf.mxu1 }
 0x12b   :  { %v2612_v40 = vadd.f32 %v2611_v25, %v2230_v33  ;;  %v2245_v52 = vmax.f32 %v604_v34, 0.0  ;;  %v606_v41 = vadd.f32 %v605_v39, %v8629_v21  ;;  %v2686_v43 = vadd.f32 %v2685_v29, %v2232_v37  ;;  %v118_v34 = vld [vmem:[%s11594_s2 + $0x70] sm:$0xff]  ;;  %v111_v39 = vld [vmem:[%s11594_s2 + $0x38] sm:$0xff] }
 0x12c   :  { %v2247_v44 = vmax.f32 %v797_v38, 0.0  ;;  %v799_v45 = vadd.f32 %v798_v42, %v8634_v23  ;;  %v607_v46 = vpop.f32.mrf.mxu0  ;;  %v800_v49 = vpop.f32.mrf.mxu1 }
 0x12d   :  { %v2576_v55 = vadd.f32 %v2575_v32, %v2245_v52  ;;  %v2246_v47 = vmax.f32 %v606_v41, 0.0  ;;  %v608_v48 = vadd.f32 %v607_v46, %v8618_v17  ;;  %v801_v58 = vadd.f32 %v800_v49, %v8622_v19 }
 0x12e   :  { %v2650_v57 = vadd.f32 %v2649_v36, %v2247_v44  ;;  %v2248_v51 = vmax.f32 %v799_v45, 0.0  ;;  %v609_v59 = vpop.f32.mrf.mxu0  ;;  %v802_v63 = vpop.f32.mrf.mxu1 }
 0x12f   :  { %v2613_v60 = vadd.f32 %v2612_v40, %v2246_v47  ;;  %v2261_v61 = vmax.f32 %v608_v48, 0.0  ;;  %v610_v62 = vadd.f32 %v609_v59, %v8629_v21  ;;  %v2263_v5 = vmax.f32 %v801_v58, 0.0  ;;  %v119_v40 = vld [vmem:[%s11594_s2 + $0x78] sm:$0xff]  ;;  %v7957_v58 = vld [vmem:[%s11593_s1] sm:$0xff]  }
 0x130   :  { %v2687_v1 = vadd.f32 %v2686_v43, %v2248_v51  ;;  %v803_v54 = vadd.f32 %v802_v63, %v8634_v23  ;;  %v613_v50 = vpop.f32.mrf.mxu0  ;;  %6910 = vmatmul.mubr.msk.bf16.gmra.mxu0 %vm460_vm0, %v8501_v56  ;;  %v806_v20 = vpop.f32.mrf.mxu1  ;;  %6926 = vmatmul.mubr.msk.bf16.gmra.mxu1 %vm460_vm0, %v8501_v56  ;;  %v110_v56 = vld [vmem:[%s11594_s2 + $0x30] sm:$0xff]  ;;  %v6846_v59 = vcombine.high %v111_v39, %v119_v40 }
 0x131   :  { %v2577_v9 = vadd.f32 %v2576_v55, %v2261_v61  ;;  %v2262_v13 = vmax.f32 %v610_v62, 0.0  ;;  %v614_v18 = vadd.f32 %v613_v50, %v8618_v17  ;;  %1313 = vmatprep.mubr.bf16.mxu0 %v8183_v0  ;;  %v2651_v22 = vadd.f32 %v2650_v57, %v2263_v5  ;;  %1506 = vmatprep.mubr.bf16.mxu1 %v8183_v0 }
 0x132   :  { %v2264_v24 = vmax.f32 %v803_v54, 0.0  ;;  %v807_v25 = vadd.f32 %v806_v20, %v8622_v19  ;;  %v615_v26 = vpop.f32.mrf.mxu0  ;;  %v808_v53 = vpop.f32.mrf.mxu1  ;;  %v6844_v47 = vcombine.high %v110_v56, %v118_v34 }
 0x133   :  { %v2614_v27 = vadd.f32 %v2613_v60, %v2262_v13  ;;  %v2277_v28 = vmax.f32 %v614_v18, 0.0  ;;  %v616_v29 = vadd.f32 %v615_v26, %v8629_v21  ;;  %v809_v32 = vadd.f32 %v808_v53, %v8634_v23 }
 0x134   :  { %v2688_v30 = vadd.f32 %v2687_v1, %v2264_v24  ;;  %v2279_v31 = vmax.f32 %v807_v25, 0.0  ;;  %v617_v33 = vpop.f32.mrf.mxu0  ;;  %v810_v38 = vpop.f32.mrf.mxu1  ;;  %v6843_v1 = vcombine.low %v110_v56, %v118_v34  ;;  %v6845_v13 = vcombine.low %v111_v39, %v119_v40 }
 0x135   :  { %v2578_v35 = vadd.f32 %v2577_v9, %v2277_v28  ;;  %v2278_v36 = vmax.f32 %v616_v29, 0.0  ;;  %v618_v37 = vadd.f32 %v617_v33, %v8618_v17  ;;  %v2280_v41 = vmax.f32 %v809_v32, 0.0 }
 0x136   :  { %v2652_v52 = vadd.f32 %v2651_v22, %v2279_v31  ;;  %v811_v42 = vadd.f32 %v810_v38, %v8622_v19  ;;  %v619_v43 = vpop.f32.mrf.mxu0  ;;  %v812_v55 = vpop.f32.mrf.mxu1 }
 0x137   :  { %v2615_v44 = vadd.f32 %v2614_v27, %v2278_v36  ;;  %v2293_v45 = vmax.f32 %v618_v37, 0.0  ;;  %v620_v46 = vadd.f32 %v619_v43, %v8629_v21  ;;  %v2689_v48 = vadd.f32 %v2688_v30, %v2280_v41  ;;  %v7958_v37 = vld [vmem:[%s11593_s1 + $0x8] sm:$0xff]  }
 0x138   :  { %v2295_v49 = vmax.f32 %v811_v42, 0.0  ;;  %v813_v57 = vadd.f32 %v812_v55, %v8634_v23  ;;  %v623_v51 = vpop.f32.mrf.mxu0  ;;  %6927 = vmatmul.mubr.msk.bf16.vlgmr.msra.gmra.mxu0 %vm460_vm0, %v7957_v58  ;;  %v816_v63 = vpop.f32.mrf.mxu1  ;;  %6943 = vmatmul.mubr.msk.bf16.vlgmr.msra.gmra.mxu1 %vm460_vm0, %v7957_v58 }
 0x139   :  { %v2579_v60 = vadd.f32 %v2578_v35, %v2293_v45  ;;  %v2294_v61 = vmax.f32 %v620_v46, 0.0  ;;  %v624_v62 = vadd.f32 %v623_v51, %v8618_v17  ;;  %1680 = vmatpush1.bf16.msra.mxu0 %v6859_v4  ;;  %v817_v50 = vadd.f32 %v816_v63, %v8622_v19  ;;  %1873 = vmatpush1.bf16.msra.mxu1 %v6861_v8 }
 0x13a   :  { %v2653_v5 = vadd.f32 %v2652_v52, %v2295_v49  ;;  %v2296_v54 = vmax.f32 %v813_v57, 0.0  ;;  %v625_v9 = vpop.f32.mrf.mxu0  ;;  %1323 = vmatprep.mubr.bf16.mxu0 %v8183_v0  ;;  %v818_v24 = vpop.f32.mrf.mxu1  ;;  %1516 = vmatprep.mubr.bf16.mxu1 %v8183_v0 }
 0x13b   :  { %v2616_v18 = vadd.f32 %v2615_v44, %v2294_v61  ;;  %v2309_v20 = vmax.f32 %v624_v62, 0.0  ;;  %v626_v22 = vadd.f32 %v625_v9, %v8629_v21  ;;  %1681 = vmatprep.subr.bf16.mxu0 %v6844_v47  ;;  %v2311_v3 = vmax.f32 %v817_v50, 0.0  ;;  %1874 = vmatprep.subr.bf16.mxu1 %v6846_v59 }
 0x13c   :  { %v2690_v2 = vadd.f32 %v2689_v48, %v2296_v54  ;;  %v819_v4 = vadd.f32 %v818_v24, %v8634_v23  ;;  %v627_v25 = vpop.f32.mrf.mxu0  ;;  %v820_v8 = vpop.f32.mrf.mxu1 }
 0x13d   :  { %v2580_v26 = vadd.f32 %v2579_v60, %v2309_v20  ;;  %v2310_v6 = vmax.f32 %v626_v22, 0.0  ;;  %v628_v7 = vadd.f32 %v627_v25, %v8618_v17  ;;  %1682 = vmatpush1.bf16.msra.mxu0 %v6843_v1  ;;  %v2654_v27 = vadd.f32 %v2653_v5, %v2311_v3  ;;  %1875 = vmatpush1.bf16.msra.mxu1 %v6845_v13 }
 0x13e   :  { %v2312_v28 = vmax.f32 %v819_v4, 0.0  ;;  %v821_v29 = vadd.f32 %v820_v8, %v8622_v19  ;;  %v629_v53 = vpop.f32.mrf.mxu0  ;;  %v822_v33 = vpop.f32.mrf.mxu1 }
 0x13f   :  { %v2617_v30 = vadd.f32 %v2616_v18, %v2310_v6  ;;  %v2325_v31 = vmax.f32 %v628_v7, 0.0  ;;  %v630_v32 = vadd.f32 %v629_v53, %v8629_v21  ;;  %v823_v35 = vadd.f32 %v822_v33, %v8634_v23 }
 0x140   :  { %v2691_v56 = vadd.f32 %v2690_v2, %v2312_v28  ;;  %v2327_v34 = vmax.f32 %v821_v29, 0.0  ;;  %v633_v36 = vpop.f32.mrf.mxu0  ;;  %6928 = vmatmul.mubr.msk.bf16.gmra.mxu0 %vm460_vm0, %v7958_v37  ;;  %v826_v52 = vpop.f32.mrf.mxu1  ;;  %6944 = vmatmul.mubr.msk.bf16.gmra.mxu1 %vm460_vm0, %v7958_v37  ;;  %v7959_v2 = vld [vmem:[%s11593_s1 + $0x10] sm:$0xff]  }
 0x141   :  { %v2581_v38 = vadd.f32 %v2580_v26, %v2325_v31  ;;  %v2326_v39 = vmax.f32 %v630_v32, 0.0  ;;  %v634_v40 = vadd.f32 %v633_v36, %v8618_v17  ;;  %1333 = vmatprep.mubr.bf16.mxu0 %v8183_v0  ;;  %v2328_v42 = vmax.f32 %v823_v35, 0.0  ;;  %1526 = vmatprep.mubr.bf16.mxu1 %v8183_v0 }
 0x142   :  { %v2655_v41 = vadd.f32 %v2654_v27, %v2327_v34  ;;  %v827_v43 = vadd.f32 %v826_v52, %v8622_v19  ;;  %v635_v44 = vpop.f32.mrf.mxu0  ;;  %v828_v47 = vpop.f32.mrf.mxu1 }
 0x143   :  { %v2618_v45 = vadd.f32 %v2617_v30, %v2326_v39  ;;  %v2341_v46 = vmax.f32 %v634_v40, 0.0  ;;  %v636_v55 = vadd.f32 %v635_v44, %v8629_v21  ;;  %v2692_v48 = vadd.f32 %v2691_v56, %v2328_v42 }
 0x144   :  { %v2343_v49 = vmax.f32 %v827_v43, 0.0  ;;  %v829_v57 = vadd.f32 %v828_v47, %v8634_v23  ;;  %v637_v51 = vpop.f32.mrf.mxu0  ;;  %v830_v61 = vpop.f32.mrf.mxu1 }
 0x145   :  { %v2582_v58 = vadd.f32 %v2581_v38, %v2341_v46  ;;  %v2342_v59 = vmax.f32 %v636_v55, 0.0  ;;  %v638_v60 = vadd.f32 %v637_v51, %v8618_v17  ;;  %v831_v1 = vadd.f32 %v830_v61, %v8622_v19 }
 0x146   :  { %v2656_v62 = vadd.f32 %v2655_v41, %v2343_v49  ;;  %v2344_v63 = vmax.f32 %v829_v57, 0.0  ;;  %v639_v5 = vpop.f32.mrf.mxu0  ;;  %v832_v13 = vpop.f32.mrf.mxu1 }
 0x147   :  { %v2619_v54 = vadd.f32 %v2618_v45, %v2342_v59  ;;  %v2357_v50 = vmax.f32 %v638_v60, 0.0  ;;  %v640_v9 = vadd.f32 %v639_v5, %v8629_v21  ;;  %v2359_v20 = vmax.f32 %v831_v1, 0.0 }
 0x148   :  { %v2693_v18 = vadd.f32 %v2692_v48, %v2344_v63  ;;  %v833_v22 = vadd.f32 %v832_v13, %v8634_v23  ;;  %v643_v24 = vpop.f32.mrf.mxu0  ;;  %6929 = vmatmul.mubr.msk.bf16.gmra.mxu0 %vm460_vm0, %v7959_v2  ;;  %v836_v26 = vpop.f32.mrf.mxu1  ;;  %6945 = vmatmul.mubr.msk.bf16.gmra.mxu1 %vm460_vm0, %v7959_v2  ;;  %v7960_v48 = vld [vmem:[%s11593_s1 + $0x18] sm:$0xff]  }
 0x149   :  { %v2583_v3 = vadd.f32 %v2582_v58, %v2357_v50  ;;  %v2358_v4 = vmax.f32 %v640_v9, 0.0  ;;  %v644_v25 = vadd.f32 %v643_v24, %v8618_v17  ;;  %1343 = vmatprep.mubr.bf16.mxu0 %v8183_v0  ;;  %v2657_v6 = vadd.f32 %v2656_v62, %v2359_v20  ;;  %1536 = vmatprep.mubr.bf16.mxu1 %v8183_v0  ;;  %v7503_v20 = vld [vmem:[#allocation4 + $0x74] ss:$8 sps:$4 sm:$0xff]  }
 0x14a   :  { %v2360_v7 = vmax.f32 %v833_v22, 0.0  ;;  %v837_v8 = vadd.f32 %v836_v26, %v8622_v19  ;;  %v645_v27 = vpop.f32.mrf.mxu0  ;;  %v838_v30 = vpop.f32.mrf.mxu1  ;;  %4738 = vmatprep.subr.bf16.mxu0 %v7503_v20 }
 0x14b   :  { %v2620_v28 = vadd.f32 %v2619_v54, %v2358_v4  ;;  %v2373_v29 = vmax.f32 %v644_v25, 0.0  ;;  %v646_v53 = vadd.f32 %v645_v27, %v8629_v21  ;;  %v839_v33 = vadd.f32 %v838_v30, %v8634_v23 }
 0x14c   :  { %v2694_v31 = vadd.f32 %v2693_v18, %v2360_v7  ;;  %v2375_v32 = vmax.f32 %v837_v8, 0.0  ;;  %v647_v56 = vpop.f32.mrf.mxu0  ;;  %v840_v37 = vpop.f32.mrf.mxu1  ;;  %v7506_v7 = vld [vmem:[#allocation4 + $0x174] ss:$8 sps:$4 sm:$0xff]  }
 0x14d   :  { %v2584_v34 = vadd.f32 %v2583_v3, %v2373_v29  ;;  %v2374_v35 = vmax.f32 %v646_v53, 0.0  ;;  %v648_v36 = vadd.f32 %v647_v56, %v8618_v17  ;;  %v2376_v39 = vmax.f32 %v839_v33, 0.0  ;;  %v7961_v33 = vld [vmem:[%s11593_s1 + $0x20] sm:$0xff]   ;;  %4779 = vmatprep.subr.bf16.mxu1 %v7506_v7 }
 0x14e   :  { %v2658_v38 = vadd.f32 %v2657_v6, %v2375_v32  ;;  %v841_v40 = vadd.f32 %v840_v37, %v8622_v19  ;;  %v649_v52 = vpop.f32.mrf.mxu0  ;;  %v842_v44 = vpop.f32.mrf.mxu1 }
 0x14f   :  { %v2621_v41 = vadd.f32 %v2620_v28, %v2374_v35  ;;  %v2389_v42 = vmax.f32 %v648_v36, 0.0  ;;  %v650_v43 = vadd.f32 %v649_v52, %v8629_v21  ;;  %v2695_v45 = vadd.f32 %v2694_v31, %v2376_v39 }
 0x150   :  { %v2391_v46 = vmax.f32 %v841_v40, 0.0  ;;  %v843_v55 = vadd.f32 %v842_v44, %v8634_v23  ;;  %v653_v47 = vpop.f32.mrf.mxu0  ;;  %6930 = vmatmul.mubr.msk.bf16.gmra.mxu0 %vm460_vm0, %v7960_v48  ;;  %v846_v58 = vpop.f32.mrf.mxu1  ;;  %6946 = vmatmul.mubr.msk.bf16.gmra.mxu1 %vm460_vm0, %v7960_v48 }
 0x151   :  { %v2585_v49 = vadd.f32 %v2584_v34, %v2389_v42  ;;  %v2390_v57 = vmax.f32 %v650_v43, 0.0  ;;  %v654_v51 = vadd.f32 %v653_v47, %v8618_v17  ;;  %1353 = vmatprep.mubr.bf16.mxu0 %v8183_v0  ;;  %v847_v61 = vadd.f32 %v846_v58, %v8622_v19  ;;  %1546 = vmatprep.mubr.bf16.mxu1 %v8183_v0 }
 0x152   :  { %v2659_v59 = vadd.f32 %v2658_v38, %v2391_v46  ;;  %v2392_v60 = vmax.f32 %v843_v55, 0.0  ;;  %v655_v62 = vpop.f32.mrf.mxu0  ;;  %v848_v54 = vpop.f32.mrf.mxu1 }
 0x153   :  { %v2622_v63 = vadd.f32 %v2621_v41, %v2390_v57  ;;  %v2405_v1 = vmax.f32 %v654_v51, 0.0  ;;  %v656_v5 = vadd.f32 %v655_v62, %v8629_v21  ;;  %v2407_v9 = vmax.f32 %v847_v61, 0.0 }
 0x154   :  { %v2696_v50 = vadd.f32 %v2695_v45, %v2392_v60  ;;  %v849_v13 = vadd.f32 %v848_v54, %v8634_v23  ;;  %v657_v18 = vpop.f32.mrf.mxu0  ;;  %v850_v3 = vpop.f32.mrf.mxu1 }
 0x155   :  { %v2586_v22 = vadd.f32 %v2585_v49, %v2405_v1  ;;  %v2406_v24 = vmax.f32 %v656_v5, 0.0  ;;  %v658_v2 = vadd.f32 %v657_v18, %v8618_v17  ;;  %v2660_v4 = vadd.f32 %v2659_v59, %v2407_v9 }
 0x156   :  { %v2408_v25 = vmax.f32 %v849_v13, 0.0  ;;  %v851_v26 = vadd.f32 %v850_v3, %v8622_v19  ;;  %v659_v6 = vpop.f32.mrf.mxu0  ;;  %v852_v29 = vpop.f32.mrf.mxu1  ;;  %v7962_v13 = vld [vmem:[%s11593_s1 + $0x28] sm:$0xff]  }
 0x157   :  { %v2623_v8 = vadd.f32 %v2622_v63, %v2406_v24  ;;  %v2421_v27 = vmax.f32 %v658_v2, 0.0  ;;  %v660_v28 = vadd.f32 %v659_v6, %v8629_v21  ;;  %v853_v31 = vadd.f32 %v852_v29, %v8634_v23 }
 0x158   :  { %v2697_v53 = vadd.f32 %v2696_v50, %v2408_v25  ;;  %v2423_v30 = vmax.f32 %v851_v26, 0.0  ;;  %v663_v32 = vpop.f32.mrf.mxu0  ;;  %6931 = vmatmul.mubr.msk.bf16.gmra.mxu0 %vm460_vm0, %v7961_v33  ;;  %v856_v36 = vpop.f32.mrf.mxu1  ;;  %6947 = vmatmul.mubr.msk.bf16.gmra.mxu1 %vm460_vm0, %v7961_v33 }
 0x159   :  { %v2587_v56 = vadd.f32 %v2586_v22, %v2421_v27  ;;  %v2422_v34 = vmax.f32 %v660_v28, 0.0  ;;  %v664_v35 = vadd.f32 %v663_v32, %v8618_v17  ;;  %1363 = vmatprep.mubr.bf16.mxu0 %v8183_v0  ;;  %v2424_v38 = vmax.f32 %v853_v31, 0.0  ;;  %1556 = vmatprep.mubr.bf16.mxu1 %v8183_v0 }
 0x15a   :  { %v2661_v37 = vadd.f32 %v2660_v4, %v2423_v30  ;;  %v857_v39 = vadd.f32 %v856_v36, %v8622_v19  ;;  %v665_v40 = vpop.f32.mrf.mxu0  ;;  %v858_v43 = vpop.f32.mrf.mxu1 }
 0x15b   :  { %v2624_v52 = vadd.f32 %v2623_v8, %v2422_v34  ;;  %v2437_v41 = vmax.f32 %v664_v35, 0.0  ;;  %v666_v42 = vadd.f32 %v665_v40, %v8629_v21  ;;  %v2698_v44 = vadd.f32 %v2697_v53, %v2424_v38 }
 0x15c   :  { %v2439_v45 = vmax.f32 %v857_v39, 0.0  ;;  %v859_v46 = vadd.f32 %v858_v43, %v8634_v23  ;;  %v667_v55 = vpop.f32.mrf.mxu0  ;;  %v860_v57 = vpop.f32.mrf.mxu1 }
 0x15d   :  { %v2588_v47 = vadd.f32 %v2587_v56, %v2437_v41  ;;  %v2438_v48 = vmax.f32 %v666_v42, 0.0  ;;  %v668_v49 = vadd.f32 %v667_v55, %v8618_v17  ;;  %v861_v59 = vadd.f32 %v860_v57, %v8622_v19 }
 0x15e   :  { %v2662_v51 = vadd.f32 %v2661_v37, %v2439_v45  ;;  %v2440_v58 = vmax.f32 %v859_v46, 0.0  ;;  %v669_v60 = vpop.f32.mrf.mxu0  ;;  %v862_v1 = vpop.f32.mrf.mxu1 }
 0x15f   :  { %v2625_v61 = vadd.f32 %v2624_v52, %v2438_v48  ;;  %v2453_v62 = vmax.f32 %v668_v49, 0.0  ;;  %v670_v63 = vadd.f32 %v669_v60, %v8629_v21  ;;  %v2455_v54 = vmax.f32 %v861_v59, 0.0 }
 0x160   :  { %v2699_v5 = vadd.f32 %v2698_v44, %v2440_v58  ;;  %v863_v50 = vadd.f32 %v862_v1, %v8634_v23  ;;  %v673_v9 = vpop.f32.mrf.mxu0  ;;  %6932 = vmatmul.mubr.msk.bf16.gmra.mxu0 %vm460_vm0, %v7962_v13  ;;  %v866_v24 = vpop.f32.mrf.mxu1  ;;  %6948 = vmatmul.mubr.msk.bf16.gmra.mxu1 %vm460_vm0, %v7962_v13  ;;  %v7963_v44 = vld [vmem:[%s11593_s1 + $0x30] sm:$0xff]  }
 0x161   :  { %v2589_v18 = vadd.f32 %v2588_v47, %v2453_v62  ;;  %v2454_v20 = vmax.f32 %v670_v63, 0.0  ;;  %v674_v22 = vadd.f32 %v673_v9, %v8618_v17  ;;  %1373 = vmatprep.mubr.bf16.mxu0 %v8183_v0  ;;  %v2663_v2 = vadd.f32 %v2662_v51, %v2455_v54  ;;  %1566 = vmatprep.mubr.bf16.mxu1 %v8183_v0 }
 0x162   :  { %v2456_v3 = vmax.f32 %v863_v50, 0.0  ;;  %v867_v4 = vadd.f32 %v866_v24, %v8622_v19  ;;  %v675_v25 = vpop.f32.mrf.mxu0  ;;  %v868_v8 = vpop.f32.mrf.mxu1 }
 0x163   :  { %v2626_v26 = vadd.f32 %v2625_v61, %v2454_v20  ;;  %v2469_v6 = vmax.f32 %v674_v22, 0.0  ;;  %v676_v7 = vadd.f32 %v675_v25, %v8629_v21  ;;  %v869_v29 = vadd.f32 %v868_v8, %v8634_v23 }
 0x164   :  { %v2700_v27 = vadd.f32 %v2699_v5, %v2456_v3  ;;  %v2471_v28 = vmax.f32 %v867_v4, 0.0  ;;  %v677_v53 = vpop.f32.mrf.mxu0  ;;  %v870_v33 = vpop.f32.mrf.mxu1 }
 0x165   :  { %v2590_v30 = vadd.f32 %v2589_v18, %v2469_v6  ;;  %v2470_v31 = vmax.f32 %v676_v7, 0.0  ;;  %v678_v32 = vadd.f32 %v677_v53, %v8618_v17  ;;  %v2472_v34 = vmax.f32 %v869_v29, 0.0 }
 0x166   :  { %v2664_v56 = vadd.f32 %v2663_v2, %v2471_v28  ;;  %v871_v35 = vadd.f32 %v870_v33, %v8622_v19  ;;  %v679_v36 = vpop.f32.mrf.mxu0  ;;  %v872_v40 = vpop.f32.mrf.mxu1 }
 0x167   :  { %v2627_v37 = vadd.f32 %v2626_v26, %v2470_v31  ;;  %v2485_v38 = vmax.f32 %v678_v32, 0.0  ;;  %v680_v39 = vadd.f32 %v679_v36, %v8629_v21  ;;  %v2701_v52 = vadd.f32 %v2700_v27, %v2472_v34  ;;  %v7964_v27 = vld [vmem:[%s11593_s1 + $0x38] sm:$0xff]  }
 0x168   :  { %v2487_v41 = vmax.f32 %v871_v35, 0.0  ;;  %v873_v42 = vadd.f32 %v872_v40, %v8634_v23  ;;  %v683_v43 = vpop.f32.mrf.mxu0  ;;  %6933 = vmatmul.mubr.msk.bf16.gmra.mxu0 %vm460_vm0, %v7963_v44  ;;  %v876_v47 = vpop.f32.mrf.mxu1  ;;  %6949 = vmatmul.mubr.msk.bf16.gmra.mxu1 %vm460_vm0, %v7963_v44 }
 0x169   :  { %v2591_v45 = vadd.f32 %v2590_v30, %v2485_v38  ;;  %v2486_v46 = vmax.f32 %v680_v39, 0.0  ;;  %v684_v55 = vadd.f32 %v683_v43, %v8618_v17  ;;  %1383 = vmatprep.mubr.bf16.mxu0 %v8183_v0  ;;  %v877_v57 = vadd.f32 %v876_v47, %v8622_v19  ;;  %1576 = vmatprep.mubr.bf16.mxu1 %v8183_v0 }
 0x16a   :  { %v2665_v48 = vadd.f32 %v2664_v56, %v2487_v41  ;;  %v2488_v49 = vmax.f32 %v873_v42, 0.0  ;;  %v685_v51 = vpop.f32.mrf.mxu0  ;;  %v878_v61 = vpop.f32.mrf.mxu1  ;;  %v158_v38 = vsub.s32 4, %v8598_v11  ;;  %v166_v42 = vsub.s32 6, %v8598_v11 }
 0x16b   :  { %v2628_v58 = vadd.f32 %v2627_v37, %v2486_v46  ;;  %v2501_v59 = vmax.f32 %v684_v55, 0.0  ;;  %v686_v60 = vadd.f32 %v685_v51, %v8629_v21  ;;  %v2503_v63 = vmax.f32 %v877_v57, 0.0 }
 0x16c   :  { %v2702_v62 = vadd.f32 %v2701_v52, %v2488_v49  ;;  %v879_v1 = vadd.f32 %v878_v61, %v8634_v23  ;;  %v687_v5 = vpop.f32.mrf.mxu0  ;;  %v880_v13 = vpop.f32.mrf.mxu1  ;;  %v162_v55 = vsub.s32 5, %v8598_v11  ;;  %v170_v51 = vsub.s32 7, %v8598_v11 }
 0x16d   :  { %v2592_v54 = vadd.f32 %v2591_v45, %v2501_v59  ;;  %v2502_v50 = vmax.f32 %v686_v60, 0.0  ;;  %v688_v9 = vadd.f32 %v687_v5, %v8618_v17  ;;  %v2666_v18 = vadd.f32 %v2665_v48, %v2503_v63 }
 0x16e   :  { %v2504_v20 = vmax.f32 %v879_v1, 0.0  ;;  %v881_v22 = vadd.f32 %v880_v13, %v8622_v19  ;;  %v689_v24 = vpop.f32.mrf.mxu0  ;;  %v882_v25 = vpop.f32.mrf.mxu1 }
 0x16f   :  { %v2629_v2 = vadd.f32 %v2628_v58, %v2502_v50  ;;  %v2517_v3 = vmax.f32 %v688_v9, 0.0  ;;  %v690_v4 = vadd.f32 %v689_v24, %v8629_v21  ;;  %v883_v7 = vadd.f32 %v882_v25, %v8634_v23 }
 0x170   :  { %v2703_v26 = vadd.f32 %v2702_v62, %v2504_v20  ;;  %v2519_v6 = vmax.f32 %v881_v22, 0.0  ;;  %v693_v8 = vpop.f32.mrf.mxu0  ;;  %6934 = vmatmul.mubr.msk.bf16.gmra.mxu0 %vm460_vm0, %v7964_v27  ;;  %v886_v30 = vpop.f32.mrf.mxu1  ;;  %6950 = vmatmul.mubr.msk.bf16.gmra.mxu1 %vm460_vm0, %v7964_v27  ;;  %v7965_v62 = vld [vmem:[%s11595_s3] sm:$0xff] }
 0x171   :  { %v2593_v28 = vadd.f32 %v2592_v54, %v2517_v3  ;;  %v2518_v29 = vmax.f32 %v690_v4, 0.0  ;;  %v694_v53 = vadd.f32 %v693_v8, %v8618_v17  ;;  %1393 = vmatprep.mubr.bf16.mxu0 %v8183_v0  ;;  %v2520_v32 = vmax.f32 %v883_v7, 0.0  ;;  %1586 = vmatprep.mubr.bf16.mxu1 %v8183_v0 }
 0x172   :  { %v2667_v31 = vadd.f32 %v2666_v18, %v2519_v6  ;;  %v887_v33 = vadd.f32 %v886_v30, %v8622_v19  ;;  %v695_v56 = vpop.f32.mrf.mxu0  ;;  %v888_v37 = vpop.f32.mrf.mxu1  ;;  %v8894_v54 = vrot.slane %v7965_v62, %v166_v42  ;;  %v8912_v24 = vrot.slane %v7965_v62, %v170_v51 }
 0x173   :  { %v2630_v34 = vadd.f32 %v2629_v2, %v2518_v29  ;;  %v2533_v35 = vmax.f32 %v694_v53, 0.0  ;;  %v696_v36 = vadd.f32 %v695_v56, %v8629_v21  ;;  %v2704_v39 = vadd.f32 %v2703_v26, %v2520_v32 }
 0x174   :  { %v2535_v40 = vmax.f32 %v887_v33, 0.0  ;;  %v889_v52 = vadd.f32 %v888_v37, %v8634_v23  ;;  %v697_v41 = vpop.f32.mrf.mxu0  ;;  %v890_v46 = vpop.f32.mrf.mxu1  ;;  %v7967_v37 = vld [vmem:[%s11593_s1 + $0x48] sm:$0xff]  }
 0x175   :  { %v2594_v43 = vadd.f32 %v2593_v28, %v2533_v35  ;;  %v2534_v44 = vmax.f32 %v696_v36, 0.0  ;;  %v698_v45 = vadd.f32 %v697_v41, %v8618_v17  ;;  %v891_v49 = vadd.f32 %v890_v46, %v8622_v19 }
 0x176   :  { %v2668_v47 = vadd.f32 %v2667_v31, %v2535_v40  ;;  %v2536_v48 = vmax.f32 %v889_v52, 0.0  ;;  %v699_v57 = vpop.f32.mrf.mxu0  ;;  %v892_v61 = vpop.f32.mrf.mxu1  ;;  %v8889_v17 = vrot.slane %v7965_v62, %v158_v38 }
 0x177   :  { %v2631_v58 = vadd.f32 %v2630_v34, %v2534_v44  ;;  %v2549_v59 = vmax.f32 %v698_v45, 0.0  ;;  %v700_v60 = vadd.f32 %v699_v57, %v8629_v21  ;;  %v2551_v1 = vmax.f32 %v891_v49, 0.0  ;;  %v7966_v21 = vld [vmem:[%s11593_s1 + $0x40] sm:$0xff]  }
 0x178   :  { %v2705_v63 = vadd.f32 %v2704_v39, %v2536_v48  ;;  %v893_v19 = vadd.f32 %v892_v61, %v8634_v23  ;;  %v929_v5 = vpop.f32.mrf.mxu0  ;;  %6935 = vmatmul.mubr.msk.bf16.gmra.mxu0 %vm460_vm0, %v7966_v21  ;;  %v1122_v13 = vpop.f32.mrf.mxu1  ;;  %6951 = vmatmul.mubr.msk.bf16.gmra.mxu1 %vm460_vm0, %v7966_v21  ;;  %v8905_v23 = vrot.slane %v7965_v62, %v162_v55 }
 0x179   :  { %v8900_v50 = vadd.f32 %v2594_v43, %v2549_v59  ;;  %v2550_v9 = vmax.f32 %v700_v60, 0.0  ;;  %1403 = vmatprep.mubr.bf16.mxu0 %v8183_v0  ;;  %v8908_v18 = vadd.f32 %v2668_v47, %v2551_v1  ;;  %1596 = vmatprep.mubr.bf16.mxu1 %v8183_v0  ;;  %v930_v3 = vadd.f32 %v929_v5, %v8889_v17 }
 0x17a   :  { %v2552_v20 = vmax.f32 %v893_v19, 0.0  ;;  %v931_v22 = vpop.f32.mrf.mxu0  ;;  %v1124_v4 = vpop.f32.mrf.mxu1  ;;  %v1123_v26 = vadd.f32 %v1122_v13, %v8894_v54 }
 0x17b   :  { %v8915_v2 = vadd.f32 %v2631_v58, %v2550_v9  ;;  %v932_v7 = vadd.f32 %v931_v22, %v8905_v23  ;;  %v1125_v28 = vadd.f32 %v1124_v4, %v8912_v24  ;;  %v2057_v30 = vmax.f32 %v930_v3, 0.0 }
 0x17c   :  { %v8918_v25 = vadd.f32 %v2705_v63, %v2552_v20  ;;  %v933_v6 = vpop.f32.mrf.mxu0  ;;  %v1126_v27 = vpop.f32.mrf.mxu1  ;;  %v2059_v56 = vmax.f32 %v1123_v26, 0.0 }
 0x17d   :  { %v934_v8 = vadd.f32 %v933_v6, %v8889_v17  ;;  %v1127_v29 = vadd.f32 %v1126_v27, %v8894_v54  ;;  %v2058_v39 = vmax.f32 %v932_v7, 0.0  ;;  %v2060_v43 = vmax.f32 %v1125_v28, 0.0  ;;  %v7968_v27 = vld [vmem:[%s11593_s1 + $0x50] sm:$0xff]  }
 0x17e   :  { %v935_v53 = vpop.f32.mrf.mxu0  ;;  %v1128_v33 = vpop.f32.mrf.mxu1 }
 0x17f   :  { %v2073_v31 = vmax.f32 %v934_v8, 0.0  ;;  %v936_v32 = vadd.f32 %v935_v53, %v8905_v23  ;;  %v2075_v34 = vmax.f32 %v1127_v29, 0.0  ;;  %v1129_v35 = vadd.f32 %v1128_v33, %v8912_v24 }
 0x180   :  { %v939_v36 = vpop.f32.mrf.mxu0  ;;  %6936 = vmatmul.mubr.msk.bf16.gmra.mxu0 %vm460_vm0, %v7967_v37  ;;  %v1132_v41 = vpop.f32.mrf.mxu1  ;;  %6952 = vmatmul.mubr.msk.bf16.gmra.mxu1 %vm460_vm0, %v7967_v37 }
 0x181   :  { %v2713_v40 = vadd.f32 %v2073_v31, %v2057_v30  ;;  %v2074_v52 = vmax.f32 %v936_v32, 0.0  ;;  %1413 = vmatprep.mubr.bf16.mxu0 %v8183_v0  ;;  %v2787_v44 = vadd.f32 %v2075_v34, %v2059_v56  ;;  %v2076_v45 = vmax.f32 %v1129_v35, 0.0  ;;  %1606 = vmatprep.mubr.bf16.mxu1 %v8183_v0 }
 0x182   :  { %v941_v46 = vpop.f32.mrf.mxu0  ;;  %v940_v48 = vadd.f32 %v939_v36, %v8889_v17  ;;  %v1133_v49 = vadd.f32 %v1132_v41, %v8894_v54  ;;  %v1134_v57 = vpop.f32.mrf.mxu1 }
 0x183   :  { %v2750_v47 = vadd.f32 %v2074_v52, %v2058_v39  ;;  %v2824_v58 = vadd.f32 %v2076_v45, %v2060_v43  ;;  %v942_v59 = vadd.f32 %v941_v46, %v8905_v23  ;;  %v1135_v60 = vadd.f32 %v1134_v57, %v8912_v24 }
 0x184   :  { %v943_v61 = vpop.f32.mrf.mxu0  ;;  %v2089_v62 = vmax.f32 %v940_v48, 0.0  ;;  %v2091_v63 = vmax.f32 %v1133_v49, 0.0  ;;  %v1136_v19 = vpop.f32.mrf.mxu1 }
 0x185   :  { %v944_v1 = vadd.f32 %v943_v61, %v8889_v17  ;;  %v2090_v5 = vmax.f32 %v942_v59, 0.0  ;;  %v2092_v21 = vmax.f32 %v1135_v60, 0.0  ;;  %v1137_v9 = vadd.f32 %v1136_v19, %v8894_v54 }
 0x186   :  { %v945_v13 = vpop.f32.mrf.mxu0  ;;  %v2714_v20 = vadd.f32 %v2713_v40, %v2089_v62  ;;  %v2788_v22 = vadd.f32 %v2787_v44, %v2091_v63  ;;  %v1138_v4 = vpop.f32.mrf.mxu1 }
 0x187   :  { %v2105_v3 = vmax.f32 %v944_v1, 0.0  ;;  %v2751_v26 = vadd.f32 %v2750_v47, %v2090_v5  ;;  %v2825_v6 = vadd.f32 %v2824_v58, %v2092_v21  ;;  %v2107_v7 = vmax.f32 %v1137_v9, 0.0  ;;  %v7969_v9 = vld [vmem:[%s11593_s1 + $0x58] sm:$0xff]  }
 0x188   :  { %v949_v8 = vpop.f32.mrf.mxu0  ;;  %6937 = vmatmul.mubr.msk.bf16.gmra.mxu0 %vm460_vm0, %v7968_v27  ;;  %v946_v29 = vadd.f32 %v945_v13, %v8905_v23  ;;  %v1139_v53 = vadd.f32 %v1138_v4, %v8912_v24  ;;  %v1142_v30 = vpop.f32.mrf.mxu1  ;;  %6953 = vmatmul.mubr.msk.bf16.gmra.mxu1 %vm460_vm0, %v7968_v27 }
 0x189   :  { %v2715_v28 = vadd.f32 %v2714_v20, %v2105_v3  ;;  %v2789_v31 = vadd.f32 %v2788_v22, %v2107_v7  ;;  %v950_v32 = vadd.f32 %v949_v8, %v8889_v17  ;;  %v1143_v33 = vadd.f32 %v1142_v30, %v8894_v54  ;;  %1423 = vmatprep.mubr.bf16.mxu0 %v8183_v0 }
 0x18a   :  { %v951_v56 = vpop.f32.mrf.mxu0  ;;  %v2106_v34 = vmax.f32 %v946_v29, 0.0  ;;  %v2108_v35 = vmax.f32 %v1139_v53, 0.0  ;;  %v1144_v37 = vpop.f32.mrf.mxu1  ;;  %1616 = vmatprep.mubr.bf16.mxu1 %v8183_v0 }
 0x18b   :  { %v952_v36 = vadd.f32 %v951_v56, %v8905_v23  ;;  %v2121_v39 = vmax.f32 %v950_v32, 0.0  ;;  %v2123_v40 = vmax.f32 %v1143_v33, 0.0  ;;  %v1145_v52 = vadd.f32 %v1144_v37, %v8912_v24 }
 0x18c   :  { %v953_v41 = vpop.f32.mrf.mxu0  ;;  %v2752_v43 = vadd.f32 %v2751_v26, %v2106_v34  ;;  %v2826_v44 = vadd.f32 %v2825_v6, %v2108_v35  ;;  %v1146_v47 = vpop.f32.mrf.mxu1 }
 0x18d   :  { %v2122_v45 = vmax.f32 %v952_v36, 0.0  ;;  %v954_v46 = vadd.f32 %v953_v41, %v8889_v17  ;;  %v2716_v48 = vadd.f32 %v2715_v28, %v2121_v39  ;;  %v2790_v49 = vadd.f32 %v2789_v31, %v2123_v40 }
 0x18e   :  { %v2124_v57 = vmax.f32 %v1145_v52, 0.0  ;;  %v1147_v58 = vadd.f32 %v1146_v47, %v8894_v54  ;;  %v955_v59 = vpop.f32.mrf.mxu0  ;;  %v1148_v63 = vpop.f32.mrf.mxu1 }
 0x18f   :  { %v2753_v60 = vadd.f32 %v2752_v43, %v2122_v45  ;;  %v2137_v61 = vmax.f32 %v954_v46, 0.0  ;;  %v956_v62 = vadd.f32 %v955_v59, %v8905_v23  ;;  %v1149_v5 = vadd.f32 %v1148_v63, %v8912_v24 }
 0x190   :  { %v2827_v1 = vadd.f32 %v2826_v44, %v2124_v57  ;;  %v2139_v19 = vmax.f32 %v1147_v58, 0.0  ;;  %v959_v21 = vpop.f32.mrf.mxu0  ;;  %6938 = vmatmul.mubr.msk.bf16.gmra.mxu0 %vm460_vm0, %v7969_v9  ;;  %v1152_v3 = vpop.f32.mrf.mxu1  ;;  %6954 = vmatmul.mubr.msk.bf16.gmra.mxu1 %vm460_vm0, %v7969_v9 }
 0x191   :  { %v2717_v13 = vadd.f32 %v2716_v48, %v2137_v61  ;;  %v2138_v20 = vmax.f32 %v956_v62, 0.0  ;;  %v960_v22 = vadd.f32 %v959_v21, %v8889_v17  ;;  %1433 = vmatprep.mubr.bf16.mxu0 %v8183_v0  ;;  %v2140_v26 = vmax.f32 %v1149_v5, 0.0  ;;  %1626 = vmatprep.mubr.bf16.mxu1 %v8183_v0 }
 0x192   :  { %v2791_v4 = vadd.f32 %v2790_v49, %v2139_v19  ;;  %v1153_v6 = vadd.f32 %v1152_v3, %v8894_v54  ;;  %v961_v7 = vpop.f32.mrf.mxu0  ;;  %v1154_v29 = vpop.f32.mrf.mxu1  ;;  %v7970_v49 = vld [vmem:[%s11593_s1 + $0x60] sm:$0xff]  }
 0x193   :  { %v2754_v8 = vadd.f32 %v2753_v60, %v2138_v20  ;;  %v2153_v27 = vmax.f32 %v960_v22, 0.0  ;;  %v962_v28 = vadd.f32 %v961_v7, %v8905_v23  ;;  %v2828_v53 = vadd.f32 %v2827_v1, %v2140_v26 }
 0x194   :  { %v2155_v30 = vmax.f32 %v1153_v6, 0.0  ;;  %v1155_v31 = vadd.f32 %v1154_v29, %v8912_v24  ;;  %v963_v32 = vpop.f32.mrf.mxu0  ;;  %v1156_v35 = vpop.f32.mrf.mxu1 }
 0x195   :  { %v2718_v33 = vadd.f32 %v2717_v13, %v2153_v27  ;;  %v2154_v56 = vmax.f32 %v962_v28, 0.0  ;;  %v964_v34 = vadd.f32 %v963_v32, %v8889_v17  ;;  %v1157_v39 = vadd.f32 %v1156_v35, %v8894_v54 }
 0x196   :  { %v2792_v36 = vadd.f32 %v2791_v4, %v2155_v30  ;;  %v2156_v37 = vmax.f32 %v1155_v31, 0.0  ;;  %v965_v40 = vpop.f32.mrf.mxu0  ;;  %v1158_v44 = vpop.f32.mrf.mxu1 }
 0x197   :  { %v2755_v52 = vadd.f32 %v2754_v8, %v2154_v56  ;;  %v2169_v41 = vmax.f32 %v964_v34, 0.0  ;;  %v966_v43 = vadd.f32 %v965_v40, %v8905_v23  ;;  %v2171_v46 = vmax.f32 %v1157_v39, 0.0 }
 0x198   :  { %v2829_v45 = vadd.f32 %v2828_v53, %v2156_v37  ;;  %v1159_v47 = vadd.f32 %v1158_v44, %v8912_v24  ;;  %v969_v48 = vpop.f32.mrf.mxu0  ;;  %6939 = vmatmul.mubr.msk.bf16.gmra.mxu0 %vm460_vm0, %v7970_v49  ;;  %v1162_v60 = vpop.f32.mrf.mxu1  ;;  %6955 = vmatmul.mubr.msk.bf16.gmra.mxu1 %vm460_vm0, %v7970_v49 }
 0x199   :  { %v2719_v57 = vadd.f32 %v2718_v33, %v2169_v41  ;;  %v2170_v58 = vmax.f32 %v966_v43, 0.0  ;;  %v970_v59 = vadd.f32 %v969_v48, %v8889_v17  ;;  %1443 = vmatprep.mubr.bf16.mxu0 %v8183_v0  ;;  %v2793_v61 = vadd.f32 %v2792_v36, %v2171_v46  ;;  %1636 = vmatprep.mubr.bf16.mxu1 %v8183_v0  ;;  %v7971_v36 = vld [vmem:[%s11593_s1 + $0x68] sm:$0xff]  }
 0x19a   :  { %v2172_v62 = vmax.f32 %v1159_v47, 0.0  ;;  %v1163_v63 = vadd.f32 %v1162_v60, %v8894_v54  ;;  %v971_v1 = vpop.f32.mrf.mxu0  ;;  %v1164_v9 = vpop.f32.mrf.mxu1 }
 0x19b   :  { %v2756_v19 = vadd.f32 %v2755_v52, %v2170_v58  ;;  %v2185_v5 = vmax.f32 %v970_v59, 0.0  ;;  %v972_v21 = vadd.f32 %v971_v1, %v8905_v23  ;;  %v1165_v22 = vadd.f32 %v1164_v9, %v8912_v24 }
 0x19c   :  { %v2830_v13 = vadd.f32 %v2829_v45, %v2172_v62  ;;  %v2187_v20 = vmax.f32 %v1163_v63, 0.0  ;;  %v973_v3 = vpop.f32.mrf.mxu0  ;;  %v1166_v7 = vpop.f32.mrf.mxu1 }
 0x19d   :  { %v2720_v4 = vadd.f32 %v2719_v57, %v2185_v5  ;;  %v2186_v26 = vmax.f32 %v972_v21, 0.0  ;;  %v974_v6 = vadd.f32 %v973_v3, %v8889_v17  ;;  %v2188_v27 = vmax.f32 %v1165_v22, 0.0 }
 0x19e   :  { %v2794_v8 = vadd.f32 %v2793_v61, %v2187_v20  ;;  %v1167_v28 = vadd.f32 %v1166_v7, %v8894_v54  ;;  %v975_v29 = vpop.f32.mrf.mxu0  ;;  %v1168_v32 = vpop.f32.mrf.mxu1 }
 0x19f   :  { %v2757_v53 = vadd.f32 %v2756_v19, %v2186_v26  ;;  %v2201_v30 = vmax.f32 %v974_v6, 0.0  ;;  %v976_v31 = vadd.f32 %v975_v29, %v8905_v23  ;;  %v2831_v33 = vadd.f32 %v2830_v13, %v2188_v27 }
 0x1a0   :  { %v2203_v56 = vmax.f32 %v1167_v28, 0.0  ;;  %v1169_v34 = vadd.f32 %v1168_v32, %v8912_v24  ;;  %v979_v35 = vpop.f32.mrf.mxu0  ;;  %6940 = vmatmul.mubr.msk.bf16.gmra.mxu0 %vm460_vm0, %v7971_v36  ;;  %v1172_v52 = vpop.f32.mrf.mxu1  ;;  %6956 = vmatmul.mubr.msk.bf16.gmra.mxu1 %vm460_vm0, %v7971_v36 }
 0x1a1   :  { %v2721_v37 = vadd.f32 %v2720_v4, %v2201_v30  ;;  %v2202_v39 = vmax.f32 %v976_v31, 0.0  ;;  %v980_v40 = vadd.f32 %v979_v35, %v8889_v17  ;;  %1453 = vmatprep.mubr.bf16.mxu0 %v8183_v0  ;;  %v1173_v44 = vadd.f32 %v1172_v52, %v8894_v54  ;;  %1646 = vmatprep.mubr.bf16.mxu1 %v8183_v0 }
 0x1a2   :  { %v2795_v41 = vadd.f32 %v2794_v8, %v2203_v56  ;;  %v2204_v43 = vmax.f32 %v1169_v34, 0.0  ;;  %v981_v45 = vpop.f32.mrf.mxu0  ;;  %v1174_v49 = vpop.f32.mrf.mxu1  ;;  %v7972_v8 = vld [vmem:[%s11593_s1 + $0x70] sm:$0xff]  }
 0x1a3   :  { %v2758_v46 = vadd.f32 %v2757_v53, %v2202_v39  ;;  %v2217_v47 = vmax.f32 %v980_v40, 0.0  ;;  %v982_v48 = vadd.f32 %v981_v45, %v8905_v23  ;;  %v2219_v58 = vmax.f32 %v1173_v44, 0.0 }
 0x1a4   :  { %v2832_v57 = vadd.f32 %v2831_v33, %v2204_v43  ;;  %v1175_v59 = vadd.f32 %v1174_v49, %v8912_v24  ;;  %v983_v60 = vpop.f32.mrf.mxu0  ;;  %v1176_v1 = vpop.f32.mrf.mxu1 }
 0x1a5   :  { %v2722_v61 = vadd.f32 %v2721_v37, %v2217_v47  ;;  %v2218_v62 = vmax.f32 %v982_v48, 0.0  ;;  %v984_v63 = vadd.f32 %v983_v60, %v8889_v17  ;;  %v2796_v19 = vadd.f32 %v2795_v41, %v2219_v58 }
 0x1a6   :  { %v2220_v5 = vmax.f32 %v1175_v59, 0.0  ;;  %v1177_v21 = vadd.f32 %v1176_v1, %v8894_v54  ;;  %v985_v9 = vpop.f32.mrf.mxu0  ;;  %v1178_v3 = vpop.f32.mrf.mxu1 }
 0x1a7   :  { %v2759_v13 = vadd.f32 %v2758_v46, %v2218_v62  ;;  %v2233_v20 = vmax.f32 %v984_v63, 0.0  ;;  %v986_v22 = vadd.f32 %v985_v9, %v8905_v23  ;;  %v1179_v6 = vadd.f32 %v1178_v3, %v8912_v24 }
 0x1a8   :  { %v2833_v4 = vadd.f32 %v2832_v57, %v2220_v5  ;;  %v2235_v26 = vmax.f32 %v1177_v21, 0.0  ;;  %v989_v7 = vpop.f32.mrf.mxu0  ;;  %6941 = vmatmul.mubr.msk.bf16.gmra.mxu0 %vm460_vm0, %v7972_v8  ;;  %v1182_v53 = vpop.f32.mrf.mxu1  ;;  %6957 = vmatmul.mubr.msk.bf16.gmra.mxu1 %vm460_vm0, %v7972_v8 }
 0x1a9   :  { %v2723_v27 = vadd.f32 %v2722_v61, %v2233_v20  ;;  %v2234_v28 = vmax.f32 %v986_v22, 0.0  ;;  %v990_v29 = vadd.f32 %v989_v7, %v8889_v17  ;;  %1463 = vmatprep.mubr.bf16.mxu0 %v8183_v0  ;;  %v2236_v31 = vmax.f32 %v1179_v6, 0.0  ;;  %1656 = vmatprep.mubr.bf16.mxu1 %v8183_v0 }
 0x1aa   :  { %v2797_v30 = vadd.f32 %v2796_v19, %v2235_v26  ;;  %v1183_v32 = vadd.f32 %v1182_v53, %v8894_v54  ;;  %v991_v33 = vpop.f32.mrf.mxu0  ;;  %v1184_v36 = vpop.f32.mrf.mxu1  ;;  %v7973_v19 = vld [vmem:[%s11593_s1 + $0x78] sm:$0xff]  }
 0x1ab   :  { %v2760_v56 = vadd.f32 %v2759_v13, %v2234_v28  ;;  %v2249_v34 = vmax.f32 %v990_v29, 0.0  ;;  %v992_v35 = vadd.f32 %v991_v33, %v8905_v23  ;;  %v2834_v37 = vadd.f32 %v2833_v4, %v2236_v31 }
 0x1ac   :  { %v2251_v39 = vmax.f32 %v1183_v32, 0.0  ;;  %v1185_v40 = vadd.f32 %v1184_v36, %v8912_v24  ;;  %v993_v52 = vpop.f32.mrf.mxu0  ;;  %v1186_v45 = vpop.f32.mrf.mxu1 }
 0x1ad   :  { %v2724_v41 = vadd.f32 %v2723_v27, %v2249_v34  ;;  %v2250_v43 = vmax.f32 %v992_v35, 0.0  ;;  %v994_v44 = vadd.f32 %v993_v52, %v8889_v17  ;;  %v1187_v48 = vadd.f32 %v1186_v45, %v8894_v54 }
 0x1ae   :  { %v2798_v46 = vadd.f32 %v2797_v30, %v2251_v39  ;;  %v2252_v47 = vmax.f32 %v1185_v40, 0.0  ;;  %v995_v49 = vpop.f32.mrf.mxu0  ;;  %v1188_v60 = vpop.f32.mrf.mxu1 }
 0x1af   :  { %v2761_v57 = vadd.f32 %v2760_v56, %v2250_v43  ;;  %v2265_v58 = vmax.f32 %v994_v44, 0.0  ;;  %v996_v59 = vadd.f32 %v995_v49, %v8905_v23  ;;  %v2267_v62 = vmax.f32 %v1187_v48, 0.0  ;;  %v7504_v43 = vld [vmem:[#allocation4 + $0x170] ss:$8 sps:$4 sm:$0xff]   ;;  %v7509_v44 = vld [vmem:[#allocation4 + $0x64] ss:$8 sps:$4 sm:$0xff]  }
 0x1b0   :  { %v2835_v61 = vadd.f32 %v2834_v37, %v2252_v47  ;;  %v1189_v63 = vadd.f32 %v1188_v60, %v8912_v24  ;;  %v999_v1 = vpop.f32.mrf.mxu0  ;;  %6942 = vmatmul.mubr.msk.bf16.gmra.mxu0 %vm460_vm0, %v7973_v19  ;;  %v1192_v13 = vpop.f32.mrf.mxu1  ;;  %6958 = vmatmul.mubr.msk.bf16.gmra.mxu1 %vm460_vm0, %v7973_v19  ;;  %v7501_v37 = vld [vmem:[#allocation4 + $0x70] ss:$8 sps:$4 sm:$0xff]   ;;  %v7974_v49 = vld [vmem:[%s11593_s1] sm:$0xff]  }
 0x1b1   :  { %v2725_v5 = vadd.f32 %v2724_v41, %v2265_v58  ;;  %v2266_v21 = vmax.f32 %v996_v59, 0.0  ;;  %v1000_v9 = vadd.f32 %v999_v1, %v8889_v17  ;;  %1699 = vmatprep.mubr.bf16.mxu0 %v8183_v0  ;;  %v2799_v20 = vadd.f32 %v2798_v46, %v2267_v62  ;;  %1892 = vmatprep.mubr.bf16.mxu1 %v8183_v0 }
 0x1b2   :  { %v2268_v22 = vmax.f32 %v1189_v63, 0.0  ;;  %v1193_v3 = vadd.f32 %v1192_v13, %v8894_v54  ;;  %v1001_v4 = vpop.f32.mrf.mxu0  ;;  %v1194_v8 = vpop.f32.mrf.mxu1 }
 0x1b3   :  { %v2762_v26 = vadd.f32 %v2761_v57, %v2266_v21  ;;  %v2281_v6 = vmax.f32 %v1000_v9, 0.0  ;;  %v1002_v7 = vadd.f32 %v1001_v4, %v8905_v23  ;;  %v1195_v29 = vadd.f32 %v1194_v8, %v8912_v24  ;;  %v7512_v57 = vld [vmem:[#allocation4 + $0x164] ss:$8 sps:$4 sm:$0xff]   ;;  %v7518_v8 = vld [vmem:[#allocation4 + $0x154] ss:$8 sps:$4 sm:$0xff]  }
 0x1b4   :  { %v2836_v27 = vadd.f32 %v2835_v61, %v2268_v22  ;;  %v2283_v28 = vmax.f32 %v1193_v3, 0.0  ;;  %v1003_v53 = vpop.f32.mrf.mxu0  ;;  %v1196_v33 = vpop.f32.mrf.mxu1  ;;  %v7510_v22 = vld [vmem:[#allocation4 + $0x160] ss:$8 sps:$4 sm:$0xff]   ;;  %v7515_v3 = vld [vmem:[#allocation4 + $0x54] ss:$8 sps:$4 sm:$0xff]  }
 0x1b5   :  { %v2726_v30 = vadd.f32 %v2725_v5, %v2281_v6  ;;  %v2282_v31 = vmax.f32 %v1002_v7, 0.0  ;;  %v1004_v32 = vadd.f32 %v1003_v53, %v8889_v17  ;;  %v2284_v34 = vmax.f32 %v1195_v29, 0.0  ;;  %v7507_v5 = vld [vmem:[#allocation4 + $0x60] ss:$8 sps:$4 sm:$0xff]  }
 0x1b6   :  { %v2800_v56 = vadd.f32 %v2799_v20, %v2283_v28  ;;  %v1197_v35 = vadd.f32 %v1196_v33, %v8894_v54  ;;  %v1005_v36 = vpop.f32.mrf.mxu0  ;;  %v1198_v41 = vpop.f32.mrf.mxu1 }
 0x1b7   :  { %v2763_v39 = vadd.f32 %v2762_v26, %v2282_v31  ;;  %v2297_v40 = vmax.f32 %v1004_v32, 0.0  ;;  %v1006_v52 = vadd.f32 %v1005_v36, %v8905_v23  ;;  %v2837_v45 = vadd.f32 %v2836_v27, %v2284_v34 }
 0x1b8   :  { %v2299_v46 = vmax.f32 %v1197_v35, 0.0  ;;  %v1199_v47 = vadd.f32 %v1198_v41, %v8912_v24  ;;  %v1009_v48 = vpop.f32.mrf.mxu0  ;;  %6959 = vmatmul.mubr.msk.bf16.vlgmr.msra.gmra.mxu0 %vm460_vm0, %v7974_v49  ;;  %v1202_v61 = vpop.f32.mrf.mxu1  ;;  %6975 = vmatmul.mubr.msk.bf16.vlgmr.msra.gmra.mxu1 %vm460_vm0, %v7974_v49 }
 0x1b9   :  { %v2727_v58 = vadd.f32 %v2726_v30, %v2297_v40  ;;  %v2298_v59 = vmax.f32 %v1006_v52, 0.0  ;;  %v1010_v60 = vadd.f32 %v1009_v48, %v8889_v17  ;;  %1709 = vmatprep.mubr.bf16.mxu0 %v8183_v0  ;;  %v1203_v1 = vadd.f32 %v1202_v61, %v8894_v54  ;;  %1902 = vmatprep.mubr.bf16.mxu1 %v8183_v0  ;;  %v7521_v40 = vld [vmem:[#allocation4 + $0x44] ss:$8 sps:$4 sm:$0xff]  }
 0x1ba   :  { %v2801_v62 = vadd.f32 %v2800_v56, %v2299_v46  ;;  %v2300_v63 = vmax.f32 %v1199_v47, 0.0  ;;  %v1011_v19 = vpop.f32.mrf.mxu0  ;;  %4739 = vmatpush1.bf16.msra.mxu0 %v7501_v37  ;;  %v1204_v20 = vpop.f32.mrf.mxu1  ;;  %4780 = vmatpush1.bf16.msra.mxu1 %v7504_v43  ;;  %v7513_v56 = vld [vmem:[#allocation4 + $0x50] ss:$8 sps:$4 sm:$0xff]   ;;  %v7524_v46 = vld [vmem:[#allocation4 + $0x144] ss:$8 sps:$4 sm:$0xff]  }
 0x1bb   :  { %v2764_v21 = vadd.f32 %v2763_v39, %v2298_v59  ;;  %v2313_v9 = vmax.f32 %v1010_v60, 0.0  ;;  %v1012_v13 = vadd.f32 %v1011_v19, %v8905_v23  ;;  %4740 = vmatprep.subr.bf16.mxu0 %v7509_v44  ;;  %v2315_v26 = vmax.f32 %v1203_v1, 0.0  ;;  %4781 = vmatprep.subr.bf16.mxu1 %v7512_v57  ;;  %v7516_v39 = vld [vmem:[#allocation4 + $0x150] ss:$8 sps:$4 sm:$0xff]  }
 0x1bc   :  { %v2838_v4 = vadd.f32 %v2837_v45, %v2300_v63  ;;  %v1205_v6 = vadd.f32 %v1204_v20, %v8912_v24  ;;  %v1013_v7 = vpop.f32.mrf.mxu0  ;;  %v1206_v53 = vpop.f32.mrf.mxu1  ;;  %v7975_v45 = vld [vmem:[%s11593_s1 + $0x8] sm:$0xff]  }
 0x1bd   :  { %v2728_v27 = vadd.f32 %v2727_v58, %v2313_v9  ;;  %v2314_v28 = vmax.f32 %v1012_v13, 0.0  ;;  %v1014_v29 = vadd.f32 %v1013_v7, %v8889_v17  ;;  %v2802_v30 = vadd.f32 %v2801_v62, %v2315_v26  ;;  %v7519_v62 = vld [vmem:[#allocation4 + $0x40] ss:$8 sps:$4 sm:$0xff]   ;;  %v7527_v9 = vld [vmem:[#allocation4 + $0x34] ss:$8 sps:$4 sm:$0xff]  }
 0x1be   :  { %v2316_v31 = vmax.f32 %v1205_v6, 0.0  ;;  %v1207_v32 = vadd.f32 %v1206_v53, %v8894_v54  ;;  %v1015_v33 = vpop.f32.mrf.mxu0  ;;  %4741 = vmatpush1.bf16.msra.mxu0 %v7507_v5  ;;  %v1208_v37 = vpop.f32.mrf.mxu1  ;;  %4782 = vmatpush1.bf16.msra.mxu1 %v7510_v22 }
 0x1bf   :  { %v2765_v34 = vadd.f32 %v2764_v21, %v2314_v28  ;;  %v2329_v35 = vmax.f32 %v1014_v29, 0.0  ;;  %v1016_v36 = vadd.f32 %v1015_v33, %v8905_v23  ;;  %4742 = vmatprep.subr.bf16.mxu0 %v7515_v3  ;;  %v1209_v43 = vadd.f32 %v1208_v37, %v8912_v24  ;;  %4783 = vmatprep.subr.bf16.mxu1 %v7518_v8  ;;  %v7522_v21 = vld [vmem:[#allocation4 + $0x140] ss:$8 sps:$4 sm:$0xff]  }
 0x1c0   :  { %v2839_v52 = vadd.f32 %v2838_v4, %v2316_v31  ;;  %v2331_v41 = vmax.f32 %v1207_v32, 0.0  ;;  %v1019_v44 = vpop.f32.mrf.mxu0  ;;  %6960 = vmatmul.mubr.msk.bf16.gmra.mxu0 %vm460_vm0, %v7975_v45  ;;  %v1212_v57 = vpop.f32.mrf.mxu1  ;;  %6976 = vmatmul.mubr.msk.bf16.gmra.mxu1 %vm460_vm0, %v7975_v45  ;;  %v7530_v4 = vld [vmem:[#allocation4 + $0x134] ss:$8 sps:$4 sm:$0xff]  }
 0x1c1   :  { %v2729_v47 = vadd.f32 %v2728_v27, %v2329_v35  ;;  %v2330_v48 = vmax.f32 %v1016_v36, 0.0  ;;  %v1020_v49 = vadd.f32 %v1019_v44, %v8889_v17  ;;  %1719 = vmatprep.mubr.bf16.mxu0 %v8183_v0  ;;  %v2332_v59 = vmax.f32 %v1209_v43, 0.0  ;;  %1912 = vmatprep.mubr.bf16.mxu1 %v8183_v0  ;;  %v7533_v35 = vld [vmem:[#allocation4 + $0x24] ss:$8 sps:$4 sm:$0xff]  }
 0x1c2   :  { %v2803_v58 = vadd.f32 %v2802_v30, %v2331_v41  ;;  %v1213_v60 = vadd.f32 %v1212_v57, %v8894_v54  ;;  %v1021_v61 = vpop.f32.mrf.mxu0  ;;  %4743 = vmatpush1.bf16.msra.mxu0 %v7513_v56  ;;  %v1214_v5 = vpop.f32.mrf.mxu1  ;;  %4784 = vmatpush1.bf16.msra.mxu1 %v7516_v39  ;;  %v7525_v30 = vld [vmem:[#allocation4 + $0x30] ss:$8 sps:$4 sm:$0xff]   ;;  %v7536_v41 = vld [vmem:[#allocation4 + $0x124] ss:$8 sps:$4 sm:$0xff]  }
 0x1c3   :  { %v2766_v63 = vadd.f32 %v2765_v34, %v2330_v48  ;;  %v2345_v1 = vmax.f32 %v1020_v49, 0.0  ;;  %v1022_v19 = vadd.f32 %v1021_v61, %v8905_v23  ;;  %4744 = vmatprep.subr.bf16.mxu0 %v7521_v40  ;;  %v2840_v13 = vadd.f32 %v2839_v52, %v2332_v59  ;;  %4785 = vmatprep.subr.bf16.mxu1 %v7524_v46  ;;  %v7528_v34 = vld [vmem:[#allocation4 + $0x130] ss:$8 sps:$4 sm:$0xff]  }
 0x1c4   :  { %v2347_v20 = vmax.f32 %v1213_v60, 0.0  ;;  %v1215_v22 = vadd.f32 %v1214_v5, %v8912_v24  ;;  %v1023_v3 = vpop.f32.mrf.mxu0  ;;  %v1216_v8 = vpop.f32.mrf.mxu1  ;;  %v7976_v52 = vld [vmem:[%s11593_s1 + $0x10] sm:$0xff]  }
 0x1c5   :  { %v2730_v26 = vadd.f32 %v2729_v47, %v2345_v1  ;;  %v2346_v6 = vmax.f32 %v1022_v19, 0.0  ;;  %v1024_v7 = vadd.f32 %v1023_v3, %v8889_v17  ;;  %v1217_v29 = vadd.f32 %v1216_v8, %v8894_v54  ;;  %v7539_v1 = vld [vmem:[#allocation4 + $0x14] ss:$8 sps:$4 sm:$0xff]  }
 0x1c6   :  { %v2804_v27 = vadd.f32 %v2803_v58, %v2347_v20  ;;  %v2348_v28 = vmax.f32 %v1215_v22, 0.0  ;;  %v1025_v53 = vpop.f32.mrf.mxu0  ;;  %4745 = vmatpush1.bf16.msra.mxu0 %v7519_v62  ;;  %v1218_v56 = vpop.f32.mrf.mxu1  ;;  %4786 = vmatpush1.bf16.msra.mxu1 %v7522_v21  ;;  %v7531_v58 = vld [vmem:[#allocation4 + $0x20] ss:$8 sps:$4 sm:$0xff]  }
 0x1c7   :  { %v2767_v31 = vadd.f32 %v2766_v63, %v2346_v6  ;;  %v2361_v32 = vmax.f32 %v1024_v7, 0.0  ;;  %v1026_v33 = vadd.f32 %v1025_v53, %v8905_v23  ;;  %4746 = vmatprep.subr.bf16.mxu0 %v7527_v9  ;;  %v2363_v37 = vmax.f32 %v1217_v29, 0.0  ;;  %4787 = vmatprep.subr.bf16.mxu1 %v7530_v4  ;;  %v7534_v63 = vld [vmem:[#allocation4 + $0x120] ss:$8 sps:$4 sm:$0xff]  }
 0x1c8   :  { %v2841_v36 = vadd.f32 %v2840_v13, %v2348_v28  ;;  %v1219_v39 = vadd.f32 %v1218_v56, %v8912_v24  ;;  %v1029_v40 = vpop.f32.mrf.mxu0  ;;  %6961 = vmatmul.mubr.msk.bf16.gmra.mxu0 %vm460_vm0, %v7976_v52  ;;  %v1222_v46 = vpop.f32.mrf.mxu1  ;;  %6977 = vmatmul.mubr.msk.bf16.gmra.mxu1 %vm460_vm0, %v7976_v52  ;;  %v7542_v13 = vld [vmem:[#allocation4 + $0x114] ss:$8 sps:$4 sm:$0xff]  }
 0x1c9   :  { %v2731_v43 = vadd.f32 %v2730_v26, %v2361_v32  ;;  %v2362_v44 = vmax.f32 %v1026_v33, 0.0  ;;  %v1030_v45 = vadd.f32 %v1029_v40, %v8889_v17  ;;  %1729 = vmatprep.mubr.bf16.mxu0 %v8183_v0  ;;  %v2805_v47 = vadd.f32 %v2804_v27, %v2363_v37  ;;  %1922 = vmatprep.mubr.bf16.mxu1 %v8183_v0  ;;  %v7537_v27 = vld [vmem:[#allocation4 + $0x10] ss:$8 sps:$4 sm:$0xff]   ;;  %v7545_v32 = vld [vmem:[#allocation4 + $0x4] ss:$8 sps:$4 sm:$0xff]  }
 0x1ca   :  { %v2364_v48 = vmax.f32 %v1219_v39, 0.0  ;;  %v1223_v49 = vadd.f32 %v1222_v46, %v8894_v54  ;;  %v1031_v57 = vpop.f32.mrf.mxu0  ;;  %4747 = vmatpush1.bf16.msra.mxu0 %v7525_v30  ;;  %v1224_v62 = vpop.f32.mrf.mxu1  ;;  %4788 = vmatpush1.bf16.msra.mxu1 %v7528_v34  ;;  %v7548_v37 = vld [vmem:[#allocation4 + $0x104] ss:$8 sps:$4 sm:$0xff]  }
 0x1cb   :  { %v2768_v59 = vadd.f32 %v2767_v31, %v2362_v44  ;;  %v2377_v60 = vmax.f32 %v1030_v45, 0.0  ;;  %v1032_v61 = vadd.f32 %v1031_v57, %v8905_v23  ;;  %4748 = vmatprep.subr.bf16.mxu0 %v7533_v35  ;;  %v1225_v21 = vadd.f32 %v1224_v62, %v8912_v24  ;;  %4789 = vmatprep.subr.bf16.mxu1 %v7536_v41  ;;  %v7540_v31 = vld [vmem:[#allocation4 + $0x110] ss:$8 sps:$4 sm:$0xff]  }
 0x1cc   :  { %v2842_v19 = vadd.f32 %v2841_v36, %v2364_v48  ;;  %v2379_v5 = vmax.f32 %v1223_v49, 0.0  ;;  %v1033_v9 = vpop.f32.mrf.mxu0  ;;  %v1226_v4 = vpop.f32.mrf.mxu1  ;;  %v7977_v36 = vld [vmem:[%s11593_s1 + $0x18] sm:$0xff]  }
 0x1cd   :  { %v2732_v20 = vadd.f32 %v2731_v43, %v2377_v60  ;;  %v2378_v22 = vmax.f32 %v1032_v61, 0.0  ;;  %v1034_v3 = vadd.f32 %v1033_v9, %v8889_v17  ;;  %v2380_v6 = vmax.f32 %v1225_v21, 0.0 }
 0x1ce   :  { %v2806_v26 = vadd.f32 %v2805_v47, %v2379_v5  ;;  %v1227_v7 = vadd.f32 %v1226_v4, %v8894_v54  ;;  %v1035_v8 = vpop.f32.mrf.mxu0  ;;  %4749 = vmatpush1.bf16.msra.mxu0 %v7531_v58  ;;  %v1228_v30 = vpop.f32.mrf.mxu1  ;;  %4790 = vmatpush1.bf16.msra.mxu1 %v7534_v63  ;;  %v7543_v47 = vld [vmem:[#allocation4] ss:$8 sps:$4 sm:$0xff]   ;;  %v7554_v63 = vld [vmem:[#allocation4 + $0x1f4] ss:$8 sps:$4 sm:$0xff]   ;;  %v7552_v4 = vld [vmem:[#allocation4 + $0x1f0] ss:$8 sps:$4 sm:$0xff]  }
 0x1cf   :  { %v2769_v28 = vadd.f32 %v2768_v59, %v2378_v22  ;;  %v2393_v29 = vmax.f32 %v1034_v3, 0.0  ;;  %v1036_v53 = vadd.f32 %v1035_v8, %v8905_v23  ;;  %4750 = vmatprep.subr.bf16.mxu0 %v7539_v1  ;;  %v2843_v33 = vadd.f32 %v2842_v19, %v2380_v6  ;;  %4791 = vmatprep.subr.bf16.mxu1 %v7542_v13  ;;  %v7546_v58 = vld [vmem:[#allocation4 + $0x100] ss:$8 sps:$4 sm:$0xff]   ;;  %v7551_v59 = vld [vmem:[#allocation4 + $0xf4] ss:$8 sps:$4 sm:$0xff]  }
 0x1d0   :  { %v2395_v56 = vmax.f32 %v1227_v7, 0.0  ;;  %v1229_v34 = vadd.f32 %v1228_v30, %v8912_v24  ;;  %v1039_v35 = vpop.f32.mrf.mxu0  ;;  %6962 = vmatmul.mubr.msk.bf16.gmra.mxu0 %vm460_vm0, %v7977_v36  ;;  %v1232_v41 = vpop.f32.mrf.mxu1  ;;  %6978 = vmatmul.mubr.msk.bf16.gmra.mxu1 %vm460_vm0, %v7977_v36  ;;  %v7978_v8 = vld [vmem:[%s11593_s1 + $0x20] sm:$0xff]   ;;  %v7563_v36 = vld [vmem:[#allocation4 + $0xd4] ss:$8 sps:$4 sm:$0xff]  }
 0x1d1   :  { %v2733_v39 = vadd.f32 %v2732_v20, %v2393_v29  ;;  %v2394_v40 = vmax.f32 %v1036_v53, 0.0  ;;  %v1040_v52 = vadd.f32 %v1039_v35, %v8889_v17  ;;  %1739 = vmatprep.mubr.bf16.mxu0 %v8183_v0  ;;  %v1233_v45 = vadd.f32 %v1232_v41, %v8894_v54  ;;  %1932 = vmatprep.mubr.bf16.mxu1 %v8183_v0  ;;  %v7549_v20 = vld [vmem:[#allocation4 + $0xf0] ss:$8 sps:$4 sm:$0xff]   ;;  %v7558_v35 = vld [vmem:[#allocation4 + $0x1e0] ss:$8 sps:$4 sm:$0xff]  }
 0x1d2   :  { %v2807_v43 = vadd.f32 %v2806_v26, %v2395_v56  ;;  %v2396_v44 = vmax.f32 %v1229_v34, 0.0  ;;  %v9085_v46 = vpop.f32.mrf.mxu0  ;;  %4751 = vmatpush1.bf16.msra.mxu0 %v7537_v27  ;;  %v9090_v57 = vpop.f32.mrf.mxu1  ;;  %4792 = vmatpush1.bf16.msra.mxu1 %v7540_v31  ;;  %v7557_v26 = vld [vmem:[#allocation4 + $0xe4] ss:$8 sps:$4 sm:$0xff]  }
 0x1d3   :  { %v9088_v48 = vadd.f32 %v2769_v28, %v2394_v40  ;;  %v2409_v49 = vmax.f32 %v1040_v52, 0.0  ;;  %4752 = vmatprep.subr.bf16.mxu0 %v7545_v32  ;;  %v2411_v61 = vmax.f32 %v1233_v45, 0.0  ;;  %4793 = vmatprep.subr.bf16.mxu1 %v7548_v37  ;;  %v7560_v27 = vld [vmem:[#allocation4 + $0x1e4] ss:$8 sps:$4 sm:$0xff]   ;;  %v7566_v40 = vld [vmem:[#allocation4 + $0x1d4] ss:$8 sps:$4 sm:$0xff]  }
 0x1d4   :  { %v9092_v60 = vadd.f32 %v2843_v33, %v2396_v44  ;;  %v1043_v62 = vpop.f32.mrf.mxu0  ;;  %v1236_v5 = vpop.f32.mrf.mxu1  ;;  %v7555_v33 = vld [vmem:[#allocation4 + $0xe0] ss:$8 sps:$4 sm:$0xff]  }
 0x1d5   :  { %v2734_v1 = vadd.f32 %v2733_v39, %v2409_v49  ;;  %v1044_v19 = vadd.f32 %v1043_v62, %v8889_v17  ;;  %v2808_v21 = vadd.f32 %v2807_v43, %v2411_v61  ;;  %v1237_v9 = vadd.f32 %v1236_v5, %v8894_v54  ;;  %v7561_v49 = vld [vmem:[#allocation4 + $0xd0] ss:$8 sps:$4 sm:$0xff]   ;;  %v7569_v62 = vld [vmem:[#allocation4 + $0xc4] ss:$8 sps:$4 sm:$0xff]  }
 0x1d6   :  { %v9096_v13 = vpop.f32.mrf.mxu0  ;;  %4753 = vmatpush1.bf16.msra.mxu0 %v7543_v47  ;;  %v9098_v3 = vpop.f32.mrf.mxu1  ;;  %4794 = vmatpush1.bf16.msra.mxu1 %v7546_v58  ;;  %v7564_v61 = vld [vmem:[#allocation4 + $0x1d0] ss:$8 sps:$4 sm:$0xff]   ;;  %v7572_v5 = vld [vmem:[#allocation4 + $0x1c4] ss:$8 sps:$4 sm:$0xff]  }
 0x1d7   :  { %v2425_v22 = vmax.f32 %v1044_v19, 0.0  ;;  %4754 = vmatprep.subr.bf16.mxu0 %v7551_v59  ;;  %v2427_v6 = vmax.f32 %v1237_v9, 0.0  ;;  %4795 = vmatprep.subr.bf16.mxu1 %v7554_v63  ;;  %v7979_v19 = vld [vmem:[%s11593_s1 + $0x28] sm:$0xff]  }
 0x1d8   :  { %v1049_v7 = vpop.f32.mrf.mxu0  ;;  %6963 = vmatmul.mubr.msk.bf16.gmra.mxu0 %vm460_vm0, %v7978_v8  ;;  %v1242_v53 = vpop.f32.mrf.mxu1  ;;  %6979 = vmatmul.mubr.msk.bf16.gmra.mxu1 %vm460_vm0, %v7978_v8 }
 0x1d9   :  { %v2735_v28 = vadd.f32 %v2734_v1, %v2425_v22  ;;  %v1050_v29 = vadd.f32 %v1049_v7, %v8889_v17  ;;  %1749 = vmatprep.mubr.bf16.mxu0 %v8183_v0  ;;  %v2809_v30 = vadd.f32 %v2808_v21, %v2427_v6  ;;  %v1243_v31 = vadd.f32 %v1242_v53, %v8894_v54  ;;  %v7567_v6 = vld [vmem:[#allocation4 + $0xc0] ss:$8 sps:$4 sm:$0xff]  }
 0x1da   :  { %v9108_v32 = vpop.f32.mrf.mxu0  ;;  %1942 = vmatprep.mubr.bf16.mxu1 %v8183_v0  ;;  %4755 = vmatpush2.bf16.msra.mxu0 %v7549_v20  ;;  %v9111_v34 = vpop.f32.mrf.mxu1 }
 0x1db   :  { %v2441_v56 = vmax.f32 %v1050_v29, 0.0  ;;  %4796 = vmatpush2.bf16.msra.mxu1 %v7552_v4  ;;  %4756 = vmatprep.subr.bf16.mxu0 %v7557_v26  ;;  %v2443_v37 = vmax.f32 %v1243_v31, 0.0 }
 0x1dc   :  { %v1053_v39 = vpop.f32.mrf.mxu0  ;;  %4797 = vmatprep.subr.bf16.mxu1 %v7560_v27  ;;  %v1246_v43 = vpop.f32.mrf.mxu1  ;;  %v7570_v27 = vld [vmem:[#allocation4 + $0x1c0] ss:$8 sps:$4 sm:$0xff]  }
 0x1dd   :  { %v2736_v52 = vadd.f32 %v2735_v28, %v2441_v56  ;;  %v1054_v41 = vadd.f32 %v1053_v39, %v8889_v17  ;;  %v2810_v44 = vadd.f32 %v2809_v30, %v2443_v37  ;;  %v1247_v45 = vadd.f32 %v1246_v43, %v8894_v54  ;;  %v7575_v28 = vld [vmem:[#allocation4 + $0xb4] ss:$8 sps:$4 sm:$0xff]   ;;  %v7573_v39 = vld [vmem:[#allocation4 + $0xb0] ss:$8 sps:$4 sm:$0xff]   ;;  %v7581_v43 = vld [vmem:[#allocation4 + $0xa4] ss:$8 sps:$4 sm:$0xff]  }
 0x1de   :  { %v9115_v47 = vpop.f32.mrf.mxu0  ;;  %4757 = vmatpush2.bf16.msra.mxu0 %v7555_v33  ;;  %v9117_v59 = vpop.f32.mrf.mxu1  ;;  %v7578_v30 = vld [vmem:[#allocation4 + $0x1b4] ss:$8 sps:$4 sm:$0xff]  }
 0x1df   :  { %v2457_v58 = vmax.f32 %v1054_v41, 0.0  ;;  %4798 = vmatpush2.bf16.msra.mxu1 %v7558_v35  ;;  %4758 = vmatprep.subr.bf16.mxu0 %v7563_v36  ;;  %v2459_v63 = vmax.f32 %v1247_v45, 0.0  ;;  %v7576_v41 = vld [vmem:[#allocation4 + $0x1b0] ss:$8 sps:$4 sm:$0xff]  }
 0x1e0   :  { %v1059_v1 = vpop.f32.mrf.mxu0  ;;  %6964 = vmatmul.mubr.msk.bf16.gmra.mxu0 %vm460_vm0, %v7979_v19  ;;  %4799 = vmatprep.subr.bf16.mxu1 %v7566_v40  ;;  %v1252_v20 = vpop.f32.mrf.mxu1 }
 0x1e1   :  { %v2737_v21 = vadd.f32 %v2736_v52, %v2457_v58  ;;  %v1060_v9 = vadd.f32 %v1059_v1, %v8889_v17  ;;  %6980 = vmatmul.mubr.msk.bf16.gmra.mxu1 %vm460_vm0, %v7979_v19  ;;  %1759 = vmatprep.mubr.bf16.mxu0 %v8183_v0  ;;  %v2811_v22 = vadd.f32 %v2810_v44, %v2459_v63  ;;  %v7584_v58 = vld [vmem:[#allocation4 + $0x1a4] ss:$8 sps:$4 sm:$0xff]  }
 0x1e2   :  { %v1253_v4 = vadd.f32 %v1252_v20, %v8894_v54  ;;  %v9127_v26 = vpop.f32.mrf.mxu0  ;;  %1952 = vmatprep.mubr.bf16.mxu1 %v8183_v0  ;;  %4759 = vmatpush2.bf16.msra.mxu0 %v7561_v49  ;;  %v9130_v8 = vpop.f32.mrf.mxu1  ;;  %v7980_v49 = vld [vmem:[%s11593_s1 + $0x30] sm:$0xff]  }
 0x1e3   :  { %v2473_v7 = vmax.f32 %v1060_v9, 0.0  ;;  %4800 = vmatpush2.bf16.msra.mxu1 %v7564_v61  ;;  %4760 = vmatprep.subr.bf16.mxu0 %v7569_v62 }
 0x1e4   :  { %v2475_v29 = vmax.f32 %v1253_v4, 0.0  ;;  %v1063_v53 = vpop.f32.mrf.mxu0  ;;  %4801 = vmatprep.subr.bf16.mxu1 %v7572_v5  ;;  %v1256_v56 = vpop.f32.mrf.mxu1  ;;  %v7587_v4 = vld [vmem:[#allocation4 + $0x94] ss:$8 sps:$4 sm:$0xff]  }
 0x1e5   :  { %v2738_v31 = vadd.f32 %v2737_v21, %v2473_v7  ;;  %v1064_v33 = vadd.f32 %v1063_v53, %v8889_v17  ;;  %v1257_v36 = vadd.f32 %v1256_v56, %v8894_v54  ;;  %v7579_v21 = vld [vmem:[#allocation4 + $0xa0] ss:$8 sps:$4 sm:$0xff]   ;;  %v7585_v56 = vld [vmem:[#allocation4 + $0x90] ss:$8 sps:$4 sm:$0xff]  }
 0x1e6   :  { %v2812_v35 = vadd.f32 %v2811_v22, %v2475_v29  ;;  %v9134_v37 = vpop.f32.mrf.mxu0  ;;  %4761 = vmatpush2.bf16.msra.mxu0 %v7567_v6  ;;  %v9136_v52 = vpop.f32.mrf.mxu1  ;;  %v7582_v22 = vld [vmem:[#allocation4 + $0x1a0] ss:$8 sps:$4 sm:$0xff]  }
 0x1e7   :  { %v2489_v40 = vmax.f32 %v1064_v33, 0.0  ;;  %4802 = vmatpush2.bf16.msra.mxu1 %v7570_v27  ;;  %4762 = vmatprep.subr.bf16.mxu0 %v7575_v28  ;;  %v2491_v44 = vmax.f32 %v1257_v36, 0.0  ;;  %v7590_v27 = vld [vmem:[#allocation4 + $0x194] ss:$8 sps:$4 sm:$0xff]  }
 0x1e8   :  { %v1069_v45 = vpop.f32.mrf.mxu0  ;;  %6965 = vmatmul.mubr.msk.bf16.gmra.mxu0 %vm460_vm0, %v7980_v49  ;;  %4803 = vmatprep.subr.bf16.mxu1 %v7578_v30  ;;  %v1262_v63 = vpop.f32.mrf.mxu1 }
 0x1e9   :  { %v2739_v61 = vadd.f32 %v2738_v31, %v2489_v40  ;;  %v1070_v62 = vadd.f32 %v1069_v45, %v8889_v17  ;;  %6981 = vmatmul.mubr.msk.bf16.gmra.mxu1 %vm460_vm0, %v7980_v49  ;;  %1769 = vmatprep.mubr.bf16.mxu0 %v8183_v0  ;;  %v2813_v1 = vadd.f32 %v2812_v35, %v2491_v44  ;;  %v7593_v40 = vld [vmem:[#allocation4 + $0x84] ss:$8 sps:$4 sm:$0xff]   ;;  %v7981_v45 = vld [vmem:[%s11593_s1 + $0x38] sm:$0xff]  }
 0x1ea   :  { %v1263_v19 = vadd.f32 %v1262_v63, %v8894_v54  ;;  %v9146_v5 = vpop.f32.mrf.mxu0  ;;  %1962 = vmatprep.mubr.bf16.mxu1 %v8183_v0  ;;  %4763 = vmatpush2.bf16.msra.mxu0 %v7573_v39  ;;  %v9149_v20 = vpop.f32.mrf.mxu1  ;;  %v7588_v39 = vld [vmem:[#allocation4 + $0x190] ss:$8 sps:$4 sm:$0xff]   ;;  %v7596_v49 = vld [vmem:[#allocation4 + $0x184] ss:$8 sps:$4 sm:$0xff]  }
 0x1eb   :  { %v2505_v9 = vmax.f32 %v1070_v62, 0.0  ;;  %4804 = vmatpush2.bf16.msra.mxu1 %v7576_v41  ;;  %4764 = vmatprep.subr.bf16.mxu0 %v7581_v43  ;;  %v1042_v41 = vadd.f32 %v9085_v46, %v8905_v23  ;;  %v1046_v46 = vadd.f32 %v9096_v13, %v8905_v23 }
 0x1ec   :  { %v2507_v6 = vmax.f32 %v1263_v19, 0.0  ;;  %v1073_v7 = vpop.f32.mrf.mxu0  ;;  %4805 = vmatprep.subr.bf16.mxu1 %v7584_v58  ;;  %v1266_v53 = vpop.f32.mrf.mxu1  ;;  %v1235_v58 = vadd.f32 %v9090_v57, %v8912_v24  ;;  %v7591_v57 = vld [vmem:[#allocation4 + $0x80] ss:$8 sps:$4 sm:$0xff]  }
 0x1ed   :  { %v2740_v28 = vadd.f32 %v2739_v61, %v2505_v9  ;;  %v1074_v29 = vadd.f32 %v1073_v7, %v8889_v17  ;;  %v1267_v31 = vadd.f32 %v1266_v53, %v8894_v54  ;;  %v1239_v9 = vadd.f32 %v9098_v3, %v8912_v24  ;;  %v7599_v7 = vld [vmem:[#allocation4 + $0x274] ss:$8 sps:$4 sm:$0xff]   ;;  %v137_v53 = vld [vmem:[%s11595_s3 + $0x8] sm:$0xff] }
 0x1ee   :  { %v2814_v30 = vadd.f32 %v2813_v1, %v2507_v6  ;;  %v9153_v33 = vpop.f32.mrf.mxu0  ;;  %4765 = vmatpush2.bf16.msra.mxu0 %v7579_v21  ;;  %v9155_v36 = vpop.f32.mrf.mxu1  ;;  %v7594_v6 = vld [vmem:[#allocation4 + $0x180] ss:$8 sps:$4 sm:$0xff]   ;;  %v2410_v13 = vmax.f32 %v1042_v41, 0.0  ;;  %v2412_v3 = vmax.f32 %v1235_v58, 0.0 }
 0x1ef   :  { %v2521_v35 = vmax.f32 %v1074_v29, 0.0  ;;  %4806 = vmatpush2.bf16.msra.mxu1 %v7582_v22  ;;  %4766 = vmatprep.subr.bf16.mxu0 %v7587_v4  ;;  %v2523_v43 = vmax.f32 %v1267_v31, 0.0  ;;  %v1245_v31 = vadd.f32 %v9111_v34, %v8912_v24  ;;  %v9194_v34 = vrot.slane %v137_v53, %v8607_v12 }
 0x1f0   :  { %v1079_v44 = vpop.f32.mrf.mxu0  ;;  %6966 = vmatmul.mubr.msk.bf16.gmra.mxu0 %vm460_vm0, %v7981_v45  ;;  %4807 = vmatprep.subr.bf16.mxu1 %v7590_v27  ;;  %v1272_v63 = vpop.f32.mrf.mxu1  ;;  %v1052_v27 = vadd.f32 %v9108_v32, %v8905_v23  ;;  %v1056_v32 = vadd.f32 %v9115_v47, %v8905_v23  ;;  %v2771_v47 = vadd.f32 %v9088_v48, %v2410_v13 }
 0x1f1   :  { %v2741_v61 = vadd.f32 %v2740_v28, %v2521_v35  ;;  %v1080_v62 = vadd.f32 %v1079_v44, %v8889_v17  ;;  %6982 = vmatmul.mubr.msk.bf16.gmra.mxu1 %vm460_vm0, %v7981_v45  ;;  %1779 = vmatprep.mubr.bf16.mxu0 %v8183_v0  ;;  %v2815_v1 = vadd.f32 %v2814_v30, %v2523_v43  ;;  %v7602_v30 = vld [vmem:[#allocation4 + $0x374] ss:$8 sps:$4 sm:$0xff]   ;;  %v2428_v45 = vmax.f32 %v1239_v9, 0.0 }
 0x1f2   :  { %v1273_v19 = vadd.f32 %v1272_v63, %v8894_v54  ;;  %v9171_v21 = vpop.f32.mrf.mxu0  ;;  %1972 = vmatprep.mubr.bf16.mxu1 %v8183_v0  ;;  %4767 = vmatpush2.bf16.msra.mxu0 %v7585_v56  ;;  %v9176_v4 = vpop.f32.mrf.mxu1  ;;  %v9212_v48 = vrot.slane %v137_v53, %v8614_v15  ;;  %v2458_v9 = vmax.f32 %v1056_v32, 0.0  ;;  %v1062_v13 = vadd.f32 %v9127_v26, %v8905_v23 }
 0x1f3   :  { %v2537_v22 = vmax.f32 %v1080_v62, 0.0  ;;  %4808 = vmatpush2.bf16.msra.mxu1 %v7588_v39  ;;  %4768 = vmatprep.subr.bf16.mxu0 %v7593_v40  ;;  %v2426_v40 = vmax.f32 %v1046_v46, 0.0  ;;  %v7982_v46 = vld [vmem:[%s11593_s1 + $0x40] sm:$0xff]  }
 0x1f4   :  { %v2539_v28 = vmax.f32 %v1273_v19, 0.0  ;;  %v1083_v29 = vpop.f32.mrf.mxu0  ;;  %4809 = vmatprep.subr.bf16.mxu1 %v7596_v49  ;;  %v1276_v39 = vpop.f32.mrf.mxu1 }
 0x1f5   :  { %v2742_v56 = vadd.f32 %v2741_v61, %v2537_v22  ;;  %v1084_v35 = vadd.f32 %v1083_v29, %v8889_v17  ;;  %v1277_v43 = vadd.f32 %v1276_v39, %v8894_v54  ;;  %v9198_v17 = vrot.slane %v137_v53, %v150_v14 }
 0x1f6   :  { %v2816_v41 = vadd.f32 %v2815_v1, %v2539_v28  ;;  %v9189_v44 = vpop.f32.mrf.mxu0  ;;  %4769 = vmatpush2.bf16.msra.mxu0 %v7591_v57  ;;  %v9191_v58 = vpop.f32.mrf.mxu1  ;;  %v2442_v61 = vmax.f32 %v1052_v27, 0.0  ;;  %v1249_v54 = vadd.f32 %v9117_v59, %v8912_v24  ;;  %v2845_v14 = vadd.f32 %v9092_v60, %v2412_v3 }
 0x1f7   :  { %v2553_v49 = vmax.f32 %v1084_v35, 0.0  ;;  %4810 = vmatpush2.bf16.msra.mxu1 %v7594_v6  ;;  %4820 = vmatprep.subr.bf16.mxu0 %v7599_v7  ;;  %v2555_v62 = vmax.f32 %v1277_v43, 0.0  ;;  %v2444_v1 = vmax.f32 %v1245_v31, 0.0  ;;  %v2772_v59 = vadd.f32 %v2771_v47, %v2426_v40 }
 0x1f8   :  { %v1315_v63 = vpop.f32.mrf.mxu0  ;;  %6967 = vmatmul.mubr.msk.bf16.gmra.mxu0 %vm460_vm0, %v7982_v46  ;;  %4861 = vmatprep.subr.bf16.mxu1 %v7602_v30  ;;  %v1508_v57 = vpop.f32.mrf.mxu1  ;;  %v9219_v7 = vrot.slane %v137_v53, %v154_v16  ;;  %v2846_v60 = vadd.f32 %v2845_v14, %v2428_v45  ;;  %v2460_v30 = vmax.f32 %v1249_v54, 0.0  ;;  %v1255_v40 = vadd.f32 %v9130_v8, %v8912_v24  ;;  %v7983_v8 = vld [vmem:[%s11593_s1 + $0x48] sm:$0xff]  }
 0x1f9   :  { %v9208_v19 = vadd.f32 %v2742_v56, %v2553_v49  ;;  %6983 = vmatmul.mubr.msk.bf16.gmra.mxu1 %vm460_vm0, %v7982_v46  ;;  %1789 = vmatprep.mubr.bf16.mxu0 %v8183_v0  ;;  %v9215_v22 = vadd.f32 %v2816_v41, %v2555_v62  ;;  %v1316_v27 = vadd.f32 %v1315_v63, %v9194_v34  ;;  %v2474_v43 = vmax.f32 %v1062_v13, 0.0 }
 0x1fa   :  { %v1317_v6 = vpop.f32.mrf.mxu0  ;;  %1982 = vmatprep.mubr.bf16.mxu1 %v8183_v0  ;;  %v1510_v28 = vpop.f32.mrf.mxu1  ;;  %v2773_v29 = vadd.f32 %v2772_v59, %v2442_v61  ;;  %v1509_v3 = vadd.f32 %v1508_v57, %v9198_v17  ;;  %v2847_v56 = vadd.f32 %v2846_v60, %v2444_v1  ;;  %v1066_v1 = vadd.f32 %v9134_v37, %v8905_v23 }
 0x1fb   :  { %v1318_v35 = vadd.f32 %v1317_v6, %v9212_v48  ;;  %v1511_v26 = vadd.f32 %v1510_v28, %v9219_v7  ;;  %v2061_v45 = vmax.f32 %v1316_v27, 0.0  ;;  %v2476_v60 = vmax.f32 %v1255_v40, 0.0 }
 0x1fc   :  { %v1319_v31 = vpop.f32.mrf.mxu0  ;;  %v1512_v53 = vpop.f32.mrf.mxu1  ;;  %v2774_v39 = vadd.f32 %v2773_v29, %v2458_v9  ;;  %v2848_v54 = vadd.f32 %v2847_v56, %v2460_v30  ;;  %v2063_v62 = vmax.f32 %v1509_v3, 0.0 }
 0x1fd   :  { %v1320_v16 = vadd.f32 %v1319_v31, %v9194_v34  ;;  %v1513_v32 = vadd.f32 %v1512_v53, %v9198_v17  ;;  %v2062_v57 = vmax.f32 %v1318_v35, 0.0  ;;  %v2064_v13 = vmax.f32 %v1511_v26, 0.0 }
 0x1fe   :  { %v1321_v41 = vpop.f32.mrf.mxu0  ;;  %v1514_v61 = vpop.f32.mrf.mxu1  ;;  %v2775_v30 = vadd.f32 %v2774_v39, %v2474_v43  ;;  %v9247_v35 = vadd.f32 %v9136_v52, %v8912_v24  ;;  %v9255_v52 = vadd.f32 %v9146_v5, %v8905_v23 }
 0x1ff   :  { %v2077_v49 = vmax.f32 %v1320_v16, 0.0  ;;  %v1322_v47 = vadd.f32 %v1321_v41, %v9212_v48  ;;  %v2079_v63 = vmax.f32 %v1513_v32, 0.0  ;;  %v1515_v46 = vadd.f32 %v1514_v61, %v9219_v7 }
 0x200   :  { %v1325_v14 = vpop.f32.mrf.mxu0  ;;  %6968 = vmatmul.mubr.msk.bf16.gmra.mxu0 %vm460_vm0, %v7983_v8  ;;  %v1518_v6 = vpop.f32.mrf.mxu1  ;;  %v2490_v32 = vmax.f32 %v1066_v1, 0.0  ;;  %v2492_v1 = vmax.f32 %v9247_v35, 0.0 }
 0x201   :  { %v2861_v59 = vadd.f32 %v2077_v49, %v2061_v45  ;;  %v2078_v9 = vmax.f32 %v1322_v47, 0.0  ;;  %6984 = vmatmul.mubr.msk.bf16.gmra.mxu1 %vm460_vm0, %v7983_v8  ;;  %1799 = vmatprep.mubr.bf16.mxu0 %v8183_v0  ;;  %v2935_v27 = vadd.f32 %v2079_v63, %v2063_v62  ;;  %v2080_v28 = vmax.f32 %v1515_v46, 0.0 }
 0x202   :  { %v1327_v29 = vpop.f32.mrf.mxu0  ;;  %1992 = vmatprep.mubr.bf16.mxu1 %v8183_v0  ;;  %v1326_v31 = vadd.f32 %v1325_v14, %v9194_v34  ;;  %v1519_v37 = vadd.f32 %v1518_v6, %v9198_v17  ;;  %v1520_v56 = vpop.f32.mrf.mxu1  ;;  %v2849_v49 = vadd.f32 %v2848_v54, %v2476_v60  ;;  %v7984_v54 = vld [vmem:[%s11593_s1 + $0x50] sm:$0xff]   ;;  %v2776_v60 = vadd.f32 %v2775_v30, %v2490_v32 }
 0x203   :  { %v2898_v3 = vadd.f32 %v2078_v9, %v2062_v57  ;;  %v2972_v16 = vadd.f32 %v2080_v28, %v2064_v13  ;;  %v1328_v53 = vadd.f32 %v1327_v29, %v9212_v48  ;;  %v1521_v40 = vadd.f32 %v1520_v56, %v9219_v7 }
 0x204   :  { %v1329_v26 = vpop.f32.mrf.mxu0  ;;  %v2093_v41 = vmax.f32 %v1326_v31, 0.0  ;;  %v2095_v45 = vmax.f32 %v1519_v37, 0.0  ;;  %v1522_v43 = vpop.f32.mrf.mxu1  ;;  %v2506_v30 = vmax.f32 %v9255_v52, 0.0  ;;  %v1269_v32 = vadd.f32 %v9155_v36, %v8912_v24 }
 0x205   :  { %v1330_v39 = vadd.f32 %v1329_v26, %v9194_v34  ;;  %v2094_v47 = vmax.f32 %v1328_v53, 0.0  ;;  %v2096_v61 = vmax.f32 %v1521_v40, 0.0  ;;  %v1523_v62 = vadd.f32 %v1522_v43, %v9198_v17 }
 0x206   :  { %v1331_v63 = vpop.f32.mrf.mxu0  ;;  %v2862_v46 = vadd.f32 %v2861_v59, %v2093_v41  ;;  %v2936_v14 = vadd.f32 %v2935_v27, %v2095_v45  ;;  %v1524_v57 = vpop.f32.mrf.mxu1  ;;  %v1082_v52 = vadd.f32 %v9171_v21, %v8905_v23  ;;  %v1086_v21 = vadd.f32 %v9189_v44, %v8905_v23 }
 0x207   :  { %v2109_v8 = vmax.f32 %v1330_v39, 0.0  ;;  %v2899_v9 = vadd.f32 %v2898_v3, %v2094_v47  ;;  %v2973_v6 = vadd.f32 %v2972_v16, %v2096_v61  ;;  %v2111_v13 = vmax.f32 %v1523_v62, 0.0 }
 0x208   :  { %v1335_v28 = vpop.f32.mrf.mxu0  ;;  %6969 = vmatmul.mubr.msk.bf16.gmra.mxu0 %vm460_vm0, %v7984_v54  ;;  %v1332_v5 = vadd.f32 %v1331_v63, %v9212_v48  ;;  %v1525_v59 = vadd.f32 %v1524_v57, %v9219_v7  ;;  %v1528_v27 = vpop.f32.mrf.mxu1  ;;  %v1265_v3 = vadd.f32 %v9149_v20, %v8912_v24  ;;  %v1076_v20 = vadd.f32 %v9153_v33, %v8905_v23 }
 0x209   :  { %v2863_v29 = vadd.f32 %v2862_v46, %v2109_v8  ;;  %6985 = vmatmul.mubr.msk.bf16.gmra.mxu1 %vm460_vm0, %v7984_v54  ;;  %v2937_v31 = vadd.f32 %v2936_v14, %v2111_v13  ;;  %v1336_v37 = vadd.f32 %v1335_v28, %v9194_v34  ;;  %v1529_v56 = vadd.f32 %v1528_v27, %v9198_v17 }
 0x20a   :  { %v1337_v35 = vpop.f32.mrf.mxu0  ;;  %1809 = vmatprep.mubr.bf16.mxu0 %v8183_v0  ;;  %v2110_v16 = vmax.f32 %v1332_v5, 0.0  ;;  %v2112_v53 = vmax.f32 %v1525_v59, 0.0  ;;  %v9272_v26 = vpop.f32.mrf.mxu1  ;;  %2002 = vmatprep.mubr.bf16.mxu1 %v8183_v0  ;;  %v2508_v36 = vmax.f32 %v1265_v3, 0.0  ;;  %v1275_v57 = vadd.f32 %v9176_v4, %v8912_v24  ;;  %v7985_v59 = vld [vmem:[%s11593_s1 + $0x58] sm:$0xff]  }
 0x20b   :  { %v1338_v40 = vadd.f32 %v1337_v35, %v9212_v48  ;;  %v2125_v41 = vmax.f32 %v1336_v37, 0.0  ;;  %v2127_v45 = vmax.f32 %v1529_v56, 0.0  ;;  %v2850_v28 = vadd.f32 %v2849_v49, %v2492_v1 }
 0x20c   :  { %v1339_v39 = vpop.f32.mrf.mxu0  ;;  %v2900_v43 = vadd.f32 %v2899_v9, %v2110_v16  ;;  %v9279_v47 = vadd.f32 %v2973_v6, %v2112_v53  ;;  %v1532_v63 = vpop.f32.mrf.mxu1  ;;  %v2522_v54 = vmax.f32 %v1076_v20, 0.0  ;;  %v2524_v27 = vmax.f32 %v1269_v32, 0.0 }
 0x20d   :  { %v2126_v61 = vmax.f32 %v1338_v40, 0.0  ;;  %v1340_v62 = vadd.f32 %v1339_v39, %v9194_v34  ;;  %v2864_v46 = vadd.f32 %v2863_v29, %v2125_v41  ;;  %v2938_v14 = vadd.f32 %v2937_v31, %v2127_v45 }
 0x20e   :  { %v1533_v33 = vadd.f32 %v1532_v63, %v9198_v17  ;;  %v9285_v8 = vpop.f32.mrf.mxu0  ;;  %v9291_v13 = vpop.f32.mrf.mxu1  ;;  %v1279_v4 = vadd.f32 %v9191_v58, %v8912_v24  ;;  %v2777_v23 = vadd.f32 %v2776_v60, %v2506_v30  ;;  %v2538_v44 = vmax.f32 %v1082_v52, 0.0 }
 0x20f   :  { %v9289_v9 = vadd.f32 %v2900_v43, %v2126_v61  ;;  %v2141_v6 = vmax.f32 %v1340_v62, 0.0  ;;  %v2633_v35 = vrot.slane %v8915_v2, 4  ;;  %v2851_v24 = vadd.f32 %v2850_v28, %v2508_v36 }
 0x210   :  { %v2143_v29 = vmax.f32 %v1533_v33, 0.0  ;;  %v1345_v5 = vpop.f32.mrf.mxu0  ;;  %6970 = vmatmul.mubr.msk.bf16.gmra.mxu0 %vm460_vm0, %v7985_v59  ;;  %v1538_v49 = vpop.f32.mrf.mxu1  ;;  %v2540_v58 = vmax.f32 %v1275_v57, 0.0  ;;  %v2707_v40 = vrot.slane %v8918_v25, 4  ;;  %v2778_v20 = vadd.f32 %v2777_v23, %v2522_v54 }
 0x211   :  { %v2865_v3 = vadd.f32 %v2864_v46, %v2141_v6  ;;  %v1346_v31 = vadd.f32 %v1345_v5, %v9194_v34  ;;  %6986 = vmatmul.mubr.msk.bf16.gmra.mxu1 %vm460_vm0, %v7985_v59  ;;  %1819 = vmatprep.mubr.bf16.mxu0 %v8183_v0  ;;  %v1539_v37 = vadd.f32 %v1538_v49, %v9198_v17  ;;  %v2554_v32 = vmax.f32 %v1086_v21, 0.0 }
 0x212   :  { %v2939_v1 = vadd.f32 %v2938_v14, %v2143_v29  ;;  %v9305_v56 = vpop.f32.mrf.mxu0  ;;  %2012 = vmatprep.mubr.bf16.mxu1 %v8183_v0  ;;  %v9309_v53 = vpop.f32.mrf.mxu1  ;;  %v2852_v41 = vadd.f32 %v2851_v24, %v2524_v27  ;;  %v2556_v45 = vmax.f32 %v1279_v4, 0.0  ;;  %v2779_v62 = vadd.f32 %v2778_v20, %v2538_v44  ;;  %v7986_v29 = vld [vmem:[%s11593_s1 + $0x60] sm:$0xff]  }
 0x213   :  { %v2157_v16 = vmax.f32 %v1346_v31, 0.0  ;;  %v2159_v60 = vmax.f32 %v1539_v37, 0.0  ;;  %v2634_v14 = vadd.f32 %v2633_v35, %v8915_v2  ;;  %v2708_v6 = vadd.f32 %v2707_v40, %v8918_v25 }
 0x214   :  { %v1349_v30 = vpop.f32.mrf.mxu0  ;;  %v1542_v61 = vpop.f32.mrf.mxu1  ;;  %v2853_v33 = vadd.f32 %v2852_v41, %v2540_v58  ;;  %v2780_v28 = vadd.f32 %v2779_v62, %v2554_v32  ;;  %v2596_v25 = vrot.slane %v8900_v50, 4  ;;  %v2670_v49 = vrot.slane %v8908_v18, 4 }
 0x215   :  { %v2866_v39 = vadd.f32 %v2865_v3, %v2157_v16  ;;  %v1350_v43 = vadd.f32 %v1349_v30, %v9194_v34  ;;  %v2940_v63 = vadd.f32 %v2939_v1, %v2159_v60  ;;  %v1543_v52 = vadd.f32 %v1542_v61, %v9198_v17 }
 0x216   :  { %v9314_v46 = vpop.f32.mrf.mxu0  ;;  %v9317_v57 = vpop.f32.mrf.mxu1  ;;  %v2854_v5 = vadd.f32 %v2853_v33, %v2556_v45  ;;  %v2635_v23 = vrot.slane %v2634_v14, 2  ;;  %v2709_v37 = vrot.slane %v2708_v6, 2  ;;  %v2781_v35 = vrot.slane %v2780_v28, 4 }
 0x217   :  { %v2173_v36 = vmax.f32 %v1350_v43, 0.0  ;;  %v2175_v54 = vmax.f32 %v1543_v52, 0.0  ;;  %v2597_v60 = vadd.f32 %v2596_v25, %v8900_v50 }
 0x218   :  { %v1355_v21 = vpop.f32.mrf.mxu0  ;;  %6971 = vmatmul.mubr.msk.bf16.gmra.mxu0 %vm460_vm0, %v7986_v29  ;;  %v1548_v2 = vpop.f32.mrf.mxu1  ;;  %v2855_v16 = vrot.slane %v2854_v5, 4  ;;  %v2636_v62 = vadd.f32 %v2635_v23, %v2634_v14  ;;  %v2710_v50 = vadd.f32 %v2709_v37, %v2708_v6 }
 0x219   :  { %v2867_v59 = vadd.f32 %v2866_v39, %v2173_v36  ;;  %v1356_v27 = vadd.f32 %v1355_v21, %v9194_v34  ;;  %6987 = vmatmul.mubr.msk.bf16.gmra.mxu1 %vm460_vm0, %v7986_v29  ;;  %1829 = vmatprep.mubr.bf16.mxu0 %v8183_v0  ;;  %v2941_v4 = vadd.f32 %v2940_v63, %v2175_v54  ;;  %v7987_v36 = vld [vmem:[%s11593_s1 + $0x68] sm:$0xff]  }
 0x21a   :  { %v1549_v3 = vadd.f32 %v1548_v2, %v9198_v17  ;;  %v9329_v31 = vpop.f32.mrf.mxu0  ;;  %2022 = vmatprep.mubr.bf16.mxu1 %v8183_v0  ;;  %v9333_v1 = vpop.f32.mrf.mxu1  ;;  %v2671_v39 = vadd.f32 %v2670_v49, %v8908_v18  ;;  %v2782_v63 = vadd.f32 %v2781_v35, %v2780_v28  ;;  %v2856_v54 = vadd.f32 %v2855_v16, %v2854_v5 }
 0x21b   :  { %v2189_v44 = vmax.f32 %v1356_v27, 0.0  ;;  %v2598_v18 = vrot.slane %v2597_v60, 2  ;;  %v2637_v5 = vrot.slane %v2636_v62, 1  ;;  %v2711_v23 = vrot.slane %v2710_v50, 1 }
 0x21c   :  { %v2191_v24 = vmax.f32 %v1549_v3, 0.0  ;;  %v1359_v58 = vpop.f32.mrf.mxu0  ;;  %v1552_v32 = vpop.f32.mrf.mxu1  ;;  %v2672_v2 = vrot.slane %v2671_v39, 2 }
 0x21d   :  { %v2868_v40 = vadd.f32 %v2867_v59, %v2189_v44  ;;  %v1360_v20 = vadd.f32 %v1359_v58, %v9194_v34  ;;  %v1553_v41 = vadd.f32 %v1552_v32, %v9198_v17  ;;  %v2857_v44 = vrot.slane %v2856_v54, 2 }
 0x21e   :  { %v2942_v30 = vadd.f32 %v2941_v4, %v2191_v24  ;;  %v9338_v45 = vpop.f32.mrf.mxu0  ;;  %v9341_v61 = vpop.f32.mrf.mxu1  ;;  %v2783_v4 = vrot.slane %v2782_v63, 2  ;;  %v2599_v58 = vadd.f32 %v2598_v18, %v2597_v60  ;;  %v2673_v32 = vadd.f32 %v2672_v2, %v2671_v39 }
 0x21f   :  { %v2205_v43 = vmax.f32 %v1360_v20, 0.0  ;;  %v2207_v52 = vmax.f32 %v1553_v41, 0.0  ;;  %v2858_v39 = vadd.f32 %v2857_v44, %v2856_v54 }
 0x220   :  { %v1365_v33 = vpop.f32.mrf.mxu0  ;;  %6972 = vmatmul.mubr.msk.bf16.gmra.mxu0 %vm460_vm0, %v7987_v36  ;;  %v1558_v59 = vpop.f32.mrf.mxu1  ;;  %v2784_v60 = vadd.f32 %v2783_v4, %v2782_v63 }
 0x221   :  { %v2869_v21 = vadd.f32 %v2868_v40, %v2205_v43  ;;  %v1366_v29 = vadd.f32 %v1365_v33, %v9194_v34  ;;  %6988 = vmatmul.mubr.msk.bf16.gmra.mxu1 %vm460_vm0, %v7987_v36  ;;  %1839 = vmatprep.mubr.bf16.mxu0 %v8183_v0  ;;  %v2943_v14 = vadd.f32 %v2942_v30, %v2207_v52  ;;  %v7988_v36 = vld [vmem:[%s11593_s1 + $0x70] sm:$0xff]  }
 0x222   :  { %v1559_v28 = vadd.f32 %v1558_v59, %v9198_v17  ;;  %v9351_v27 = vpop.f32.mrf.mxu0  ;;  %2032 = vmatprep.mubr.bf16.mxu1 %v8183_v0  ;;  %v9354_v6 = vpop.f32.mrf.mxu1  ;;  %v2638_v43 = vadd.f32 %v2637_v5, %v2636_v62  ;;  %v2600_v62 = vrot.slane %v2599_v58, 1 }
 0x223   :  { %v2221_v25 = vmax.f32 %v1366_v29, 0.0 }
 0x224   :  { %v2223_v3 = vmax.f32 %v1559_v28, 0.0  ;;  %v1369_v49 = vpop.f32.mrf.mxu0  ;;  %v1562_v24 = vpop.f32.mrf.mxu1  ;;  %v3159_v5 = vmul.f32 0.00390625, %v2638_v43 }
 0x225   :  { %v2870_v37 = vadd.f32 %v2869_v21, %v2221_v25  ;;  %v1370_v35 = vadd.f32 %v1369_v49, %v9194_v34  ;;  %v1563_v40 = vadd.f32 %v1562_v24, %v9198_v17  ;;  %v2712_v21 = vadd.f32 %v2711_v23, %v2710_v50 }
 0x226   :  { %v2944_v16 = vadd.f32 %v2943_v14, %v2223_v3  ;;  %v9358_v20 = vpop.f32.mrf.mxu0  ;;  %v9360_v41 = vpop.f32.mrf.mxu1  ;;  %v2674_v25 = vrot.slane %v2673_v32, 1  ;;  %v2785_v23 = vrot.slane %v2784_v60, 1  ;;  %v2601_v24 = vadd.f32 %v2600_v62, %v2599_v58 }
 0x227   :  { %v2237_v30 = vmax.f32 %v1370_v35, 0.0  ;;  %v2239_v52 = vmax.f32 %v1563_v40, 0.0  ;;  %v3161_v49 = vmul.f32 0.00390625, %v2712_v21  ;;  %v2859_v35 = vrot.slane %v2858_v39, 1  ;;  %v7989_v21 = vld [vmem:[%s11593_s1 + $0x78] sm:$0xff]  }
 0x228   :  { %v1375_v33 = vpop.f32.mrf.mxu0  ;;  %6973 = vmatmul.mubr.msk.bf16.gmra.mxu0 %vm460_vm0, %v7988_v36  ;;  %v1568_v18 = vpop.f32.mrf.mxu1  ;;  %v3175_v43 = vpack.c.bf16 %v3159_v5, %v3159_v5  ;;  %v2786_v58 = vadd.f32 %v2785_v23, %v2784_v60  ;;  %v2818_v23 = vrot.slane %v9215_v22, 4 }
 0x229   :  { %v2871_v29 = vadd.f32 %v2870_v37, %v2237_v30  ;;  %v1376_v59 = vadd.f32 %v1375_v33, %v9194_v34  ;;  %6989 = vmatmul.mubr.msk.bf16.gmra.mxu1 %vm460_vm0, %v7988_v36  ;;  %1849 = vmatprep.mubr.bf16.mxu0 %v8183_v0  ;;  %v2945_v14 = vadd.f32 %v2944_v16, %v2239_v52 }
 0x22a   :  { %v1569_v28 = vadd.f32 %v1568_v18, %v9198_v17  ;;  %v9370_v2 = vpop.f32.mrf.mxu0  ;;  %2042 = vmatprep.mubr.bf16.mxu1 %v8183_v0  ;;  %v9373_v63 = vpop.f32.mrf.mxu1  ;;  %v2675_v0 = vadd.f32 %v2674_v25, %v2673_v32  ;;  %v2860_v32 = vadd.f32 %v2859_v35, %v2858_v39 }
 0x22b   :  { %v2253_v50 = vmax.f32 %v1376_v59, 0.0 }
 0x22c   :  { %v2255_v4 = vmax.f32 %v1569_v28, 0.0  ;;  %v1379_v3 = vpop.f32.mrf.mxu0  ;;  %v1572_v44 = vpop.f32.mrf.mxu1  ;;  %v3158_v28 = vmul.f32 0.00390625, %v2601_v24  ;;  %v7597_v24 = vld [vmem:[#allocation4 + $0x270] ss:$8 sps:$4 sm:$0xff]  }
 0x22d   :  { %v2872_v37 = vadd.f32 %v2871_v29, %v2253_v50  ;;  %v1380_v54 = vadd.f32 %v1379_v3, %v9194_v34  ;;  %v1573_v40 = vadd.f32 %v1572_v44, %v9198_v17  ;;  %v3177_v29 = vpack.c.bf16 %v3161_v49, %v3161_v49 }
 0x22e   :  { %v2946_v16 = vadd.f32 %v2945_v14, %v2255_v4  ;;  %v9377_v30 = vpop.f32.mrf.mxu0  ;;  %v9379_v33 = vpop.f32.mrf.mxu1  ;;  %v3160_v4 = vmul.f32 0.00390625, %v2675_v0  ;;  %v2744_v3 = vrot.slane %v9208_v19, 4  ;;  %v3163_v44 = vmul.f32 0.00390625, %v2786_v58  ;;  %v7605_v58 = vld [vmem:[#allocation4 + $0x264] ss:$8 sps:$4 sm:$0xff]  }
 0x22f   :  { %v2269_v52 = vmax.f32 %v1380_v54, 0.0  ;;  %v2271_v36 = vmax.f32 %v1573_v40, 0.0 }
 0x230   :  { %v1385_v59 = vpop.f32.mrf.mxu0  ;;  %6974 = vmatmul.mubr.msk.bf16.gmra.mxu0 %vm460_vm0, %v7989_v21  ;;  %v1578_v14 = vpop.f32.mrf.mxu1 }
 0x231   :  { %v2873_v18 = vadd.f32 %v2872_v37, %v2269_v52  ;;  %v1386_v62 = vadd.f32 %v1385_v59, %v9194_v34  ;;  %6990 = vmatmul.mubr.msk.bf16.gmra.mxu1 %vm460_vm0, %v7989_v21  ;;  %4770 = vmatprep.mubr.bf16.mxu0 %v3175_v43  ;;  %v2947_v25 = vadd.f32 %v2946_v16, %v2271_v36  ;;  %v3165_v16 = vmul.f32 0.00390625, %v2860_v32  ;;  %v7600_v59 = vld [vmem:[#allocation4 + $0x370] ss:$8 sps:$4 sm:$0xff]  }
 0x232   :  { %v1579_v50 = vadd.f32 %v1578_v14, %v9198_v17  ;;  %4811 = vmatprep.mubr.bf16.mxu1 %v3177_v29  ;;  %v9388_v5 = vpop.f32.mrf.mxu0  ;;  %v9391_v60 = vpop.f32.mrf.mxu1  ;;  %v3174_v52 = vpack.c.bf16 %v3158_v28, %v3158_v28  ;;  %v3176_v21 = vpack.c.bf16 %v3160_v4, %v3160_v4  ;;  %v2745_v29 = vadd.f32 %v2744_v3, %v9208_v19  ;;  %v7608_v28 = vld [vmem:[#allocation4 + $0x364] ss:$8 sps:$4 sm:$0xff]  }
 0x233   :  { %v2285_v49 = vmax.f32 %v1386_v62, 0.0  ;;  %v3179_v32 = vpack.c.bf16 %v3163_v44, %v3163_v44  ;;  %v3181_v4 = vpack.c.bf16 %v3165_v16, %v3165_v16  ;;  %v1531_v19 = vadd.f32 %v9272_v26, %v9219_v7  ;;  %v7611_v44 = vld [vmem:[#allocation4 + $0x254] ss:$8 sps:$4 sm:$0xff]  }
 0x234   :  { %v2287_v37 = vmax.f32 %v1579_v50, 0.0  ;;  %v1389_v54 = vpop.f32.mrf.mxu0  ;;  %v1582_v35 = vpop.f32.mrf.mxu1  ;;  %v7614_v16 = vld [vmem:[#allocation4 + $0x354] ss:$8 sps:$4 sm:$0xff]  }
 0x235   :  { %v2874_v40 = vadd.f32 %v2873_v18, %v2285_v49  ;;  %v1390_v39 = vadd.f32 %v1389_v54, %v9194_v34  ;;  %v1583_v0 = vadd.f32 %v1582_v35, %v9198_v17  ;;  %v2819_v18 = vadd.f32 %v2818_v23, %v9215_v22  ;;  %v7603_v35 = vld [vmem:[#allocation4 + $0x260] ss:$8 sps:$4 sm:$0xff]  }
 0x236   :  { %v2948_v43 = vadd.f32 %v2947_v25, %v2287_v37  ;;  %v9396_v36 = vpop.f32.mrf.mxu0  ;;  %v9399_v14 = vpop.f32.mrf.mxu1  ;;  %v7606_v23 = vld [vmem:[#allocation4 + $0x360] ss:$8 sps:$4 sm:$0xff]  }
 0x237   :  { %v2301_v62 = vmax.f32 %v1390_v39, 0.0  ;;  %v2303_v50 = vmax.f32 %v1583_v0, 0.0  ;;  %v2820_v26 = vrot.slane %v2819_v18, 2 }
 0x238   :  { %v1395_v49 = vpop.f32.mrf.mxu0  ;;  %4771 = vmatmul.mubr.bf16.vlgmr.msra.gmra.mxu0 %v3174_v52  ;;  %v1588_v54 = vpop.f32.mrf.mxu1  ;;  %v1342_v52 = vadd.f32 %v9285_v8, %v9212_v48 }
 0x239   :  { %v2875_v25 = vadd.f32 %v2874_v40, %v2301_v62  ;;  %v1396_v37 = vadd.f32 %v1395_v49, %v9194_v34  ;;  %4812 = vmatmul.mubr.bf16.vlgmr.msra.gmra.mxu1 %v3176_v21  ;;  %4821 = vmatpush1.bf16.msra.mxu0 %v7597_v24  ;;  %v2949_v3 = vadd.f32 %v2948_v43, %v2303_v50  ;;  %v2746_v40 = vrot.slane %v2745_v29, 2 }
 0x23a   :  { %v1589_v39 = vadd.f32 %v1588_v54, %v9198_v17  ;;  %4862 = vmatpush1.bf16.msra.mxu1 %v7600_v59  ;;  %4852 = vmatprep.mubr.bf16.mxu0 %v3179_v32  ;;  %v9406_v22 = vpop.f32.mrf.mxu0  ;;  %v9410_v24 = vpop.f32.mrf.mxu1  ;;  %v1535_v43 = vadd.f32 %v9291_v13, %v9219_v7  ;;  %v1348_v62 = vadd.f32 %v9305_v56, %v9212_v48  ;;  %v7609_v32 = vld [vmem:[#allocation4 + $0x250] ss:$8 sps:$4 sm:$0xff]  }
 0x23b   :  { %v2317_v0 = vmax.f32 %v1396_v37, 0.0  ;;  %4893 = vmatprep.mubr.bf16.mxu1 %v3181_v4  ;;  %4822 = vmatprep.subr.bf16.mxu0 %v7605_v58  ;;  %v2128_v37 = vmax.f32 %v1531_v19, 0.0  ;;  %v1541_v58 = vadd.f32 %v9309_v53, %v9219_v7  ;;  %v9422_v56 = vadd.f32 %v2746_v40, %v2745_v29  ;;  %v7620_v53 = vld [vmem:[#allocation4 + $0x344] ss:$8 sps:$4 sm:$0xff]  }
 0x23c   :  { %v2319_v59 = vmax.f32 %v1589_v39, 0.0  ;;  %4863 = vmatprep.subr.bf16.mxu1 %v7608_v28  ;;  %v1399_v21 = vpop.f32.mrf.mxu0  ;;  %v1592_v8 = vpop.f32.mrf.mxu1  ;;  %v7612_v28 = vld [vmem:[#allocation4 + $0x350] ss:$8 sps:$4 sm:$0xff]   ;;  %v7617_v39 = vld [vmem:[#allocation4 + $0x244] ss:$8 sps:$4 sm:$0xff]   ;;  %v1358_v29 = vadd.f32 %v9329_v31, %v9212_v48 }
 0x23d   :  { %v2876_v50 = vadd.f32 %v2875_v25, %v2317_v0  ;;  %v1400_v49 = vadd.f32 %v1399_v21, %v9194_v34  ;;  %4823 = vmatpush1.bf16.msra.mxu0 %v7603_v35  ;;  %v1593_v4 = vadd.f32 %v1592_v8, %v9198_v17  ;;  %v2142_v25 = vmax.f32 %v1342_v52, 0.0 }
 0x23e   :  { %v2950_v54 = vadd.f32 %v2949_v3, %v2319_v59  ;;  %4864 = vmatpush1.bf16.msra.mxu1 %v7606_v23  ;;  %v9420_v13 = vpop.f32.mrf.mxu0  ;;  %4824 = vmatprep.subr.bf16.mxu0 %v7611_v44  ;;  %v1352_v35 = vadd.f32 %v9314_v46, %v9212_v48  ;;  %v9426_v19 = vpop.f32.mrf.mxu1  ;;  %v9428_v3 = vadd.f32 %v2820_v26, %v2819_v18  ;;  %v2144_v59 = vmax.f32 %v1535_v43, 0.0 }
 0x23f   :  { %v2333_v0 = vmax.f32 %v1400_v49, 0.0  ;;  %4865 = vmatprep.subr.bf16.mxu1 %v7614_v16  ;;  %v1545_v23 = vadd.f32 %v9317_v57, %v9219_v7  ;;  %v2335_v44 = vmax.f32 %v1593_v4, 0.0  ;;  %v2158_v8 = vmax.f32 %v1348_v62, 0.0  ;;  %v7615_v49 = vld [vmem:[#allocation4 + $0x240] ss:$8 sps:$4 sm:$0xff]  }
 0x240   :  { %v1405_v21 = vpop.f32.mrf.mxu0  ;;  %v1598_v52 = vpop.f32.mrf.mxu1  ;;  %v2975_v16 = vadd.f32 %v9279_v47, %v2128_v37  ;;  %v2160_v18 = vmax.f32 %v1541_v58, 0.0  ;;  %v7618_v62 = vld [vmem:[#allocation4 + $0x340] ss:$8 sps:$4 sm:$0xff]   ;;  %v7623_v4 = vld [vmem:[#allocation4 + $0x234] ss:$8 sps:$4 sm:$0xff]   ;;  %v2902_v31 = vadd.f32 %v9289_v9, %v2142_v25 }
 0x241   :  { %v2877_v40 = vadd.f32 %v2876_v50, %v2333_v0  ;;  %v1406_v46 = vadd.f32 %v1405_v21, %v9194_v34  ;;  %4825 = vmatpush1.bf16.msra.mxu0 %v7609_v32  ;;  %v2951_v26 = vadd.f32 %v2950_v54, %v2335_v44  ;;  %v1599_v43 = vadd.f32 %v1598_v52, %v9198_v17  ;;  %v7626_v47 = vld [vmem:[#allocation4 + $0x334] ss:$8 sps:$4 sm:$0xff]  }
 0x242   :  { %4866 = vmatpush1.bf16.msra.mxu1 %v7612_v28  ;;  %v9437_v57 = vpop.f32.mrf.mxu0  ;;  %4826 = vmatprep.subr.bf16.mxu0 %v7617_v39  ;;  %v2174_v50 = vmax.f32 %v1352_v35, 0.0  ;;  %v1551_v0 = vadd.f32 %v9333_v1, %v9219_v7  ;;  %v9442_v21 = vpop.f32.mrf.mxu1  ;;  %v2976_v37 = vadd.f32 %v2975_v16, %v2144_v59  ;;  %v2176_v58 = vmax.f32 %v1545_v23, 0.0  ;;  %v7621_v1 = vld [vmem:[#allocation4 + $0x230] ss:$8 sps:$4 sm:$0xff]  }
 0x243   :  { %v2349_v32 = vmax.f32 %v1406_v46, 0.0  ;;  %4867 = vmatprep.subr.bf16.mxu1 %v7620_v53  ;;  %v1362_v54 = vadd.f32 %v9338_v45, %v9212_v48  ;;  %v2351_v28 = vmax.f32 %v1599_v43, 0.0  ;;  %v2903_v44 = vadd.f32 %v2902_v31, %v2158_v8  ;;  %v7624_v23 = vld [vmem:[#allocation4 + $0x330] ss:$8 sps:$4 sm:$0xff]   ;;  %v7629_v45 = vld [vmem:[#allocation4 + $0x224] ss:$8 sps:$4 sm:$0xff]  }
 0x244   :  { %v1409_v39 = vpop.f32.mrf.mxu0  ;;  %v2190_v52 = vmax.f32 %v1358_v29, 0.0  ;;  %v1602_v25 = vpop.f32.mrf.mxu1  ;;  %v2977_v35 = vadd.f32 %v2976_v37, %v2160_v18  ;;  %v2192_v43 = vmax.f32 %v1551_v0, 0.0  ;;  %v1555_v8 = vadd.f32 %v9341_v61, %v9219_v7 }
 0x245   :  { %v2878_v10 = vadd.f32 %v2877_v40, %v2349_v32  ;;  %v1410_v9 = vadd.f32 %v1409_v39, %v9194_v34  ;;  %4827 = vmatpush1.bf16.msra.mxu0 %v7615_v49  ;;  %v2952_v46 = vadd.f32 %v2951_v26, %v2351_v28  ;;  %v1603_v53 = vadd.f32 %v1602_v25, %v9198_v17  ;;  %v7632_v49 = vld [vmem:[#allocation4 + $0x324] ss:$8 sps:$4 sm:$0xff]   ;;  %v7627_v28 = vld [vmem:[#allocation4 + $0x220] ss:$8 sps:$4 sm:$0xff]  }
 0x246   :  { %4868 = vmatpush1.bf16.msra.mxu1 %v7618_v62  ;;  %v9448_v59 = vpop.f32.mrf.mxu0  ;;  %4828 = vmatprep.subr.bf16.mxu0 %v7623_v4  ;;  %v2904_v16 = vadd.f32 %v2903_v44, %v2174_v50  ;;  %v9452_v40 = vpop.f32.mrf.mxu1  ;;  %v2978_v18 = vadd.f32 %v2977_v35, %v2176_v58  ;;  %v2206_v26 = vmax.f32 %v1362_v54, 0.0  ;;  %v1368_v62 = vadd.f32 %v9351_v27, %v9212_v48  ;;  %v7630_v39 = vld [vmem:[#allocation4 + $0x320] ss:$8 sps:$4 sm:$0xff]   ;;  %v7635_v44 = vld [vmem:[#allocation4 + $0x214] ss:$8 sps:$4 sm:$0xff]  }
 0x247   :  { %v2365_v29 = vmax.f32 %v1410_v9, 0.0  ;;  %4869 = vmatprep.subr.bf16.mxu1 %v7626_v47  ;;  %v2367_v31 = vmax.f32 %v1603_v53, 0.0  ;;  %v1561_v50 = vadd.f32 %v9354_v6, %v9219_v7  ;;  %v1372_v47 = vadd.f32 %v9358_v20, %v9212_v48 }
 0x248   :  { %v1415_v32 = vpop.f32.mrf.mxu0  ;;  %v2905_v4 = vadd.f32 %v2904_v16, %v2190_v52  ;;  %v1608_v61 = vpop.f32.mrf.mxu1  ;;  %v2979_v52 = vadd.f32 %v2978_v18, %v2192_v43  ;;  %v2208_v6 = vmax.f32 %v1555_v8, 0.0  ;;  %v2222_v35 = vmax.f32 %v1368_v62, 0.0 }
 0x249   :  { %v2879_v0 = vadd.f32 %v2878_v10, %v2365_v29  ;;  %v1416_v37 = vadd.f32 %v1415_v32, %v9194_v34  ;;  %4829 = vmatpush1.bf16.msra.mxu0 %v7621_v1  ;;  %v2953_v58 = vadd.f32 %v2952_v46, %v2367_v31  ;;  %v1609_v54 = vadd.f32 %v1608_v61, %v9198_v17  ;;  %v7638_v1 = vld [vmem:[#allocation4 + $0x314] ss:$8 sps:$4 sm:$0xff]   ;;  %v7633_v29 = vld [vmem:[#allocation4 + $0x210] ss:$8 sps:$4 sm:$0xff]   ;;  %v7641_v32 = vld [vmem:[#allocation4 + $0x204] ss:$8 sps:$4 sm:$0xff]  }
 0x24a   :  { %4870 = vmatpush1.bf16.msra.mxu1 %v7624_v23  ;;  %v9462_v27 = vpop.f32.mrf.mxu0  ;;  %4830 = vmatprep.subr.bf16.mxu0 %v7629_v45  ;;  %v1565_v10 = vadd.f32 %v9360_v41, %v9219_v7  ;;  %v9466_v25 = vpop.f32.mrf.mxu1  ;;  %v2906_v20 = vadd.f32 %v2905_v4, %v2206_v26  ;;  %v1378_v46 = vadd.f32 %v9370_v2, %v9212_v48  ;;  %v2224_v45 = vmax.f32 %v1561_v50, 0.0  ;;  %v7636_v31 = vld [vmem:[#allocation4 + $0x310] ss:$8 sps:$4 sm:$0xff]   ;;  %v7644_v61 = vld [vmem:[#allocation4 + $0x304] ss:$8 sps:$4 sm:$0xff]  }
 0x24b   :  { %v2381_v9 = vmax.f32 %v1416_v37, 0.0  ;;  %4871 = vmatprep.subr.bf16.mxu1 %v7632_v49  ;;  %v2383_v53 = vmax.f32 %v1609_v54, 0.0  ;;  %v1571_v16 = vadd.f32 %v9373_v63, %v9219_v7  ;;  %v2238_v18 = vmax.f32 %v1372_v47, 0.0 }
 0x24c   :  { %v1419_v23 = vpop.f32.mrf.mxu0  ;;  %v1612_v41 = vpop.f32.mrf.mxu1  ;;  %v1382_v49 = vadd.f32 %v9377_v30, %v9212_v48  ;;  %v2980_v63 = vadd.f32 %v2979_v52, %v2208_v6  ;;  %v2240_v4 = vmax.f32 %v1565_v10, 0.0  ;;  %v1575_v50 = vadd.f32 %v9379_v33, %v9219_v7  ;;  %v7639_v10 = vld [vmem:[#allocation4 + $0x200] ss:$8 sps:$4 sm:$0xff]  }
 0x24d   :  { %v2880_v43 = vadd.f32 %v2879_v0, %v2381_v9  ;;  %v1420_v8 = vadd.f32 %v1419_v23, %v9194_v34  ;;  %4831 = vmatpush1.bf16.msra.mxu0 %v7627_v28  ;;  %v2954_v26 = vadd.f32 %v2953_v58, %v2383_v53  ;;  %v1613_v62 = vadd.f32 %v1612_v41, %v9198_v17  ;;  %v7647_v53 = vld [vmem:[#allocation4 + $0x2f4] ss:$8 sps:$4 sm:$0xff]  }
 0x24e   :  { %4872 = vmatpush1.bf16.msra.mxu1 %v7630_v39  ;;  %v9476_v2 = vpop.f32.mrf.mxu0  ;;  %4832 = vmatprep.subr.bf16.mxu0 %v7635_v44  ;;  %v9480_v37 = vpop.f32.mrf.mxu1  ;;  %v2907_v30 = vadd.f32 %v2906_v20, %v2222_v35  ;;  %v2254_v28 = vmax.f32 %v1378_v46, 0.0  ;;  %v1388_v47 = vadd.f32 %v9388_v5, %v9212_v48  ;;  %v2981_v39 = vadd.f32 %v2980_v63, %v2224_v45  ;;  %v7642_v46 = vld [vmem:[#allocation4 + $0x300] ss:$8 sps:$4 sm:$0xff]  }
 0x24f   :  { %v2397_v0 = vmax.f32 %v1420_v8, 0.0  ;;  %4873 = vmatprep.subr.bf16.mxu1 %v7638_v1  ;;  %v2399_v58 = vmax.f32 %v1613_v62, 0.0  ;;  %v2256_v44 = vmax.f32 %v1571_v16, 0.0  ;;  %v1581_v52 = vadd.f32 %v9391_v60, %v9219_v7 }
 0x250   :  { %v9484_v54 = vpop.f32.mrf.mxu0  ;;  %v9490_v33 = vpop.f32.mrf.mxu1  ;;  %v2908_v9 = vadd.f32 %v2907_v30, %v2238_v18  ;;  %v2270_v1 = vmax.f32 %v1382_v49, 0.0  ;;  %v1392_v20 = vadd.f32 %v9396_v36, %v9212_v48  ;;  %v2982_v60 = vadd.f32 %v2981_v39, %v2240_v4 }
 0x251   :  { %v9488_v6 = vadd.f32 %v2880_v43, %v2397_v0  ;;  %4833 = vmatpush1.bf16.msra.mxu0 %v7633_v29  ;;  %v9494_v5 = vadd.f32 %v2954_v26, %v2399_v58  ;;  %v2272_v23 = vmax.f32 %v1575_v50, 0.0  ;;  %v1585_v45 = vadd.f32 %v9399_v14, %v9219_v7  ;;  %v7650_v43 = vld [vmem:[#allocation4 + $0x3f4] ss:$8 sps:$4 sm:$0xff]   ;;  %v7645_v14 = vld [vmem:[#allocation4 + $0x2f0] ss:$8 sps:$4 sm:$0xff]  }
 0x252   :  { %4874 = vmatpush1.bf16.msra.mxu1 %v7636_v31  ;;  %v9496_v35 = vpop.f32.mrf.mxu0  ;;  %4834 = vmatprep.subr.bf16.mxu0 %v7641_v32  ;;  %v9500_v16 = vpop.f32.mrf.mxu1  ;;  %v2748_v8 = vrot.slane %v9422_v56, 1  ;;  %v2909_v36 = vadd.f32 %v2908_v9, %v2254_v28  ;;  %v2286_v41 = vmax.f32 %v1388_v47, 0.0  ;;  %v1398_v29 = vadd.f32 %v9406_v22, %v9212_v48  ;;  %v7648_v0 = vld [vmem:[#allocation4 + $0x3f0] ss:$8 sps:$4 sm:$0xff]   ;;  %v7656_v58 = vld [vmem:[#allocation4 + $0x3e4] ss:$8 sps:$4 sm:$0xff]  }
 0x253   :  { %4875 = vmatprep.subr.bf16.mxu1 %v7644_v61  ;;  %v2983_v49 = vadd.f32 %v2982_v60, %v2256_v44  ;;  %v2288_v26 = vmax.f32 %v1581_v52, 0.0  ;;  %v1591_v62 = vadd.f32 %v9410_v24, %v9219_v7  ;;  %v2822_v32 = vrot.slane %v9428_v3, 1  ;;  %v7653_v61 = vld [vmem:[#allocation4 + $0x2e4] ss:$8 sps:$4 sm:$0xff]  }
 0x254   :  { %v9505_v18 = vpop.f32.mrf.mxu0  ;;  %v9509_v31 = vpop.f32.mrf.mxu1  ;;  %v2910_v63 = vadd.f32 %v2909_v36, %v2270_v1  ;;  %v2302_v4 = vmax.f32 %v1392_v20, 0.0  ;;  %v1402_v50 = vadd.f32 %v9420_v13, %v9212_v48  ;;  %v2304_v28 = vmax.f32 %v1585_v45, 0.0  ;;  %v7654_v45 = vld [vmem:[#allocation4 + $0x3e0] ss:$8 sps:$4 sm:$0xff]  }
 0x255   :  { %4835 = vmatpush1.bf16.msra.mxu0 %v7639_v10  ;;  %v2984_v30 = vadd.f32 %v2983_v49, %v2272_v23  ;;  %v1595_v24 = vadd.f32 %v9426_v19, %v9219_v7  ;;  %v2749_v39 = vadd.f32 %v2748_v8, %v9422_v56  ;;  %v2318_v52 = vmax.f32 %v1398_v29, 0.0  ;;  %v7651_v19 = vld [vmem:[#allocation4 + $0x2e0] ss:$8 sps:$4 sm:$0xff]  }
 0x256   :  { %4876 = vmatpush1.bf16.msra.mxu1 %v7642_v46  ;;  %v9514_v22 = vpop.f32.mrf.mxu0  ;;  %4836 = vmatprep.subr.bf16.mxu0 %v7647_v53  ;;  %v9518_v47 = vpop.f32.mrf.mxu1  ;;  %v2911_v44 = vadd.f32 %v2910_v63, %v2286_v41  ;;  %v1408_v13 = vadd.f32 %v9437_v57, %v9212_v48  ;;  %v2320_v1 = vmax.f32 %v1591_v62, 0.0  ;;  %v1601_v20 = vadd.f32 %v9442_v21, %v9219_v7 }
 0x257   :  { %4877 = vmatprep.subr.bf16.mxu1 %v7650_v43  ;;  %v2985_v9 = vadd.f32 %v2984_v30, %v2288_v26  ;;  %v2823_v53 = vadd.f32 %v2822_v32, %v9428_v3  ;;  %v2334_v56 = vmax.f32 %v1402_v50, 0.0  ;;  %v1412_v23 = vadd.f32 %v9448_v59, %v9212_v48  ;;  %v7659_v43 = vld [vmem:[#allocation4 + $0x2d4] ss:$8 sps:$4 sm:$0xff]  }
 0x258   :  { %v9523_v10 = vpop.f32.mrf.mxu0  ;;  %v9527_v46 = vpop.f32.mrf.mxu1  ;;  %v2912_v60 = vadd.f32 %v2911_v44, %v2302_v4  ;;  %v2336_v36 = vmax.f32 %v1595_v24, 0.0  ;;  %v1605_v21 = vadd.f32 %v9452_v40, %v9219_v7  ;;  %v7662_v3 = vld [vmem:[#allocation4 + $0x3d4] ss:$8 sps:$4 sm:$0xff]   ;;  %v9538_v29 = vmul.f32 0.00390625, %v2749_v39  ;;  %v7657_v40 = vld [vmem:[#allocation4 + $0x2d0] ss:$8 sps:$4 sm:$0xff]  }
 0x259   :  { %4837 = vmatpush2.bf16.msra.mxu0 %v7645_v14  ;;  %v2986_v8 = vadd.f32 %v2985_v9, %v2304_v28  ;;  %v2350_v26 = vmax.f32 %v1408_v13, 0.0  ;;  %v1418_v59 = vadd.f32 %v9462_v27, %v9212_v48  ;;  %v2352_v32 = vmax.f32 %v1601_v20, 0.0  ;;  %v7660_v28 = vld [vmem:[#allocation4 + $0x3d0] ss:$8 sps:$4 sm:$0xff]   ;;  %v7665_v24 = vld [vmem:[#allocation4 + $0x2c4] ss:$8 sps:$4 sm:$0xff]  }
 0x25a   :  { %4878 = vmatpush2.bf16.msra.mxu1 %v7648_v0  ;;  %v9532_v57 = vpop.f32.mrf.mxu0  ;;  %4838 = vmatprep.subr.bf16.mxu0 %v7653_v61  ;;  %v9536_v41 = vpop.f32.mrf.mxu1  ;;  %v2913_v49 = vadd.f32 %v2912_v60, %v2318_v52  ;;  %v1611_v63 = vadd.f32 %v9466_v25, %v9219_v7  ;;  %v9548_v50 = vmul.f32 0.00390625, %v2823_v53  ;;  %v2366_v61 = vmax.f32 %v1412_v23, 0.0  ;;  %v7668_v13 = vld [vmem:[#allocation4 + $0x3c4] ss:$8 sps:$4 sm:$0xff]   ;;  %v7663_v23 = vld [vmem:[#allocation4 + $0x2c0] ss:$8 sps:$4 sm:$0xff]  }
 0x25b   :  { %4879 = vmatprep.subr.bf16.mxu1 %v7656_v58  ;;  %v2987_v14 = vadd.f32 %v2986_v8, %v2320_v1  ;;  %v1422_v30 = vadd.f32 %v9476_v2, %v9212_v48  ;;  %v2368_v39 = vmax.f32 %v1605_v21, 0.0  ;;  %v1615_v25 = vadd.f32 %v9480_v37, %v9219_v7  ;;  %v7666_v21 = vld [vmem:[#allocation4 + $0x3c0] ss:$8 sps:$4 sm:$0xff]  }
 0x25c   :  { %v9542_v62 = vpop.f32.mrf.mxu0  ;;  %v9546_v4 = vpop.f32.mrf.mxu1  ;;  %v2914_v0 = vadd.f32 %v2913_v49, %v2334_v56  ;;  %v1426_v44 = vadd.f32 %v9484_v54, %v9194_v34  ;;  %v3178_v2 = vpack.c.bf16 %v9538_v29, %v9538_v29  ;;  %v2382_v1 = vmax.f32 %v1418_v59, 0.0  ;;  %v7702_v29 = vld [vmem:[#allocation4 + $0x560] ss:$8 sps:$4 sm:$0xff]  }
 0x25d   :  { %4839 = vmatpush2.bf16.msra.mxu0 %v7651_v19  ;;  %v2988_v58 = vadd.f32 %v2987_v14, %v2336_v36  ;;  %v1619_v20 = vadd.f32 %v9490_v33, %v9198_v17  ;;  %v2384_v60 = vmax.f32 %v1611_v63, 0.0  ;;  %v1428_v37 = vadd.f32 %v9496_v35, %v9212_v48  ;;  %v7671_v35 = vld [vmem:[#allocation4 + $0x2b4] ss:$8 sps:$4 sm:$0xff]  }
 0x25e   :  { %4880 = vmatpush2.bf16.msra.mxu1 %v7654_v45  ;;  %v9552_v27 = vpop.f32.mrf.mxu0  ;;  %4840 = vmatprep.subr.bf16.mxu0 %v7659_v43  ;;  %v1634_v52 = vpop.f32.mrf.mxu1  ;;  %v2915_v9 = vadd.f32 %v2914_v0, %v2350_v26  ;;  %v1621_v54 = vadd.f32 %v9500_v16, %v9219_v7  ;;  %v2398_v43 = vmax.f32 %v1422_v30, 0.0  ;;  %v1430_v8 = vadd.f32 %v9505_v18, %v9194_v34  ;;  %v7674_v14 = vld [vmem:[#allocation4 + $0x3b4] ss:$8 sps:$4 sm:$0xff]  }
 0x25f   :  { %4881 = vmatprep.subr.bf16.mxu1 %v7662_v3  ;;  %v2989_v53 = vadd.f32 %v2988_v58, %v2352_v32  ;;  %v1623_v33 = vadd.f32 %v9509_v31, %v9198_v17  ;;  %v2400_v49 = vmax.f32 %v1615_v25, 0.0  ;;  %v2413_v16 = vmax.f32 %v1426_v44, 0.0 }
 0x260   :  { %v9562_v19 = vpop.f32.mrf.mxu0  ;;  %v9568_v56 = vpop.f32.mrf.mxu1  ;;  %v2916_v45 = vadd.f32 %v2915_v9, %v2366_v61  ;;  %v1432_v26 = vadd.f32 %v9514_v22, %v9212_v48  ;;  %v3180_v18 = vpack.c.bf16 %v9548_v50, %v9548_v50  ;;  %v2415_v63 = vmax.f32 %v1619_v20, 0.0  ;;  %v7677_v9 = vld [vmem:[#allocation4 + $0x2a4] ss:$8 sps:$4 sm:$0xff]  }
 0x261   :  { %4841 = vmatpush2.bf16.msra.mxu0 %v7657_v40  ;;  %v2990_v3 = vadd.f32 %v2989_v53, %v2368_v39  ;;  %v1625_v31 = vadd.f32 %v9518_v47, %v9219_v7  ;;  %v2414_v61 = vmax.f32 %v1428_v37, 0.0  ;;  %v2416_v30 = vmax.f32 %v1621_v54, 0.0  ;;  %v7680_v37 = vld [vmem:[#allocation4 + $0x3a4] ss:$8 sps:$4 sm:$0xff]  }
 0x262   :  { %4882 = vmatpush2.bf16.msra.mxu1 %v7660_v28  ;;  %v1447_v36 = vpop.f32.mrf.mxu0  ;;  %4842 = vmatprep.subr.bf16.mxu0 %v7665_v24  ;;  %v1640_v59 = vpop.f32.mrf.mxu1  ;;  %v2917_v32 = vadd.f32 %v2916_v45, %v2382_v1  ;;  %v1438_v28 = vadd.f32 %v9532_v57, %v9212_v48  ;;  %v7669_v24 = vld [vmem:[#allocation4 + $0x2b0] ss:$8 sps:$4 sm:$0xff]   ;;  %v2429_v39 = vmax.f32 %v1430_v8, 0.0  ;;  %v2431_v25 = vmax.f32 %v1623_v33, 0.0 }
 0x263   :  { %4883 = vmatprep.subr.bf16.mxu1 %v7668_v13  ;;  %v2991_v0 = vadd.f32 %v2990_v3, %v2384_v60  ;;  %v1631_v44 = vadd.f32 %v9536_v41, %v9219_v7  ;;  %v7672_v13 = vld [vmem:[#allocation4 + $0x3b0] ss:$8 sps:$4 sm:$0xff]   ;;  %v2882_v20 = vadd.f32 %v9488_v6, %v2413_v16  ;;  %v2430_v53 = vmax.f32 %v1432_v26, 0.0  ;;  %v7683_v26 = vld [vmem:[#allocation4 + $0x294] ss:$8 sps:$4 sm:$0xff]  }
 0x264   :  { %v9580_v40 = vpop.f32.mrf.mxu0  ;;  %v9584_v22 = vpop.f32.mrf.mxu1  ;;  %v2918_v58 = vadd.f32 %v2917_v32, %v2398_v43  ;;  %v1442_v57 = vadd.f32 %v9552_v27, %v9212_v48  ;;  %v2956_v54 = vadd.f32 %v9494_v5, %v2415_v63  ;;  %v1436_v41 = vadd.f32 %v9523_v10, %v9194_v34  ;;  %v7675_v27 = vld [vmem:[#allocation4 + $0x2a0] ss:$8 sps:$4 sm:$0xff]  }
 0x265   :  { %4843 = vmatpush2.bf16.msra.mxu0 %v7663_v23  ;;  %v2992_v1 = vadd.f32 %v2991_v0, %v2400_v49  ;;  %v2432_v23 = vmax.f32 %v1625_v31, 0.0  ;;  %v1635_v45 = vadd.f32 %v1634_v52, %v9219_v7  ;;  %v2446_v6 = vmax.f32 %v1438_v28, 0.0  ;;  %v7678_v52 = vld [vmem:[#allocation4 + $0x3a0] ss:$8 sps:$4 sm:$0xff]   ;;  %v7686_v0 = vld [vmem:[#allocation4 + $0x394] ss:$8 sps:$4 sm:$0xff]  }
 0x266   :  { %4884 = vmatpush2.bf16.msra.mxu1 %v7666_v21  ;;  %v1451_v47 = vpop.f32.mrf.mxu0  ;;  %4844 = vmatprep.subr.bf16.mxu0 %v7671_v35  ;;  %v1644_v60 = vpop.f32.mrf.mxu1  ;;  %v2919_v8 = vadd.f32 %v2918_v58, %v2414_v61  ;;  %v1448_v21 = vadd.f32 %v1447_v36, %v9212_v48  ;;  %v2883_v3 = vadd.f32 %v2882_v20, %v2429_v39  ;;  %v2448_v5 = vmax.f32 %v1631_v44, 0.0 }
 0x267   :  { %4885 = vmatprep.subr.bf16.mxu1 %v7674_v14  ;;  %v2993_v33 = vadd.f32 %v2992_v1, %v2416_v30  ;;  %v9600_v49 = vadd.f32 %v2956_v54, %v2431_v25  ;;  %v1641_v16 = vadd.f32 %v1640_v59, %v9219_v7  ;;  %v9605_v32 = vadd.f32 %v9527_v46, %v9198_v17 }
 0x268   :  { %v9595_v43 = vpop.f32.mrf.mxu0  ;;  %v9598_v35 = vpop.f32.mrf.mxu1  ;;  %v2920_v14 = vadd.f32 %v2919_v8, %v2430_v53  ;;  %v2462_v36 = vmax.f32 %v1442_v57, 0.0  ;;  %v1452_v63 = vadd.f32 %v1451_v47, %v9212_v48  ;;  %v2445_v30 = vmax.f32 %v1436_v41, 0.0  ;;  %v7681_v47 = vld [vmem:[#allocation4 + $0x290] ss:$8 sps:$4 sm:$0xff]  }
 0x269   :  { %4845 = vmatpush2.bf16.msra.mxu0 %v7669_v24  ;;  %v2994_v61 = vadd.f32 %v2993_v33, %v2432_v23  ;;  %v2464_v28 = vmax.f32 %v1635_v45, 0.0  ;;  %v1645_v59 = vadd.f32 %v1644_v60, %v9219_v7  ;;  %v1440_v39 = vadd.f32 %v9542_v62, %v9194_v34  ;;  %v7684_v57 = vld [vmem:[#allocation4 + $0x390] ss:$8 sps:$4 sm:$0xff]   ;;  %v7689_v62 = vld [vmem:[#allocation4 + $0x284] ss:$8 sps:$4 sm:$0xff]  }
 0x26a   :  { %4886 = vmatpush2.bf16.msra.mxu1 %v7672_v13  ;;  %v1457_v10 = vpop.f32.mrf.mxu0  ;;  %4846 = vmatprep.subr.bf16.mxu0 %v7677_v9  ;;  %v1650_v31 = vpop.f32.mrf.mxu1  ;;  %v2921_v58 = vadd.f32 %v2920_v14, %v2446_v6  ;;  %v2478_v25 = vmax.f32 %v1448_v21, 0.0  ;;  %v9618_v9 = vadd.f32 %v9546_v4, %v9198_v17  ;;  %v2480_v1 = vmax.f32 %v1641_v16, 0.0  ;;  %v7692_v4 = vld [vmem:[#allocation4 + $0x384] ss:$8 sps:$4 sm:$0xff]  }
 0x26b   :  { %4887 = vmatprep.subr.bf16.mxu1 %v7680_v37  ;;  %v1458_v46 = vadd.f32 %v1457_v10, %v9212_v48  ;;  %v2995_v13 = vadd.f32 %v2994_v61, %v2448_v5  ;;  %v1651_v20 = vadd.f32 %v1650_v31, %v9219_v7  ;;  %v9623_v37 = vadd.f32 %v9562_v19, %v9194_v34  ;;  %v7690_v31 = vld [vmem:[#allocation4 + $0x380] ss:$8 sps:$4 sm:$0xff]  }
 0x26c   :  { %v9609_v24 = vpop.f32.mrf.mxu0  ;;  %v9614_v44 = vpop.f32.mrf.mxu1  ;;  %v2922_v60 = vadd.f32 %v2921_v58, %v2462_v36  ;;  %v2494_v54 = vmax.f32 %v1452_v63, 0.0  ;;  %v2447_v45 = vmax.f32 %v9605_v32, 0.0  ;;  %v2496_v33 = vmax.f32 %v1645_v59, 0.0  ;;  %v7698_v58 = vld [vmem:[#allocation4 + $0x574] ss:$8 sps:$4 sm:$0xff]  }
 0x26d   :  { %4847 = vmatpush2.bf16.msra.mxu0 %v7675_v27  ;;  %v2996_v8 = vadd.f32 %v2995_v13, %v2464_v28  ;;  %v2884_v27 = vadd.f32 %v2883_v3, %v2445_v30  ;;  %v2461_v5 = vmax.f32 %v1440_v39, 0.0  ;;  %v2510_v10 = vmax.f32 %v1458_v46, 0.0  ;;  %v7695_v3 = vld [vmem:[#allocation4 + $0x474] ss:$8 sps:$4 sm:$0xff]  }
 0x26e   :  { %4888 = vmatpush2.bf16.msra.mxu1 %v7678_v52  ;;  %v1461_v53 = vpop.f32.mrf.mxu0  ;;  %4848 = vmatprep.subr.bf16.mxu0 %v7683_v26  ;;  %v1654_v41 = vpop.f32.mrf.mxu1  ;;  %v2923_v16 = vadd.f32 %v2922_v60, %v2478_v25  ;;  %v7687_v52 = vld [vmem:[#allocation4 + $0x280] ss:$8 sps:$4 sm:$0xff]   ;;  %v2463_v26 = vmax.f32 %v9618_v9, 0.0  ;;  %v9635_v14 = vadd.f32 %v9568_v56, %v9198_v17  ;;  %v2512_v36 = vmax.f32 %v1651_v20, 0.0 }
 0x26f   :  { %v1462_v23 = vadd.f32 %v1461_v53, %v9212_v48  ;;  %4889 = vmatprep.subr.bf16.mxu1 %v7686_v0  ;;  %v1655_v6 = vadd.f32 %v1654_v41, %v9219_v7  ;;  %v2997_v32 = vadd.f32 %v2996_v8, %v2480_v1  ;;  %v2477_v0 = vmax.f32 %v9623_v37, 0.0 }
 0x270   :  { %v9628_v21 = vpop.f32.mrf.mxu0  ;;  %v9630_v19 = vpop.f32.mrf.mxu1  ;;  %v2924_v61 = vadd.f32 %v2923_v16, %v2494_v54  ;;  %v1450_v56 = vadd.f32 %v9580_v40, %v9194_v34  ;;  %v2958_v13 = vadd.f32 %v9600_v49, %v2447_v45  ;;  %v2885_v9 = vadd.f32 %v2884_v27, %v2461_v5  ;;  %v7701_v49 = vld [vmem:[#allocation4 + $0x464] ss:$8 sps:$4 sm:$0xff]  }
 0x271   :  { %4849 = vmatpush2.bf16.msra.mxu0 %v7681_v47  ;;  %v2526_v30 = vmax.f32 %v1462_v23, 0.0  ;;  %v2998_v39 = vadd.f32 %v2997_v32, %v2496_v33  ;;  %v2528_v25 = vmax.f32 %v1655_v6, 0.0  ;;  %v1456_v40 = vadd.f32 %v9595_v43, %v9194_v34  ;;  %v7696_v23 = vld [vmem:[#allocation4 + $0x570] ss:$8 sps:$4 sm:$0xff]   ;;  %v7704_v6 = vld [vmem:[#allocation4 + $0x564] ss:$8 sps:$4 sm:$0xff]  }
 0x272   :  { %4890 = vmatpush2.bf16.msra.mxu1 %v7684_v57  ;;  %v1467_v63 = vpop.f32.mrf.mxu0  ;;  %4850 = vmatprep.subr.bf16.mxu0 %v7689_v62  ;;  %v1660_v59 = vpop.f32.mrf.mxu1  ;;  %v2925_v1 = vadd.f32 %v2924_v61, %v2510_v10  ;;  %v7693_v57 = vld [vmem:[#allocation4 + $0x470] ss:$8 sps:$4 sm:$0xff]   ;;  %v1643_v62 = vadd.f32 %v9584_v22, %v9198_v17  ;;  %v2959_v41 = vadd.f32 %v2958_v13, %v2463_v26  ;;  %v2493_v27 = vmax.f32 %v1450_v56, 0.0 }
 0x273   :  { %v1468_v28 = vadd.f32 %v1467_v63, %v9212_v48  ;;  %4891 = vmatprep.subr.bf16.mxu1 %v7692_v4  ;;  %v1661_v46 = vadd.f32 %v1660_v59, %v9219_v7  ;;  %v2999_v60 = vadd.f32 %v2998_v39, %v2512_v36  ;;  %v2479_v4 = vmax.f32 %v9635_v14, 0.0 }
 0x274   :  { %v1469_v47 = vpop.f32.mrf.mxu0  ;;  %v9643_v53 = vpop.f32.mrf.mxu1  ;;  %v2926_v45 = vadd.f32 %v2925_v1, %v2526_v30  ;;  %v2886_v22 = vadd.f32 %v2885_v9, %v2477_v0  ;;  %v1649_v10 = vadd.f32 %v9598_v35, %v9198_v17  ;;  %v2509_v32 = vmax.f32 %v1456_v40, 0.0  ;;  %v7710_v0 = vld [vmem:[#allocation4 + $0x554] ss:$8 sps:$4 sm:$0xff]   ;;  %v7708_v1 = vld [vmem:[#allocation4 + $0x550] ss:$8 sps:$4 sm:$0xff]  }
 0x275   :  { %v2542_v20 = vmax.f32 %v1468_v28, 0.0  ;;  %4851 = vmatpush2.bf16.msra.mxu0 %v7687_v52  ;;  %v2544_v37 = vmax.f32 %v1661_v46, 0.0  ;;  %v3000_v5 = vadd.f32 %v2999_v60, %v2528_v25  ;;  %v1466_v50 = vadd.f32 %v9628_v21, %v9194_v34  ;;  %v7705_v21 = vld [vmem:[#allocation4 + $0x450] ss:$8 sps:$4 sm:$0xff]  }
 0x276   :  { %4892 = vmatpush2.bf16.msra.mxu1 %v7690_v31  ;;  %v1471_v54 = vpop.f32.mrf.mxu0  ;;  %4902 = vmatprep.subr.bf16.mxu0 %v7695_v3  ;;  %v1664_v33 = vpop.f32.mrf.mxu1  ;;  %v1653_v31 = vadd.f32 %v9614_v44, %v9198_v17  ;;  %v2960_v61 = vadd.f32 %v2959_v41, %v2479_v4  ;;  %v2887_v30 = vadd.f32 %v2886_v22, %v2493_v27 }
 0x277   :  { %v1472_v8 = vadd.f32 %v1471_v54, %v9212_v48  ;;  %4943 = vmatprep.subr.bf16.mxu1 %v7698_v58  ;;  %v1665_v43 = vadd.f32 %v1664_v33, %v9219_v7  ;;  %v1460_v48 = vadd.f32 %v9609_v24, %v9194_v34  ;;  %v2927_v52 = vadd.f32 %v2926_v45, %v2542_v20  ;;  %v7699_v7 = vld [vmem:[#allocation4 + $0x460] ss:$8 sps:$4 sm:$0xff]   ;;  %v7707_v24 = vld [vmem:[#allocation4 + $0x454] ss:$8 sps:$4 sm:$0xff]   ;;  %v7713_v20 = vld [vmem:[#allocation4 + $0x444] ss:$8 sps:$4 sm:$0xff]  }
 0x278   :  { %4853 = vmatmul.mubr.bf16.vlgmr.msra.gmra.mxu0 %v3178_v2  ;;  %v9655_v16 = vpop.f32.mrf.mxu0  ;;  %v9664_v14 = vpop.f32.mrf.mxu1  ;;  %v2495_v2 = vmax.f32 %v1643_v62, 0.0  ;;  %v3001_v36 = vadd.f32 %v3000_v5, %v2544_v37  ;;  %v2511_v58 = vmax.f32 %v1649_v10, 0.0  ;;  %v1659_v39 = vadd.f32 %v9630_v19, %v9198_v17  ;;  %v7711_v45 = vld [vmem:[#allocation4 + $0x440] ss:$8 sps:$4 sm:$0xff]  }
 0x279   :  { %v2558_v26 = vmax.f32 %v1472_v8, 0.0  ;;  %4894 = vmatmul.mubr.bf16.vlgmr.msra.gmra.mxu1 %v3180_v18  ;;  %4903 = vmatpush1.bf16.msra.mxu0 %v7693_v57  ;;  %v2560_v63 = vmax.f32 %v1665_v43, 0.0  ;;  %v2525_v56 = vmax.f32 %v1460_v48, 0.0  ;;  %v1470_v44 = vadd.f32 %v1469_v47, %v9194_v34  ;;  %v7716_v34 = vld [vmem:[#allocation4 + $0x544] ss:$8 sps:$4 sm:$0xff]  }
 0x27a   :  { %4944 = vmatpush1.bf16.msra.mxu1 %v7696_v23  ;;  %v9666_v35 = vpop.f32.mrf.mxu0  ;;  %4904 = vmatprep.subr.bf16.mxu0 %v7701_v49  ;;  %v9672_v3 = vpop.f32.mrf.mxu1  ;;  %v2961_v46 = vadd.f32 %v2960_v61, %v2495_v2  ;;  %v2888_v13 = vadd.f32 %v2887_v30, %v2509_v32  ;;  %v2527_v57 = vmax.f32 %v1653_v31, 0.0  ;;  %v2541_v62 = vmax.f32 %v1466_v50, 0.0  ;;  %v7722_v43 = vld [vmem:[#allocation4 + $0x534] ss:$8 sps:$4 sm:$0xff]   ;;  %v7720_v32 = vld [vmem:[#allocation4 + $0x530] ss:$8 sps:$4 sm:$0xff]  }
 0x27b   :  { %v2928_v18 = vadd.f32 %v2927_v52, %v2558_v26  ;;  %4945 = vmatprep.subr.bf16.mxu1 %v7704_v6  ;;  %v3002_v28 = vadd.f32 %v3001_v36, %v2560_v63  ;;  %v1663_v40 = vadd.f32 %v9643_v53, %v9198_v17  ;;  %v2543_v49 = vmax.f32 %v1659_v39, 0.0  ;;  %v7714_v17 = vld [vmem:[#allocation4 + $0x540] ss:$8 sps:$4 sm:$0xff]   ;;  %v7719_v53 = vld [vmem:[#allocation4 + $0x434] ss:$8 sps:$4 sm:$0xff]  }
 0x27c   :  { %v9674_v59 = vpop.f32.mrf.mxu0  ;;  %v9679_v25 = vpop.f32.mrf.mxu1  ;;  %v2962_v54 = vadd.f32 %v2961_v46, %v2511_v58  ;;  %v2889_v23 = vadd.f32 %v2888_v13, %v2525_v56  ;;  %v2557_v41 = vmax.f32 %v1470_v44, 0.0  ;;  %v7725_v31 = vld [vmem:[#allocation4 + $0x424] ss:$8 sps:$4 sm:$0xff]   ;;  %v7726_v56 = vld [vmem:[#allocation4 + $0x520] ss:$8 sps:$4 sm:$0xff]  }
 0x27d   :  { %4905 = vmatpush1.bf16.msra.mxu0 %v7699_v7  ;;  %v2929_v19 = vrot.slane %v2928_v18, 4  ;;  %v3003_v47 = vrot.slane %v3002_v28, 4  ;;  %v2559_v22 = vmax.f32 %v1663_v40, 0.0  ;;  %v7728_v50 = vld [vmem:[#allocation4 + $0x524] ss:$8 sps:$4 sm:$0xff]  }
 0x27e   :  { %4946 = vmatpush1.bf16.msra.mxu1 %v7702_v29  ;;  %v9681_v9 = vpop.f32.mrf.mxu0  ;;  %4906 = vmatprep.subr.bf16.mxu0 %v7707_v24  ;;  %v9685_v60 = vpop.f32.mrf.mxu1  ;;  %v2963_v33 = vadd.f32 %v2962_v54, %v2527_v57  ;;  %v2890_v6 = vadd.f32 %v2889_v23, %v2541_v62  ;;  %v7717_v29 = vld [vmem:[#allocation4 + $0x430] ss:$8 sps:$4 sm:$0xff]   ;;  %v7731_v39 = vld [vmem:[#allocation4 + $0x414] ss:$8 sps:$4 sm:$0xff]  }
 0x27f   :  { %4947 = vmatprep.subr.bf16.mxu1 %v7710_v0  ;;  %v2930_v27 = vadd.f32 %v2929_v19, %v2928_v18  ;;  %v3004_v10 = vadd.f32 %v3003_v47, %v3002_v28  ;;  %v7723_v28 = vld [vmem:[#allocation4 + $0x420] ss:$8 sps:$4 sm:$0xff]   ;;  %v7734_v13 = vld [vmem:[#allocation4 + $0x514] ss:$8 sps:$4 sm:$0xff]   ;;  %v7729_v40 = vld [vmem:[#allocation4 + $0x410] ss:$8 sps:$4 sm:$0xff]  }
 0x280   :  { %v9687_v37 = vpop.f32.mrf.mxu0  ;;  %v9689_v4 = vpop.f32.mrf.mxu1  ;;  %v2964_v52 = vadd.f32 %v2963_v33, %v2543_v49  ;;  %v2891_v26 = vadd.f32 %v2890_v6, %v2557_v41  ;;  %v7737_v47 = vld [vmem:[#allocation4 + $0x404] ss:$8 sps:$4 sm:$0xff]  }
 0x281   :  { %4907 = vmatpush1.bf16.msra.mxu0 %v7705_v21  ;;  %v2931_v63 = vrot.slane %v2930_v27, 2  ;;  %v3005_v18 = vrot.slane %v3004_v10, 2 }
 0x282   :  { %4948 = vmatpush1.bf16.msra.mxu1 %v7708_v1  ;;  %v9691_v8 = vpop.f32.mrf.mxu0  ;;  %4908 = vmatprep.subr.bf16.mxu0 %v7713_v20  ;;  %v9693_v5 = vpop.f32.mrf.mxu1  ;;  %v2965_v36 = vadd.f32 %v2964_v52, %v2559_v22  ;;  %v2892_v61 = vrot.slane %v2891_v26, 4  ;;  %v7743_v52 = vld [vmem:[#allocation4 + $0x4f4] ss:$8 sps:$4 sm:$0xff]  }
 0x283   :  { %4949 = vmatprep.subr.bf16.mxu1 %v7716_v34  ;;  %v2932_v46 = vadd.f32 %v2931_v63, %v2930_v27  ;;  %v3006_v20 = vadd.f32 %v3005_v18, %v3004_v10  ;;  %v7732_v34 = vld [vmem:[#allocation4 + $0x510] ss:$8 sps:$4 sm:$0xff]   ;;  %v7735_v27 = vld [vmem:[#allocation4 + $0x400] ss:$8 sps:$4 sm:$0xff]   ;;  %v7746_v18 = vld [vmem:[#allocation4 + $0x5f4] ss:$8 sps:$4 sm:$0xff]  }
 0x284   :  { %v9695_v48 = vpop.f32.mrf.mxu0  ;;  %v9697_v7 = vpop.f32.mrf.mxu1  ;;  %v2966_v44 = vrot.slane %v2965_v36, 4  ;;  %v2893_v57 = vadd.f32 %v2892_v61, %v2891_v26  ;;  %v7738_v10 = vld [vmem:[#allocation4 + $0x500] ss:$8 sps:$4 sm:$0xff]  }
 0x285   :  { %4909 = vmatpush1.bf16.msra.mxu0 %v7711_v45  ;;  %v2933_v23 = vrot.slane %v2932_v46, 1  ;;  %v3007_v49 = vrot.slane %v3006_v20, 1  ;;  %v7740_v45 = vld [vmem:[#allocation4 + $0x504] ss:$8 sps:$4 sm:$0xff]  }
 0x286   :  { %4950 = vmatpush1.bf16.msra.mxu1 %v7714_v17  ;;  %v9699_v2 = vpop.f32.mrf.mxu0  ;;  %4910 = vmatprep.subr.bf16.mxu0 %v7719_v53  ;;  %v9701_v24 = vpop.f32.mrf.mxu1  ;;  %v2967_v54 = vadd.f32 %v2966_v44, %v2965_v36  ;;  %v2894_v53 = vrot.slane %v2893_v57, 2  ;;  %v7990_v63 = vld [vmem:[%s11595_s3 + $0x8] sm:$0xff] }
 0x287   :  { %4951 = vmatprep.subr.bf16.mxu1 %v7722_v43  ;;  %v2934_v33 = vadd.f32 %v2933_v23, %v2932_v46  ;;  %v3008_v6 = vadd.f32 %v3007_v49, %v3006_v20  ;;  %v7741_v46 = vld [vmem:[#allocation4 + $0x4f0] ss:$8 sps:$4 sm:$0xff]  }
 0x288   :  { %v9703_v0 = vpop.f32.mrf.mxu0  ;;  %v9705_v30 = vpop.f32.mrf.mxu1  ;;  %v2968_v26 = vrot.slane %v2967_v54, 2  ;;  %v2895_v61 = vadd.f32 %v2894_v53, %v2893_v57  ;;  %v7749_v57 = vld [vmem:[#allocation4 + $0x4e4] ss:$8 sps:$4 sm:$0xff]  }
 0x289   :  { %4911 = vmatpush1.bf16.msra.mxu0 %v7717_v29  ;;  %v3167_v29 = vmul.f32 0.00390625, %v2934_v33 }
 0x28a   :  { %4952 = vmatpush1.bf16.msra.mxu1 %v7720_v32  ;;  %v9707_v58 = vpop.f32.mrf.mxu0  ;;  %v9709_v21 = vpop.f32.mrf.mxu1  ;;  %4912 = vmatprep.subr.bf16.mxu0 %v7725_v31  ;;  %v3169_v32 = vmul.f32 0.00390625, %v3008_v6  ;;  %v9732_v31 = vrot.slane %v7990_v63, %v158_v38  ;;  %v9748_v38 = vrot.slane %v7990_v63, %v170_v51  ;;  %v2896_v49 = vrot.slane %v2895_v61, 1 }
 0x28b   :  { %4953 = vmatprep.subr.bf16.mxu1 %v7728_v50 }
 0x28c   :  { %v9711_v1 = vpop.f32.mrf.mxu0  ;;  %v9713_v62 = vpop.f32.mrf.mxu1  ;;  %v1702_v11 = vadd.f32 %v9655_v16, %v9732_v31  ;;  %v7747_v16 = vld [vmem:[#allocation4 + $0x4e0] ss:$8 sps:$4 sm:$0xff]   ;;  %v1897_v33 = vadd.f32 %v9672_v3, %v9748_v38  ;;  %v1712_v6 = vadd.f32 %v9687_v37, %v9732_v31  ;;  %v1907_v37 = vadd.f32 %v9693_v5, %v9748_v38  ;;  %v7761_v5 = vld [vmem:[#allocation4 + $0x4c4] ss:$8 sps:$4 sm:$0xff]  }
 0x28d   :  { %4913 = vmatpush1.bf16.msra.mxu0 %v7723_v28  ;;  %v9738_v28 = vrot.slane %v7990_v63, %v166_v42  ;;  %v7744_v42 = vld [vmem:[#allocation4 + $0x5f0] ss:$8 sps:$4 sm:$0xff]  }
 0x28e   :  { %4954 = vmatpush1.bf16.msra.mxu1 %v7726_v56  ;;  %v9715_v19 = vpop.f32.mrf.mxu0  ;;  %4914 = vmatprep.subr.bf16.mxu0 %v7731_v39  ;;  %v9717_v41 = vpop.f32.mrf.mxu1  ;;  %v3183_v56 = vpack.c.bf16 %v3167_v29, %v3167_v29  ;;  %v3185_v39 = vpack.c.bf16 %v3169_v32, %v3169_v32 }
 0x28f   :  { %4955 = vmatprep.subr.bf16.mxu1 %v7734_v13  ;;  %v9744_v13 = vrot.slane %v7990_v63, %v162_v55  ;;  %v7752_v55 = vld [vmem:[#allocation4 + $0x5e4] ss:$8 sps:$4 sm:$0xff]   ;;  %v1899_v51 = vadd.f32 %v9679_v25, %v9738_v28  ;;  %v7753_v63 = vld [vmem:[#allocation4 + $0x4d0] ss:$8 sps:$4 sm:$0xff]  }
 0x290   :  { %v9719_v17 = vpop.f32.mrf.mxu0  ;;  %v9721_v22 = vpop.f32.mrf.mxu1  ;;  %4934 = vmatprep.mubr.bf16.mxu0 %v3183_v56  ;;  %4975 = vmatprep.mubr.bf16.mxu1 %v3185_v39  ;;  %v2065_v56 = vmax.f32 %v1702_v11, 0.0 }
 0x291   :  { %4915 = vmatpush1.bf16.msra.mxu0 %v7729_v40  ;;  %v2969_v40 = vadd.f32 %v2968_v26, %v2967_v54  ;;  %v1895_v54 = vadd.f32 %v9664_v14, %v9738_v28  ;;  %v1704_v25 = vadd.f32 %v9666_v35, %v9744_v13  ;;  %v7758_v35 = vld [vmem:[#allocation4 + $0x5d4] ss:$8 sps:$4 sm:$0xff]   ;;  %v2083_v29 = vmax.f32 %v1899_v51, 0.0 }
 0x292   :  { %4956 = vmatpush1.bf16.msra.mxu1 %v7732_v34  ;;  %v9723_v43 = vpop.f32.mrf.mxu0  ;;  %4916 = vmatprep.subr.bf16.mxu0 %v7737_v47  ;;  %v9725_v36 = vpop.f32.mrf.mxu1  ;;  %v1706_v34 = vadd.f32 %v9674_v59, %v9732_v31  ;;  %v1708_v59 = vadd.f32 %v9681_v9, %v9744_v13  ;;  %v7750_v9 = vld [vmem:[#allocation4 + $0x5e0] ss:$8 sps:$4 sm:$0xff]   ;;  %v1714_v3 = vadd.f32 %v9691_v8, %v9744_v13  ;;  %v2097_v51 = vmax.f32 %v1712_v6, 0.0 }
 0x293   :  { %4957 = vmatprep.subr.bf16.mxu1 %v7740_v45  ;;  %v1901_v45 = vadd.f32 %v9685_v60, %v9748_v38  ;;  %v2970_v60 = vrot.slane %v2969_v40, 1 }
 0x294   :  { %v9734_v50 = vpop.f32.mrf.mxu0  ;;  %v9740_v44 = vpop.f32.mrf.mxu1  ;;  %v2082_v39 = vmax.f32 %v1708_v59, 0.0 }
 0x295   :  { %4917 = vmatpush1.bf16.msra.mxu0 %v7735_v27  ;;  %v7755_v27 = vld [vmem:[#allocation4 + $0x4d4] ss:$8 sps:$4 sm:$0xff]   ;;  %v2971_v15 = vadd.f32 %v2970_v60, %v2969_v40 }
 0x296   :  { %4958 = vmatpush1.bf16.msra.mxu1 %v7738_v10  ;;  %v9750_v20 = vpop.f32.mrf.mxu0  ;;  %4918 = vmatprep.subr.bf16.mxu0 %v7743_v52  ;;  %v9754_v47 = vpop.f32.mrf.mxu1  ;;  %v2081_v10 = vmax.f32 %v1706_v34, 0.0  ;;  %v1905_v52 = vadd.f32 %v9689_v4, %v9738_v28  ;;  %v7756_v4 = vld [vmem:[#allocation4 + $0x5d0] ss:$8 sps:$4 sm:$0xff]   ;;  %v2066_v34 = vmax.f32 %v1704_v25, 0.0 }
 0x297   :  { %4959 = vmatprep.subr.bf16.mxu1 %v7746_v18  ;;  %v2897_v18 = vadd.f32 %v2896_v49, %v2895_v61  ;;  %v1716_v61 = vadd.f32 %v9695_v48, %v9732_v31  ;;  %v7764_v49 = vld [vmem:[#allocation4 + $0x5c4] ss:$8 sps:$4 sm:$0xff]  }
 0x298   :  { %v9760_v23 = vpop.f32.mrf.mxu0  ;;  %v9768_v53 = vpop.f32.mrf.mxu1  ;;  %v3009_v12 = vadd.f32 %v2081_v10, %v2065_v56  ;;  %v3046_v40 = vadd.f32 %v2082_v39, %v2066_v34  ;;  %v1911_v10 = vadd.f32 %v9701_v24, %v9748_v38  ;;  %v7770_v24 = vld [vmem:[#allocation4 + $0x5b4] ss:$8 sps:$4 sm:$0xff]   ;;  %v1724_v39 = vadd.f32 %v9707_v58, %v9744_v13  ;;  %v7765_v34 = vld [vmem:[#allocation4 + $0x4b0] ss:$8 sps:$4 sm:$0xff]  }
 0x299   :  { %4919 = vmatpush2.bf16.msra.mxu0 %v7741_v46  ;;  %v2084_v46 = vmax.f32 %v1901_v45, 0.0  ;;  %v2100_v45 = vmax.f32 %v1907_v37, 0.0  ;;  %v2113_v37 = vmax.f32 %v1716_v61, 0.0  ;;  %v1919_v58 = vadd.f32 %v9713_v62, %v9738_v28  ;;  %v7776_v62 = vld [vmem:[#allocation4 + $0x5a4] ss:$8 sps:$4 sm:$0xff]  }
 0x29a   :  { %4960 = vmatpush2.bf16.msra.mxu1 %v7744_v42  ;;  %v9776_v14 = vpop.f32.mrf.mxu0  ;;  %4920 = vmatprep.subr.bf16.mxu0 %v7749_v57  ;;  %v9780_v26 = vpop.f32.mrf.mxu1  ;;  %v2067_v57 = vmax.f32 %v1895_v54, 0.0  ;;  %v2098_v54 = vmax.f32 %v1714_v3, 0.0  ;;  %v3010_v60 = vadd.f32 %v3009_v12, %v2097_v51  ;;  %v9812_v3 = vmul.f32 0.00390625, %v2971_v15 }
 0x29b   :  { %4961 = vmatprep.subr.bf16.mxu1 %v7752_v55  ;;  %v2068_v55 = vmax.f32 %v1897_v33, 0.0  ;;  %v9800_v33 = vmul.f32 0.00390625, %v2897_v18 }
 0x29c   :  { %v9786_v32 = vpop.f32.mrf.mxu0  ;;  %v9788_v42 = vpop.f32.mrf.mxu1  ;;  %v3083_v59 = vadd.f32 %v2083_v29, %v2067_v57  ;;  %v7767_v29 = vld [vmem:[#allocation4 + $0x4b4] ss:$8 sps:$4 sm:$0xff]   ;;  %v3047_v18 = vadd.f32 %v3046_v40, %v2098_v54  ;;  %v1921_v54 = vadd.f32 %v9717_v41, %v9748_v38 }
 0x29d   :  { %11865 = vst [vmem:[#allocation16_spill] sm:$0xff] %v9786_v32  ;;  %4921 = vmatpush2.bf16.msra.mxu0 %v7747_v16  ;;  %v2099_v32 = vmax.f32 %v1905_v52, 0.0  ;;  %v1909_v16 = vadd.f32 %v9697_v7, %v9738_v28  ;;  %v3120_v6 = vadd.f32 %v2084_v46, %v2068_v55  ;;  %v1722_v7 = vadd.f32 %v9703_v0, %v9732_v31 }
 0x29e   :  { %4962 = vmatpush2.bf16.msra.mxu1 %v7750_v9  ;;  %v9790_v8 = vpop.f32.mrf.mxu0  ;;  %4922 = vmatprep.subr.bf16.mxu0 %v7755_v27  ;;  %v9794_v11 = vpop.f32.mrf.mxu1  ;;  %v1718_v9 = vadd.f32 %v9699_v2, %v9744_v13  ;;  %v7759_v27 = vld [vmem:[#allocation4 + $0x4c0] ss:$8 sps:$4 sm:$0xff]   ;;  %v3182_v15 = vpack.c.bf16 %v9800_v33, %v9800_v33  ;;  %v2116_v55 = vmax.f32 %v1911_v10, 0.0 }
 0x29f   :  { %4963 = vmatprep.subr.bf16.mxu1 %v7758_v35  ;;  %v7762_v35 = vld [vmem:[#allocation4 + $0x5c0] ss:$8 sps:$4 sm:$0xff]   ;;  %v3084_v2 = vadd.f32 %v3083_v59, %v2099_v32  ;;  %v3121_v56 = vadd.f32 %v3120_v6, %v2100_v45  ;;  %v2115_v0 = vmax.f32 %v1909_v16, 0.0  ;;  %v2129_v51 = vmax.f32 %v1722_v7, 0.0 }
 0x2a0   :  { %v9798_v25 = vpop.f32.mrf.mxu0  ;;  %v2114_v32 = vmax.f32 %v1718_v9, 0.0  ;;  %v3011_v59 = vadd.f32 %v3010_v60, %v2113_v37  ;;  %v1732_v45 = vadd.f32 %v9719_v17, %v9732_v31  ;;  %v2130_v6 = vmax.f32 %v1724_v39, 0.0 }
 0x2a1   :  { %v9804_v48 = vpop.f32.mrf.mxu1  ;;  %4923 = vmatpush2.bf16.msra.mxu0 %v7753_v63  ;;  %v1915_v63 = vadd.f32 %v9705_v30, %v9738_v28  ;;  %v1726_v30 = vadd.f32 %v9711_v1, %v9732_v31  ;;  %v3085_v40 = vadd.f32 %v3084_v2, %v2115_v0  ;;  %v1925_v9 = vadd.f32 %v9721_v22, %v9738_v28  ;;  %v7774_v22 = vld [vmem:[#allocation4 + $0x5a0] ss:$8 sps:$4 sm:$0xff]   ;;  %v7779_v0 = vld [vmem:[#allocation4 + $0x494] ss:$8 sps:$4 sm:$0xff]  }
 0x2a2   :  { %4964 = vmatpush2.bf16.msra.mxu1 %v7756_v4  ;;  %v9810_v52 = vpop.f32.mrf.mxu0  ;;  %4924 = vmatprep.subr.bf16.mxu0 %v7761_v5  ;;  %v1917_v4 = vadd.f32 %v9709_v21, %v9748_v38  ;;  %v1728_v5 = vadd.f32 %v9715_v19, %v9744_v13  ;;  %v7768_v21 = vld [vmem:[#allocation4 + $0x5b0] ss:$8 sps:$4 sm:$0xff]   ;;  %v3184_v19 = vpack.c.bf16 %v9812_v3, %v9812_v3  ;;  %v2148_v39 = vmax.f32 %v1921_v54, 0.0 }
 0x2a3   :  { %v9816_v12 = vpop.f32.mrf.mxu1  ;;  %4965 = vmatprep.subr.bf16.mxu1 %v7764_v49  ;;  %v7773_v49 = vld [vmem:[#allocation4 + $0x4a4] ss:$8 sps:$4 sm:$0xff]   ;;  %v2131_v1 = vmax.f32 %v1915_v63, 0.0  ;;  %v3048_v60 = vadd.f32 %v3047_v18, %v2114_v32  ;;  %v2145_v41 = vmax.f32 %v1726_v30, 0.0  ;;  %v1734_v17 = vadd.f32 %v9723_v43, %v9744_v13  ;;  %v7782_v30 = vld [vmem:[#allocation4 + $0x594] ss:$8 sps:$4 sm:$0xff]  }
 0x2a4   :  { %v9820_v46 = vpop.f32.mrf.mxu0  ;;  %v2132_v10 = vmax.f32 %v1917_v4, 0.0  ;;  %v3012_v37 = vadd.f32 %v3011_v59, %v2129_v51  ;;  %v2147_v63 = vmax.f32 %v1919_v58, 0.0  ;;  %v2146_v2 = vmax.f32 %v1728_v5, 0.0 }
 0x2a5   :  { %v9828_v57 = vpop.f32.mrf.mxu1  ;;  %4925 = vmatpush2.bf16.msra.mxu0 %v7759_v27  ;;  %v3086_v18 = vadd.f32 %v3085_v40, %v2131_v1  ;;  %v2161_v32 = vmax.f32 %v1732_v45, 0.0  ;;  %v1927_v43 = vadd.f32 %v9725_v36, %v9748_v38  ;;  %v1929_v51 = vadd.f32 %v9740_v44, %v9738_v28  ;;  %v7777_v1 = vld [vmem:[#allocation4 + $0x490] ss:$8 sps:$4 sm:$0xff]   ;;  %v7785_v40 = vld [vmem:[#allocation4 + $0x484] ss:$8 sps:$4 sm:$0xff]  }
 0x2a6   :  { %4966 = vmatpush2.bf16.msra.mxu1 %v7762_v35  ;;  %v9834_v61 = vpop.f32.mrf.mxu0  ;;  %4926 = vmatprep.subr.bf16.mxu0 %v7767_v29  ;;  %v7771_v35 = vld [vmem:[#allocation4 + $0x4a0] ss:$8 sps:$4 sm:$0xff]   ;;  %v3122_v29 = vadd.f32 %v3121_v56, %v2116_v55  ;;  %v3049_v56 = vadd.f32 %v3048_v60, %v2130_v6  ;;  %v1736_v55 = vadd.f32 %v9734_v50, %v9732_v31  ;;  %v7780_v44 = vld [vmem:[#allocation4 + $0x590] ss:$8 sps:$4 sm:$0xff]  }
 0x2a7   :  { %v9840_v16 = vpop.f32.mrf.mxu1  ;;  %4967 = vmatprep.subr.bf16.mxu1 %v7770_v24  ;;  %v1738_v36 = vadd.f32 %v9750_v20, %v9744_v13  ;;  %v3087_v54 = vadd.f32 %v3086_v18, %v2147_v63  ;;  %v1931_v50 = vadd.f32 %v9754_v47, %v9748_v38  ;;  %v2164_v60 = vmax.f32 %v1927_v43, 0.0  ;;  %v9879_v47 = vld [vmem:[%s11597_s5] sm:$0x3]  ;;  %v11866_v43 = vld [vmem:[#allocation16_spill] sm:$0xff] }
 0x2a8   :  { %v9846_v27 = vpop.f32.mrf.mxu0  ;;  %v3123_v5 = vadd.f32 %v3122_v29, %v2132_v10  ;;  %v3050_v45 = vadd.f32 %v3049_v56, %v2146_v2  ;;  %v1742_v20 = vadd.f32 %v9760_v23, %v9732_v31  ;;  %v2179_v29 = vmax.f32 %v1929_v51, 0.0 }
 0x2a9   :  { %v9850_v7 = vpop.f32.mrf.mxu1  ;;  %4927 = vmatpush2.bf16.msra.mxu0 %v7765_v34  ;;  %v2163_v34 = vmax.f32 %v1925_v9, 0.0  ;;  %v1744_v23 = vadd.f32 %v9776_v14, %v9744_v13  ;;  %v7791_v14 = vld [vmem:[#allocation4 + $0x674] ss:$8 sps:$4 sm:$0xff]  }
 0x2aa   :  { %4968 = vmatpush2.bf16.msra.mxu1 %v7768_v21  ;;  %v9852_v24 = vpop.f32.mrf.mxu0  ;;  %4928 = vmatprep.subr.bf16.mxu0 %v7773_v49  ;;  %v3013_v21 = vadd.f32 %v3012_v37, %v2145_v41  ;;  %v2162_v49 = vmax.f32 %v1734_v17, 0.0  ;;  %v3124_v6 = vadd.f32 %v3123_v5, %v2148_v39  ;;  %v7788_v41 = vld [vmem:[#allocation4 + $0x584] ss:$8 sps:$4 sm:$0xff]   ;;  %v1935_v37 = vadd.f32 %v9768_v53, %v9738_v28  ;;  %v7783_v39 = vld [vmem:[#allocation4 + $0x480] ss:$8 sps:$4 sm:$0xff]  }
 0x2ab   :  { %v9856_v4 = vpop.f32.mrf.mxu1  ;;  %4969 = vmatprep.subr.bf16.mxu1 %v7776_v62  ;;  %v3088_v17 = vadd.f32 %v3087_v54, %v2163_v34  ;;  %v1939_v53 = vadd.f32 %v9788_v42, %v9738_v28  ;;  %v7786_v34 = vld [vmem:[#allocation4 + $0x580] ss:$8 sps:$4 sm:$0xff]   ;;  %v2193_v5 = vmax.f32 %v1742_v20, 0.0 }
 0x2ac   :  { %v9862_v58 = vpop.f32.mrf.mxu0  ;;  %v3014_v9 = vadd.f32 %v3013_v21, %v2161_v32  ;;  %v3051_v2 = vadd.f32 %v3050_v45, %v2162_v49  ;;  %v2180_v32 = vmax.f32 %v1931_v50, 0.0  ;;  %v3125_v51 = vadd.f32 %v3124_v6, %v2164_v60 }
 0x2ad   :  { %v9866_v59 = vpop.f32.mrf.mxu1  ;;  %4929 = vmatpush2.bf16.msra.mxu0 %v7771_v35  ;;  %v2177_v35 = vmax.f32 %v1736_v55, 0.0  ;;  %v11867_v55 = vld [vmem:[#allocation14_spill] sm:$0xff]  ;;  %v1748_v21 = vadd.f32 %v9790_v8, %v9744_v13  ;;  %v3089_v45 = vadd.f32 %v3088_v17, %v2179_v29  ;;  %v2195_v50 = vmax.f32 %v1935_v37, 0.0 }
 0x2ae   :  { %4970 = vmatpush2.bf16.msra.mxu1 %v7774_v22  ;;  %v9870_v62 = vpop.f32.mrf.mxu0  ;;  %4930 = vmatprep.subr.bf16.mxu0 %v7779_v0  ;;  %v2178_v22 = vmax.f32 %v1738_v36, 0.0  ;;  %v1937_v0 = vadd.f32 %v9780_v26, %v9748_v38  ;;  %v7794_v36 = vld [vmem:[#allocation4 + $0x774] ss:$8 sps:$4 sm:$0xff]   ;;  %v2194_v60 = vmax.f32 %v1744_v23, 0.0  ;;  %v1752_v8 = vadd.f32 %v9798_v25, %v9732_v31  ;;  %v7797_v29 = vld [vmem:[#allocation4 + $0x664] ss:$8 sps:$4 sm:$0xff]  }
 0x2af   :  { %v9874_v10 = vpop.f32.mrf.mxu1  ;;  %4971 = vmatprep.subr.bf16.mxu1 %v7782_v30  ;;  %v1746_v30 = vadd.f32 %v11866_v43, %v9732_v31  ;;  %v3015_v54 = vadd.f32 %v3014_v9, %v2177_v35  ;;  %v3126_v26 = vadd.f32 %v3125_v51, %v2180_v32  ;;  %v2211_v9 = vmax.f32 %v1939_v53, 0.0  ;;  %v7792_v35 = vld [vmem:[#allocation4 + $0x770] ss:$8 sps:$4 sm:$0xff]  }
 0x2b0   :  { %v9883_v63 = vpop.f32.mrf.mxu0  ;;  %v3052_v6 = vadd.f32 %v3051_v2, %v2178_v22  ;;  %v2196_v20 = vmax.f32 %v1937_v0, 0.0  ;;  %v1945_v17 = vadd.f32 %v9804_v48, %v9738_v28  ;;  %v2210_v2 = vmax.f32 %v1748_v21, 0.0  ;;  %v7800_v0 = vld [vmem:[#allocation4 + $0x764] ss:$8 sps:$4 sm:$0xff]  }
 0x2b1   :  { %v9889_v18 = vpop.f32.mrf.mxu1  ;;  %4931 = vmatpush2.bf16.msra.mxu0 %v7777_v1  ;;  %v11868_v1 = vld [vmem:[#allocation15_spill] sm:$0xff]  ;;  %v2209_v42 = vmax.f32 %v1746_v30, 0.0  ;;  %v3016_v37 = vadd.f32 %v3015_v54, %v2193_v5  ;;  %v1754_v25 = vadd.f32 %v9810_v52, %v9744_v13  ;;  %v1947_v22 = vadd.f32 %v9816_v12, %v9748_v38 }
 0x2b2   :  { %4972 = vmatpush2.bf16.msra.mxu1 %v7780_v44  ;;  %v9895_v56 = vpop.f32.mrf.mxu0  ;;  %4932 = vmatprep.subr.bf16.mxu0 %v7785_v40  ;;  %v1941_v44 = vadd.f32 %v9794_v11, %v9748_v38  ;;  %v1756_v32 = vadd.f32 %v9820_v46, %v9732_v31  ;;  %v1949_v30 = vadd.f32 %v9828_v57, %v9738_v28  ;;  %v7795_v57 = vld [vmem:[#allocation4 + $0x660] ss:$8 sps:$4 sm:$0xff]   ;;  %v2227_v33 = vmax.f32 %v1945_v17, 0.0  ;;  %v7801_v17 = vld [vmem:[#allocation4 + $0x650] ss:$8 sps:$4 sm:$0xff]  }
 0x2b3   :  { %v9901_v49 = vpop.f32.mrf.mxu1  ;;  %4973 = vmatprep.subr.bf16.mxu1 %v7788_v41  ;;  %v7789_v41 = vld [vmem:[#allocation4 + $0x670] ss:$8 sps:$4 sm:$0xff]   ;;  %v3053_v53 = vadd.f32 %v3052_v6, %v2194_v60  ;;  %v3127_v12 = vadd.f32 %v3126_v26, %v2196_v20  ;;  %v3017_v51 = vadd.f32 %v3016_v37, %v2209_v42  ;;  %v7798_v26 = vld [vmem:[#allocation4 + $0x760] ss:$8 sps:$4 sm:$0xff]   ;;  %v2226_v54 = vmax.f32 %v1754_v25, 0.0 }
 0x2b4   :  { %v9907_v40 = vpop.f32.mrf.mxu0  ;;  %v2212_v48 = vmax.f32 %v1941_v44, 0.0  ;;  %v2228_v3 = vmax.f32 %v1947_v22, 0.0  ;;  %v7806_v42 = vld [vmem:[#allocation4 + $0x754] ss:$8 sps:$4 sm:$0xff]   ;;  %v2241_v44 = vmax.f32 %v1756_v32, 0.0  ;;  %v2243_v6 = vmax.f32 %v1949_v30, 0.0 }
 0x2b5   :  { %v9911_v43 = vpop.f32.mrf.mxu1  ;;  %4933 = vmatpush2.bf16.msra.mxu0 %v7783_v39  ;;  %v3090_v39 = vadd.f32 %v3089_v45, %v2195_v50  ;;  %v1766_v37 = vadd.f32 %v9862_v58, %v9732_v31  ;;  %v7809_v25 = vld [vmem:[#allocation4 + $0x644] ss:$8 sps:$4 sm:$0xff]  }
 0x2b6   :  { %4974 = vmatpush2.bf16.msra.mxu1 %v7786_v34  ;;  %v9915_v11 = vpop.f32.mrf.mxu0  ;;  %4984 = vmatprep.subr.bf16.mxu0 %v7791_v14  ;;  %v2225_v34 = vmax.f32 %v1752_v8, 0.0  ;;  %v1758_v14 = vadd.f32 %v9834_v61, %v9744_v13  ;;  %v7803_v61 = vld [vmem:[#allocation4 + $0x654] ss:$8 sps:$4 sm:$0xff]   ;;  %v3128_v50 = vadd.f32 %v3127_v12, %v2212_v48  ;;  %v7812_v32 = vld [vmem:[#allocation4 + $0x744] ss:$8 sps:$4 sm:$0xff]  }
 0x2b7   :  { %v9921_v23 = vpop.f32.mrf.mxu1  ;;  %5025 = vmatprep.subr.bf16.mxu1 %v7794_v36  ;;  %v3091_v5 = vadd.f32 %v3090_v39, %v2211_v9  ;;  %v3054_v36 = vadd.f32 %v3053_v53, %v2210_v2  ;;  %v1768_v39 = vadd.f32 %v9870_v62, %v9744_v13  ;;  %v7807_v62 = vld [vmem:[#allocation4 + $0x640] ss:$8 sps:$4 sm:$0xff]  }
 0x2b8   :  { %4935 = vmatmul.mubr.bf16.vlgmr.msra.gmra.mxu0 %v3182_v15  ;;  %v9930_v52 = vpop.f32.mrf.mxu0  ;;  %v1951_v15 = vadd.f32 %v9840_v16, %v9748_v38  ;;  %v1955_v16 = vadd.f32 %v9850_v7, %v9738_v28  ;;  %v3018_v20 = vadd.f32 %v3017_v51, %v2225_v34  ;;  %v2242_v8 = vmax.f32 %v1758_v14, 0.0 }
 0x2b9   :  { %4976 = vmatmul.mubr.bf16.vlgmr.msra.gmra.mxu1 %v3184_v19  ;;  %v9937_v46 = vpop.f32.mrf.mxu1  ;;  %4985 = vmatpush1.bf16.msra.mxu0 %v7789_v41  ;;  %v1762_v19 = vadd.f32 %v9846_v27, %v9732_v31  ;;  %v1764_v41 = vadd.f32 %v9852_v24, %v9744_v13  ;;  %v1957_v27 = vadd.f32 %v9856_v4, %v9748_v38  ;;  %v7804_v24 = vld [vmem:[#allocation4 + $0x750] ss:$8 sps:$4 sm:$0xff]  }
 0x2ba   :  { %v9941_v21 = vpop.f32.mrf.mxu0  ;;  %5026 = vmatpush1.bf16.msra.mxu1 %v7792_v35  ;;  %4986 = vmatprep.subr.bf16.mxu0 %v7797_v29  ;;  %v3092_v35 = vadd.f32 %v3091_v5, %v2227_v33  ;;  %v2244_v29 = vmax.f32 %v1951_v15, 0.0  ;;  %v1959_v7 = vadd.f32 %v9866_v59, %v9738_v28  ;;  %v3055_v22 = vadd.f32 %v3054_v36, %v2226_v54  ;;  %v7815_v54 = vld [vmem:[#allocation4 + $0x634] ss:$8 sps:$4 sm:$0xff]  }
 0x2bb   :  { %v9945_v45 = vpop.f32.mrf.mxu1  ;;  %5027 = vmatprep.subr.bf16.mxu1 %v7800_v0  ;;  %v3129_v4 = vadd.f32 %v3128_v50, %v2228_v3  ;;  %v2257_v0 = vmax.f32 %v1762_v19, 0.0  ;;  %v3019_v58 = vadd.f32 %v3018_v20, %v2241_v44  ;;  %v2259_v53 = vmax.f32 %v1955_v16, 0.0  ;;  %v7818_v44 = vld [vmem:[#allocation4 + $0x734] ss:$8 sps:$4 sm:$0xff]  }
 0x2bc   :  { %v9949_v60 = vpop.f32.mrf.mxu0  ;;  %v3093_v30 = vadd.f32 %v3092_v35, %v2243_v6  ;;  %v1961_v59 = vadd.f32 %v9874_v10, %v9748_v38  ;;  %v3056_v34 = vadd.f32 %v3055_v22, %v2242_v8  ;;  %v2258_v14 = vmax.f32 %v1764_v41, 0.0  ;;  %v7810_v10 = vld [vmem:[#allocation4 + $0x740] ss:$8 sps:$4 sm:$0xff]   ;;  %v7813_v35 = vld [vmem:[#allocation4 + $0x630] ss:$8 sps:$4 sm:$0xff]  }
 0x2bd   :  { %v9955_v9 = vpop.f32.mrf.mxu1  ;;  %4987 = vmatpush1.bf16.msra.mxu0 %v7795_v57  ;;  %v2260_v57 = vmax.f32 %v1957_v27, 0.0  ;;  %v1772_v51 = vadd.f32 %v9883_v63, %v9732_v31  ;;  %v3130_v33 = vadd.f32 %v3129_v4, %v2244_v29  ;;  %v2273_v15 = vmax.f32 %v1766_v37, 0.0 }
 0x2be   :  { %v9961_v2 = vpop.f32.mrf.mxu0  ;;  %5028 = vmatpush1.bf16.msra.mxu1 %v7798_v26  ;;  %4988 = vmatprep.subr.bf16.mxu0 %v7803_v61  ;;  %v2275_v26 = vmax.f32 %v1959_v7, 0.0  ;;  %v1965_v61 = vadd.f32 %v9889_v18, %v9738_v28  ;;  %v3020_v3 = vadd.f32 %v3019_v58, %v2257_v0  ;;  %v2274_v19 = vmax.f32 %v1768_v39, 0.0 }
 0x2bf   :  { %v9965_v48 = vpop.f32.mrf.mxu1  ;;  %5029 = vmatprep.subr.bf16.mxu1 %v7806_v42  ;;  %v1774_v63 = vadd.f32 %v9895_v56, %v9744_v13  ;;  %v1967_v42 = vadd.f32 %v9901_v49, %v9748_v38  ;;  %v3094_v6 = vadd.f32 %v3093_v30, %v2259_v53  ;;  %v2276_v18 = vmax.f32 %v1961_v59, 0.0 }
 0x2c0   :  { %v9969_v12 = vpop.f32.mrf.mxu0  ;;  %v1776_v16 = vadd.f32 %v9907_v40, %v9732_v31  ;;  %v1969_v20 = vadd.f32 %v9911_v43, %v9738_v28  ;;  %v3057_v41 = vadd.f32 %v3056_v34, %v2258_v14  ;;  %v3131_v27 = vadd.f32 %v3130_v33, %v2260_v57  ;;  %v7816_v43 = vld [vmem:[#allocation4 + $0x730] ss:$8 sps:$4 sm:$0xff]  }
 0x2c1   :  { %v9973_v5 = vpop.f32.mrf.mxu1  ;;  %4989 = vmatpush1.bf16.msra.mxu0 %v7801_v17  ;;  %v2289_v56 = vmax.f32 %v1772_v51, 0.0  ;;  %v1778_v49 = vadd.f32 %v9915_v11, %v9744_v13  ;;  %v3021_v29 = vadd.f32 %v3020_v3, %v2273_v15  ;;  %v3095_v37 = vadd.f32 %v3094_v6, %v2275_v26 }
 0x2c2   :  { %v9977_v36 = vpop.f32.mrf.mxu0  ;;  %5030 = vmatpush1.bf16.msra.mxu1 %v7804_v24  ;;  %4990 = vmatprep.subr.bf16.mxu0 %v7809_v25  ;;  %v2291_v7 = vmax.f32 %v1965_v61, 0.0  ;;  %v1971_v40 = vadd.f32 %v9921_v23, %v9748_v38  ;;  %v7821_v25 = vld [vmem:[#allocation4 + $0x624] ss:$8 sps:$4 sm:$0xff]   ;;  %v3058_v22 = vadd.f32 %v3057_v41, %v2274_v19  ;;  %v2290_v4 = vmax.f32 %v1774_v63, 0.0 }
 0x2c3   :  { %v9983_v50 = vpop.f32.mrf.mxu1  ;;  %5031 = vmatprep.subr.bf16.mxu1 %v7812_v32  ;;  %v2292_v0 = vmax.f32 %v1967_v42, 0.0  ;;  %v1782_v11 = vadd.f32 %v9930_v52, %v9732_v31  ;;  %v7824_v32 = vld [vmem:[#allocation4 + $0x724] ss:$8 sps:$4 sm:$0xff]   ;;  %v3132_v58 = vadd.f32 %v3131_v27, %v2276_v18  ;;  %v2305_v30 = vmax.f32 %v1776_v16, 0.0  ;;  %v7830_v42 = vld [vmem:[#allocation4 + $0x714] ss:$8 sps:$4 sm:$0xff]  }
 0x2c4   :  { %v9989_v8 = vpop.f32.mrf.mxu0  ;;  %v2307_v53 = vmax.f32 %v1969_v20, 0.0  ;;  %v1975_v23 = vadd.f32 %v9937_v46, %v9738_v28  ;;  %v3022_v34 = vadd.f32 %v3021_v29, %v2289_v56  ;;  %v2306_v14 = vmax.f32 %v1778_v49, 0.0 }
 0x2c5   :  { %v9993_v17 = vpop.f32.mrf.mxu1  ;;  %4991 = vmatpush1.bf16.msra.mxu0 %v7807_v62  ;;  %v1784_v57 = vadd.f32 %v9941_v21, %v9744_v13  ;;  %v1977_v52 = vadd.f32 %v9945_v45, %v9748_v38  ;;  %v7819_v62 = vld [vmem:[#allocation4 + $0x620] ss:$8 sps:$4 sm:$0xff]   ;;  %v3096_v33 = vadd.f32 %v3095_v37, %v2291_v7  ;;  %v2308_v15 = vmax.f32 %v1971_v40, 0.0  ;;  %v7833_v40 = vld [vmem:[#allocation4 + $0x604] ss:$8 sps:$4 sm:$0xff]  }
 0x2c6   :  { %v9997_v24 = vpop.f32.mrf.mxu0  ;;  %5032 = vmatpush1.bf16.msra.mxu1 %v7810_v10  ;;  %4992 = vmatprep.subr.bf16.mxu0 %v7815_v54  ;;  %v1786_v26 = vadd.f32 %v9949_v60, %v9732_v31  ;;  %v1979_v46 = vadd.f32 %v9955_v9, %v9738_v28  ;;  %v7822_v21 = vld [vmem:[#allocation4 + $0x720] ss:$8 sps:$4 sm:$0xff]   ;;  %v7827_v10 = vld [vmem:[#allocation4 + $0x614] ss:$8 sps:$4 sm:$0xff]   ;;  %v3059_v54 = vadd.f32 %v3058_v22, %v2290_v4  ;;  %v2321_v3 = vmax.f32 %v1782_v11, 0.0 }
 0x2c7   :  { %v10001_v39 = vpop.f32.mrf.mxu1  ;;  %5033 = vmatprep.subr.bf16.mxu1 %v7818_v44  ;;  %v3133_v45 = vadd.f32 %v3132_v58, %v2292_v0  ;;  %v1788_v19 = vadd.f32 %v9961_v2, %v9744_v13  ;;  %v3023_v60 = vadd.f32 %v3022_v34, %v2305_v30  ;;  %v3097_v44 = vadd.f32 %v3096_v33, %v2307_v53  ;;  %v7825_v2 = vld [vmem:[#allocation4 + $0x610] ss:$8 sps:$4 sm:$0xff]   ;;  %v7836_v0 = vld [vmem:[#allocation4 + $0x704] ss:$8 sps:$4 sm:$0xff]  }
 0x2c8   :  { %v10005_v59 = vpop.f32.mrf.mxu0  ;;  %v2323_v6 = vmax.f32 %v1975_v23, 0.0  ;;  %v1981_v9 = vadd.f32 %v9965_v48, %v9748_v38  ;;  %v3060_v16 = vadd.f32 %v3059_v54, %v2306_v14  ;;  %v2322_v20 = vmax.f32 %v1784_v57, 0.0  ;;  %v7828_v48 = vld [vmem:[#allocation4 + $0x710] ss:$8 sps:$4 sm:$0xff]   ;;  %v7842_v54 = vld [vmem:[#allocation4 + $0x7f4] ss:$8 sps:$4 sm:$0xff]  }
 0x2c9   :  { %v10011_v51 = vpop.f32.mrf.mxu1  ;;  %4993 = vmatpush1.bf16.msra.mxu0 %v7813_v35  ;;  %v2324_v41 = vmax.f32 %v1977_v52, 0.0  ;;  %v1792_v27 = vadd.f32 %v9969_v12, %v9732_v31  ;;  %v3134_v49 = vadd.f32 %v3133_v45, %v2308_v15  ;;  %v2337_v35 = vmax.f32 %v1786_v26, 0.0  ;;  %v7839_v15 = vld [vmem:[#allocation4 + $0x6f4] ss:$8 sps:$4 sm:$0xff]  }
 0x2ca   :  { %v10017_v61 = vpop.f32.mrf.mxu0  ;;  %5034 = vmatpush1.bf16.msra.mxu1 %v7816_v43  ;;  %4994 = vmatprep.subr.bf16.mxu0 %v7821_v25  ;;  %v2339_v29 = vmax.f32 %v1979_v46, 0.0  ;;  %v1985_v37 = vadd.f32 %v9973_v5, %v9738_v28  ;;  %v3024_v43 = vadd.f32 %v3023_v60, %v2321_v3  ;;  %v2338_v25 = vmax.f32 %v1788_v19, 0.0 }
 0x2cb   :  { %v10021_v63 = vpop.f32.mrf.mxu1  ;;  %5035 = vmatprep.subr.bf16.mxu1 %v7824_v32  ;;  %v1794_v12 = vadd.f32 %v9977_v36, %v9744_v13  ;;  %v1987_v22 = vadd.f32 %v9983_v50, %v9748_v38  ;;  %v3098_v11 = vadd.f32 %v3097_v44, %v2323_v6  ;;  %v2340_v32 = vmax.f32 %v1981_v9, 0.0  ;;  %v7831_v50 = vld [vmem:[#allocation4 + $0x600] ss:$8 sps:$4 sm:$0xff]  }
 0x2cc   :  { %v10025_v18 = vpop.f32.mrf.mxu0  ;;  %v1796_v5 = vadd.f32 %v9989_v8, %v9732_v31  ;;  %v1989_v58 = vadd.f32 %v9993_v17, %v9738_v28  ;;  %v3061_v53 = vadd.f32 %v3060_v16, %v2322_v20  ;;  %v3135_v23 = vadd.f32 %v3134_v49, %v2324_v41  ;;  %v7834_v17 = vld [vmem:[#allocation4 + $0x700] ss:$8 sps:$4 sm:$0xff]   ;;  %v7840_v49 = vld [vmem:[#allocation4 + $0x7f0] ss:$8 sps:$4 sm:$0xff]  }
 0x2cd   :  { %v1998_v56 = vpop.f32.mrf.mxu1  ;;  %4995 = vmatpush1.bf16.msra.mxu0 %v7819_v62  ;;  %v2353_v34 = vmax.f32 %v1792_v27, 0.0  ;;  %v1798_v36 = vadd.f32 %v9997_v24, %v9744_v13  ;;  %v3025_v57 = vadd.f32 %v3024_v43, %v2337_v35  ;;  %v3099_v52 = vadd.f32 %v3098_v11, %v2339_v29  ;;  %v7845_v35 = vld [vmem:[#allocation4 + $0x6e4] ss:$8 sps:$4 sm:$0xff]  }
 0x2ce   :  { %v10031_v7 = vpop.f32.mrf.mxu0  ;;  %5036 = vmatpush1.bf16.msra.mxu1 %v7822_v21  ;;  %4996 = vmatprep.subr.bf16.mxu0 %v7827_v10  ;;  %v2355_v62 = vmax.f32 %v1985_v37, 0.0  ;;  %v1991_v33 = vadd.f32 %v10001_v39, %v9748_v38  ;;  %v3062_v26 = vadd.f32 %v3061_v53, %v2338_v25  ;;  %v2354_v46 = vmax.f32 %v1794_v12, 0.0 }
 0x2cf   :  { %v2000_v4 = vpop.f32.mrf.mxu1  ;;  %5037 = vmatprep.subr.bf16.mxu1 %v7830_v42  ;;  %v2356_v21 = vmax.f32 %v1987_v22, 0.0  ;;  %v1802_v24 = vadd.f32 %v10005_v59, %v9732_v31  ;;  %v3136_v45 = vadd.f32 %v3135_v23, %v2340_v32  ;;  %v2369_v3 = vmax.f32 %v1796_v5, 0.0  ;;  %v7837_v59 = vld [vmem:[#allocation4 + $0x6f0] ss:$8 sps:$4 sm:$0xff]  }
 0x2d0   :  { %v1811_v30 = vpop.f32.mrf.mxu0  ;;  %v2371_v19 = vmax.f32 %v1989_v58, 0.0  ;;  %v1995_v39 = vadd.f32 %v10011_v51, %v9738_v28  ;;  %v3026_v60 = vadd.f32 %v3025_v57, %v2353_v34  ;;  %v2370_v44 = vmax.f32 %v1798_v36, 0.0  ;;  %v7843_v58 = vld [vmem:[#allocation4 + $0x6e0] ss:$8 sps:$4 sm:$0xff]   ;;  %v7851_v57 = vld [vmem:[#allocation4 + $0x6d4] ss:$8 sps:$4 sm:$0xff]  }
 0x2d1   :  { %v2004_v14 = vpop.f32.mrf.mxu1  ;;  %4997 = vmatpush1.bf16.msra.mxu0 %v7825_v2  ;;  %v1804_v6 = vadd.f32 %v10017_v61, %v9744_v13  ;;  %v1997_v9 = vadd.f32 %v10021_v63, %v9748_v38  ;;  %v3100_v20 = vadd.f32 %v3099_v52, %v2355_v62  ;;  %v2372_v41 = vmax.f32 %v1991_v33, 0.0 }
 0x2d2   :  { %v10045_v8 = vpop.f32.mrf.mxu0  ;;  %5038 = vmatpush1.bf16.msra.mxu1 %v7828_v48  ;;  %4998 = vmatprep.subr.bf16.mxu0 %v7833_v40  ;;  %v1806_v27 = vadd.f32 %v10025_v18, %v9732_v31  ;;  %v1999_v2 = vadd.f32 %v1998_v56, %v9738_v28  ;;  %v3063_v29 = vadd.f32 %v3062_v26, %v2354_v46  ;;  %v2385_v37 = vmax.f32 %v1802_v24, 0.0  ;;  %v7848_v40 = vld [vmem:[#allocation4 + $0x7e4] ss:$8 sps:$4 sm:$0xff]  }
 0x2d3   :  { %v2006_v10 = vpop.f32.mrf.mxu1  ;;  %5039 = vmatprep.subr.bf16.mxu1 %v7836_v0  ;;  %v3137_v61 = vadd.f32 %v3136_v45, %v2356_v21  ;;  %v1808_v63 = vadd.f32 %v10031_v7, %v9744_v13  ;;  %v3027_v43 = vadd.f32 %v3026_v60, %v2369_v3  ;;  %v3101_v25 = vadd.f32 %v3100_v20, %v2371_v19 }
 0x2d4   :  { %v1815_v42 = vpop.f32.mrf.mxu0  ;;  %v2387_v12 = vmax.f32 %v1995_v39, 0.0  ;;  %v2001_v18 = vadd.f32 %v2000_v4, %v9748_v38  ;;  %v3064_v22 = vadd.f32 %v3063_v29, %v2370_v44  ;;  %v2386_v0 = vmax.f32 %v1804_v6, 0.0 }
 0x2d5   :  { %v2008_v16 = vpop.f32.mrf.mxu1  ;;  %4999 = vmatpush1.bf16.msra.mxu0 %v7831_v50  ;;  %v2388_v11 = vmax.f32 %v1997_v9, 0.0  ;;  %v1812_v32 = vadd.f32 %v1811_v30, %v9732_v31  ;;  %v3138_v53 = vadd.f32 %v3137_v61, %v2372_v41  ;;  %v2401_v23 = vmax.f32 %v1806_v27, 0.0  ;;  %v7846_v50 = vld [vmem:[#allocation4 + $0x7e0] ss:$8 sps:$4 sm:$0xff]   ;;  %v7857_v9 = vld [vmem:[#allocation4 + $0x6c4] ss:$8 sps:$4 sm:$0xff]  }
 0x2d6   :  { %v1817_v51 = vpop.f32.mrf.mxu0  ;;  %5040 = vmatpush1.bf16.msra.mxu1 %v7834_v17  ;;  %5000 = vmatprep.subr.bf16.mxu0 %v7839_v15  ;;  %v2403_v7 = vmax.f32 %v1999_v2, 0.0  ;;  %v2005_v34 = vadd.f32 %v2004_v14, %v9738_v28  ;;  %v3028_v4 = vadd.f32 %v3027_v43, %v2385_v37  ;;  %v2402_v52 = vmax.f32 %v1808_v63, 0.0  ;;  %v7854_v17 = vld [vmem:[#allocation4 + $0x7d4] ss:$8 sps:$4 sm:$0xff]   ;;  %v7860_v2 = vld [vmem:[#allocation4 + $0x7c4] ss:$8 sps:$4 sm:$0xff]  }
 0x2d7   :  { %v2010_v48 = vpop.f32.mrf.mxu1  ;;  %5041 = vmatprep.subr.bf16.mxu1 %v7842_v54  ;;  %v1814_v62 = vadd.f32 %v10045_v8, %v9744_v13  ;;  %v2007_v30 = vadd.f32 %v2006_v10, %v9748_v38  ;;  %v3102_v15 = vadd.f32 %v3101_v25, %v2387_v12  ;;  %v2404_v26 = vmax.f32 %v2001_v18, 0.0  ;;  %v7849_v8 = vld [vmem:[#allocation4 + $0x6d0] ss:$8 sps:$4 sm:$0xff]   ;;  %v7855_v25 = vld [vmem:[#allocation4 + $0x6c0] ss:$8 sps:$4 sm:$0xff]  }
 0x2d8   :  { %v1821_v56 = vpop.f32.mrf.mxu0  ;;  %v1816_v46 = vadd.f32 %v1815_v42, %v9732_v31  ;;  %v2009_v14 = vadd.f32 %v2008_v16, %v9738_v28  ;;  %v3065_v24 = vadd.f32 %v3064_v22, %v2386_v0  ;;  %v3139_v54 = vadd.f32 %v3138_v53, %v2388_v11  ;;  %v7852_v42 = vld [vmem:[#allocation4 + $0x7d0] ss:$8 sps:$4 sm:$0xff]   ;;  %v7858_v11 = vld [vmem:[#allocation4 + $0x7c0] ss:$8 sps:$4 sm:$0xff]  }
 0x2d9   :  { %v2014_v5 = vpop.f32.mrf.mxu1  ;;  %5001 = vmatpush2.bf16.msra.mxu0 %v7837_v59  ;;  %v2417_v45 = vmax.f32 %v1812_v32, 0.0  ;;  %v1818_v3 = vadd.f32 %v1817_v51, %v9744_v13  ;;  %v3029_v39 = vadd.f32 %v3028_v4, %v2401_v23  ;;  %v3103_v10 = vadd.f32 %v3102_v15, %v2403_v7  ;;  %v7863_v32 = vld [vmem:[#allocation4 + $0x6b4] ss:$8 sps:$4 sm:$0xff]  }
 0x2da   :  { %v1823_v36 = vpop.f32.mrf.mxu0  ;;  %5042 = vmatpush2.bf16.msra.mxu1 %v7840_v49  ;;  %5002 = vmatprep.subr.bf16.mxu0 %v7845_v35  ;;  %v2419_v60 = vmax.f32 %v2005_v34, 0.0  ;;  %v2011_v44 = vadd.f32 %v2010_v48, %v9748_v38  ;;  %v3066_v16 = vadd.f32 %v3065_v24, %v2402_v52  ;;  %v2418_v59 = vmax.f32 %v1814_v62, 0.0  ;;  %v7866_v34 = vld [vmem:[#allocation4 + $0x7b4] ss:$8 sps:$4 sm:$0xff]  }
 0x2db   :  { %v2016_v33 = vpop.f32.mrf.mxu1  ;;  %5043 = vmatprep.subr.bf16.mxu1 %v7848_v40  ;;  %v2420_v20 = vmax.f32 %v2007_v30, 0.0  ;;  %v1822_v41 = vadd.f32 %v1821_v56, %v9732_v31  ;;  %v3140_v51 = vadd.f32 %v3139_v54, %v2404_v26  ;;  %v2433_v49 = vmax.f32 %v1816_v46, 0.0  ;;  %v7861_v26 = vld [vmem:[#allocation4 + $0x6b0] ss:$8 sps:$4 sm:$0xff]  }
 0x2dc   :  { %v1825_v21 = vpop.f32.mrf.mxu0  ;;  %v2435_v35 = vmax.f32 %v2009_v14, 0.0  ;;  %v2015_v29 = vadd.f32 %v2014_v5, %v9738_v28  ;;  %v3030_v37 = vadd.f32 %v3029_v39, %v2417_v45  ;;  %v2434_v63 = vmax.f32 %v1818_v3, 0.0  ;;  %v7864_v45 = vld [vmem:[#allocation4 + $0x7b0] ss:$8 sps:$4 sm:$0xff]   ;;  %v7869_v3 = vld [vmem:[#allocation4 + $0x6a4] ss:$8 sps:$4 sm:$0xff]  }
 0x2dd   :  { %v2018_v19 = vpop.f32.mrf.mxu1  ;;  %5003 = vmatpush2.bf16.msra.mxu0 %v7843_v58  ;;  %v1824_v48 = vadd.f32 %v1823_v36, %v9744_v13  ;;  %v2017_v40 = vadd.f32 %v2016_v33, %v9748_v38  ;;  %v3104_v12 = vadd.f32 %v3103_v10, %v2419_v60  ;;  %v2436_v18 = vmax.f32 %v2011_v44, 0.0  ;;  %v7872_v44 = vld [vmem:[#allocation4 + $0x7a4] ss:$8 sps:$4 sm:$0xff]  }
 0x2de   :  { %v1827_v6 = vpop.f32.mrf.mxu0  ;;  %5044 = vmatpush2.bf16.msra.mxu1 %v7846_v50  ;;  %5004 = vmatprep.subr.bf16.mxu0 %v7851_v57  ;;  %v1826_v56 = vadd.f32 %v1825_v21, %v9732_v31  ;;  %v2019_v22 = vadd.f32 %v2018_v19, %v9738_v28  ;;  %v3067_v5 = vadd.f32 %v3066_v16, %v2418_v59  ;;  %v2449_v53 = vmax.f32 %v1822_v41, 0.0 }
 0x2df   :  { %v2020_v27 = vpop.f32.mrf.mxu1  ;;  %5045 = vmatprep.subr.bf16.mxu1 %v7854_v17  ;;  %v3141_v58 = vadd.f32 %v3140_v51, %v2420_v20  ;;  %v1828_v23 = vadd.f32 %v1827_v6, %v9744_v13  ;;  %v3031_v36 = vadd.f32 %v3030_v37, %v2433_v49  ;;  %v3105_v50 = vadd.f32 %v3104_v12, %v2435_v35  ;;  %v7867_v49 = vld [vmem:[#allocation4 + $0x6a0] ss:$8 sps:$4 sm:$0xff]  }
 0x2e0   :  { %v1831_v61 = vpop.f32.mrf.mxu0  ;;  %v2451_v57 = vmax.f32 %v2015_v29, 0.0  ;;  %v2021_v4 = vadd.f32 %v2020_v27, %v9748_v38  ;;  %v3068_v62 = vadd.f32 %v3067_v5, %v2434_v63  ;;  %v2450_v30 = vmax.f32 %v1824_v48, 0.0  ;;  %v7870_v48 = vld [vmem:[#allocation4 + $0x7a0] ss:$8 sps:$4 sm:$0xff]  }
 0x2e1   :  { %v2024_v43 = vpop.f32.mrf.mxu1  ;;  %5005 = vmatpush2.bf16.msra.mxu0 %v7849_v8  ;;  %v2452_v33 = vmax.f32 %v2017_v40, 0.0  ;;  %v1832_v17 = vadd.f32 %v1831_v61, %v9732_v31  ;;  %v3142_v46 = vadd.f32 %v3141_v58, %v2436_v18  ;;  %v2465_v14 = vmax.f32 %v1826_v56, 0.0  ;;  %v7875_v40 = vld [vmem:[#allocation4 + $0x694] ss:$8 sps:$4 sm:$0xff]  }
 0x2e2   :  { %v1833_v0 = vpop.f32.mrf.mxu0  ;;  %5046 = vmatpush2.bf16.msra.mxu1 %v7852_v42  ;;  %5006 = vmatprep.subr.bf16.mxu0 %v7857_v9  ;;  %v2467_v21 = vmax.f32 %v2019_v22, 0.0  ;;  %v2025_v24 = vadd.f32 %v2024_v43, %v9738_v28  ;;  %v3032_v19 = vadd.f32 %v3031_v36, %v2449_v53  ;;  %v2466_v8 = vmax.f32 %v1828_v23, 0.0  ;;  %v7878_v22 = vld [vmem:[#allocation4 + $0x794] ss:$8 sps:$4 sm:$0xff]  }
 0x2e3   :  { %v2026_v7 = vpop.f32.mrf.mxu1  ;;  %5047 = vmatprep.subr.bf16.mxu1 %v7860_v2  ;;  %v1834_v39 = vadd.f32 %v1833_v0, %v9744_v13  ;;  %v3106_v6 = vadd.f32 %v3105_v50, %v2451_v57  ;;  %v2468_v42 = vmax.f32 %v2021_v4, 0.0  ;;  %v3069_v20 = vadd.f32 %v3068_v62, %v2450_v30  ;;  %v7873_v50 = vld [vmem:[#allocation4 + $0x690] ss:$8 sps:$4 sm:$0xff]  }
 0x2e4   :  { %v1835_v52 = vpop.f32.mrf.mxu0  ;;  %v2027_v10 = vadd.f32 %v2026_v7, %v9748_v38  ;;  %v3143_v41 = vadd.f32 %v3142_v46, %v2452_v33  ;;  %v2481_v27 = vmax.f32 %v1832_v17, 0.0  ;;  %v3033_v35 = vadd.f32 %v3032_v19, %v2465_v14  ;;  %v7876_v33 = vld [vmem:[#allocation4 + $0x790] ss:$8 sps:$4 sm:$0xff]   ;;  %v7881_v17 = vld [vmem:[#allocation4 + $0x684] ss:$8 sps:$4 sm:$0xff]  }
 0x2e5   :  { %v2028_v15 = vpop.f32.mrf.mxu1  ;;  %5007 = vmatpush2.bf16.msra.mxu0 %v7855_v25  ;;  %v1836_v9 = vadd.f32 %v1835_v52, %v9732_v31  ;;  %v3107_v29 = vadd.f32 %v3106_v6, %v2467_v21  ;;  %v2483_v61 = vmax.f32 %v2025_v24, 0.0  ;;  %v3070_v43 = vadd.f32 %v3069_v20, %v2466_v8  ;;  %v7884_v24 = vld [vmem:[#allocation4 + $0x784] ss:$8 sps:$4 sm:$0xff]  }
 0x2e6   :  { %v1837_v54 = vpop.f32.mrf.mxu0  ;;  %5048 = vmatpush2.bf16.msra.mxu1 %v7858_v11  ;;  %5008 = vmatprep.subr.bf16.mxu0 %v7863_v32  ;;  %v2029_v16 = vadd.f32 %v2028_v15, %v9738_v28  ;;  %v2482_v25 = vmax.f32 %v1834_v39, 0.0  ;;  %v2484_v12 = vmax.f32 %v2027_v10, 0.0  ;;  %v3144_v0 = vadd.f32 %v3143_v41, %v2468_v42  ;;  %v7879_v42 = vld [vmem:[#allocation4 + $0x680] ss:$8 sps:$4 sm:$0xff]  }
 0x2e7   :  { %v2030_v60 = vpop.f32.mrf.mxu1  ;;  %5049 = vmatprep.subr.bf16.mxu1 %v7866_v34  ;;  %v1838_v2 = vadd.f32 %v1837_v54, %v9744_v13  ;;  %v2497_v11 = vmax.f32 %v1836_v9, 0.0  ;;  %v3034_v53 = vadd.f32 %v3033_v35, %v2481_v27  ;;  %v3108_v57 = vadd.f32 %v3107_v29, %v2483_v61  ;;  %v7882_v27 = vld [vmem:[#allocation4 + $0x780] ss:$8 sps:$4 sm:$0xff]  }
 0x2e8   :  { %v1841_v59 = vpop.f32.mrf.mxu0  ;;  %v2031_v37 = vadd.f32 %v2030_v60, %v9748_v38  ;;  %v2499_v32 = vmax.f32 %v2029_v16, 0.0  ;;  %v3071_v15 = vadd.f32 %v3070_v43, %v2482_v25 }
 0x2e9   :  { %v2034_v51 = vpop.f32.mrf.mxu1  ;;  %5009 = vmatpush2.bf16.msra.mxu0 %v7861_v26  ;;  %v1842_v18 = vadd.f32 %v1841_v59, %v9732_v31  ;;  %v2498_v23 = vmax.f32 %v1838_v2, 0.0  ;;  %v3145_v26 = vadd.f32 %v3144_v0, %v2484_v12  ;;  %v3035_v54 = vadd.f32 %v3034_v53, %v2497_v11 }
 0x2ea   :  { %v1843_v63 = vpop.f32.mrf.mxu0  ;;  %5050 = vmatpush2.bf16.msra.mxu1 %v7864_v45  ;;  %5010 = vmatprep.subr.bf16.mxu0 %v7869_v3  ;;  %v2035_v5 = vadd.f32 %v2034_v51, %v9738_v28  ;;  %v2500_v4 = vmax.f32 %v2031_v37, 0.0  ;;  %v3109_v45 = vadd.f32 %v3108_v57, %v2499_v32 }
 0x2eb   :  { %v2036_v56 = vpop.f32.mrf.mxu1  ;;  %5051 = vmatprep.subr.bf16.mxu1 %v7872_v44  ;;  %v1844_v7 = vadd.f32 %v1843_v63, %v9744_v13  ;;  %v2513_v46 = vmax.f32 %v1842_v18, 0.0  ;;  %v3072_v39 = vadd.f32 %v3071_v15, %v2498_v23 }
 0x2ec   :  { %v1845_v58 = vpop.f32.mrf.mxu0  ;;  %v2037_v52 = vadd.f32 %v2036_v56, %v9748_v38  ;;  %v2515_v3 = vmax.f32 %v2035_v5, 0.0  ;;  %v3146_v9 = vadd.f32 %v3145_v26, %v2500_v4 }
 0x2ed   :  { %v1846_v34 = vadd.f32 %v1845_v58, %v9732_v31  ;;  %v2038_v36 = vpop.f32.mrf.mxu1  ;;  %5011 = vmatpush2.bf16.msra.mxu0 %v7867_v49  ;;  %v2514_v10 = vmax.f32 %v1844_v7, 0.0  ;;  %v3036_v2 = vadd.f32 %v3035_v54, %v2513_v46 }
 0x2ee   :  { %v2039_v62 = vadd.f32 %v2038_v36, %v9738_v28  ;;  %v1847_v30 = vpop.f32.mrf.mxu0  ;;  %5052 = vmatpush2.bf16.msra.mxu1 %v7870_v48  ;;  %5012 = vmatprep.subr.bf16.mxu0 %v7875_v40  ;;  %v2516_v16 = vmax.f32 %v2037_v52, 0.0  ;;  %v3110_v61 = vadd.f32 %v3109_v45, %v2515_v3 }
 0x2ef   :  { %v1848_v14 = vadd.f32 %v1847_v30, %v9744_v13  ;;  %v2040_v21 = vpop.f32.mrf.mxu1  ;;  %5053 = vmatprep.subr.bf16.mxu1 %v7878_v22  ;;  %v2529_v60 = vmax.f32 %v1846_v34, 0.0  ;;  %v3073_v43 = vadd.f32 %v3072_v39, %v2514_v10 }
 0x2f0   :  { %v2041_v19 = vadd.f32 %v2040_v21, %v9748_v38  ;;  %v1851_v8 = vpop.f32.mrf.mxu0  ;;  %v2531_v59 = vmax.f32 %v2039_v62, 0.0  ;;  %v3147_v22 = vadd.f32 %v3146_v9, %v2516_v16 }
 0x2f1   :  { %v1852_v44 = vadd.f32 %v1851_v8, %v9732_v31  ;;  %v2044_v6 = vpop.f32.mrf.mxu1  ;;  %5013 = vmatpush2.bf16.msra.mxu0 %v7873_v50  ;;  %v2530_v51 = vmax.f32 %v1848_v14, 0.0  ;;  %v3037_v25 = vadd.f32 %v3036_v2, %v2529_v60 }
 0x2f2   :  { %v2045_v20 = vadd.f32 %v2044_v6, %v9738_v28  ;;  %v1853_v41 = vpop.f32.mrf.mxu0  ;;  %5054 = vmatpush2.bf16.msra.mxu1 %v7876_v33  ;;  %5014 = vmatprep.subr.bf16.mxu0 %v7881_v17  ;;  %v2532_v37 = vmax.f32 %v2041_v19, 0.0  ;;  %v3111_v0 = vadd.f32 %v3110_v61, %v2531_v59 }
 0x2f3   :  { %v2545_v49 = vmax.f32 %v1852_v44, 0.0  ;;  %v1854_v35 = vadd.f32 %v1853_v41, %v9744_v13  ;;  %v2046_v29 = vpop.f32.mrf.mxu1  ;;  %5055 = vmatprep.subr.bf16.mxu1 %v7884_v24  ;;  %v3074_v58 = vadd.f32 %v3073_v43, %v2530_v51  ;;  %v10112_v41 = vld [vmem:[#allocation7 + $0xf8] sm:$0xff] }
 0x2f4   :  { %v2547_v63 = vmax.f32 %v2045_v20, 0.0  ;;  %v2047_v48 = vadd.f32 %v2046_v29, %v9748_v38  ;;  %v1855_v40 = vpop.f32.mrf.mxu0  ;;  %v3148_v36 = vadd.f32 %v3147_v22, %v2532_v37  ;;  %11871 = vst [vmem:[#allocation16_spill] sm:$0xff] %v10112_v41 }
 0x2f5   :  { %v2546_v12 = vmax.f32 %v1854_v35, 0.0  ;;  %v1856_v18 = vadd.f32 %v1855_v40, %v9732_v31  ;;  %v2048_v56 = vpop.f32.mrf.mxu1  ;;  %5015 = vmatpush2.bf16.msra.mxu0 %v7879_v42  ;;  %v3038_v53 = vadd.f32 %v3037_v25, %v2545_v49 }
 0x2f6   :  { %v2548_v11 = vmax.f32 %v2047_v48, 0.0  ;;  %v2049_v32 = vadd.f32 %v2048_v56, %v9738_v28  ;;  %v1857_v5 = vpop.f32.mrf.mxu0  ;;  %5056 = vmatpush2.bf16.msra.mxu1 %v7882_v27  ;;  %v3112_v50 = vadd.f32 %v3111_v0, %v2547_v63  ;;  %v11869_v28 = vrot.slane %v9879_v47, %v11867_v55  ;;  %5146 = vmatprep.subr.mxu0 %v10112_v41 }
 0x2f7   :  { %v2561_v23 = vmax.f32 %v1856_v18, 0.0  ;;  %v1858_v7 = vadd.f32 %v1857_v5, %v9744_v13  ;;  %v2050_v34 = vpop.f32.mrf.mxu1  ;;  %v3075_v52 = vadd.f32 %v3074_v58, %v2546_v12 }
 0x2f8   :  { %v2563_v57 = vmax.f32 %v2049_v32, 0.0  ;;  %v2051_v31 = vadd.f32 %v2050_v34, %v9748_v38  ;;  %v4772_v4 = vpop.f32.mrf.mxu0  ;;  %v3149_v15 = vadd.f32 %v3148_v36, %v2548_v11  ;;  %v11870_v38 = vrot.slane %v9879_v47, %v11868_v1  ;;  %v10119_v34 = vld [vmem:[#allocation7 + $0xe0] sm:$0xff]  ;;  %v10122_v36 = vld [vmem:[#allocation7 + $0xd8] sm:$0xff] }
 0x2f9   :  { %v3039_v62 = vadd.f32 %v3038_v53, %v2561_v23  ;;  %v2562_v30 = vmax.f32 %v1858_v7, 0.0  ;;  %v4773_v33 = vadd.f32 %v4772_v4, %v11869_v28  ;;  %v4813_v17 = vpop.f32.mrf.mxu1  ;;  %v10115_v53 = vld [vmem:[#allocation7 + $0xf0] sm:$0xff]  ;;  %v10117_v7 = vld [vmem:[#allocation7 + $0xe8] sm:$0xff]  ;;  %v10136_v4 = vld [vmem:[#allocation7 + $0xc0] sm:$0xff] }
 0x2fa   :  { %v3113_v26 = vadd.f32 %v3112_v50, %v2563_v57  ;;  %v2564_v46 = vmax.f32 %v2051_v31, 0.0  ;;  %v4774_v14 = vpop.f32.mrf.mxu0  ;;  %v10125_v50 = vld [vmem:[#allocation7 + $0xd0] sm:$0xff]  ;;  %v10128_v57 = vld [vmem:[#allocation7 + $0xc8] sm:$0xff]  ;;  %v10133_v31 = vld [vmem:[%s11598_s6 + $0x38] sm:$0xff] }
 0x2fb   :  { %v3040_v13 = vrot.slane %v3039_v62, 4  ;;  %v3076_v21 = vadd.f32 %v3075_v52, %v2562_v30  ;;  %v10105_v24 = vadd.f32 %v4813_v17, %v4773_v33  ;;  %v4775_v54 = vadd.f32 %v4774_v14, %v11870_v38  ;;  %v4815_v45 = vpop.f32.mrf.mxu1  ;;  %11872 = vst [vmem:[#allocation14_spill] sm:$0xff] %v10133_v31  ;;  %5244 = vmatprep.subr.mxu1 %v10133_v31  ;;  %v10140_v52 = vld [vmem:[#allocation7 + $0xb8] sm:$0xff]  ;;  %v10146_v30 = vld [vmem:[#allocation7 + $0xa8] sm:$0xff]  ;;  %v10149_v28 = vld [vmem:[#allocation7 + $0xa0] sm:$0xff] }
 0x2fc   :  { %v3114_v3 = vrot.slane %v3113_v26, 4  ;;  %v3150_v19 = vadd.f32 %v3149_v15, %v2564_v46  ;;  %v4776_v8 = vpop.f32.mrf.mxu0  ;;  %v10152_v33 = vld [vmem:[#allocation7 + $0x98] sm:$0xff]  ;;  %v10155_v17 = vld [vmem:[#allocation7 + $0x90] sm:$0xff]  ;;  %v10158_v15 = vld [vmem:[#allocation7 + $0x88] sm:$0xff] }
 0x2fd   :  { %v3041_v39 = vadd.f32 %v3040_v13, %v3039_v62  ;;  %v3077_v10 = vrot.slane %v3076_v21, 4  ;;  %v10110_v60 = vadd.f32 %v4815_v45, %v4775_v54  ;;  %v4817_v44 = vpop.f32.mrf.mxu1  ;;  %v10143_v62 = vld [vmem:[#allocation7 + $0xb0] sm:$0xff]  ;;  %v10164_v46 = vld [vmem:[#allocation7 + $0x78] sm:$0xff]  ;;  %v10170_v13 = vld [vmem:[#allocation7 + $0x68] sm:$0xff] }
 0x2fe   :  { %v3115_v6 = vadd.f32 %v3114_v3, %v3113_v26  ;;  %v3151_v42 = vrot.slane %v3150_v19, 4  ;;  %v4777_v9 = vpop.f32.mrf.mxu0  ;;  %v10161_v26 = vld [vmem:[#allocation7 + $0x80] sm:$0xff]  ;;  %v10167_v14 = vld [vmem:[#allocation7 + $0x70] sm:$0xff]  ;;  %v10176_v38 = vld [vmem:[#allocation7 + $0x58] sm:$0xff] }
 0x2ff   :  { %v3042_v16 = vrot.slane %v3041_v39, 2  ;;  %v3078_v59 = vadd.f32 %v3077_v10, %v3076_v21  ;;  %v4818_v20 = vpop.f32.mrf.mxu1  ;;  %v10173_v21 = vld [vmem:[#allocation7 + $0x60] sm:$0xff]  ;;  %v10179_v54 = vld [vmem:[#allocation7 + $0x50] sm:$0xff]  ;;  %v10182_v45 = vld [vmem:[#allocation7 + $0x48] sm:$0xff] }
 0x300   :  { %v3116_v27 = vrot.slane %v3115_v6, 2  ;;  %v3152_v47 = vadd.f32 %v3151_v42, %v3150_v19  ;;  %v10185_v3 = vld [vmem:[#allocation7 + $0x40] sm:$0xff]  ;;  %v10188_v19 = vld [vmem:[#allocation7 + $0x38] sm:$0xff]  ;;  %v10191_v8 = vld [vmem:[#allocation7 + $0x30] sm:$0xff] }
 0x301   :  { %v3043_v2 = vadd.f32 %v3042_v16, %v3041_v39  ;;  %v3079_v51 = vrot.slane %v3078_v59, 2  ;;  %v10194_v39 = vld [vmem:[#allocation7 + $0x28] sm:$0xff]  ;;  %v10197_v10 = vld [vmem:[#allocation7 + $0x20] sm:$0xff]  ;;  %v10200_v44 = vld [vmem:[#allocation7 + $0x18] sm:$0xff] }
 0x302   :  { %v3117_v49 = vadd.f32 %v3116_v27, %v3115_v6  ;;  %v3153_v35 = vrot.slane %v3152_v47, 2  ;;  %v10203_v6 = vld [vmem:[#allocation7 + $0x10] sm:$0xff]  ;;  %v10206_v42 = vld [vmem:[#allocation7 + $0x8] sm:$0xff]  ;;  %v10209_v9 = vld [vmem:[#allocation7] sm:$0xff] }
 0x303   :  { %v3044_v29 = vrot.slane %v3043_v2, 1  ;;  %v3080_v61 = vadd.f32 %v3079_v51, %v3078_v59  ;;  %v10212_v16 = vld [vmem:[#allocation7 + $0x1f8] sm:$0xff]  ;;  %v10215_v59 = vld [vmem:[#allocation7 + $0x1f0] sm:$0xff]  ;;  %v10218_v20 = vld [vmem:[#allocation7 + $0x1e8] sm:$0xff] }
 0x304   :  { %v3118_v37 = vrot.slane %v3117_v49, 1  ;;  %v3154_v63 = vadd.f32 %v3153_v35, %v3152_v47  ;;  %v10221_v27 = vld [vmem:[#allocation7 + $0x1e0] sm:$0xff]  ;;  %v10224_v47 = vld [vmem:[#allocation7 + $0x1d8] sm:$0xff]  ;;  %v10230_v51 = vld [vmem:[#allocation7 + $0x1c8] sm:$0xff] }
 0x305   :  { %v3045_v48 = vadd.f32 %v3044_v29, %v3043_v2  ;;  %v3081_v40 = vrot.slane %v3080_v61, 1  ;;  %v10227_v2 = vld [vmem:[#allocation7 + $0x1d0] sm:$0xff]  ;;  %11874 = vst [vmem:[#allocation17_spill] sm:$0xff] %v10230_v51  ;;  %v10236_v35 = vld [vmem:[#allocation7 + $0x1b8] sm:$0xff] }
 0x306   :  { %v3119_v43 = vadd.f32 %v3118_v37, %v3117_v49  ;;  %v3155_v25 = vrot.slane %v3154_v63, 1  ;;  %11873 = vst [vmem:[#allocation15_spill] sm:$0xff] %v10227_v2  ;;  %v10233_v49 = vld [vmem:[#allocation7 + $0x1c0] sm:$0xff]  ;;  %11876 = vst [vmem:[#allocation19_spill] sm:$0xff] %v10236_v35  ;;  %v10239_v29 = vld [vmem:[#allocation7 + $0x1b0] sm:$0xff] }
 0x307   :  { %v3082_v12 = vadd.f32 %v3081_v40, %v3080_v61  ;;  %v3170_v18 = vmul.f32 0.00390625, %v3045_v48  ;;  %11875 = vst [vmem:[#allocation18_spill] sm:$0xff] %v10233_v49  ;;  %11877 = vst [vmem:[#allocation20_spill] sm:$0xff] %v10239_v29  ;;  %v10242_v61 = vld [vmem:[#allocation7 + $0x1a8] sm:$0xff]  ;;  %v10245_v37 = vld [vmem:[#allocation7 + $0x1a0] sm:$0xff] }
 0x308   :  { %v3156_v56 = vadd.f32 %v3155_v25, %v3154_v63  ;;  %v3172_v22 = vmul.f32 0.00390625, %v3119_v43  ;;  %11878 = vst [vmem:[#allocation21_spill] sm:$0xff] %v10242_v61  ;;  %11879 = vst [vmem:[#allocation22_spill] sm:$0xff] %v10245_v37  ;;  %v10248_v63 = vld [vmem:[#allocation7 + $0x198] sm:$0xff]  ;;  %v10251_v40 = vld [vmem:[#allocation7 + $0x190] sm:$0xff] }
 0x309   :  { %v3171_v0 = vmul.f32 0.00390625, %v3082_v12  ;;  %v3186_v5 = vpack.c.bf16 %v3170_v18, %v3170_v18  ;;  %11880 = vst [vmem:[#allocation23_spill] sm:$0xff] %v10248_v63  ;;  %11881 = vst [vmem:[#allocation24_spill] sm:$0xff] %v10251_v40  ;;  %v10255_v12 = vld [vmem:[#allocation7 + $0x188] sm:$0xff] }
 0x30a   :  { %v3173_v11 = vmul.f32 0.00390625, %v3156_v56  ;;  %v3188_v23 = vpack.c.bf16 %v3172_v22, %v3172_v22  ;;  %11882 = vst [vmem:[#allocation25_spill] sm:$0xff] %v10255_v12  ;;  %v10258_v56 = vld [vmem:[#allocation7 + $0x180] sm:$0xff] }
 0x30b   :  { %v3187_v32 = vpack.c.bf16 %v3171_v0, %v3171_v0  ;;  %11883 = vst [vmem:[#allocation26_spill] sm:$0xff] %v10258_v56 }
 0x30c   :  { %v3189_v58 = vpack.c.bf16 %v3173_v11, %v3173_v11 }
 0x30d   :  { %5016 = vmatprep.mubr.bf16.mxu0 %v3187_v32  ;;  %v10264_v32 = vld [vmem:[#allocation7 + $0x178] sm:$0xff] }
 0x30e   :  { %5057 = vmatprep.mubr.bf16.mxu1 %v3189_v58  ;;  %5017 = vmatmul.mubr.bf16.vlgmr.msra.gmra.mxu0 %v3186_v5  ;;  %11884 = vst [vmem:[#allocation27_spill] sm:$0xff] %v10264_v32  ;;  %v10267_v5 = vld [vmem:[#allocation7 + $0x170] sm:$0xff] }
 0x30f   :  { %5058 = vmatmul.mubr.bf16.vlgmr.msra.gmra.mxu1 %v3188_v23  ;;  %5147 = vmatpush1.msra.mxu0 %v10115_v53  ;;  %11885 = vst [vmem:[#allocation28_spill] sm:$0xff] %v10267_v5 }
 0x310   :  { %5148 = vmatprep.subr.mxu0 %v10117_v7 }
 0x311   :  { %5149 = vmatpush1.msra.mxu0 %v10119_v34 }
 0x312   :  { %5150 = vmatprep.subr.mxu0 %v10122_v36 }
 0x313   :  { %5151 = vmatpush1.msra.mxu0 %v10125_v50 }
 0x314   :  { %5152 = vmatprep.subr.mxu0 %v10128_v57 }
 0x315   :  { %5153 = vmatpush1.msra.mxu0 %v10136_v4 }
 0x316   :  { %5154 = vmatprep.subr.mxu0 %v10140_v52 }
 0x317   :  { %5155 = vmatpush1.msra.mxu0 %v10143_v62 }
 0x318   :  { %5156 = vmatprep.subr.mxu0 %v10146_v30 }
 0x319   :  { %5157 = vmatpush1.msra.mxu0 %v10149_v28 }
 0x31a   :  { %5158 = vmatprep.subr.mxu0 %v10152_v33 }
 0x31b   :  { %5159 = vmatpush1.msra.mxu0 %v10155_v17 }
 0x31c   :  { %5160 = vmatprep.subr.mxu0 %v10158_v15 }
 0x31d   :  { %5161 = vmatpush1.msra.mxu0 %v10161_v26 }
 0x31e   :  { %5162 = vmatprep.subr.mxu0 %v10164_v46 }
 0x31f   :  { %5163 = vmatpush1.msra.mxu0 %v10167_v14 }
 0x320   :  { %5164 = vmatprep.subr.mxu0 %v10170_v13 }
 0x321   :  { %5165 = vmatpush1.msra.mxu0 %v10173_v21 }
 0x322   :  { %5166 = vmatprep.subr.mxu0 %v10176_v38 }
 0x323   :  { %5167 = vmatpush1.msra.mxu0 %v10179_v54 }
 0x324   :  { %5168 = vmatprep.subr.mxu0 %v10182_v45 }
 0x325   :  { %5169 = vmatpush1.msra.mxu0 %v10185_v3 }
 0x326   :  { %5170 = vmatprep.subr.mxu0 %v10188_v19 }
 0x327   :  { %5171 = vmatpush1.msra.mxu0 %v10191_v8 }
 0x328   :  { %5172 = vmatprep.subr.mxu0 %v10194_v39 }
 0x329   :  { %5173 = vmatpush1.msra.mxu0 %v10197_v10 }
 0x32a   :  { %5174 = vmatprep.subr.mxu0 %v10200_v44 }
 0x32b   :  { %5175 = vmatpush1.msra.mxu0 %v10203_v6 }
 0x32c   :  { %5176 = vmatprep.subr.mxu0 %v10206_v42 }
 0x32d   :  { %5177 = vmatpush1.msra.mxu0 %v10209_v9 }
 0x32e   :  { %5178 = vmatprep.subr.mxu0 %v10212_v16 }
 0x32f   :  { %5179 = vmatpush2.msra.mxu0 %v10215_v59 }
 0x330   :  { %5180 = vmatprep.subr.mxu0 %v10218_v20 }
 0x331   :  { %5181 = vmatpush2.msra.mxu0 %v10221_v27 }
 0x332   :  { %5182 = vmatprep.subr.mxu0 %v10224_v47 }
 0x333   :  { %5183 = vmatpush2.msra.mxu0 %v10227_v2 }
 0x334   :  { %5184 = vmatprep.subr.mxu0 %v10230_v51 }
 0x335   :  { %5185 = vmatpush2.msra.mxu0 %v10233_v49 }
 0x336   :  { %5186 = vmatprep.subr.mxu0 %v10236_v35 }
 0x337   :  { %5187 = vmatpush2.msra.mxu0 %v10239_v29 }
 0x338   :  { %v4854_v48 = vpop.f32.mrf.mxu0  ;;  %5188 = vmatprep.subr.mxu0 %v10242_v61 }
 0x339   :  { %v4855_v43 = vadd.f32 %v4854_v48, %v10105_v24  ;;  %v4895_v25 = vpop.f32.mrf.mxu1  ;;  %5189 = vmatpush2.msra.mxu0 %v10245_v37  ;;  %v10272_v48 = vld [vmem:[#allocation7 + $0x168] sm:$0xff] }
 0x33a   :  { %v4856_v18 = vpop.f32.mrf.mxu0  ;;  %5190 = vmatprep.subr.mxu0 %v10248_v63  ;;  %11886 = vst [vmem:[#allocation29_spill] sm:$0xff] %v10272_v48 }
 0x33b   :  { %v10260_v22 = vadd.f32 %v4895_v25, %v4855_v43  ;;  %v4857_v0 = vadd.f32 %v4856_v18, %v10110_v60  ;;  %v4897_v11 = vpop.f32.mrf.mxu1  ;;  %5191 = vmatpush2.msra.mxu0 %v10251_v40  ;;  %v10275_v60 = vld [vmem:[#allocation7 + $0x160] sm:$0xff]  ;;  %v10278_v18 = vld [vmem:[#allocation7 + $0x158] sm:$0xff] }
 0x33c   :  { %v4858_v24 = vpop.f32.mrf.mxu0  ;;  %5192 = vmatprep.subr.mxu0 %v10255_v12  ;;  %11887 = vst [vmem:[#allocation30_spill] sm:$0xff] %v10275_v60  ;;  %11888 = vst [vmem:[#allocation31_spill] sm:$0xff] %v10278_v18  ;;  %v11908_v12 = vlaneseq }
 0x33d   :  { %v10269_v58 = vadd.f32 %v4897_v11, %v4857_v0  ;;  %v4899_v23 = vpop.f32.mrf.mxu1  ;;  %5193 = vmatpush2.msra.mxu0 %v10258_v56  ;;  %v10281_v24 = vld [vmem:[#allocation7 + $0x150] sm:$0xff]  ;;  %v10284_v0 = vld [vmem:[#allocation7 + $0x148] sm:$0xff]  ;;  %v10287_v11 = vld [vmem:[#allocation7 + $0x140] sm:$0xff] }
 0x33e   :  { %v4859_v43 = vpop.f32.mrf.mxu0  ;;  %5194 = vmatprep.subr.mxu0 %v10264_v32  ;;  %11889 = vst [vmem:[#allocation32_spill] sm:$0xff] %v10281_v24  ;;  %11890 = vst [vmem:[#allocation33_spill] sm:$0xff] %v10284_v0  ;;  %v10292_v23 = vld [vmem:[#allocation7 + $0x138] sm:$0xff]  ;;  %v10349_v32 = vld [vmem:[%s11598_s6] sm:$0xff]  ;;  %v10365_v40 = vand.u32 127, %v11908_v12 }
 0x33f   :  { %v4900_v25 = vpop.f32.mrf.mxu1  ;;  %5195 = vmatpush2.msra.mxu0 %v10267_v5  ;;  %11891 = vst [vmem:[#allocation34_spill] sm:$0xff] %v10287_v11  ;;  %11892 = vst [vmem:[#allocation35_spill] sm:$0xff] %v10292_v23  ;;  %v10297_v43 = vld [vmem:[%s11598_s6 + $0x30] sm:$0xff]  ;;  %v10342_v5 = vld [vmem:[#allocation7 + $0x108] sm:$0xff] }
 0x340   :  { %5196 = vmatprep.subr.mxu0 %v10272_v48  ;;  %11893 = vst [vmem:[#allocation36_spill] sm:$0xff] %v10297_v43  ;;  %v10299_v25 = vld [vmem:[#allocation7 + $0x130] sm:$0xff]  ;;  %5245 = vmatpush1.msra.mxu1 %v10297_v43  ;;  %11904 = vst [vmem:[#allocation47_spill] sm:$0xff] %v10342_v5  ;;  %v10358_v56 = vld [vmem:[%s11601_s9 + $0xf8] sm:$0xff] }
 0x341   :  { %5197 = vmatpush2.msra.mxu0 %v10275_v60  ;;  %11894 = vst [vmem:[#allocation37_spill] sm:$0xff] %v10299_v25  ;;  %v10331_v60 = vld [vmem:[%s11598_s6 + $0x10] sm:$0xff]  ;;  %11905 = vst [vmem:[#allocation48_spill] sm:$0xff] %v10349_v32 }
 0x342   :  { %5198 = vmatprep.subr.mxu0 %v10278_v18  ;;  %v10317_v18 = vld [vmem:[#allocation7 + $0x120] sm:$0xff]  ;;  %11901 = vst [vmem:[#allocation44_spill] sm:$0xff] %v10331_v60  ;;  %v10335_v48 = vld [vmem:[#allocation7 + $0x110] sm:$0xff]  ;;  %11907 = vst [vmem:[#allocation50_spill] sm:$0xff] %v10358_v56 }
 0x343   :  { %5199 = vmatpush2.msra.mxu0 %v10281_v24  ;;  %v10306_v24 = vld [vmem:[%s11598_s6 + $0x28] sm:$0xff]  ;;  %11898 = vst [vmem:[#allocation41_spill] sm:$0xff] %v10317_v18  ;;  %11902 = vst [vmem:[#allocation45_spill] sm:$0xff] %v10335_v48  ;;  %v10385_v12 = vld [vmem:[%s11601_s9 + $0x70] sm:$0xff] }
 0x344   :  { %5200 = vmatprep.subr.mxu0 %v10284_v0  ;;  %11895 = vst [vmem:[#allocation38_spill] sm:$0xff] %v10306_v24  ;;  %5246 = vmatprep.subr.mxu1 %v10306_v24  ;;  %v10315_v0 = vld [vmem:[%s11598_s6 + $0x20] sm:$0xff]  ;;  %11909 = vst [vmem:[#allocation51_spill] sm:$0xff] %v10365_v40 }
 0x345   :  { %5201 = vmatpush2.msra.mxu0 %v10287_v11  ;;  %v10310_v11 = vld [vmem:[#allocation7 + $0x128] sm:$0xff]  ;;  %11897 = vst [vmem:[#allocation40_spill] sm:$0xff] %v10315_v0  ;;  %5247 = vmatpush1.msra.mxu1 %v10315_v0  ;;  %11912 = vst [vmem:[#allocation54_spill] sm:$0xff] %v10385_v12 }
 0x346   :  { %5202 = vmatprep.subr.mxu0 %v10292_v23  ;;  %11896 = vst [vmem:[#allocation39_spill] sm:$0xff] %v10310_v11  ;;  %v10324_v23 = vld [vmem:[%s11598_s6 + $0x18] sm:$0xff] }
 0x347   :  { %5203 = vmatpush2.msra.mxu0 %v10299_v25  ;;  %11899 = vst [vmem:[#allocation42_spill] sm:$0xff] %v10324_v23  ;;  %v10326_v25 = vld [vmem:[#allocation7 + $0x118] sm:$0xff]  ;;  %5248 = vmatprep.subr.mxu1 %v10324_v23 }
 0x348   :  { %5204 = vmatprep.subr.mxu0 %v10310_v11  ;;  %11900 = vst [vmem:[#allocation43_spill] sm:$0xff] %v10326_v25  ;;  %v10340_v11 = vld [vmem:[%s11598_s6 + $0x8] sm:$0xff]  ;;  %5249 = vmatpush1.msra.mxu1 %v10331_v60 }
 0x349   :  { %5205 = vmatpush2.msra.mxu0 %v10317_v18  ;;  %11903 = vst [vmem:[#allocation46_spill] sm:$0xff] %v10340_v11  ;;  %v10351_v18 = vld [vmem:[#allocation7 + $0x100] sm:$0xff]  ;;  %5250 = vmatprep.subr.mxu1 %v10340_v11 }
 0x34a   :  { %5206 = vmatprep.subr.mxu0 %v10326_v25  ;;  %11906 = vst [vmem:[#allocation49_spill] sm:$0xff] %v10351_v18  ;;  %5251 = vmatpush1.msra.mxu1 %v10349_v32  ;;  %v11649_v25 = vmov 0.0  }
 0x34b   :  { %5207 = vmatpush2.msra.mxu0 %v10335_v48  ;;  %5284 = vmatprep.mubr.f32.mxu1 %v11649_v25  ;;  %v5069_v48 = vstv %s5068_s18 }
 0x34c   :  { %5208 = vmatprep.subr.mxu0 %v10342_v5  ;;  %7265 = vmatprep.subr.mxu1 %v10358_v56  ;;  %vm5070_vm1 = vcmp.eq.s32.totalorder %v10365_v40, %v5069_v48  ;;  %v10373_v5 = vld [vmem:[%s11601_s9 + $0x78] sm:$0xff]  ;;  %v10391_v48 = vld [vmem:[%s11601_s9 + $0xe8] sm:$0xff] }
 0x34d   :  { %5209 = vmatpush2.msra.mxu0 %v10351_v18  ;;  %11910 = vst [vmem:[#allocation52_spill] sm:$0xff] %v10373_v5  ;;  %v7247_v63 = vsel %vm5070_vm1, 1.0, %v11649_v25  ;;  %v10379_v18 = vld [vmem:[%s11601_s9 + $0xf0] sm:$0xff]  ;;  %11913 = vst [vmem:[#allocation55_spill] sm:$0xff] %v10391_v48  ;;  %v10397_v25 = vld [vmem:[%s11601_s9 + $0x68] sm:$0xff] }
 0x34e   :  { %5561 = vmatprep.subr.mxu0 %v10133_v31  ;;  %11911 = vst [vmem:[#allocation53_spill] sm:$0xff] %v10379_v18  ;;  %7249 = vmatmul.mubr.msk.f32.vlgmr.msra.gmra.mxu1 %vm460_vm0, %v7247_v63  ;;  %11914 = vst [vmem:[#allocation56_spill] sm:$0xff] %v10397_v25  ;;  %v10403_v63 = vld [vmem:[%s11601_s9 + $0xe0] sm:$0xff] }
 0x34f   :  { %7266 = vmatpush3.msra.mxu1 %v10373_v5  ;;  %11915 = vst [vmem:[#allocation57_spill] sm:$0xff] %v10403_v63  ;;  %v10409_v5 = vld [vmem:[%s11601_s9 + $0x60] sm:$0xff] }
 0x350   :  { %7267 = vmatprep.subr.mxu1 %v10379_v18  ;;  %11916 = vst [vmem:[#allocation58_spill] sm:$0xff] %v10409_v5  ;;  %v10415_v18 = vld [vmem:[%s11601_s9 + $0xd8] sm:$0xff] }
 0x351   :  { %7268 = vmatpush3.msra.mxu1 %v10385_v12  ;;  %11917 = vst [vmem:[#allocation59_spill] sm:$0xff] %v10415_v18  ;;  %v10421_v12 = vld [vmem:[%s11601_s9 + $0x58] sm:$0xff] }
 0x352   :  { %7269 = vmatprep.subr.mxu1 %v10391_v48  ;;  %11918 = vst [vmem:[#allocation60_spill] sm:$0xff] %v10421_v12 }
 0x353   :  { %7270 = vmatpush3.msra.mxu1 %v10397_v25 }
 0x354   :  { %7271 = vmatprep.subr.mxu1 %v10403_v63 }
 0x355   :  { %7272 = vmatpush3.msra.mxu1 %v10409_v5 }
 0x356   :  { %7273 = vmatprep.subr.mxu1 %v10415_v18  ;;  %v10431_v18 = vld [vmem:[%s11601_s9 + $0xd0] sm:$0xff] }
 0x357   :  { %7274 = vmatpush3.msra.mxu1 %v10421_v12  ;;  %11919 = vst [vmem:[#allocation61_spill] sm:$0xff] %v10431_v18 }
 0x358   :  { %7275 = vmatprep.subr.mxu1 %v10431_v18 }
 0x378   :  { %v4936_v48 = vpop.f32.mrf.mxu0 }
 0x379   :  { %v4937_v25 = vadd.f32 %v4936_v48, %v10260_v22  ;;  %v4977_v40 = vpop.f32.mrf.mxu1 }
 0x37a   :  { %v4938_v31 = vpop.f32.mrf.mxu0 }
 0x37b   :  { %v4978_v37 = vadd.f32 %v4977_v40, %v4937_v25  ;;  %v4939_v61 = vadd.f32 %v4938_v31, %v10269_v58  ;;  %v4979_v63 = vpop.f32.mrf.mxu1 }
 0x37c   :  { %v4940_v29 = vpop.f32.mrf.mxu0 }
 0x37d   :  { %v4980_v35 = vadd.f32 %v4979_v63, %v4939_v61  ;;  %v4981_v49 = vpop.f32.mrf.mxu1  ;;  %v10468_v63 = vld [vmem:[%s11601_s9 + $0x40] sm:$0xff] }
 0x37e   :  { %v4941_v51 = vpop.f32.mrf.mxu0  ;;  %11925 = vst [vmem:[#allocation66_spill] sm:$0xff] %v10468_v63 }
 0x37f   :  { %v4982_v2 = vpop.f32.mrf.mxu1 }
 0x380   :  { %v11920_v2 = vmov 0.0  }
 0x3ce   :  { %v5018_v12 = vpop.f32.mrf.mxu0 }
 0x3cf   :  { %v5059_v22 = vpop.f32.mrf.mxu1  ;;  %v5019_v48 = vadd.f32 %v5018_v12, %v4978_v37  ;;  %v10451_v37 = vld [vmem:[%s11601_s9 + $0xc8] sm:$0xff]  ;;  %v10463_v12 = vld [vmem:[%s11601_s9 + $0xc0] sm:$0xff] }
 0x3d0   :  { %v5020_v5 = vpop.f32.mrf.mxu0  ;;  %11922 = vst [vmem:[#allocation63_spill] sm:$0xff] %v10451_v37  ;;  %11924 = vst [vmem:[#allocation65_spill] sm:$0xff] %v10463_v12 }
 0x3d1   :  { %v5021_v40 = vadd.f32 %v5020_v5, %v4980_v35  ;;  %v5061_v25 = vpop.f32.mrf.mxu1  ;;  %v5060_v61 = vadd.f32 %v5059_v22, %v5019_v48  ;;  %v10446_v35 = vld [vmem:[%s11601_s9 + $0x50] sm:$0xff]  ;;  %v10458_v5 = vld [vmem:[%s11601_s9 + $0x48] sm:$0xff]  ;;  %v10474_v22 = vld [vmem:[%s11601_s9 + $0xb8] sm:$0xff] }
 0x3d2   :  { %v5022_v31 = vpop.f32.mrf.mxu0  ;;  %11921 = vst [vmem:[#allocation62_spill] sm:$0xff] %v10446_v35  ;;  %7276 = vmatpush3.msra.mxu1 %v10446_v35  ;;  %11923 = vst [vmem:[#allocation64_spill] sm:$0xff] %v10458_v5  ;;  %v10480_v48 = vld [vmem:[%s11601_s9 + $0x38] sm:$0xff] }
 0x3d3   :  { %v5062_v58 = vadd.f32 %v5061_v25, %v5021_v40  ;;  %v5063_v29 = vpop.f32.mrf.mxu1  ;;  %7277 = vmatprep.subr.mxu1 %v10451_v37  ;;  %11926 = vst [vmem:[#allocation67_spill] sm:$0xff] %v10474_v22  ;;  %11927 = vst [vmem:[#allocation68_spill] sm:$0xff] %v10480_v48  ;;  %v10486_v40 = vld [vmem:[%s11601_s9 + $0xb0] sm:$0xff]  ;;  %v10498_v31 = vld [vmem:[%s11601_s9 + $0xa8] sm:$0xff] }
 0x3d4   :  { %v5023_v49 = vpop.f32.mrf.mxu0  ;;  %7278 = vmatpush3.msra.mxu1 %v10458_v5  ;;  %11928 = vst [vmem:[#allocation69_spill] sm:$0xff] %v10486_v40  ;;  %v10492_v25 = vld [vmem:[%s11601_s9 + $0x30] sm:$0xff]  ;;  %11930 = vst [vmem:[#allocation71_spill] sm:$0xff] %v10498_v31  ;;  %v10510_v29 = vld [vmem:[%s11601_s9 + $0xa0] sm:$0xff] }
 0x3d5   :  { %v5064_v51 = vpop.f32.mrf.mxu1  ;;  %5210 = vmatprep.mubr.f32.mxu0 %v5062_v58  ;;  %7279 = vmatprep.subr.mxu1 %v10463_v12  ;;  %11929 = vst [vmem:[#allocation70_spill] sm:$0xff] %v10492_v25  ;;  %v10504_v58 = vld [vmem:[%s11601_s9 + $0x28] sm:$0xff]  ;;  %11932 = vst [vmem:[#allocation73_spill] sm:$0xff] %v10510_v29  ;;  %v10522_v49 = vld [vmem:[%s11601_s9 + $0x98] sm:$0xff] }
 0x3d6   :  { %5211 = vmatmul.mubr.f32.vlgmr.msra.gmra.mxu0 %v5060_v61  ;;  %7280 = vmatpush3.msra.mxu1 %v10468_v63  ;;  %11931 = vst [vmem:[#allocation72_spill] sm:$0xff] %v10504_v58  ;;  %v10516_v61 = vld [vmem:[%s11601_s9 + $0x20] sm:$0xff]  ;;  %11934 = vst [vmem:[#allocation75_spill] sm:$0xff] %v10522_v49  ;;  %v10528_v51 = vld [vmem:[%s11601_s9 + $0x18] sm:$0xff] }
 0x3d7   :  { %5562 = vmatpush1.msra.mxu0 %v10297_v43  ;;  %5601 = vmatprep.mubr.f32.mxu0 %v11920_v2  ;;  %11933 = vst [vmem:[#allocation74_spill] sm:$0xff] %v10516_v61  ;;  %11935 = vst [vmem:[#allocation76_spill] sm:$0xff] %v10528_v51 }
 0x3d8   :  { %5563 = vmatprep.subr.mxu0 %v10306_v24  ;;  %7281 = vmatprep.subr.mxu1 %v10474_v22 }
 0x3d9   :  { %5564 = vmatpush1.msra.mxu0 %v10315_v0  ;;  %7282 = vmatpush3.msra.mxu1 %v10480_v48 }
 0x3da   :  { %5565 = vmatprep.subr.mxu0 %v10324_v23  ;;  %7283 = vmatprep.subr.mxu1 %v10486_v40 }
 0x3db   :  { %5566 = vmatpush1.msra.mxu0 %v10331_v60  ;;  %7284 = vmatpush3.msra.mxu1 %v10492_v25 }
 0x3dc   :  { %5567 = vmatprep.subr.mxu0 %v10340_v11  ;;  %7285 = vmatprep.subr.mxu1 %v10498_v31  ;;  %v10534_v31 = vld [vmem:[%s11601_s9 + $0x90] sm:$0xff] }
 0x3dd   :  { %5568 = vmatpush1.msra.mxu0 %v10349_v32  ;;  %7286 = vmatpush3.msra.mxu1 %v10504_v58  ;;  %11936 = vst [vmem:[#allocation77_spill] sm:$0xff] %v10534_v31  ;;  %v10540_v58 = vld [vmem:[%s11601_s9 + $0x10] sm:$0xff] }
 0x3de   :  { %7300 = vmatprep.subr.mxu0 %v10358_v56  ;;  %7287 = vmatprep.subr.mxu1 %v10510_v29  ;;  %11937 = vst [vmem:[#allocation78_spill] sm:$0xff] %v10540_v58  ;;  %v10546_v29 = vld [vmem:[%s11601_s9 + $0x88] sm:$0xff] }
 0x3df   :  { %7288 = vmatpush3.msra.mxu1 %v10516_v61  ;;  %11938 = vst [vmem:[#allocation79_spill] sm:$0xff] %v10546_v29  ;;  %v10552_v61 = vld [vmem:[%s11601_s9 + $0x8] sm:$0xff] }
 0x3e0   :  { %7289 = vmatprep.subr.mxu1 %v10522_v49  ;;  %11939 = vst [vmem:[#allocation80_spill] sm:$0xff] %v10552_v61  ;;  %v10558_v49 = vld [vmem:[%s11601_s9 + $0x80] sm:$0xff] }
 0x3e1   :  { %7290 = vmatpush3.msra.mxu1 %v10528_v51  ;;  %11940 = vst [vmem:[#allocation81_spill] sm:$0xff] %v10558_v49  ;;  %v10564_v51 = vld [vmem:[%s11601_s9] sm:$0xff] }
 0x3e2   :  { %7291 = vmatprep.subr.mxu1 %v10534_v31  ;;  %11941 = vst [vmem:[#allocation82_spill] sm:$0xff] %v10564_v51 }
 0x3e3   :  { %7292 = vmatpush3.msra.mxu1 %v10540_v58  ;;  %v5291_v58 = vld [vmem:[%s11600_s8] sm:$0x3]  ;;  %s7260_s8 = sld [smem:[#allocation3 + $0x5]] }
 0x3e4   :  { %7293 = vmatprep.subr.mxu1 %v10546_v29  ;;  %v10574_v29 = vrot.slane %v5291_v58, %v11867_v55  ;;  %v10577_v48 = vrot.slane %v5291_v58, %v11868_v1  ;;  %v11942_v55 = vld [vmem:[#allocation15_spill] sm:$0xff]  ;;  %v11943_v1 = vld [vmem:[#allocation17_spill] sm:$0xff]  ;;  %v11950_v58 = vld [vmem:[#allocation24_spill] sm:$0xff] }
 0x3e5   :  { %7294 = vmatpush3.msra.mxu1 %v10552_v61 }
 0x3e6   :  { %7295 = vmatprep.subr.mxu1 %v10558_v49 }
 0x3e7   :  { %7296 = vmatpush3.msra.mxu1 %v10564_v51 }
 0x3e8   :  { %5463 = vmatprep.subr.mxu1 %v10112_v41 }
 0x40e   :  { %v5286_v31 = vpop.f32.mrf.mxu1 }
 0x410   :  { %v5288_v61 = vpop.f32.mrf.mxu1 }
 0x496   :  { %v5212_v25 = vpop.f32.mrf.mxu0 }
 0x497   :  { %v5287_v40 = vadd.f32 %v5286_v31, %v5212_v25  ;;  %v11948_v25 = vld [vmem:[#allocation22_spill] sm:$0xff]  ;;  %v11949_v31 = vld [vmem:[#allocation23_spill] sm:$0xff] }
 0x498   :  { %v5214_v22 = vpop.f32.mrf.mxu0 }
 0x499   :  { %v5289_v49 = vadd.f32 %v5288_v61, %v5214_v22  ;;  %v5303_v51 = vadd.f32 %v10574_v29, %v5287_v40  ;;  %v11946_v22 = vld [vmem:[#allocation20_spill] sm:$0xff]  ;;  %v11947_v40 = vld [vmem:[#allocation21_spill] sm:$0xff] }
 0x49a   :  { %v11951_v61 = vld [vmem:[#allocation25_spill] sm:$0xff] }
 0x49b   :  { %v5304_v41 = vadd.f32 %v10577_v48, %v5289_v49  ;;  %v11952_v49 = vld [vmem:[#allocation26_spill] sm:$0xff] }
 0x49d   :  { %7885 = vtanh.f32 %v5304_v41  ;;  %v11944_v41 = vld [vmem:[#allocation18_spill] sm:$0xff] }
 0x49e   :  { %7887 = vtanh.f32 %v5303_v51  ;;  %v11953_v51 = vld [vmem:[#allocation27_spill] sm:$0xff] }
 0x4aa   :  { %v7886_v63 = vpop.eup %7885 }
 0x4ab   :  { %v10581_v12 = vpop.eup %7887  ;;  %5404 = vmatprep.mubr.f32.mxu1 %v7886_v63 }
 0x4ac   :  { %5405 = vmatmul.mubr.f32.vlgmr.msra.gmra.mxu1 %v10581_v12 }
 0x4ad   :  { %5464 = vmatpush1.msra.mxu1 %v10115_v53  ;;  %5527 = vmatprep.mubr.f32.mxu1 %v7886_v63  ;;  %v11945_v63 = vld [vmem:[#allocation19_spill] sm:$0xff] }
 0x4ae   :  { %5465 = vmatprep.subr.mxu1 %v10117_v7 }
 0x4af   :  { %5466 = vmatpush1.msra.mxu1 %v10119_v34 }
 0x4b0   :  { %5467 = vmatprep.subr.mxu1 %v10122_v36 }
 0x4b1   :  { %5468 = vmatpush1.msra.mxu1 %v10125_v50 }
 0x4b2   :  { %5469 = vmatprep.subr.mxu1 %v10128_v57 }
 0x4b3   :  { %5470 = vmatpush1.msra.mxu1 %v10136_v4 }
 0x4b4   :  { %5471 = vmatprep.subr.mxu1 %v10140_v52 }
 0x4b5   :  { %5472 = vmatpush1.msra.mxu1 %v10143_v62 }
 0x4b6   :  { %5473 = vmatprep.subr.mxu1 %v10146_v30 }
 0x4b7   :  { %5474 = vmatpush1.msra.mxu1 %v10149_v28 }
 0x4b8   :  { %5475 = vmatprep.subr.mxu1 %v10152_v33 }
 0x4b9   :  { %5476 = vmatpush1.msra.mxu1 %v10155_v17 }
 0x4ba   :  { %5477 = vmatprep.subr.mxu1 %v10158_v15 }
 0x4bb   :  { %5478 = vmatpush1.msra.mxu1 %v10161_v26 }
 0x4bc   :  { %5479 = vmatprep.subr.mxu1 %v10164_v46 }
 0x4bd   :  { %5480 = vmatpush1.msra.mxu1 %v10167_v14 }
 0x4be   :  { %5481 = vmatprep.subr.mxu1 %v10170_v13 }
 0x4bf   :  { %5482 = vmatpush1.msra.mxu1 %v10173_v21 }
 0x4c0   :  { %5483 = vmatprep.subr.mxu1 %v10176_v38 }
 0x4c1   :  { %5484 = vmatpush1.msra.mxu1 %v10179_v54 }
 0x4c2   :  { %5485 = vmatprep.subr.mxu1 %v10182_v45 }
 0x4c3   :  { %5486 = vmatpush1.msra.mxu1 %v10185_v3 }
 0x4c4   :  { %5487 = vmatprep.subr.mxu1 %v10188_v19 }
 0x4c5   :  { %5488 = vmatpush1.msra.mxu1 %v10191_v8 }
 0x4c6   :  { %5489 = vmatprep.subr.mxu1 %v10194_v39 }
 0x4c7   :  { %5490 = vmatpush1.msra.mxu1 %v10197_v10 }
 0x4c8   :  { %5491 = vmatprep.subr.mxu1 %v10200_v44 }
 0x4c9   :  { %5492 = vmatpush1.msra.mxu1 %v10203_v6 }
 0x4ca   :  { %5493 = vmatprep.subr.mxu1 %v10206_v42 }
 0x4cb   :  { %5494 = vmatpush1.msra.mxu1 %v10209_v9 }
 0x4cc   :  { %5495 = vmatprep.subr.mxu1 %v10212_v16 }
 0x4cd   :  { %5496 = vmatpush2.msra.mxu1 %v10215_v59 }
 0x4ce   :  { %5497 = vmatprep.subr.mxu1 %v10218_v20 }
 0x4cf   :  { %5498 = vmatpush2.msra.mxu1 %v10221_v27 }
 0x4d0   :  { %5499 = vmatprep.subr.mxu1 %v10224_v47 }
 0x4d1   :  { %5500 = vmatpush2.msra.mxu1 %v11942_v55 }
 0x4d2   :  { %5501 = vmatprep.subr.mxu1 %v11943_v1  ;;  %v11954_v1 = vld [vmem:[#allocation28_spill] sm:$0xff] }
 0x4d3   :  { %5502 = vmatpush2.msra.mxu1 %v11944_v41  ;;  %v11955_v41 = vld [vmem:[#allocation29_spill] sm:$0xff] }
 0x4d4   :  { %5503 = vmatprep.subr.mxu1 %v11945_v63  ;;  %v11956_v63 = vld [vmem:[#allocation30_spill] sm:$0xff] }
 0x4d5   :  { %5504 = vmatpush2.msra.mxu1 %v11946_v22  ;;  %v11957_v22 = vld [vmem:[#allocation31_spill] sm:$0xff] }
 0x4d6   :  { %5505 = vmatprep.subr.mxu1 %v11947_v40  ;;  %v11958_v40 = vld [vmem:[#allocation32_spill] sm:$0xff] }
 0x4d7   :  { %5506 = vmatpush2.msra.mxu1 %v11948_v25  ;;  %v11959_v25 = vld [vmem:[#allocation33_spill] sm:$0xff] }
 0x4d8   :  { %5507 = vmatprep.subr.mxu1 %v11949_v31  ;;  %v11960_v31 = vld [vmem:[#allocation34_spill] sm:$0xff] }
 0x4d9   :  { %5508 = vmatpush2.msra.mxu1 %v11950_v58  ;;  %v11961_v58 = vld [vmem:[#allocation35_spill] sm:$0xff] }
 0x4da   :  { %5509 = vmatprep.subr.mxu1 %v11951_v61  ;;  %v11962_v61 = vld [vmem:[#allocation37_spill] sm:$0xff] }
 0x4db   :  { %5510 = vmatpush2.msra.mxu1 %v11952_v49  ;;  %v11963_v49 = vld [vmem:[#allocation39_spill] sm:$0xff] }
 0x4dc   :  { %5511 = vmatprep.subr.mxu1 %v11953_v51  ;;  %v11964_v51 = vld [vmem:[#allocation41_spill] sm:$0xff] }
 0x4dd   :  { %5512 = vmatpush2.msra.mxu1 %v11954_v1  ;;  %v11965_v1 = vld [vmem:[#allocation43_spill] sm:$0xff] }
 0x4de   :  { %5513 = vmatprep.subr.mxu1 %v11955_v41  ;;  %v11966_v41 = vld [vmem:[#allocation45_spill] sm:$0xff] }
 0x4df   :  { %5514 = vmatpush2.msra.mxu1 %v11956_v63  ;;  %v11967_v63 = vld [vmem:[#allocation47_spill] sm:$0xff] }
 0x4e0   :  { %5515 = vmatprep.subr.mxu1 %v11957_v22  ;;  %v11968_v22 = vld [vmem:[#allocation49_spill] sm:$0xff] }
 0x4e1   :  { %5516 = vmatpush2.msra.mxu1 %v11958_v40 }
 0x4e2   :  { %5517 = vmatprep.subr.mxu1 %v11959_v25  ;;  %v11969_v25 = vld [vmem:[#allocation14_spill] sm:$0xff] }
 0x4e3   :  { %5518 = vmatpush2.msra.mxu1 %v11960_v31 }
 0x4e4   :  { %5519 = vmatprep.subr.mxu1 %v11961_v58 }
 0x4e5   :  { %5520 = vmatpush2.msra.mxu1 %v11962_v61 }
 0x4e6   :  { %5521 = vmatprep.subr.mxu1 %v11963_v49 }
 0x4e7   :  { %5522 = vmatpush2.msra.mxu1 %v11964_v51 }
 0x4e8   :  { %5523 = vmatprep.subr.mxu1 %v11965_v1 }
 0x4e9   :  { %5524 = vmatpush2.msra.mxu1 %v11966_v41 }
 0x4ea   :  { %5525 = vmatprep.subr.mxu1 %v11967_v63 }
 0x4eb   :  { %5526 = vmatpush2.msra.mxu1 %v11968_v22 }
 0x4ec   :  { %5528 = vmatmul.mubr.f32.vlgmr.msra.gmra.mxu1 %v10581_v12  ;;  %5832 = vmatprep.subr.mxu1 %v11969_v25 }
 0x4ed   :  { %5833 = vmatpush1.msra.mxu1 %v10297_v43  ;;  %5872 = vmatprep.mubr.f32.mxu1 %v11920_v2  ;;  %v10661_v43 = vld [vmem:[%s11602_s10] sm:$0x1] }
 0x4ee   :  { %5834 = vmatprep.subr.mxu1 %v10306_v24  ;;  %11970 = vst [vmem:[#allocation15_spill] sm:$0xff] %v10661_v43 }
 0x4ef   :  { %5835 = vmatpush1.msra.mxu1 %v10315_v0 }
 0x4f0   :  { %5836 = vmatprep.subr.mxu1 %v10324_v23 }
 0x4f1   :  { %5837 = vmatpush1.msra.mxu1 %v10331_v60 }
 0x4f2   :  { %5838 = vmatprep.subr.mxu1 %v10340_v11 }
 0x4f3   :  { %5839 = vmatpush1.msra.mxu1 %v10349_v32 }
 0x4f4   :  { %7335 = vmatprep.subr.mxu1 %v10358_v56 }
 0x56c   :  { %v7297_v12 = vpop.f32.mrf.mxu1 }
 0x56e   :  { %v7298_v25 = vpop.f32.mrf.mxu1 }
 0x56f   :  { %v7299_v24 = vadd.f32 %v7298_v25, %v7297_v12 }
 0x571   :  { %v5407_v0 = vadd.f32 %v7299_v24, %v10661_v43 }
 0x573   :  { %v5411_v23 = vsel %vm5410_vm2, %v5407_v0, -inf }
 0x574   :  { %5412 = vmax.xlane.f32.xlu0 %v5411_v23 }
 0x5fd   :  { %v5413_v60 = vpop.xlane.xlu0 %5412 }
 0x5fe   :  { %v5414_v11 = vsub.f32 %v5407_v0, %v5413_v60  ;;  %v11973_v60 = vld [vmem:[#allocation51_spill] sm:$0xff] }
 0x600   :  { %v5415_v22 = vmul.f32 1.442695, %v5414_v11 }
 0x602   :  { %7889 = vpow2.f32 %v5415_v22 }
 0x60f   :  { %v7890_v32 = vpop.eup %7889 }
 0x610   :  { %v5417_v56 = vsel %vm5410_vm2, %v7890_v32, 0.0 }
 0x611   :  { %5418 = vadd.xlane.f32.xlu0 %v5417_v56 }
 0x69a   :  { %v5419_v63 = vpop.xlane.xlu0 %5418 }
 0x69b   :  { %7891 = vrcp.f32 %v5419_v63 }
 0x6a8   :  { %v7892_v41 = vpop.eup %7891 }
 0x6a9   :  { %v10666_v1 = vmul.f32 %v7892_v41, %v7890_v32 }
 0x6ab   :  { %11971 = vst [vmem:[#allocation32_spill] sm:$0xff] %v10666_v1  ;;  %v5422_v25 = vsel %vm5410_vm2, %v10666_v1, -inf }
 0x6ac   :  { %5423 = vmax.xlane.f32.xlu1 %v5422_v25 }
 0x735   :  { %v10670_v24 = vpop.xlane.xlu1 %5423 }
 0x736   :  { %11972 = vst [vmem:[#allocation34_spill] sm:$0xff] %v10670_v24  ;;  %vm5425_vm3 = vcmp.ge.f32.partialorder %v10666_v1, %v10670_v24  ;;  %v11988_v24 = vld [vmem:[#allocation70_spill] sm:$0xff] }
 0x737   :  { %v5426_v0 = vsel %vm5425_vm3, %v11973_v60, 32 }
 0x738   :  { %v5427_v11 = vsel %vm5410_vm2, %v5426_v0, 2147483647  ;;  %v11974_v0 = vld [vmem:[#allocation52_spill] sm:$0xff] }
 0x739   :  { %v5429_v23 = vshra.s32 %v5427_v11, 16  ;;  %v5428_v63 = vand.u32 65535, %v5427_v11  ;;  %v11976_v11 = vld [vmem:[#allocation54_spill] sm:$0xff] }
 0x73b   :  { %v5431_v56 = vcvt.s32.f32 %v5429_v23  ;;  %v5430_v32 = vcvt.s32.f32 %v5428_v63  ;;  %v11975_v23 = vld [vmem:[#allocation53_spill] sm:$0xff]  ;;  %v11978_v63 = vld [vmem:[#allocation56_spill] sm:$0xff] }
 0x73d   :  { %5432 = vmin.xlane.f32.xlu1 %v5431_v56 }
 0x7c6   :  { %v5433_v22 = vpop.xlane.xlu1 %5432 }
 0x7c7   :  { %vm5434_vm4 = vcmp.eq.f32.partialorder %v5431_v56, %v5433_v22  ;;  %v5439_v12 = vcvt.f32.s32 %v5433_v22  ;;  %v11977_v56 = vld [vmem:[#allocation55_spill] sm:$0xff]  ;;  %v11979_v22 = vld [vmem:[#allocation57_spill] sm:$0xff] }
 0x7c8   :  { %v5435_v41 = vsel %vm5434_vm4, %v5430_v32, inf  ;;  %v11980_v32 = vld [vmem:[#allocation58_spill] sm:$0xff] }
 0x7c9   :  { %5436 = vmin.xlane.f32.xlu0 %v5435_v41  ;;  %v5440_v43 = vshll.u32 %v5439_v12, 16  ;;  %v11985_v41 = vld [vmem:[#allocation67_spill] sm:$0xff]  ;;  %v11986_v12 = vld [vmem:[#allocation68_spill] sm:$0xff] }
 0x852   :  { %v5437_v25 = vpop.xlane.xlu0 %5436 }
 0x853   :  { %v5438_v51 = vcvt.f32.s32 %v5437_v25  ;;  %v11987_v25 = vld [vmem:[#allocation69_spill] sm:$0xff] }
 0x855   :  { %v5441_v49 = vadd.s32 %v5440_v43, %v5438_v51  ;;  %v11981_v43 = vld [vmem:[#allocation59_spill] sm:$0xff]  ;;  %v11984_v51 = vld [vmem:[#allocation66_spill] sm:$0xff] }
 0x857   :  { %vm5442_vm5 = vcmp.eq.s32.totalorder %v11973_v60, %v5441_v49  ;;  %v11982_v49 = vld [vmem:[#allocation60_spill] sm:$0xff] }
 0x858   :  { %v7250_v1 = vsel %vm5442_vm5, 1.0, %v11920_v2 }
 0x859   :  { %7252 = vmatmul.mubr.msk.f32.vlgmr.msra.gmra.mxu0 %vm460_vm0, %v7250_v1  ;;  %v11983_v1 = vld [vmem:[#allocation65_spill] sm:$0xff] }
 0x85a   :  { %7301 = vmatpush3.msra.mxu0 %v11974_v0 }
 0x85b   :  { %7302 = vmatprep.subr.mxu0 %v11975_v23 }
 0x85c   :  { %7303 = vmatpush3.msra.mxu0 %v11976_v11 }
 0x85d   :  { %7304 = vmatprep.subr.mxu0 %v11977_v56 }
 0x85e   :  { %7305 = vmatpush3.msra.mxu0 %v11978_v63 }
 0x85f   :  { %7306 = vmatprep.subr.mxu0 %v11979_v22 }
 0x860   :  { %7307 = vmatpush3.msra.mxu0 %v11980_v32 }
 0x861   :  { %7308 = vmatprep.subr.mxu0 %v11981_v43 }
 0x862   :  { %7309 = vmatpush3.msra.mxu0 %v11982_v49  ;;  %v11989_v49 = vld [vmem:[#allocation71_spill] sm:$0xff] }
 0x863   :  { %7310 = vmatprep.subr.mxu0 %v10431_v18  ;;  %v11990_v18 = vld [vmem:[#allocation72_spill] sm:$0xff] }
 0x864   :  { %7311 = vmatpush3.msra.mxu0 %v10446_v35  ;;  %v11991_v35 = vld [vmem:[#allocation73_spill] sm:$0xff] }
 0x865   :  { %7312 = vmatprep.subr.mxu0 %v10451_v37  ;;  %v11992_v37 = vld [vmem:[#allocation74_spill] sm:$0xff] }
 0x866   :  { %7313 = vmatpush3.msra.mxu0 %v10458_v5  ;;  %v11993_v5 = vld [vmem:[#allocation75_spill] sm:$0xff] }
 0x867   :  { %7314 = vmatprep.subr.mxu0 %v11983_v1  ;;  %v11994_v1 = vld [vmem:[#allocation76_spill] sm:$0xff] }
 0x868   :  { %7315 = vmatpush3.msra.mxu0 %v11984_v51  ;;  %v11995_v51 = vld [vmem:[#allocation77_spill] sm:$0xff] }
 0x869   :  { %7316 = vmatprep.subr.mxu0 %v11985_v41  ;;  %v11996_v41 = vld [vmem:[#allocation78_spill] sm:$0xff] }
 0x86a   :  { %7317 = vmatpush3.msra.mxu0 %v11986_v12  ;;  %v11997_v12 = vld [vmem:[#allocation79_spill] sm:$0xff] }
 0x86b   :  { %7318 = vmatprep.subr.mxu0 %v11987_v25  ;;  %v11998_v25 = vld [vmem:[#allocation80_spill] sm:$0xff] }
 0x86c   :  { %7319 = vmatpush3.msra.mxu0 %v11988_v24  ;;  %v11999_v24 = vld [vmem:[#allocation81_spill] sm:$0xff] }
 0x86d   :  { %7320 = vmatprep.subr.mxu0 %v11989_v49  ;;  %v12000_v49 = vld [vmem:[#allocation82_spill] sm:$0xff] }
 0x86e   :  { %7321 = vmatpush3.msra.mxu0 %v11990_v18  ;;  %v12001_v18 = vld [vmem:[#allocation16_spill] sm:$0xff] }
 0x86f   :  { %7322 = vmatprep.subr.mxu0 %v11991_v35  ;;  %v5529_v35 = vpop.f32.mrf.mxu1 }
 0x870   :  { %7323 = vmatpush3.msra.mxu0 %v11992_v37 }
 0x871   :  { %7324 = vmatprep.subr.mxu0 %v11993_v5  ;;  %v5531_v5 = vpop.f32.mrf.mxu1 }
 0x872   :  { %7325 = vmatpush3.msra.mxu0 %v11994_v1 }
 0x873   :  { %7326 = vmatprep.subr.mxu0 %v11995_v51 }
 0x874   :  { %7327 = vmatpush3.msra.mxu0 %v11996_v41 }
 0x875   :  { %7328 = vmatprep.subr.mxu0 %v11997_v12 }
 0x876   :  { %7329 = vmatpush3.msra.mxu0 %v11998_v25 }
 0x877   :  { %7330 = vmatprep.subr.mxu0 %v11999_v24 }
 0x878   :  { %7331 = vmatpush3.msra.mxu0 %v12000_v49 }
 0x879   :  { %5734 = vmatprep.subr.mxu0 %v12001_v18 }
 0x919   :  { %v5603_v37 = vpop.f32.mrf.mxu0 }
 0x91a   :  { %v5604_v43 = vadd.f32 %v5603_v37, %v5529_v35 }
 0x91b   :  { %v5605_v32 = vpop.f32.mrf.mxu0 }
 0x91c   :  { %v5606_v1 = vadd.f32 %v5605_v32, %v5531_v5  ;;  %v5608_v51 = vadd.f32 %v5604_v43, %v10574_v29 }
 0x91e   :  { %v5609_v41 = vadd.f32 %v5606_v1, %v10577_v48 }
 0x920   :  { %7893 = vtanh.f32 %v5609_v41 }
 0x921   :  { %7895 = vtanh.f32 %v5608_v51 }
 0x92d   :  { %v7894_v12 = vpop.eup %7893 }
 0x92e   :  { %v10713_v25 = vpop.eup %7895  ;;  %5676 = vmatprep.mubr.f32.mxu0 %v7894_v12 }
 0x92f   :  { %5677 = vmatmul.mubr.f32.vlgmr.msra.gmra.mxu0 %v10713_v25 }
 0x930   :  { %5735 = vmatpush1.msra.mxu0 %v10115_v53  ;;  %5798 = vmatprep.mubr.f32.mxu0 %v7894_v12  ;;  %v12002_v53 = vld [vmem:[#allocation17_spill] sm:$0xff] }
 0x931   :  { %5736 = vmatprep.subr.mxu0 %v10117_v7  ;;  %v12003_v7 = vld [vmem:[#allocation18_spill] sm:$0xff] }
 0x932   :  { %5737 = vmatpush1.msra.mxu0 %v10119_v34  ;;  %v12004_v34 = vld [vmem:[#allocation19_spill] sm:$0xff] }
 0x933   :  { %5738 = vmatprep.subr.mxu0 %v10122_v36  ;;  %v12005_v36 = vld [vmem:[#allocation20_spill] sm:$0xff] }
 0x934   :  { %5739 = vmatpush1.msra.mxu0 %v10125_v50  ;;  %v12006_v50 = vld [vmem:[#allocation21_spill] sm:$0xff] }
 0x935   :  { %5740 = vmatprep.subr.mxu0 %v10128_v57  ;;  %v12007_v57 = vld [vmem:[#allocation22_spill] sm:$0xff] }
 0x936   :  { %5741 = vmatpush1.msra.mxu0 %v10136_v4  ;;  %v12008_v4 = vld [vmem:[#allocation23_spill] sm:$0xff] }
 0x937   :  { %5742 = vmatprep.subr.mxu0 %v10140_v52  ;;  %v12009_v52 = vld [vmem:[#allocation24_spill] sm:$0xff] }
 0x938   :  { %5743 = vmatpush1.msra.mxu0 %v10143_v62  ;;  %v12010_v62 = vld [vmem:[#allocation25_spill] sm:$0xff] }
 0x939   :  { %5744 = vmatprep.subr.mxu0 %v10146_v30  ;;  %v12011_v30 = vld [vmem:[#allocation26_spill] sm:$0xff] }
 0x93a   :  { %5745 = vmatpush1.msra.mxu0 %v10149_v28  ;;  %v12012_v28 = vld [vmem:[#allocation27_spill] sm:$0xff] }
 0x93b   :  { %5746 = vmatprep.subr.mxu0 %v10152_v33  ;;  %v12013_v33 = vld [vmem:[#allocation28_spill] sm:$0xff] }
 0x93c   :  { %5747 = vmatpush1.msra.mxu0 %v10155_v17  ;;  %v12014_v17 = vld [vmem:[#allocation29_spill] sm:$0xff] }
 0x93d   :  { %5748 = vmatprep.subr.mxu0 %v10158_v15  ;;  %v12015_v15 = vld [vmem:[#allocation30_spill] sm:$0xff] }
 0x93e   :  { %5749 = vmatpush1.msra.mxu0 %v10161_v26  ;;  %v12016_v26 = vld [vmem:[#allocation31_spill] sm:$0xff] }
 0x93f   :  { %5750 = vmatprep.subr.mxu0 %v10164_v46  ;;  %v12017_v46 = vld [vmem:[#allocation33_spill] sm:$0xff] }
 0x940   :  { %5751 = vmatpush1.msra.mxu0 %v10167_v14  ;;  %v12018_v14 = vld [vmem:[#allocation39_spill] sm:$0xff] }
 0x941   :  { %5752 = vmatprep.subr.mxu0 %v10170_v13  ;;  %v12019_v13 = vld [vmem:[#allocation41_spill] sm:$0xff] }
 0x942   :  { %5753 = vmatpush1.msra.mxu0 %v10173_v21  ;;  %v12020_v21 = vld [vmem:[#allocation43_spill] sm:$0xff] }
 0x943   :  { %5754 = vmatprep.subr.mxu0 %v10176_v38  ;;  %v12021_v38 = vld [vmem:[#allocation45_spill] sm:$0xff] }
 0x944   :  { %5755 = vmatpush1.msra.mxu0 %v10179_v54  ;;  %v12022_v54 = vld [vmem:[#allocation47_spill] sm:$0xff] }
 0x945   :  { %5756 = vmatprep.subr.mxu0 %v10182_v45  ;;  %v12023_v45 = vld [vmem:[#allocation49_spill] sm:$0xff] }
 0x946   :  { %5757 = vmatpush1.msra.mxu0 %v10185_v3  ;;  %v12024_v3 = vld [vmem:[#allocation14_spill] sm:$0xff] }
 0x947   :  { %5758 = vmatprep.subr.mxu0 %v10188_v19  ;;  %v12025_v19 = vld [vmem:[#allocation36_spill] sm:$0xff] }
 0x948   :  { %5759 = vmatpush1.msra.mxu0 %v10191_v8  ;;  %v12026_v8 = vld [vmem:[#allocation38_spill] sm:$0xff] }
 0x949   :  { %5760 = vmatprep.subr.mxu0 %v10194_v39  ;;  %v12027_v39 = vld [vmem:[#allocation40_spill] sm:$0xff] }
 0x94a   :  { %5761 = vmatpush1.msra.mxu0 %v10197_v10  ;;  %v12028_v10 = vld [vmem:[#allocation42_spill] sm:$0xff] }
 0x94b   :  { %5762 = vmatprep.subr.mxu0 %v10200_v44  ;;  %v12029_v44 = vld [vmem:[#allocation44_spill] sm:$0xff] }
 0x94c   :  { %5763 = vmatpush1.msra.mxu0 %v10203_v6  ;;  %v12030_v6 = vld [vmem:[#allocation46_spill] sm:$0xff] }
 0x94d   :  { %5764 = vmatprep.subr.mxu0 %v10206_v42  ;;  %v12031_v42 = vld [vmem:[#allocation48_spill] sm:$0xff] }
 0x94e   :  { %5765 = vmatpush1.msra.mxu0 %v10209_v9  ;;  %v12032_v9 = vld [vmem:[#allocation50_spill] sm:$0xff] }
 0x94f   :  { %5766 = vmatprep.subr.mxu0 %v10212_v16 }
 0x950   :  { %5767 = vmatpush2.msra.mxu0 %v10215_v59 }
 0x951   :  { %5768 = vmatprep.subr.mxu0 %v10218_v20 }
 0x952   :  { %5769 = vmatpush2.msra.mxu0 %v10221_v27  ;;  %v12033_v27 = vld [vmem:[#allocation15_spill] sm:$0xff] }
 0x953   :  { %5770 = vmatprep.subr.mxu0 %v10224_v47 }
 0x954   :  { %5771 = vmatpush2.msra.mxu0 %v11942_v55 }
 0x955   :  { %5772 = vmatprep.subr.mxu0 %v12002_v53 }
 0x956   :  { %5773 = vmatpush2.msra.mxu0 %v12003_v7 }
 0x957   :  { %5774 = vmatprep.subr.mxu0 %v12004_v34 }
 0x958   :  { %5775 = vmatpush2.msra.mxu0 %v12005_v36 }
 0x959   :  { %5776 = vmatprep.subr.mxu0 %v12006_v50 }
 0x95a   :  { %5777 = vmatpush2.msra.mxu0 %v12007_v57 }
 0x95b   :  { %5778 = vmatprep.subr.mxu0 %v12008_v4 }
 0x95c   :  { %5779 = vmatpush2.msra.mxu0 %v12009_v52 }
 0x95d   :  { %5780 = vmatprep.subr.mxu0 %v12010_v62 }
 0x95e   :  { %5781 = vmatpush2.msra.mxu0 %v12011_v30  ;;  %v12036_v30 = vld [vmem:[#allocation58_spill] sm:$0xff] }
 0x95f   :  { %5782 = vmatprep.subr.mxu0 %v12012_v28  ;;  %v12037_v28 = vld [vmem:[#allocation59_spill] sm:$0xff] }
 0x960   :  { %5783 = vmatpush2.msra.mxu0 %v12013_v33  ;;  %v12038_v33 = vld [vmem:[#allocation60_spill] sm:$0xff] }
 0x961   :  { %5784 = vmatprep.subr.mxu0 %v12014_v17  ;;  %v12039_v17 = vld [vmem:[#allocation61_spill] sm:$0xff] }
 0x962   :  { %5785 = vmatpush2.msra.mxu0 %v12015_v15  ;;  %v12040_v15 = vld [vmem:[#allocation62_spill] sm:$0xff] }
 0x963   :  { %5786 = vmatprep.subr.mxu0 %v12016_v26  ;;  %v12047_v26 = vld [vmem:[#allocation69_spill] sm:$0xff] }
 0x964   :  { %5787 = vmatpush2.msra.mxu0 %v11958_v40 }
 0x965   :  { %5788 = vmatprep.subr.mxu0 %v12017_v46  ;;  %v12048_v46 = vld [vmem:[#allocation70_spill] sm:$0xff] }
 0x966   :  { %5789 = vmatpush2.msra.mxu0 %v11960_v31 }
 0x967   :  { %5790 = vmatprep.subr.mxu0 %v11961_v58 }
 0x968   :  { %5791 = vmatpush2.msra.mxu0 %v11962_v61 }
 0x969   :  { %5792 = vmatprep.subr.mxu0 %v12018_v14  ;;  %v12049_v14 = vld [vmem:[#allocation71_spill] sm:$0xff] }
 0x96a   :  { %5793 = vmatpush2.msra.mxu0 %v12019_v13  ;;  %v12050_v13 = vld [vmem:[#allocation72_spill] sm:$0xff] }
 0x96b   :  { %5794 = vmatprep.subr.mxu0 %v12020_v21  ;;  %v12051_v21 = vld [vmem:[#allocation73_spill] sm:$0xff] }
 0x96c   :  { %5795 = vmatpush2.msra.mxu0 %v12021_v38  ;;  %v12052_v38 = vld [vmem:[#allocation74_spill] sm:$0xff] }
 0x96d   :  { %5796 = vmatprep.subr.mxu0 %v12022_v54  ;;  %v12053_v54 = vld [vmem:[#allocation75_spill] sm:$0xff] }
 0x96e   :  { %5797 = vmatpush2.msra.mxu0 %v12023_v45  ;;  %v12054_v45 = vld [vmem:[#allocation76_spill] sm:$0xff] }
 0x96f   :  { %5799 = vmatmul.mubr.f32.vlgmr.msra.gmra.mxu0 %v10713_v25  ;;  %6103 = vmatprep.subr.mxu0 %v12024_v3  ;;  %v12055_v3 = vld [vmem:[#allocation77_spill] sm:$0xff] }
 0x970   :  { %6104 = vmatpush1.msra.mxu0 %v12025_v19  ;;  %6143 = vmatprep.mubr.f32.mxu0 %v11920_v2  ;;  %v12056_v19 = vld [vmem:[#allocation78_spill] sm:$0xff] }
 0x971   :  { %6105 = vmatprep.subr.mxu0 %v12026_v8  ;;  %v12057_v8 = vld [vmem:[#allocation79_spill] sm:$0xff] }
 0x972   :  { %6106 = vmatpush1.msra.mxu0 %v12027_v39  ;;  %v12058_v39 = vld [vmem:[#allocation80_spill] sm:$0xff] }
 0x973   :  { %6107 = vmatprep.subr.mxu0 %v12028_v10  ;;  %v10837_v10 = vld [vmem:[#allocation7 + $0xf8] sm:$0xff] }
 0x974   :  { %6108 = vmatpush1.msra.mxu0 %v12029_v44 }
 0x975   :  { %6109 = vmatprep.subr.mxu0 %v12030_v6 }
 0x976   :  { %6110 = vmatpush1.msra.mxu0 %v12031_v42 }
 0x977   :  { %7370 = vmatprep.subr.mxu0 %v12032_v9 }
 0x9ef   :  { %v7332_v16 = vpop.f32.mrf.mxu0 }
 0x9f1   :  { %v7333_v59 = vpop.f32.mrf.mxu0 }
 0x9f2   :  { %v7334_v20 = vadd.f32 %v7333_v59, %v7332_v16 }
 0x9f4   :  { %v5679_v47 = vadd.f32 %v7334_v20, %v12033_v27 }
 0x9f6   :  { %v5682_v18 = vsel %vm5410_vm2, %v5679_v47, -inf }
 0x9f7   :  { %5683 = vmax.xlane.f32.xlu1 %v5682_v18 }
 0xa2f   :  { %v5800_v44 = vpop.f32.mrf.mxu0 }
 0xa31   :  { %v5802_v9 = vpop.f32.mrf.mxu0 }
 0xa80   :  { %v5684_v35 = vpop.xlane.xlu1 %5683 }
 0xa81   :  { %v5685_v37 = vsub.f32 %v5679_v47, %v5684_v35 }
 0xa83   :  { %v5686_v5 = vmul.f32 1.442695, %v5685_v37  ;;  %v10845_v37 = vld [vmem:[#allocation7 + $0xf0] sm:$0xff] }
 0xa85   :  { %7897 = vpow2.f32 %v5686_v5  ;;  %v10848_v5 = vld [vmem:[#allocation7 + $0xe8] sm:$0xff] }
 0xa92   :  { %v7898_v55 = vpop.eup %7897 }
 0xa93   :  { %v5688_v40 = vsel %vm5410_vm2, %v7898_v55, 0.0 }
 0xa94   :  { %5689 = vadd.xlane.f32.xlu0 %v5688_v40  ;;  %v10854_v40 = vld [vmem:[#allocation7 + $0xd8] sm:$0xff] }
 0xb1d   :  { %v5690_v31 = vpop.xlane.xlu0 %5689 }
 0xb1e   :  { %7899 = vrcp.f32 %v5690_v31  ;;  %v10857_v31 = vld [vmem:[#allocation7 + $0xd0] sm:$0xff] }
 0xb2b   :  { %v7900_v58 = vpop.eup %7899 }
 0xb2c   :  { %v10793_v61 = vmul.f32 %v7900_v58, %v7898_v55  ;;  %v10851_v55 = vld [vmem:[#allocation7 + $0xe0] sm:$0xff]  ;;  %v10860_v58 = vld [vmem:[#allocation7 + $0xc8] sm:$0xff] }
 0xb2e   :  { %12034 = vst [vmem:[#allocation35_spill] sm:$0xff] %v10793_v61  ;;  %v5693_v32 = vsel %vm5410_vm2, %v10793_v61, -inf }
 0xb2f   :  { %5694 = vmax.xlane.f32.xlu1 %v5693_v32  ;;  %v10863_v32 = vld [vmem:[#allocation7 + $0xc0] sm:$0xff] }
 0xbb8   :  { %v10797_v43 = vpop.xlane.xlu1 %5694 }
 0xbb9   :  { %12035 = vst [vmem:[#allocation37_spill] sm:$0xff] %v10797_v43  ;;  %vm5696_vm6 = vcmp.ge.f32.partialorder %v10793_v61, %v10797_v43  ;;  %v10947_v61 = vld [vmem:[#allocation7 + $0x1e0] sm:$0xff]  ;;  %v10950_v43 = vld [vmem:[#allocation7 + $0x1d8] sm:$0xff] }
 0xbba   :  { %v5697_v1 = vsel %vm5696_vm6, %v11973_v60, 32  ;;  %12070 = vst [vmem:[#allocation18_spill] sm:$0xff] %v10947_v61  ;;  %12071 = vst [vmem:[#allocation19_spill] sm:$0xff] %v10950_v43 }
 0xbbb   :  { %v5698_v51 = vsel %vm5410_vm2, %v5697_v1, 2147483647  ;;  %v10866_v1 = vld [vmem:[#allocation7 + $0xb8] sm:$0xff] }
 0xbbc   :  { %v5700_v41 = vshra.s32 %v5698_v51, 16  ;;  %v5699_v25 = vand.u32 65535, %v5698_v51  ;;  %v10869_v51 = vld [vmem:[#allocation7 + $0xb0] sm:$0xff] }
 0xbbe   :  { %v5702_v12 = vcvt.s32.f32 %v5700_v41  ;;  %v5701_v7 = vcvt.s32.f32 %v5699_v25  ;;  %v10872_v41 = vld [vmem:[#allocation7 + $0xa8] sm:$0xff]  ;;  %v10878_v25 = vld [vmem:[#allocation7 + $0x98] sm:$0xff] }
 0xbc0   :  { %5703 = vmin.xlane.f32.xlu0 %v5702_v12 }
 0xc49   :  { %v5704_v53 = vpop.xlane.xlu0 %5703 }
 0xc4a   :  { %vm5705_vm7 = vcmp.eq.f32.partialorder %v5702_v12, %v5704_v53  ;;  %v5710_v36 = vcvt.f32.s32 %v5704_v53  ;;  %v10875_v12 = vld [vmem:[#allocation7 + $0xa0] sm:$0xff]  ;;  %v10881_v53 = vld [vmem:[#allocation7 + $0x90] sm:$0xff] }
 0xc4b   :  { %v5706_v34 = vsel %vm5705_vm7, %v5701_v7, inf  ;;  %v10884_v7 = vld [vmem:[#allocation7 + $0x88] sm:$0xff] }
 0xc4c   :  { %5707 = vmin.xlane.f32.xlu1 %v5706_v34  ;;  %v5711_v57 = vshll.u32 %v5710_v36, 16  ;;  %v10887_v34 = vld [vmem:[#allocation7 + $0x80] sm:$0xff]  ;;  %v10890_v36 = vld [vmem:[#allocation7 + $0x78] sm:$0xff] }
 0xcd5   :  { %v5708_v50 = vpop.xlane.xlu1 %5707 }
 0xcd6   :  { %v5709_v4 = vcvt.f32.s32 %v5708_v50  ;;  %v10893_v50 = vld [vmem:[#allocation7 + $0x70] sm:$0xff] }
 0xcd8   :  { %v5712_v52 = vadd.s32 %v5711_v57, %v5709_v4  ;;  %v10896_v57 = vld [vmem:[#allocation7 + $0x68] sm:$0xff]  ;;  %v10899_v4 = vld [vmem:[#allocation7 + $0x60] sm:$0xff] }
 0xcda   :  { %vm5713_vm8 = vcmp.eq.s32.totalorder %v11973_v60, %v5712_v52  ;;  %v10902_v52 = vld [vmem:[#allocation7 + $0x58] sm:$0xff] }
 0xcdb   :  { %v7253_v62 = vsel %vm5713_vm8, 1.0, %v11920_v2 }
 0xcdc   :  { %7255 = vmatmul.mubr.msk.f32.vlgmr.msra.gmra.mxu1 %vm460_vm0, %v7253_v62  ;;  %v10905_v62 = vld [vmem:[#allocation7 + $0x50] sm:$0xff] }
 0xcdd   :  { %7336 = vmatpush3.msra.mxu1 %v11974_v0  ;;  %v12041_v0 = vld [vmem:[#allocation63_spill] sm:$0xff] }
 0xcde   :  { %7337 = vmatprep.subr.mxu1 %v11975_v23  ;;  %v12042_v23 = vld [vmem:[#allocation64_spill] sm:$0xff] }
 0xcdf   :  { %7338 = vmatpush3.msra.mxu1 %v11976_v11  ;;  %v12043_v11 = vld [vmem:[#allocation65_spill] sm:$0xff] }
 0xce0   :  { %7339 = vmatprep.subr.mxu1 %v11977_v56  ;;  %v12044_v56 = vld [vmem:[#allocation66_spill] sm:$0xff] }
 0xce1   :  { %7340 = vmatpush3.msra.mxu1 %v11978_v63  ;;  %v12045_v63 = vld [vmem:[#allocation67_spill] sm:$0xff] }
 0xce2   :  { %7341 = vmatprep.subr.mxu1 %v11979_v22  ;;  %v12046_v22 = vld [vmem:[#allocation68_spill] sm:$0xff] }
 0xce3   :  { %7342 = vmatpush3.msra.mxu1 %v12036_v30  ;;  %v10908_v30 = vld [vmem:[#allocation7 + $0x48] sm:$0xff] }
 0xce4   :  { %7343 = vmatprep.subr.mxu1 %v12037_v28  ;;  %v10911_v28 = vld [vmem:[#allocation7 + $0x40] sm:$0xff] }
 0xce5   :  { %7344 = vmatpush3.msra.mxu1 %v12038_v33  ;;  %v10914_v33 = vld [vmem:[#allocation7 + $0x38] sm:$0xff] }
 0xce6   :  { %7345 = vmatprep.subr.mxu1 %v12039_v17  ;;  %12059 = vst [vmem:[#allocation51_spill] sm:$0xff] %v10914_v33  ;;  %v10917_v17 = vld [vmem:[#allocation7 + $0x30] sm:$0xff] }
 0xce7   :  { %7346 = vmatpush3.msra.mxu1 %v12040_v15  ;;  %12060 = vst [vmem:[#allocation52_spill] sm:$0xff] %v10917_v17 }
 0xce8   :  { %7347 = vmatprep.subr.mxu1 %v12041_v0 }
 0xce9   :  { %7348 = vmatpush3.msra.mxu1 %v12042_v23 }
 0xcea   :  { %7349 = vmatprep.subr.mxu1 %v12043_v11 }
 0xceb   :  { %7350 = vmatpush3.msra.mxu1 %v12044_v56 }
 0xcec   :  { %7351 = vmatprep.subr.mxu1 %v12045_v63 }
 0xced   :  { %7352 = vmatpush3.msra.mxu1 %v12046_v22 }
 0xcee   :  { %7353 = vmatprep.subr.mxu1 %v12047_v26 }
 0xcef   :  { %7354 = vmatpush3.msra.mxu1 %v12048_v46 }
 0xcf0   :  { %7355 = vmatprep.subr.mxu1 %v12049_v14 }
 0xcf1   :  { %7356 = vmatpush3.msra.mxu1 %v12050_v13 }
 0xcf2   :  { %7357 = vmatprep.subr.mxu1 %v12051_v21 }
 0xcf3   :  { %7358 = vmatpush3.msra.mxu1 %v12052_v38 }
 0xcf4   :  { %7359 = vmatprep.subr.mxu1 %v12053_v54 }
 0xcf5   :  { %7360 = vmatpush3.msra.mxu1 %v12054_v45 }
 0xcf6   :  { %7361 = vmatprep.subr.mxu1 %v12055_v3 }
 0xcf7   :  { %7362 = vmatpush3.msra.mxu1 %v12056_v19 }
 0xcf8   :  { %7363 = vmatprep.subr.mxu1 %v12057_v8 }
 0xcf9   :  { %7364 = vmatpush3.msra.mxu1 %v12058_v39 }
 0xcfa   :  { %7365 = vmatprep.subr.mxu1 %v11999_v24 }
 0xcfb   :  { %7366 = vmatpush3.msra.mxu1 %v12000_v49 }
 0xcfc   :  { %6005 = vmatprep.subr.mxu1 %v10837_v10 }
 0xd9c   :  { %v5874_v6 = vpop.f32.mrf.mxu1 }
 0xd9d   :  { %v5875_v42 = vadd.f32 %v5874_v6, %v5800_v44  ;;  %v10920_v44 = vld [vmem:[#allocation7 + $0x28] sm:$0xff]  ;;  %v10923_v6 = vld [vmem:[#allocation7 + $0x20] sm:$0xff] }
 0xd9e   :  { %v5876_v16 = vpop.f32.mrf.mxu1  ;;  %12061 = vst [vmem:[#allocation53_spill] sm:$0xff] %v10920_v44  ;;  %12062 = vst [vmem:[#allocation54_spill] sm:$0xff] %v10923_v6 }
 0xd9f   :  { %v5877_v59 = vadd.f32 %v5876_v16, %v5802_v9  ;;  %v5879_v20 = vadd.f32 %v5875_v42, %v10574_v29  ;;  %v10926_v42 = vld [vmem:[#allocation7 + $0x18] sm:$0xff]  ;;  %v10929_v9 = vld [vmem:[#allocation7 + $0x10] sm:$0xff]  ;;  %v10932_v16 = vld [vmem:[#allocation7 + $0x8] sm:$0xff] }
 0xda0   :  { %12063 = vst [vmem:[#allocation55_spill] sm:$0xff] %v10926_v42  ;;  %12064 = vst [vmem:[#allocation56_spill] sm:$0xff] %v10929_v9 }
 0xda1   :  { %v5880_v47 = vadd.f32 %v5877_v59, %v10577_v48  ;;  %12065 = vst [vmem:[#allocation57_spill] sm:$0xff] %v10932_v16  ;;  %v10935_v59 = vld [vmem:[#allocation7] sm:$0xff] }
 0xda2   :  { %12066 = vst [vmem:[#allocation81_spill] sm:$0xff] %v10935_v59 }
 0xda3   :  { %7901 = vtanh.f32 %v5880_v47  ;;  %v10941_v47 = vld [vmem:[#allocation7 + $0x1f0] sm:$0xff] }
 0xda4   :  { %7903 = vtanh.f32 %v5879_v20  ;;  %v10938_v20 = vld [vmem:[#allocation7 + $0x1f8] sm:$0xff]  ;;  %12068 = vst [vmem:[#allocation16_spill] sm:$0xff] %v10941_v47 }
 0xda5   :  { %12067 = vst [vmem:[#allocation82_spill] sm:$0xff] %v10938_v20 }
 0xdb0   :  { %v7902_v18 = vpop.eup %7901 }
 0xdb1   :  { %v10842_v35 = vpop.eup %7903  ;;  %5947 = vmatprep.mubr.f32.mxu1 %v7902_v18 }
 0xdb2   :  { %5948 = vmatmul.mubr.f32.vlgmr.msra.gmra.mxu1 %v10842_v35 }
 0xdb3   :  { %6006 = vmatpush1.msra.mxu1 %v10845_v37  ;;  %6069 = vmatprep.mubr.f32.mxu1 %v7902_v18  ;;  %v10944_v18 = vld [vmem:[#allocation7 + $0x1e8] sm:$0xff] }
 0xdb4   :  { %6007 = vmatprep.subr.mxu1 %v10848_v5  ;;  %12069 = vst [vmem:[#allocation17_spill] sm:$0xff] %v10944_v18 }
 0xdb5   :  { %6008 = vmatpush1.msra.mxu1 %v10851_v55 }
 0xdb6   :  { %6009 = vmatprep.subr.mxu1 %v10854_v40 }
 0xdb7   :  { %6010 = vmatpush1.msra.mxu1 %v10857_v31 }
 0xdb8   :  { %6011 = vmatprep.subr.mxu1 %v10860_v58 }
 0xdb9   :  { %6012 = vmatpush1.msra.mxu1 %v10863_v32 }
 0xdba   :  { %6013 = vmatprep.subr.mxu1 %v10866_v1 }
 0xdbb   :  { %6014 = vmatpush1.msra.mxu1 %v10869_v51 }
 0xdbc   :  { %6015 = vmatprep.subr.mxu1 %v10872_v41 }
 0xdbd   :  { %6016 = vmatpush1.msra.mxu1 %v10875_v12 }
 0xdbe   :  { %6017 = vmatprep.subr.mxu1 %v10878_v25 }
 0xdbf   :  { %6018 = vmatpush1.msra.mxu1 %v10881_v53 }
 0xdc0   :  { %6019 = vmatprep.subr.mxu1 %v10884_v7 }
 0xdc1   :  { %6020 = vmatpush1.msra.mxu1 %v10887_v34 }
 0xdc2   :  { %6021 = vmatprep.subr.mxu1 %v10890_v36 }
 0xdc3   :  { %6022 = vmatpush1.msra.mxu1 %v10893_v50 }
 0xdc4   :  { %6023 = vmatprep.subr.mxu1 %v10896_v57 }
 0xdc5   :  { %6024 = vmatpush1.msra.mxu1 %v10899_v4 }
 0xdc6   :  { %6025 = vmatprep.subr.mxu1 %v10902_v52 }
 0xdc7   :  { %6026 = vmatpush1.msra.mxu1 %v10905_v62 }
 0xdc8   :  { %6027 = vmatprep.subr.mxu1 %v10908_v30 }
 0xdc9   :  { %6028 = vmatpush1.msra.mxu1 %v10911_v28 }
 0xdca   :  { %6029 = vmatprep.subr.mxu1 %v10914_v33 }
 0xdcb   :  { %6030 = vmatpush1.msra.mxu1 %v10917_v17 }
 0xdcc   :  { %6031 = vmatprep.subr.mxu1 %v10920_v44 }
 0xdcd   :  { %6032 = vmatpush1.msra.mxu1 %v10923_v6 }
 0xdce   :  { %6033 = vmatprep.subr.mxu1 %v10926_v42 }
 0xdcf   :  { %6034 = vmatpush1.msra.mxu1 %v10929_v9 }
 0xdd0   :  { %6035 = vmatprep.subr.mxu1 %v10932_v16 }
 0xdd1   :  { %6036 = vmatpush1.msra.mxu1 %v10935_v59  ;;  %v10953_v59 = vld [vmem:[#allocation7 + $0x1d0] sm:$0xff] }
 0xdd2   :  { %6037 = vmatprep.subr.mxu1 %v10938_v20  ;;  %12072 = vst [vmem:[#allocation20_spill] sm:$0xff] %v10953_v59  ;;  %v10956_v20 = vld [vmem:[#allocation7 + $0x1c8] sm:$0xff] }
 0xdd3   :  { %6038 = vmatpush2.msra.mxu1 %v10941_v47  ;;  %12073 = vst [vmem:[#allocation21_spill] sm:$0xff] %v10956_v20  ;;  %v10959_v47 = vld [vmem:[#allocation7 + $0x1c0] sm:$0xff] }
 0xdd4   :  { %6039 = vmatprep.subr.mxu1 %v10944_v18  ;;  %12074 = vst [vmem:[#allocation22_spill] sm:$0xff] %v10959_v47  ;;  %v10962_v18 = vld [vmem:[#allocation7 + $0x1b8] sm:$0xff] }
 0xdd5   :  { %6040 = vmatpush2.msra.mxu1 %v10947_v61  ;;  %12075 = vst [vmem:[#allocation23_spill] sm:$0xff] %v10962_v18  ;;  %v10965_v61 = vld [vmem:[#allocation7 + $0x1b0] sm:$0xff] }
 0xdd6   :  { %6041 = vmatprep.subr.mxu1 %v10950_v43  ;;  %12076 = vst [vmem:[#allocation24_spill] sm:$0xff] %v10965_v61  ;;  %v10968_v43 = vld [vmem:[#allocation7 + $0x1a8] sm:$0xff] }
 0xdd7   :  { %6042 = vmatpush2.msra.mxu1 %v10953_v59  ;;  %12077 = vst [vmem:[#allocation25_spill] sm:$0xff] %v10968_v43  ;;  %v10971_v59 = vld [vmem:[#allocation7 + $0x1a0] sm:$0xff] }
 0xdd8   :  { %6043 = vmatprep.subr.mxu1 %v10956_v20  ;;  %12078 = vst [vmem:[#allocation26_spill] sm:$0xff] %v10971_v59  ;;  %v10974_v20 = vld [vmem:[#allocation7 + $0x198] sm:$0xff] }
 0xdd9   :  { %6044 = vmatpush2.msra.mxu1 %v10959_v47  ;;  %12079 = vst [vmem:[#allocation27_spill] sm:$0xff] %v10974_v20  ;;  %v10977_v47 = vld [vmem:[#allocation7 + $0x190] sm:$0xff] }
 0xdda   :  { %6045 = vmatprep.subr.mxu1 %v10962_v18  ;;  %12080 = vst [vmem:[#allocation28_spill] sm:$0xff] %v10977_v47  ;;  %v10980_v18 = vld [vmem:[#allocation7 + $0x188] sm:$0xff] }
 0xddb   :  { %6046 = vmatpush2.msra.mxu1 %v10965_v61  ;;  %12081 = vst [vmem:[#allocation29_spill] sm:$0xff] %v10980_v18  ;;  %v10983_v61 = vld [vmem:[#allocation7 + $0x180] sm:$0xff] }
 0xddc   :  { %6047 = vmatprep.subr.mxu1 %v10968_v43  ;;  %12082 = vst [vmem:[#allocation30_spill] sm:$0xff] %v10983_v61  ;;  %v10986_v43 = vld [vmem:[#allocation7 + $0x178] sm:$0xff] }
 0xddd   :  { %6048 = vmatpush2.msra.mxu1 %v10971_v59  ;;  %12083 = vst [vmem:[#allocation31_spill] sm:$0xff] %v10986_v43  ;;  %v10989_v59 = vld [vmem:[#allocation7 + $0x170] sm:$0xff] }
 0xdde   :  { %6049 = vmatprep.subr.mxu1 %v10974_v20  ;;  %12084 = vst [vmem:[#allocation33_spill] sm:$0xff] %v10989_v59  ;;  %v10992_v20 = vld [vmem:[#allocation7 + $0x168] sm:$0xff] }
 0xddf   :  { %6050 = vmatpush2.msra.mxu1 %v10977_v47  ;;  %12085 = vst [vmem:[#allocation39_spill] sm:$0xff] %v10992_v20  ;;  %v10995_v47 = vld [vmem:[#allocation7 + $0x160] sm:$0xff] }
 0xde0   :  { %6051 = vmatprep.subr.mxu1 %v10980_v18  ;;  %12086 = vst [vmem:[#allocation41_spill] sm:$0xff] %v10995_v47  ;;  %v10998_v18 = vld [vmem:[#allocation7 + $0x158] sm:$0xff] }
 0xde1   :  { %6052 = vmatpush2.msra.mxu1 %v10983_v61  ;;  %12087 = vst [vmem:[#allocation43_spill] sm:$0xff] %v10998_v18  ;;  %v11001_v61 = vld [vmem:[#allocation7 + $0x150] sm:$0xff] }
 0xde2   :  { %6053 = vmatprep.subr.mxu1 %v10986_v43  ;;  %12088 = vst [vmem:[#allocation45_spill] sm:$0xff] %v11001_v61  ;;  %v11004_v43 = vld [vmem:[#allocation7 + $0x148] sm:$0xff] }
 0xde3   :  { %6054 = vmatpush2.msra.mxu1 %v10989_v59  ;;  %12089 = vst [vmem:[#allocation47_spill] sm:$0xff] %v11004_v43  ;;  %v11007_v59 = vld [vmem:[#allocation7 + $0x140] sm:$0xff] }
 0xde4   :  { %6055 = vmatprep.subr.mxu1 %v10992_v20  ;;  %12090 = vst [vmem:[#allocation49_spill] sm:$0xff] %v11007_v59  ;;  %v11010_v20 = vld [vmem:[#allocation7 + $0x138] sm:$0xff] }
 0xde5   :  { %6056 = vmatpush2.msra.mxu1 %v10995_v47  ;;  %12091 = vst [vmem:[#allocation14_spill] sm:$0xff] %v11010_v20  ;;  %v11013_v47 = vld [vmem:[#allocation7 + $0x130] sm:$0xff] }
 0xde6   :  { %6057 = vmatprep.subr.mxu1 %v10998_v18  ;;  %12092 = vst [vmem:[#allocation36_spill] sm:$0xff] %v11013_v47  ;;  %v11016_v18 = vld [vmem:[#allocation7 + $0x128] sm:$0xff] }
 0xde7   :  { %6058 = vmatpush2.msra.mxu1 %v11001_v61  ;;  %12093 = vst [vmem:[#allocation38_spill] sm:$0xff] %v11016_v18  ;;  %v11019_v61 = vld [vmem:[#allocation7 + $0x120] sm:$0xff] }
 0xde8   :  { %6059 = vmatprep.subr.mxu1 %v11004_v43  ;;  %12094 = vst [vmem:[#allocation40_spill] sm:$0xff] %v11019_v61  ;;  %v11022_v43 = vld [vmem:[#allocation7 + $0x118] sm:$0xff] }
 0xde9   :  { %6060 = vmatpush2.msra.mxu1 %v11007_v59  ;;  %12095 = vst [vmem:[#allocation42_spill] sm:$0xff] %v11022_v43  ;;  %v11025_v59 = vld [vmem:[#allocation7 + $0x110] sm:$0xff] }
 0xdea   :  { %6061 = vmatprep.subr.mxu1 %v11010_v20  ;;  %12096 = vst [vmem:[#allocation44_spill] sm:$0xff] %v11025_v59  ;;  %v11028_v20 = vld [vmem:[#allocation7 + $0x108] sm:$0xff] }
 0xdeb   :  { %6062 = vmatpush2.msra.mxu1 %v11013_v47  ;;  %12097 = vst [vmem:[#allocation46_spill] sm:$0xff] %v11028_v20  ;;  %v11031_v47 = vld [vmem:[#allocation7 + $0x100] sm:$0xff] }
 0xdec   :  { %6063 = vmatprep.subr.mxu1 %v11016_v18  ;;  %12098 = vst [vmem:[#allocation48_spill] sm:$0xff] %v11031_v47 }
 0xded   :  { %6064 = vmatpush2.msra.mxu1 %v11019_v61  ;;  %v11038_v61 = vld [vmem:[%s11598_s6 + $0x38] sm:$0xff] }
 0xdee   :  { %6065 = vmatprep.subr.mxu1 %v11022_v43  ;;  %12099 = vst [vmem:[#allocation50_spill] sm:$0xff] %v11038_v61 }
 0xdef   :  { %6066 = vmatpush2.msra.mxu1 %v11025_v59  ;;  %v11044_v59 = vld [vmem:[%s11598_s6 + $0x30] sm:$0xff] }
 0xdf0   :  { %6067 = vmatprep.subr.mxu1 %v11028_v20  ;;  %12100 = vst [vmem:[#allocation58_spill] sm:$0xff] %v11044_v59 }
 0xdf1   :  { %6068 = vmatpush2.msra.mxu1 %v11031_v47  ;;  %v11069_v47 = vld [vmem:[%s11598_s6 + $0x10] sm:$0xff] }
 0xdf2   :  { %6070 = vmatmul.mubr.f32.vlgmr.msra.gmra.mxu1 %v10842_v35  ;;  %6374 = vmatprep.subr.mxu1 %v11038_v61  ;;  %v11051_v35 = vld [vmem:[%s11598_s6 + $0x28] sm:$0xff]  ;;  %v11057_v61 = vld [vmem:[%s11598_s6 + $0x20] sm:$0xff]  ;;  %12104 = vst [vmem:[#allocation62_spill] sm:$0xff] %v11069_v47 }
 0xdf3   :  { %6375 = vmatpush1.msra.mxu1 %v11044_v59  ;;  %6414 = vmatprep.mubr.f32.mxu1 %v11920_v2  ;;  %12101 = vst [vmem:[#allocation59_spill] sm:$0xff] %v11051_v35  ;;  %12102 = vst [vmem:[#allocation60_spill] sm:$0xff] %v11057_v61  ;;  %v11063_v59 = vld [vmem:[%s11598_s6 + $0x18] sm:$0xff] }
 0xdf4   :  { %6376 = vmatprep.subr.mxu1 %v11051_v35  ;;  %12103 = vst [vmem:[#allocation61_spill] sm:$0xff] %v11063_v59  ;;  %v11075_v35 = vld [vmem:[%s11598_s6 + $0x8] sm:$0xff] }
 0xdf5   :  { %6377 = vmatpush1.msra.mxu1 %v11057_v61  ;;  %12105 = vst [vmem:[#allocation63_spill] sm:$0xff] %v11075_v35  ;;  %v11081_v61 = vld [vmem:[%s11598_s6] sm:$0xff] }
 0xdf6   :  { %6378 = vmatprep.subr.mxu1 %v11063_v59  ;;  %12106 = vst [vmem:[#allocation64_spill] sm:$0xff] %v11081_v61  ;;  %v11087_v59 = vld [vmem:[%s11601_s9 + $0xf8] sm:$0xff] }
 0xdf7   :  { %6379 = vmatpush1.msra.mxu1 %v11069_v47  ;;  %12107 = vst [vmem:[#allocation65_spill] sm:$0xff] %v11087_v59 }
 0xdf8   :  { %6380 = vmatprep.subr.mxu1 %v11075_v35 }
 0xdf9   :  { %6381 = vmatpush1.msra.mxu1 %v11081_v61 }
 0xdfa   :  { %7405 = vmatprep.subr.mxu1 %v11087_v59 }
 0xe72   :  { %v7367_v47 = vpop.f32.mrf.mxu1 }
 0xe74   :  { %v7368_v20 = vpop.f32.mrf.mxu1 }
 0xe75   :  { %v7369_v43 = vadd.f32 %v7368_v20, %v7367_v47 }
 0xe77   :  { %v5950_v18 = vadd.f32 %v7369_v43, %v12033_v27 }
 0xe79   :  { %v5953_v35 = vsel %vm5410_vm2, %v5950_v18, -inf }
 0xe7a   :  { %5954 = vmax.xlane.f32.xlu0 %v5953_v35 }
 0xf03   :  { %v5955_v16 = vpop.xlane.xlu0 %5954 }
 0xf04   :  { %v5956_v9 = vsub.f32 %v5950_v18, %v5955_v16 }
 0xf06   :  { %v5957_v42 = vmul.f32 1.442695, %v5956_v9 }
 0xf08   :  { %7905 = vpow2.f32 %v5957_v42 }
 0xf15   :  { %v7906_v61 = vpop.eup %7905 }
 0xf16   :  { %v5959_v6 = vsel %vm5410_vm2, %v7906_v61, 0.0 }
 0xf17   :  { %5960 = vadd.xlane.f32.xlu1 %v5959_v6 }
 0xfa0   :  { %v5961_v44 = vpop.xlane.xlu1 %5960 }
 0xfa1   :  { %7907 = vrcp.f32 %v5961_v44 }
 0xfae   :  { %v7908_v17 = vpop.eup %7907 }
 0xfaf   :  { %v11093_v59 = vmul.f32 %v7908_v17, %v7906_v61 }
 0xfb1   :  { %12108 = vst [vmem:[#allocation66_spill] sm:$0xff] %v11093_v59  ;;  %v5964_v20 = vsel %vm5410_vm2, %v11093_v59, -inf }
 0xfb2   :  { %5965 = vmax.xlane.f32.xlu0 %v5964_v20 }
0x103b   :  { %v11097_v43 = vpop.xlane.xlu0 %5965 }
0x103c   :  { %12109 = vst [vmem:[#allocation67_spill] sm:$0xff] %v11097_v43  ;;  %vm5967_vm9 = vcmp.ge.f32.partialorder %v11093_v59, %v11097_v43  ;;  %v12134_v43 = vld [vmem:[#allocation31_spill] sm:$0xff] }
0x103d   :  { %v5968_v42 = vsel %vm5967_vm9, %v11973_v60, 32 }
0x103e   :  { %v5969_v9 = vsel %vm5410_vm2, %v5968_v42, 2147483647  ;;  %v11109_v42 = vld [vmem:[%s11601_s9 + $0x78] sm:$0xff] }
0x103f   :  { %v5971_v16 = vshra.s32 %v5969_v9, 16  ;;  %v5970_v44 = vand.u32 65535, %v5969_v9  ;;  %v11115_v9 = vld [vmem:[%s11601_s9 + $0xf0] sm:$0xff] }
0x1041   :  { %v5973_v6 = vcvt.s32.f32 %v5971_v16  ;;  %v5972_v61 = vcvt.s32.f32 %v5970_v44  ;;  %v11139_v16 = vld [vmem:[%s11601_s9 + $0xe0] sm:$0xff]  ;;  %v11151_v44 = vld [vmem:[%s11601_s9 + $0xd8] sm:$0xff] }
0x1043   :  { %5974 = vmin.xlane.f32.xlu1 %v5973_v6 }
0x10cc   :  { %v5975_v47 = vpop.xlane.xlu1 %5974 }
0x10cd   :  { %vm5976_vm10 = vcmp.eq.f32.partialorder %v5973_v6, %v5975_v47  ;;  %v5981_v18 = vcvt.f32.s32 %v5975_v47  ;;  %v11145_v6 = vld [vmem:[%s11601_s9 + $0x60] sm:$0xff]  ;;  %v11157_v47 = vld [vmem:[%s11601_s9 + $0x58] sm:$0xff] }
0x10ce   :  { %v5977_v17 = vsel %vm5976_vm10, %v5972_v61, inf  ;;  %v11163_v61 = vld [vmem:[%s11601_s9 + $0xd0] sm:$0xff] }
0x10cf   :  { %5978 = vmin.xlane.f32.xlu0 %v5977_v17  ;;  %v5982_v20 = vshll.u32 %v5981_v18, 16  ;;  %v12121_v17 = vld [vmem:[#allocation18_spill] sm:$0xff]  ;;  %v12122_v18 = vld [vmem:[#allocation19_spill] sm:$0xff] }
0x1158   :  { %v5979_v35 = vpop.xlane.xlu0 %5978 }
0x1159   :  { %v5980_v27 = vcvt.f32.s32 %v5979_v35  ;;  %v12123_v35 = vld [vmem:[#allocation20_spill] sm:$0xff] }
0x115b   :  { %v5983_v33 = vadd.s32 %v5982_v20, %v5980_v27  ;;  %v11121_v27 = vld [vmem:[%s11601_s9 + $0x70] sm:$0xff]  ;;  %v12124_v20 = vld [vmem:[#allocation21_spill] sm:$0xff] }
0x115d   :  { %vm5984_vm11 = vcmp.eq.s32.totalorder %v11973_v60, %v5983_v33  ;;  %v11127_v33 = vld [vmem:[%s11601_s9 + $0xe8] sm:$0xff] }
0x115e   :  { %v7256_v59 = vsel %vm5984_vm11, 1.0, %v11920_v2 }
0x115f   :  { %7258 = vmatmul.mubr.msk.f32.vlgmr.msra.gmra.mxu0 %vm460_vm0, %v7256_v59  ;;  %v11133_v59 = vld [vmem:[%s11601_s9 + $0x68] sm:$0xff] }
0x1160   :  { %7371 = vmatpush3.msra.mxu0 %v11109_v42 }
0x1161   :  { %7372 = vmatprep.subr.mxu0 %v11115_v9 }
0x1162   :  { %7373 = vmatpush3.msra.mxu0 %v11121_v27 }
0x1163   :  { %7374 = vmatprep.subr.mxu0 %v11127_v33 }
0x1164   :  { %7375 = vmatpush3.msra.mxu0 %v11133_v59 }
0x1165   :  { %7376 = vmatprep.subr.mxu0 %v11139_v16 }
0x1166   :  { %7377 = vmatpush3.msra.mxu0 %v11145_v6 }
0x1167   :  { %7378 = vmatprep.subr.mxu0 %v11151_v44 }
0x1168   :  { %7379 = vmatpush3.msra.mxu0 %v11157_v47 }
0x1169   :  { %7380 = vmatprep.subr.mxu0 %v11163_v61 }
0x116a   :  { %7381 = vmatpush3.msra.mxu0 %v12040_v15  ;;  %v6071_v15 = vpop.f32.mrf.mxu1 }
0x116b   :  { %7382 = vmatprep.subr.mxu0 %v12041_v0 }
0x116c   :  { %7383 = vmatpush3.msra.mxu0 %v12042_v23 }
0x116d   :  { %7384 = vmatprep.subr.mxu0 %v12043_v11  ;;  %v6073_v11 = vpop.f32.mrf.mxu1 }
0x116e   :  { %7385 = vmatpush3.msra.mxu0 %v12044_v56 }
0x116f   :  { %7386 = vmatprep.subr.mxu0 %v12045_v63 }
0x1170   :  { %7387 = vmatpush3.msra.mxu0 %v12046_v22 }
0x1171   :  { %7388 = vmatprep.subr.mxu0 %v12047_v26 }
0x1172   :  { %7389 = vmatpush3.msra.mxu0 %v12048_v46 }
0x1173   :  { %7390 = vmatprep.subr.mxu0 %v12049_v14 }
0x1174   :  { %7391 = vmatpush3.msra.mxu0 %v12050_v13  ;;  %v12112_v13 = vld [vmem:[#allocation53_spill] sm:$0xff] }
0x1175   :  { %7392 = vmatprep.subr.mxu0 %v12051_v21  ;;  %v12113_v21 = vld [vmem:[#allocation54_spill] sm:$0xff] }
0x1176   :  { %7393 = vmatpush3.msra.mxu0 %v12052_v38  ;;  %v12114_v38 = vld [vmem:[#allocation55_spill] sm:$0xff] }
0x1177   :  { %7394 = vmatprep.subr.mxu0 %v12053_v54  ;;  %v12115_v54 = vld [vmem:[#allocation56_spill] sm:$0xff] }
0x1178   :  { %7395 = vmatpush3.msra.mxu0 %v12054_v45  ;;  %v12116_v45 = vld [vmem:[#allocation57_spill] sm:$0xff] }
0x1179   :  { %7396 = vmatprep.subr.mxu0 %v12055_v3  ;;  %v12117_v3 = vld [vmem:[#allocation81_spill] sm:$0xff] }
0x117a   :  { %7397 = vmatpush3.msra.mxu0 %v12056_v19  ;;  %v12118_v19 = vld [vmem:[#allocation82_spill] sm:$0xff] }
0x117b   :  { %7398 = vmatprep.subr.mxu0 %v12057_v8  ;;  %v12119_v8 = vld [vmem:[#allocation16_spill] sm:$0xff] }
0x117c   :  { %7399 = vmatpush3.msra.mxu0 %v12058_v39  ;;  %v12120_v39 = vld [vmem:[#allocation17_spill] sm:$0xff] }
0x117d   :  { %7400 = vmatprep.subr.mxu0 %v11999_v24  ;;  %v12110_v24 = vld [vmem:[#allocation51_spill] sm:$0xff] }
0x117e   :  { %7401 = vmatpush3.msra.mxu0 %v12000_v49  ;;  %v12111_v49 = vld [vmem:[#allocation52_spill] sm:$0xff] }
0x117f   :  { %6276 = vmatprep.subr.mxu0 %v10837_v10 }
0x121f   :  { %v6145_v0 = vpop.f32.mrf.mxu0 }
0x1220   :  { %v6146_v23 = vadd.f32 %v6145_v0, %v6071_v15  ;;  %v12125_v15 = vld [vmem:[#allocation22_spill] sm:$0xff]  ;;  %v12126_v0 = vld [vmem:[#allocation23_spill] sm:$0xff] }
0x1221   :  { %v6147_v56 = vpop.f32.mrf.mxu0 }
0x1222   :  { %v6148_v63 = vadd.f32 %v6147_v56, %v6073_v11  ;;  %v6150_v22 = vadd.f32 %v6146_v23, %v10574_v29  ;;  %v12127_v23 = vld [vmem:[#allocation24_spill] sm:$0xff]  ;;  %v12128_v11 = vld [vmem:[#allocation25_spill] sm:$0xff]  ;;  %v12129_v56 = vld [vmem:[#allocation26_spill] sm:$0xff] }
0x1224   :  { %v6151_v26 = vadd.f32 %v6148_v63, %v10577_v48  ;;  %v12130_v63 = vld [vmem:[#allocation27_spill] sm:$0xff] }
0x1226   :  { %7909 = vtanh.f32 %v6151_v26  ;;  %v12132_v26 = vld [vmem:[#allocation29_spill] sm:$0xff] }
0x1227   :  { %7911 = vtanh.f32 %v6150_v22  ;;  %v12131_v22 = vld [vmem:[#allocation28_spill] sm:$0xff] }
0x1233   :  { %v7910_v46 = vpop.eup %7909 }
0x1234   :  { %v11190_v14 = vpop.eup %7911  ;;  %6218 = vmatprep.mubr.f32.mxu0 %v7910_v46 }
0x1235   :  { %6219 = vmatmul.mubr.f32.vlgmr.msra.gmra.mxu0 %v11190_v14 }
0x1236   :  { %6277 = vmatpush1.msra.mxu0 %v10845_v37  ;;  %6340 = vmatprep.mubr.f32.mxu0 %v7910_v46  ;;  %v12133_v46 = vld [vmem:[#allocation30_spill] sm:$0xff] }
0x1237   :  { %6278 = vmatprep.subr.mxu0 %v10848_v5 }
0x1238   :  { %6279 = vmatpush1.msra.mxu0 %v10851_v55 }
0x1239   :  { %6280 = vmatprep.subr.mxu0 %v10854_v40 }
0x123a   :  { %6281 = vmatpush1.msra.mxu0 %v10857_v31 }
0x123b   :  { %6282 = vmatprep.subr.mxu0 %v10860_v58 }
0x123c   :  { %6283 = vmatpush1.msra.mxu0 %v10863_v32 }
0x123d   :  { %6284 = vmatprep.subr.mxu0 %v10866_v1 }
0x123e   :  { %6285 = vmatpush1.msra.mxu0 %v10869_v51 }
0x123f   :  { %6286 = vmatprep.subr.mxu0 %v10872_v41 }
0x1240   :  { %6287 = vmatpush1.msra.mxu0 %v10875_v12 }
0x1241   :  { %6288 = vmatprep.subr.mxu0 %v10878_v25 }
0x1242   :  { %6289 = vmatpush1.msra.mxu0 %v10881_v53 }
0x1243   :  { %6290 = vmatprep.subr.mxu0 %v10884_v7 }
0x1244   :  { %6291 = vmatpush1.msra.mxu0 %v10887_v34 }
0x1245   :  { %6292 = vmatprep.subr.mxu0 %v10890_v36 }
0x1246   :  { %6293 = vmatpush1.msra.mxu0 %v10893_v50 }
0x1247   :  { %6294 = vmatprep.subr.mxu0 %v10896_v57 }
0x1248   :  { %6295 = vmatpush1.msra.mxu0 %v10899_v4 }
0x1249   :  { %6296 = vmatprep.subr.mxu0 %v10902_v52 }
0x124a   :  { %6297 = vmatpush1.msra.mxu0 %v10905_v62 }
0x124b   :  { %6298 = vmatprep.subr.mxu0 %v10908_v30 }
0x124c   :  { %6299 = vmatpush1.msra.mxu0 %v10911_v28 }
0x124d   :  { %6300 = vmatprep.subr.mxu0 %v12110_v24 }
0x124e   :  { %6301 = vmatpush1.msra.mxu0 %v12111_v49 }
0x124f   :  { %6302 = vmatprep.subr.mxu0 %v12112_v13 }
0x1250   :  { %6303 = vmatpush1.msra.mxu0 %v12113_v21 }
0x1251   :  { %6304 = vmatprep.subr.mxu0 %v12114_v38 }
0x1252   :  { %6305 = vmatpush1.msra.mxu0 %v12115_v54 }
0x1253   :  { %6306 = vmatprep.subr.mxu0 %v12116_v45 }
0x1254   :  { %6307 = vmatpush1.msra.mxu0 %v12117_v3 }
0x1255   :  { %6308 = vmatprep.subr.mxu0 %v12118_v19 }
0x1256   :  { %6309 = vmatpush2.msra.mxu0 %v12119_v8 }
0x1257   :  { %6310 = vmatprep.subr.mxu0 %v12120_v39 }
0x1258   :  { %6311 = vmatpush2.msra.mxu0 %v12121_v17 }
0x1259   :  { %6312 = vmatprep.subr.mxu0 %v12122_v18 }
0x125a   :  { %6313 = vmatpush2.msra.mxu0 %v12123_v35 }
0x125b   :  { %6314 = vmatprep.subr.mxu0 %v12124_v20  ;;  %v12135_v20 = vld [vmem:[#allocation33_spill] sm:$0xff] }
0x125c   :  { %6315 = vmatpush2.msra.mxu0 %v12125_v15  ;;  %v12136_v15 = vld [vmem:[#allocation39_spill] sm:$0xff] }
0x125d   :  { %6316 = vmatprep.subr.mxu0 %v12126_v0  ;;  %v12137_v0 = vld [vmem:[#allocation41_spill] sm:$0xff] }
0x125e   :  { %6317 = vmatpush2.msra.mxu0 %v12127_v23  ;;  %v12138_v23 = vld [vmem:[#allocation43_spill] sm:$0xff] }
0x125f   :  { %6318 = vmatprep.subr.mxu0 %v12128_v11  ;;  %v12139_v11 = vld [vmem:[#allocation45_spill] sm:$0xff] }
0x1260   :  { %6319 = vmatpush2.msra.mxu0 %v12129_v56  ;;  %v12140_v56 = vld [vmem:[#allocation47_spill] sm:$0xff] }
0x1261   :  { %6320 = vmatprep.subr.mxu0 %v12130_v63  ;;  %v12141_v63 = vld [vmem:[#allocation49_spill] sm:$0xff] }
0x1262   :  { %6321 = vmatpush2.msra.mxu0 %v12131_v22  ;;  %v12142_v22 = vld [vmem:[#allocation14_spill] sm:$0xff] }
0x1263   :  { %6322 = vmatprep.subr.mxu0 %v12132_v26  ;;  %v12143_v26 = vld [vmem:[#allocation36_spill] sm:$0xff] }
0x1264   :  { %6323 = vmatpush2.msra.mxu0 %v12133_v46  ;;  %v12144_v46 = vld [vmem:[#allocation38_spill] sm:$0xff] }
0x1265   :  { %6324 = vmatprep.subr.mxu0 %v12134_v43  ;;  %v12145_v43 = vld [vmem:[#allocation40_spill] sm:$0xff] }
0x1266   :  { %6325 = vmatpush2.msra.mxu0 %v12135_v20  ;;  %v12146_v20 = vld [vmem:[#allocation42_spill] sm:$0xff] }
0x1267   :  { %6326 = vmatprep.subr.mxu0 %v12136_v15  ;;  %v12147_v15 = vld [vmem:[#allocation44_spill] sm:$0xff] }
0x1268   :  { %6327 = vmatpush2.msra.mxu0 %v12137_v0  ;;  %v12148_v0 = vld [vmem:[#allocation46_spill] sm:$0xff] }
0x1269   :  { %6328 = vmatprep.subr.mxu0 %v12138_v23  ;;  %v12149_v23 = vld [vmem:[#allocation48_spill] sm:$0xff] }
0x126a   :  { %6329 = vmatpush2.msra.mxu0 %v12139_v11 }
0x126b   :  { %6330 = vmatprep.subr.mxu0 %v12140_v56  ;;  %v12150_v56 = vld [vmem:[#allocation50_spill] sm:$0xff] }
0x126c   :  { %6331 = vmatpush2.msra.mxu0 %v12141_v63  ;;  %v12151_v63 = vld [vmem:[#allocation58_spill] sm:$0xff] }
0x126d   :  { %6332 = vmatprep.subr.mxu0 %v12142_v22 }
0x126e   :  { %6333 = vmatpush2.msra.mxu0 %v12143_v26  ;;  %v12152_v26 = vld [vmem:[#allocation59_spill] sm:$0xff] }
0x126f   :  { %6334 = vmatprep.subr.mxu0 %v12144_v46  ;;  %v12153_v46 = vld [vmem:[#allocation60_spill] sm:$0xff] }
0x1270   :  { %6335 = vmatpush2.msra.mxu0 %v12145_v43  ;;  %v12154_v43 = vld [vmem:[#allocation61_spill] sm:$0xff] }
0x1271   :  { %6336 = vmatprep.subr.mxu0 %v12146_v20  ;;  %v12155_v20 = vld [vmem:[#allocation62_spill] sm:$0xff] }
0x1272   :  { %6337 = vmatpush2.msra.mxu0 %v12147_v15  ;;  %v12156_v15 = vld [vmem:[#allocation63_spill] sm:$0xff] }
0x1273   :  { %6338 = vmatprep.subr.mxu0 %v12148_v0  ;;  %v12157_v0 = vld [vmem:[#allocation64_spill] sm:$0xff] }
0x1274   :  { %6339 = vmatpush2.msra.mxu0 %v12149_v23  ;;  %v12158_v23 = vld [vmem:[#allocation65_spill] sm:$0xff] }
0x1275   :  { %6341 = vmatmul.mubr.f32.vlgmr.msra.gmra.mxu0 %v11190_v14  ;;  %6645 = vmatprep.subr.mxu0 %v12150_v56 }
0x1276   :  { %6646 = vmatpush1.msra.mxu0 %v12151_v63  ;;  %6685 = vmatprep.mubr.f32.mxu0 %v11920_v2  ;;  %v12159_v63 = vld [vmem:[#allocation15_spill] sm:$0xff] }
0x1277   :  { %6647 = vmatprep.subr.mxu0 %v12152_v26 }
0x1278   :  { %6648 = vmatpush1.msra.mxu0 %v12153_v46 }
0x1279   :  { %6649 = vmatprep.subr.mxu0 %v12154_v43 }
0x127a   :  { %6650 = vmatpush1.msra.mxu0 %v12155_v20 }
0x127b   :  { %6651 = vmatprep.subr.mxu0 %v12156_v15 }
0x127c   :  { %6652 = vmatpush1.msra.mxu0 %v12157_v0 }
0x127d   :  { %7440 = vmatprep.subr.mxu0 %v12158_v23 }
0x12f5   :  { %v7402_v14 = vpop.f32.mrf.mxu0 }
0x12f7   :  { %v7403_v56 = vpop.f32.mrf.mxu0 }
0x12f8   :  { %v7404_v22 = vadd.f32 %v7403_v56, %v7402_v14 }
0x12fa   :  { %v6221_v11 = vadd.f32 %v7404_v22, %v12159_v63 }
0x12fc   :  { %v6224_v35 = vsel %vm5410_vm2, %v6221_v11, -inf }
0x12fd   :  { %6225 = vmax.xlane.f32.xlu1 %v6224_v35 }
0x1386   :  { %v6226_v26 = vpop.xlane.xlu1 %6225 }
0x1387   :  { %v6227_v46 = vsub.f32 %v6221_v11, %v6226_v26 }
0x1389   :  { %v6228_v18 = vmul.f32 1.442695, %v6227_v46 }
0x138b   :  { %7913 = vpow2.f32 %v6228_v18 }
0x1398   :  { %v7914_v43 = vpop.eup %7913 }
0x1399   :  { %v6230_v20 = vsel %vm5410_vm2, %v7914_v43, 0.0 }
0x139a   :  { %6231 = vadd.xlane.f32.xlu0 %v6230_v20 }
0x1423   :  { %v6232_v15 = vpop.xlane.xlu0 %6231 }
0x1424   :  { %7915 = vrcp.f32 %v6232_v15 }
0x1431   :  { %v7916_v0 = vpop.eup %7915 }
0x1432   :  { %v11270_v23 = vmul.f32 %v7916_v0, %v7914_v43 }
0x1434   :  { %12160 = vst [vmem:[#allocation68_spill] sm:$0xff] %v11270_v23  ;;  %v6235_v14 = vsel %vm5410_vm2, %v11270_v23, -inf }
0x1435   :  { %6236 = vmax.xlane.f32.xlu1 %v6235_v14 }
0x14be   :  { %v11274_v22 = vpop.xlane.xlu1 %6236 }
0x14bf   :  { %12161 = vst [vmem:[#allocation69_spill] sm:$0xff] %v11274_v22  ;;  %vm6238_vm12 = vcmp.ge.f32.partialorder %v11270_v23, %v11274_v22  ;;  %v11380_v22 = vld [vmem:[%s11601_s9 + $0x18] sm:$0xff] }
0x14c0   :  { %v6239_v18 = vsel %vm6238_vm12, %v11973_v60, 32  ;;  %12172 = vst [vmem:[#allocation80_spill] sm:$0xff] %v11380_v22 }
0x14c1   :  { %v6240_v35 = vsel %vm5410_vm2, %v6239_v18, 2147483647  ;;  %v11308_v18 = vld [vmem:[%s11601_s9 + $0x48] sm:$0xff] }
0x14c2   :  { %v6242_v11 = vshra.s32 %v6240_v35, 16  ;;  %v6241_v63 = vand.u32 65535, %v6240_v35  ;;  %v11314_v35 = vld [vmem:[%s11601_s9 + $0xc0] sm:$0xff] }
0x14c4   :  { %v6244_v56 = vcvt.s32.f32 %v6242_v11  ;;  %v6243_v46 = vcvt.s32.f32 %v6241_v63  ;;  %v11320_v11 = vld [vmem:[%s11601_s9 + $0x40] sm:$0xff]  ;;  %v11332_v63 = vld [vmem:[%s11601_s9 + $0x38] sm:$0xff] }
0x14c5   :  { %12162 = vst [vmem:[#allocation70_spill] sm:$0xff] %v11320_v11  ;;  %12164 = vst [vmem:[#allocation72_spill] sm:$0xff] %v11332_v63 }
0x14c6   :  { %6245 = vmin.xlane.f32.xlu0 %v6244_v56 }
0x154f   :  { %v6246_v26 = vpop.xlane.xlu0 %6245 }
0x1550   :  { %vm6247_vm13 = vcmp.eq.f32.partialorder %v6244_v56, %v6246_v26  ;;  %v6252_v20 = vcvt.f32.s32 %v6246_v26  ;;  %v11326_v56 = vld [vmem:[%s11601_s9 + $0xb8] sm:$0xff]  ;;  %v11338_v26 = vld [vmem:[%s11601_s9 + $0xb0] sm:$0xff] }
0x1551   :  { %v6248_v43 = vsel %vm6247_vm13, %v6243_v46, inf  ;;  %12163 = vst [vmem:[#allocation71_spill] sm:$0xff] %v11326_v56  ;;  %12165 = vst [vmem:[#allocation73_spill] sm:$0xff] %v11338_v26  ;;  %v11344_v46 = vld [vmem:[%s11601_s9 + $0x30] sm:$0xff] }
0x1552   :  { %6249 = vmin.xlane.f32.xlu1 %v6248_v43  ;;  %v6253_v0 = vshll.u32 %v6252_v20, 16  ;;  %12166 = vst [vmem:[#allocation74_spill] sm:$0xff] %v11344_v46  ;;  %v11350_v43 = vld [vmem:[%s11601_s9 + $0xa8] sm:$0xff] }
0x1553   :  { %12167 = vst [vmem:[#allocation75_spill] sm:$0xff] %v11350_v43  ;;  %v11356_v20 = vld [vmem:[%s11601_s9 + $0x28] sm:$0xff] }
0x1554   :  { %12168 = vst [vmem:[#allocation76_spill] sm:$0xff] %v11356_v20 }
0x15db   :  { %v6250_v15 = vpop.xlane.xlu1 %6249 }
0x15dc   :  { %v6251_v14 = vcvt.f32.s32 %v6250_v15  ;;  %v11362_v15 = vld [vmem:[%s11601_s9 + $0xa0] sm:$0xff] }
0x15dd   :  { %12169 = vst [vmem:[#allocation77_spill] sm:$0xff] %v11362_v15 }
0x15de   :  { %v6254_v17 = vadd.s32 %v6253_v0, %v6251_v14  ;;  %v11368_v0 = vld [vmem:[%s11601_s9 + $0x20] sm:$0xff]  ;;  %v11374_v14 = vld [vmem:[%s11601_s9 + $0x98] sm:$0xff] }
0x15df   :  { %12170 = vst [vmem:[#allocation78_spill] sm:$0xff] %v11368_v0  ;;  %12171 = vst [vmem:[#allocation79_spill] sm:$0xff] %v11374_v14 }
0x15e0   :  { %vm6255_vm14 = vcmp.eq.s32.totalorder %v11973_v60, %v6254_v17  ;;  %v11296_v17 = vld [vmem:[%s11601_s9 + $0x50] sm:$0xff] }
0x15e1   :  { %v7259_v23 = vsel %vm6255_vm14, 1.0, %v11920_v2 }
0x15e2   :  { %7261 = vmatmul.mubr.msk.f32.vlgmr.msra.gmra.mxu1 %vm460_vm0, %v7259_v23  ;;  %v11302_v23 = vld [vmem:[%s11601_s9 + $0xc8] sm:$0xff] }
0x15e3   :  { %7406 = vmatpush3.msra.mxu1 %v11109_v42 }
0x15e4   :  { %7407 = vmatprep.subr.mxu1 %v11115_v9 }
0x15e5   :  { %7408 = vmatpush3.msra.mxu1 %v11121_v27 }
0x15e6   :  { %7409 = vmatprep.subr.mxu1 %v11127_v33 }
0x15e7   :  { %7410 = vmatpush3.msra.mxu1 %v11133_v59 }
0x15e8   :  { %7411 = vmatprep.subr.mxu1 %v11139_v16 }
0x15e9   :  { %7412 = vmatpush3.msra.mxu1 %v11145_v6 }
0x15ea   :  { %7413 = vmatprep.subr.mxu1 %v11151_v44 }
0x15eb   :  { %7414 = vmatpush3.msra.mxu1 %v11157_v47 }
0x15ec   :  { %7415 = vmatprep.subr.mxu1 %v11163_v61 }
0x15ed   :  { %7416 = vmatpush3.msra.mxu1 %v11296_v17 }
0x15ee   :  { %7417 = vmatprep.subr.mxu1 %v11302_v23 }
0x15ef   :  { %7418 = vmatpush3.msra.mxu1 %v11308_v18 }
0x15f0   :  { %7419 = vmatprep.subr.mxu1 %v11314_v35 }
0x15f1   :  { %7420 = vmatpush3.msra.mxu1 %v11320_v11 }
0x15f2   :  { %7421 = vmatprep.subr.mxu1 %v11326_v56 }
0x15f3   :  { %7422 = vmatpush3.msra.mxu1 %v11332_v63 }
0x15f4   :  { %7423 = vmatprep.subr.mxu1 %v11338_v26 }
0x15f5   :  { %7424 = vmatpush3.msra.mxu1 %v11344_v46 }
0x15f6   :  { %7425 = vmatprep.subr.mxu1 %v11350_v43 }
0x15f7   :  { %7426 = vmatpush3.msra.mxu1 %v11356_v20 }
0x15f8   :  { %7427 = vmatprep.subr.mxu1 %v11362_v15  ;;  %v11386_v15 = vld [vmem:[%s11601_s9 + $0x90] sm:$0xff] }
0x15f9   :  { %7428 = vmatpush3.msra.mxu1 %v11368_v0  ;;  %12173 = vst [vmem:[#allocation51_spill] sm:$0xff] %v11386_v15  ;;  %v11392_v0 = vld [vmem:[%s11601_s9 + $0x10] sm:$0xff] }
0x15fa   :  { %7429 = vmatprep.subr.mxu1 %v11374_v14  ;;  %12174 = vst [vmem:[#allocation52_spill] sm:$0xff] %v11392_v0  ;;  %v11398_v14 = vld [vmem:[%s11601_s9 + $0x88] sm:$0xff] }
0x15fb   :  { %7430 = vmatpush3.msra.mxu1 %v11380_v22  ;;  %12175 = vst [vmem:[#allocation53_spill] sm:$0xff] %v11398_v14  ;;  %v11404_v22 = vld [vmem:[%s11601_s9 + $0x8] sm:$0xff] }
0x15fc   :  { %7431 = vmatprep.subr.mxu1 %v11386_v15  ;;  %12176 = vst [vmem:[#allocation54_spill] sm:$0xff] %v11404_v22  ;;  %v11410_v15 = vld [vmem:[%s11601_s9 + $0x80] sm:$0xff] }
0x15fd   :  { %7432 = vmatpush3.msra.mxu1 %v11392_v0  ;;  %12177 = vst [vmem:[#allocation55_spill] sm:$0xff] %v11410_v15  ;;  %v11416_v0 = vld [vmem:[%s11601_s9] sm:$0xff] }
0x15fe   :  { %7433 = vmatprep.subr.mxu1 %v11398_v14  ;;  %v6342_v14 = vpop.f32.mrf.mxu0 }
0x15ff   :  { %7434 = vmatpush3.msra.mxu1 %v11404_v22 }
0x1600   :  { %7435 = vmatprep.subr.mxu1 %v11410_v15  ;;  %v6344_v22 = vpop.f32.mrf.mxu0 }
0x1601   :  { %7436 = vmatpush3.msra.mxu1 %v11416_v0 }
0x1602   :  { %6547 = vmatprep.subr.mxu1 %v10837_v10  ;;  %v12178_v10 = vld [vmem:[#allocation18_spill] sm:$0xff] }
0x16a2   :  { %v6416_v20 = vpop.f32.mrf.mxu1 }
0x16a3   :  { %v6417_v43 = vadd.f32 %v6416_v20, %v6342_v14 }
0x16a4   :  { %v6418_v46 = vpop.f32.mrf.mxu1 }
0x16a5   :  { %v6419_v26 = vadd.f32 %v6418_v46, %v6344_v22  ;;  %v6421_v63 = vadd.f32 %v6417_v43, %v10574_v29 }
0x16a7   :  { %v6422_v56 = vadd.f32 %v6419_v26, %v10577_v48 }
0x16a9   :  { %7917 = vtanh.f32 %v6422_v56 }
0x16aa   :  { %7919 = vtanh.f32 %v6421_v63 }
0x16b6   :  { %v7918_v15 = vpop.eup %7917 }
0x16b7   :  { %v11422_v11 = vpop.eup %7919  ;;  %6489 = vmatprep.mubr.f32.mxu1 %v7918_v15 }
0x16b8   :  { %6490 = vmatmul.mubr.f32.vlgmr.msra.gmra.mxu1 %v11422_v11 }
0x16b9   :  { %6548 = vmatpush1.msra.mxu1 %v10845_v37  ;;  %6611 = vmatprep.mubr.f32.mxu1 %v7918_v15  ;;  %v12179_v37 = vld [vmem:[#allocation19_spill] sm:$0xff] }
0x16ba   :  { %6549 = vmatprep.subr.mxu1 %v10848_v5  ;;  %v12180_v5 = vld [vmem:[#allocation20_spill] sm:$0xff] }
0x16bb   :  { %6550 = vmatpush1.msra.mxu1 %v10851_v55  ;;  %v12181_v55 = vld [vmem:[#allocation21_spill] sm:$0xff] }
0x16bc   :  { %6551 = vmatprep.subr.mxu1 %v10854_v40  ;;  %v12182_v40 = vld [vmem:[#allocation22_spill] sm:$0xff] }
0x16bd   :  { %6552 = vmatpush1.msra.mxu1 %v10857_v31  ;;  %v12183_v31 = vld [vmem:[#allocation23_spill] sm:$0xff] }
0x16be   :  { %6553 = vmatprep.subr.mxu1 %v10860_v58  ;;  %v12184_v58 = vld [vmem:[#allocation24_spill] sm:$0xff] }
0x16bf   :  { %6554 = vmatpush1.msra.mxu1 %v10863_v32  ;;  %v12185_v32 = vld [vmem:[#allocation25_spill] sm:$0xff] }
0x16c0   :  { %6555 = vmatprep.subr.mxu1 %v10866_v1  ;;  %v12186_v1 = vld [vmem:[#allocation26_spill] sm:$0xff] }
0x16c1   :  { %6556 = vmatpush1.msra.mxu1 %v10869_v51  ;;  %v12187_v51 = vld [vmem:[#allocation27_spill] sm:$0xff] }
0x16c2   :  { %6557 = vmatprep.subr.mxu1 %v10872_v41  ;;  %v12188_v41 = vld [vmem:[#allocation28_spill] sm:$0xff] }
0x16c3   :  { %6558 = vmatpush1.msra.mxu1 %v10875_v12  ;;  %v12189_v12 = vld [vmem:[#allocation29_spill] sm:$0xff] }
0x16c4   :  { %6559 = vmatprep.subr.mxu1 %v10878_v25  ;;  %v12190_v25 = vld [vmem:[#allocation30_spill] sm:$0xff] }
0x16c5   :  { %6560 = vmatpush1.msra.mxu1 %v10881_v53  ;;  %v12191_v53 = vld [vmem:[#allocation31_spill] sm:$0xff] }
0x16c6   :  { %6561 = vmatprep.subr.mxu1 %v10884_v7  ;;  %v12192_v7 = vld [vmem:[#allocation33_spill] sm:$0xff] }
0x16c7   :  { %6562 = vmatpush1.msra.mxu1 %v10887_v34  ;;  %v12193_v34 = vld [vmem:[#allocation39_spill] sm:$0xff] }
0x16c8   :  { %6563 = vmatprep.subr.mxu1 %v10890_v36  ;;  %v12194_v36 = vld [vmem:[#allocation41_spill] sm:$0xff] }
0x16c9   :  { %6564 = vmatpush1.msra.mxu1 %v10893_v50  ;;  %v12195_v50 = vld [vmem:[#allocation43_spill] sm:$0xff] }
0x16ca   :  { %6565 = vmatprep.subr.mxu1 %v10896_v57  ;;  %v12196_v57 = vld [vmem:[#allocation45_spill] sm:$0xff] }
0x16cb   :  { %6566 = vmatpush1.msra.mxu1 %v10899_v4  ;;  %v12197_v4 = vld [vmem:[#allocation47_spill] sm:$0xff] }
0x16cc   :  { %6567 = vmatprep.subr.mxu1 %v10902_v52  ;;  %v12198_v52 = vld [vmem:[#allocation49_spill] sm:$0xff] }
0x16cd   :  { %6568 = vmatpush1.msra.mxu1 %v10905_v62  ;;  %v12199_v62 = vld [vmem:[#allocation14_spill] sm:$0xff] }
0x16ce   :  { %6569 = vmatprep.subr.mxu1 %v10908_v30  ;;  %v12200_v30 = vld [vmem:[#allocation36_spill] sm:$0xff] }
0x16cf   :  { %6570 = vmatpush1.msra.mxu1 %v10911_v28  ;;  %v12201_v28 = vld [vmem:[#allocation38_spill] sm:$0xff] }
0x16d0   :  { %6571 = vmatprep.subr.mxu1 %v12110_v24  ;;  %v12202_v24 = vld [vmem:[#allocation40_spill] sm:$0xff] }
0x16d1   :  { %6572 = vmatpush1.msra.mxu1 %v12111_v49  ;;  %v12203_v49 = vld [vmem:[#allocation42_spill] sm:$0xff] }
0x16d2   :  { %6573 = vmatprep.subr.mxu1 %v12112_v13  ;;  %v12204_v13 = vld [vmem:[#allocation44_spill] sm:$0xff] }
0x16d3   :  { %6574 = vmatpush1.msra.mxu1 %v12113_v21  ;;  %v12205_v21 = vld [vmem:[#allocation46_spill] sm:$0xff] }
0x16d4   :  { %6575 = vmatprep.subr.mxu1 %v12114_v38  ;;  %v12206_v38 = vld [vmem:[#allocation48_spill] sm:$0xff] }
0x16d5   :  { %6576 = vmatpush1.msra.mxu1 %v12115_v54 }
0x16d6   :  { %6577 = vmatprep.subr.mxu1 %v12116_v45 }
0x16d7   :  { %6578 = vmatpush1.msra.mxu1 %v12117_v3 }
0x16d8   :  { %6579 = vmatprep.subr.mxu1 %v12118_v19  ;;  %v11492_v19 = vld [vmem:[%s11602_s10] sm:$0x1]  ;;  %s7248_s10 = sld [smem:[#allocation3 + $0x1]] }
0x16d9   :  { %6580 = vmatpush2.msra.mxu1 %v12119_v8 }
0x16da   :  { %6581 = vmatprep.subr.mxu1 %v12120_v39 }
0x16db   :  { %6582 = vmatpush2.msra.mxu1 %v12178_v10 }
0x16dc   :  { %6583 = vmatprep.subr.mxu1 %v12179_v37 }
0x16dd   :  { %6584 = vmatpush2.msra.mxu1 %v12180_v5 }
0x16de   :  { %6585 = vmatprep.subr.mxu1 %v12181_v55 }
0x16df   :  { %6586 = vmatpush2.msra.mxu1 %v12182_v40 }
0x16e0   :  { %6587 = vmatprep.subr.mxu1 %v12183_v31 }
0x16e1   :  { %6588 = vmatpush2.msra.mxu1 %v12184_v58 }
0x16e2   :  { %6589 = vmatprep.subr.mxu1 %v12185_v32 }
0x16e3   :  { %6590 = vmatpush2.msra.mxu1 %v12186_v1 }
0x16e4   :  { %6591 = vmatprep.subr.mxu1 %v12187_v51 }
0x16e5   :  { %6592 = vmatpush2.msra.mxu1 %v12188_v41 }
0x16e6   :  { %6593 = vmatprep.subr.mxu1 %v12189_v12 }
0x16e7   :  { %6594 = vmatpush2.msra.mxu1 %v12190_v25 }
0x16e8   :  { %6595 = vmatprep.subr.mxu1 %v12191_v53 }
0x16e9   :  { %6596 = vmatpush2.msra.mxu1 %v12192_v7  ;;  %v12222_v7 = vld [vmem:[#allocation55_spill] sm:$0xff] }
0x16ea   :  { %6597 = vmatprep.subr.mxu1 %v12193_v34 }
0x16eb   :  { %6598 = vmatpush2.msra.mxu1 %v12194_v36 }
0x16ec   :  { %6599 = vmatprep.subr.mxu1 %v12195_v50 }
0x16ed   :  { %6600 = vmatpush2.msra.mxu1 %v12196_v57 }
0x16ee   :  { %6601 = vmatprep.subr.mxu1 %v12197_v4 }
0x16ef   :  { %6602 = vmatpush2.msra.mxu1 %v12198_v52 }
0x16f0   :  { %6603 = vmatprep.subr.mxu1 %v12199_v62 }
0x16f1   :  { %6604 = vmatpush2.msra.mxu1 %v12200_v30 }
0x16f2   :  { %6605 = vmatprep.subr.mxu1 %v12201_v28 }
0x16f3   :  { %6606 = vmatpush2.msra.mxu1 %v12202_v24 }
0x16f4   :  { %6607 = vmatprep.subr.mxu1 %v12203_v49 }
0x16f5   :  { %6608 = vmatpush2.msra.mxu1 %v12204_v13 }
0x16f6   :  { %6609 = vmatprep.subr.mxu1 %v12205_v21 }
0x16f7   :  { %6610 = vmatpush2.msra.mxu1 %v12206_v38 }
0x16f8   :  { %6612 = vmatmul.mubr.f32.vlgmr.msra.gmra.mxu1 %v11422_v11 }
0x1778   :  { %v7437_v54 = vpop.f32.mrf.mxu1 }
0x177a   :  { %v7438_v45 = vpop.f32.mrf.mxu1 }
0x177b   :  { %v7439_v3 = vadd.f32 %v7438_v45, %v7437_v54  ;;  %v12223_v54 = vld [vmem:[#allocation34_spill] sm:$0xff]  ;;  %v12224_v45 = vld [vmem:[#allocation32_spill] sm:$0xff] }
0x177d   :  { %v6492_v8 = vadd.f32 %v11492_v19, %v7439_v3  ;;  %v5445_v3 = vsub.f32 %v12224_v45, %v12223_v54 }
0x177f   :  { %v6495_v39 = vsel %vm5410_vm2, %v6492_v8, -inf }
0x1780   :  { %6496 = vmax.xlane.f32.xlu0 %v6495_v39  ;;  %v12225_v39 = vld [vmem:[#allocation67_spill] sm:$0xff] }
0x17b8   :  { %v6613_v34 = vpop.f32.mrf.mxu1 }
0x17ba   :  { %v6615_v57 = vpop.f32.mrf.mxu1 }
0x1809   :  { %v6497_v22 = vpop.xlane.xlu0 %6496 }
0x180a   :  { %v6498_v56 = vsub.f32 %v6492_v8, %v6497_v22  ;;  %v12226_v22 = vld [vmem:[#allocation66_spill] sm:$0xff] }
0x180c   :  { %v6499_v63 = vmul.f32 1.442695, %v6498_v56  ;;  %v5987_v56 = vsub.f32 %v12226_v22, %v12225_v39 }
0x180e   :  { %7921 = vpow2.f32 %v6499_v63 }
0x181b   :  { %v7922_v26 = vpop.eup %7921 }
0x181c   :  { %v6501_v11 = vsel %vm5410_vm2, %v7922_v26, 0.0 }
0x181d   :  { %6502 = vadd.xlane.f32.xlu1 %v6501_v11 }
0x18a6   :  { %v6503_v46 = vpop.xlane.xlu1 %6502 }
0x18a7   :  { %7923 = vrcp.f32 %v6503_v46 }
0x18b4   :  { %v7924_v43 = vpop.eup %7923 }
0x18b5   :  { %v11497_v20 = vmul.f32 %v7924_v43, %v7922_v26  ;;  %v5988_v26 = vmul.f32 1.442695, %v5987_v56 }
0x18b7   :  { %v6506_v15 = vsel %vm5410_vm2, %v11497_v20, -inf }
0x18b8   :  { %6507 = vmax.xlane.f32.xlu0 %v6506_v15 }
0x1941   :  { %v11501_v14 = vpop.xlane.xlu0 %6507 }
0x1942   :  { %vm6509_vm15 = vcmp.ge.f32.partialorder %v11497_v20, %v11501_v14  ;;  %v6529_v11 = vsub.f32 %v11497_v20, %v11501_v14 }
0x1943   :  { %v6510_v10 = vsel %vm6509_vm15, %v11973_v60, 32 }
0x1944   :  { %v6511_v37 = vsel %vm5410_vm2, %v6510_v10, 2147483647 }
0x1945   :  { %v6513_v5 = vshra.s32 %v6511_v37, 16  ;;  %v6512_v40 = vand.u32 65535, %v6511_v37 }
0x1947   :  { %v6515_v55 = vcvt.s32.f32 %v6513_v5  ;;  %v6514_v58 = vcvt.s32.f32 %v6512_v40  ;;  %v5454_v5 = vstv %s7248_s10 }
0x1949   :  { %6516 = vmin.xlane.f32.xlu1 %v6515_v55 }
0x19d2   :  { %v6517_v31 = vpop.xlane.xlu1 %6516 }
0x19d3   :  { %vm6518_vm1 = vcmp.eq.f32.partialorder %v6515_v55, %v6517_v31  ;;  %v6523_v1 = vcvt.f32.s32 %v6517_v31  ;;  %v5996_v31 = vstv %s7254_s26 }
0x19d4   :  { %v6519_v32 = vsel %vm6518_vm1, %v6514_v58, inf  ;;  %vm5997_vm4 = vcmp.eq.s32.totalorder %v11973_v60, %v5996_v31 }
0x19d5   :  { %6520 = vmin.xlane.f32.xlu0 %v6519_v32  ;;  %v6524_v41 = vshll.u32 %v6523_v1, 16  ;;  %v6538_v1 = vstv %s7260_s8 }
0x19d6   :  { %vm6539_vm5 = vcmp.eq.s32.totalorder %v11973_v60, %v6538_v1 }
0x1a5e   :  { %v6521_v51 = vpop.xlane.xlu0 %6520 }
0x1a5f   :  { %v6522_v12 = vcvt.f32.s32 %v6521_v51 }
0x1a61   :  { %v6525_v25 = vadd.s32 %v6524_v41, %v6522_v12  ;;  %v5998_v41 = vsel %vm5997_vm4, %v12226_v22, 0.0 }
0x1a62   :  { %v5999_v12 = vsel %vm5410_vm2, %v5998_v41, 0.0 }
0x1a63   :  { %vm6526_vm3 = vcmp.eq.s32.totalorder %v11973_v60, %v6525_v25  ;;  %v6540_v25 = vsel %vm6539_vm5, %v11497_v20, 0.0 }
0x1a64   :  { %v7262_v53 = vsel %vm6526_vm3, 1.0, %v11920_v2  ;;  %v12207_v2 = vld [vmem:[#allocation70_spill] sm:$0xff] }
0x1a65   :  { %7264 = vmatmul.mubr.msk.f32.vlgmr.msra.gmra.mxu0 %vm460_vm0, %v7262_v53  ;;  %vm5455_vm0 = vcmp.eq.s32.totalorder %v11973_v60, %v5454_v5  ;;  %v6541_v53 = vsel %vm5410_vm2, %v6540_v25, 0.0 }
0x1a66   :  { %7441 = vmatpush3.msra.mxu0 %v11109_v42  ;;  %v12208_v42 = vld [vmem:[#allocation71_spill] sm:$0xff]  ;;  %v5456_v32 = vsel %vm5455_vm0, %v12224_v45, 0.0 }
0x1a67   :  { %7442 = vmatprep.subr.mxu0 %v11115_v9  ;;  %v12209_v9 = vld [vmem:[#allocation72_spill] sm:$0xff]  ;;  %v5457_v51 = vsel %vm5410_vm2, %v5456_v32, 0.0 }
0x1a68   :  { %7443 = vmatpush3.msra.mxu0 %v11121_v27  ;;  %v12210_v27 = vld [vmem:[#allocation73_spill] sm:$0xff] }
0x1a69   :  { %7444 = vmatprep.subr.mxu0 %v11127_v33  ;;  %v12211_v33 = vld [vmem:[#allocation74_spill] sm:$0xff] }
0x1a6a   :  { %7445 = vmatpush3.msra.mxu0 %v11133_v59  ;;  %v12212_v59 = vld [vmem:[#allocation75_spill] sm:$0xff] }
0x1a6b   :  { %7446 = vmatprep.subr.mxu0 %v11139_v16  ;;  %v12213_v16 = vld [vmem:[#allocation76_spill] sm:$0xff] }
0x1a6c   :  { %7447 = vmatpush3.msra.mxu0 %v11145_v6  ;;  %v12214_v6 = vld [vmem:[#allocation77_spill] sm:$0xff] }
0x1a6d   :  { %7448 = vmatprep.subr.mxu0 %v11151_v44  ;;  %v12215_v44 = vld [vmem:[#allocation78_spill] sm:$0xff] }
0x1a6e   :  { %7449 = vmatpush3.msra.mxu0 %v11157_v47  ;;  %v12216_v47 = vld [vmem:[#allocation79_spill] sm:$0xff] }
0x1a6f   :  { %7450 = vmatprep.subr.mxu0 %v11163_v61  ;;  %v12217_v61 = vld [vmem:[#allocation80_spill] sm:$0xff] }
0x1a70   :  { %7451 = vmatpush3.msra.mxu0 %v11296_v17  ;;  %v12218_v17 = vld [vmem:[#allocation51_spill] sm:$0xff] }
0x1a71   :  { %7452 = vmatprep.subr.mxu0 %v11302_v23  ;;  %v12219_v23 = vld [vmem:[#allocation52_spill] sm:$0xff] }
0x1a72   :  { %7453 = vmatpush3.msra.mxu0 %v11308_v18  ;;  %v12220_v18 = vld [vmem:[#allocation53_spill] sm:$0xff] }
0x1a73   :  { %7454 = vmatprep.subr.mxu0 %v11314_v35  ;;  %v12221_v35 = vld [vmem:[#allocation54_spill] sm:$0xff] }
0x1a74   :  { %7455 = vmatpush3.msra.mxu0 %v12207_v2  ;;  %v12227_v2 = vld [vmem:[#allocation37_spill] sm:$0xff] }
0x1a75   :  { %7456 = vmatprep.subr.mxu0 %v12208_v42  ;;  %v12228_v42 = vld [vmem:[#allocation35_spill] sm:$0xff] }
0x1a76   :  { %7457 = vmatpush3.msra.mxu0 %v12209_v9  ;;  %v5716_v9 = vsub.f32 %v12228_v42, %v12227_v2 }
0x1a77   :  { %7458 = vmatprep.subr.mxu0 %v12210_v27 }
0x1a78   :  { %7459 = vmatpush3.msra.mxu0 %v12211_v33  ;;  %v5717_v33 = vmul.f32 1.442695, %v5716_v9 }
0x1a79   :  { %7460 = vmatprep.subr.mxu0 %v12212_v59  ;;  %v12229_v59 = vld [vmem:[#allocation69_spill] sm:$0xff] }
0x1a7a   :  { %7461 = vmatpush3.msra.mxu0 %v12213_v16  ;;  %v12230_v16 = vld [vmem:[#allocation68_spill] sm:$0xff] }
0x1a7b   :  { %7462 = vmatprep.subr.mxu0 %v12214_v6  ;;  %v6258_v6 = vsub.f32 %v12230_v16, %v12229_v59 }
0x1a7c   :  { %7463 = vmatpush3.msra.mxu0 %v12215_v44 }
0x1a7d   :  { %7464 = vmatprep.subr.mxu0 %v12216_v47  ;;  %v6259_v44 = vmul.f32 1.442695, %v6258_v6 }
0x1a7e   :  { %7465 = vmatpush3.msra.mxu0 %v12217_v61 }
0x1a7f   :  { %7466 = vmatprep.subr.mxu0 %v12218_v17 }
0x1a80   :  { %7467 = vmatpush3.msra.mxu0 %v12219_v23 }
0x1a81   :  { %7468 = vmatprep.subr.mxu0 %v12220_v18 }
0x1a82   :  { %7469 = vmatpush3.msra.mxu0 %v12221_v35 }
0x1a83   :  { %7470 = vmatprep.subr.mxu0 %v12222_v7 }
0x1a84   :  { %7471 = vmatpush3.msra.mxu0 %v11416_v0 }
0x1b25   :  { %v6687_v36 = vpop.f32.mrf.mxu0 }
0x1b26   :  { %v6688_v50 = vadd.f32 %v6687_v36, %v6613_v34 }
0x1b27   :  { %v6689_v4 = vpop.f32.mrf.mxu0 }
0x1b28   :  { %v6690_v52 = vadd.f32 %v6689_v4, %v6615_v57  ;;  %v6692_v62 = vadd.f32 %v6688_v50, %v10574_v29  ;;  %v5725_v50 = vstv %s7251_s27  ;;  %v6267_v4 = vstv %s7257_s28 }
0x1b29   :  { %vm5726_vm6 = vcmp.eq.s32.totalorder %v11973_v60, %v5725_v50  ;;  %vm6268_vm7 = vcmp.eq.s32.totalorder %v11973_v60, %v6267_v4 }
0x1b2a   :  { %v6693_v30 = vadd.f32 %v6690_v52, %v10577_v48  ;;  %v5446_v48 = vmul.f32 1.442695, %v5445_v3 }
0x1b2c   :  { %7925 = vtanh.f32 %v6693_v30  ;;  %v6789_v30 = vstv %s7263_s29 }
0x1b2d   :  { %7927 = vtanh.f32 %v6692_v62  ;;  %v5727_v62 = vsel %vm5726_vm6, %v12228_v42, 0.0  ;;  %vm6790_vm8 = vcmp.eq.s32.totalorder %v11973_v60, %v6789_v30 }
0x1b39   :  { %v7926_v28 = vpop.eup %7925 }
0x1b3a   :  { %v7928_v24 = vpop.eup %7927  ;;  %6760 = vmatprep.mubr.f32.mxu0 %v7926_v28  ;;  %v5728_v28 = vsel %vm5410_vm2, %v5727_v62, 0.0 }
0x1b3b   :  { %6761 = vmatmul.mubr.f32.vlgmr.msra.gmra.mxu0 %v7928_v24  ;;  %v6269_v24 = vsel %vm6268_vm7, %v12230_v16, 0.0 }
0x1bfb   :  { %v7472_v49 = vpop.f32.mrf.mxu0 }
0x1bfd   :  { %v7473_v13 = vpop.f32.mrf.mxu0 }
0x1bfe   :  { %v7474_v21 = vadd.f32 %v7473_v13, %v7472_v49  ;;  %v6270_v49 = vsel %vm5410_vm2, %v6269_v24, 0.0 }
0x1c00   :  { %v6763_v0 = vadd.f32 %v11492_v19, %v7474_v21  ;;  %v6530_v19 = vmul.f32 1.442695, %v6529_v11 }
0x1c02   :  { %v6766_v38 = vsel %vm5410_vm2, %v6763_v0, -inf }
0x1c03   :  { %6767 = vmax.xlane.f32.xlu1 %v6766_v38 }
0x1c8c   :  { %v6768_v29 = vpop.xlane.xlu1 %6767 }
0x1c8d   :  { %v6769_v8 = vsub.f32 %v6763_v0, %v6768_v29 }
0x1c8f   :  { %v6770_v63 = vmul.f32 1.442695, %v6769_v8 }
0x1c91   :  { %7929 = vpow2.f32 %v6770_v63 }
0x1c92   :  { %7931 = vpow2.f32 %v5446_v48 }
0x1c93   :  { %7933 = vpow2.f32 %v5988_v26 }
0x1c94   :  { %7935 = vpow2.f32 %v6530_v19 }
0x1c9e   :  { %v7930_v46 = vpop.eup %7929 }
0x1c9f   :  { %v6772_v43 = vsel %vm5410_vm2, %v7930_v46, 0.0  ;;  %v7932_v15 = vpop.eup %7931 }
0x1ca0   :  { %6773 = vadd.xlane.f32.xlu0 %v6772_v43  ;;  %v5448_v10 = vsel %vm5410_vm2, %v7932_v15, 0.0  ;;  %v7934_v37 = vpop.eup %7933 }
0x1ca1   :  { %v5990_v55 = vsel %vm5410_vm2, %v7934_v37, 0.0  ;;  %v7936_v40 = vpop.eup %7935 }
0x1ca2   :  { %v6532_v58 = vsel %vm5410_vm2, %v7936_v40, 0.0 }
0x1ca4   :  { %5449 = vadd.xlane.f32.xlu0 %v5448_v10 }
0x1ca8   :  { %5991 = vadd.xlane.f32.xlu0 %v5990_v55 }
0x1cac   :  { %6533 = vadd.xlane.f32.xlu0 %v6532_v58 }
0x1cb0   :  { %5458 = vadd.xlane.f32.xlu0 %v5457_v51 }
0x1cb4   :  { %6000 = vadd.xlane.f32.xlu0 %v5999_v12 }
0x1cb8   :  { %6542 = vadd.xlane.f32.xlu0 %v6541_v53 }
0x1d29   :  { %v6774_v27 = vpop.xlane.xlu0 %6773 }
0x1d2a   :  { %7937 = vrcp.f32 %v6774_v27 }
0x1d2b   :  { %7939 = vpow2.f32 %v5717_v33 }
0x1d2c   :  { %7941 = vpow2.f32 %v6259_v44 }
0x1d2d   :  { %v5450_v0 = vpop.xlane.xlu0 %5449 }
0x1d31   :  { %v5992_v45 = vpop.xlane.xlu0 %5991 }
0x1d35   :  { %v6534_v29 = vpop.xlane.xlu0 %6533 }
0x1d37   :  { %v7938_v47 = vpop.eup %7937 }
0x1d38   :  { %v6776_v61 = vmul.f32 %v7938_v47, %v7930_v46  ;;  %v7940_v20 = vpop.eup %7939 }
0x1d39   :  { %v5719_v23 = vsel %vm5410_vm2, %v7940_v20, 0.0  ;;  %v7942_v18 = vpop.eup %7941  ;;  %v5459_v46 = vpop.xlane.xlu0 %5458 }
0x1d3a   :  { %v6777_v17 = vsel %vm5410_vm2, %v6776_v61, -inf  ;;  %v6261_v35 = vsel %vm5410_vm2, %v7942_v18, 0.0  ;;  %v6791_v13 = vsel %vm6790_vm8, %v6776_v61, 0.0 }
0x1d3b   :  { %6778 = vmax.xlane.f32.xlu1 %v6777_v17  ;;  %v6792_v21 = vsel %vm5410_vm2, %v6791_v13, 0.0 }
0x1d3d   :  { %v6001_v58 = vpop.xlane.xlu0 %6000 }
0x1d3f   :  { %5720 = vadd.xlane.f32.xlu1 %v5719_v23 }
0x1d41   :  { %v6543_v9 = vpop.xlane.xlu0 %6542 }
0x1d43   :  { %6262 = vadd.xlane.f32.xlu1 %v6261_v35 }
0x1dc4   :  { %v11571_v7 = vpop.xlane.xlu1 %6778 }
0x1dc5   :  { %v6780_v34 = vsub.f32 %v6776_v61, %v11571_v7 }
0x1dc7   :  { %v6781_v36 = vmul.f32 1.442695, %v6780_v34 }
0x1dc8   :  { %v5721_v38 = vpop.xlane.xlu1 %5720 }
0x1dc9   :  { %7943 = vpow2.f32 %v6781_v36 }
0x1dca   :  { %7945 = vlog2.f32 %v5450_v0 }
0x1dcb   :  { %7947 = vlog2.f32 %v5721_v38 }
0x1dcc   :  { %7949 = vlog2.f32 %v5992_v45  ;;  %v6263_v3 = vpop.xlane.xlu1 %6262 }
0x1dcd   :  { %7951 = vlog2.f32 %v6263_v3 }
0x1dce   :  { %7953 = vlog2.f32 %v6534_v29 }
0x1dd6   :  { %v7944_v57 = vpop.eup %7943 }
0x1dd7   :  { %v6783_v52 = vsel %vm5410_vm2, %v7944_v57, 0.0  ;;  %v7946_v8 = vpop.eup %7945  ;;  %vm6797_vm2 = vcmask 0  }
0x1dd8   :  { %6784 = vadd.xlane.f32.xlu1 %v6783_v52  ;;  %v7948_v48 = vpop.eup %7947  ;;  %v5452_v60 = vmul.f32 0.6931472, %v7946_v8 }
0x1dd9   :  { %v7950_v22 = vpop.eup %7949  ;;  %v5723_v56 = vmul.f32 0.6931472, %v7948_v48 }
0x1dda   :  { %v5994_v26 = vmul.f32 0.6931472, %v7950_v22  ;;  %v5453_v11 = vadd.f32 %v5452_v60, %v12223_v54  ;;  %v7952_v19 = vpop.eup %7951 }
0x1ddb   :  { %v5724_v43 = vadd.f32 %v5723_v56, %v12227_v2  ;;  %v6265_v5 = vmul.f32 0.6931472, %v7952_v19  ;;  %v7954_v40 = vpop.eup %7953 }
0x1ddc   :  { %5729 = vadd.xlane.f32.xlu1 %v5728_v28  ;;  %v5460_v10 = vsub.f32 %v5453_v11, %v5459_v46  ;;  %v5995_v37 = vadd.f32 %v5994_v26, %v12225_v39  ;;  %v6536_v1 = vmul.f32 0.6931472, %v7954_v40 }
0x1ddd   :  { %v6266_v41 = vadd.f32 %v6265_v5, %v12229_v59 }
0x1dde   :  { %v6002_v51 = vsub.f32 %v5995_v37, %v6001_v58  ;;  %v6537_v25 = vadd.f32 %v6536_v1, %v11501_v14 }
0x1de0   :  { %6271 = vadd.xlane.f32.xlu1 %v6270_v49  ;;  %v6544_v27 = vsub.f32 %v6537_v25, %v6543_v9 }
0x1de4   :  { %6793 = vadd.xlane.f32.xlu1 %v6792_v21 }
0x1e61   :  { %v6785_v63 = vpop.xlane.xlu1 %6784 }
0x1e62   :  { %7955 = vlog2.f32 %v6785_v63 }
0x1e65   :  { %v5730_v15 = vpop.xlane.xlu1 %5729 }
0x1e66   :  { %v5731_v55 = vsub.f32 %v5724_v43, %v5730_v15 }
0x1e68   :  { %v5732_v31 = vadd.f32 %v5731_v55, %v5460_v10 }
0x1e69   :  { %v6272_v32 = vpop.xlane.xlu1 %6271 }
0x1e6a   :  { %v6003_v54 = vadd.f32 %v6002_v51, %v5732_v31  ;;  %v6273_v12 = vsub.f32 %v6266_v41, %v6272_v32 }
0x1e6c   :  { %v6274_v42 = vadd.f32 %v6273_v12, %v6003_v54 }
0x1e6d   :  { %v6794_v33 = vpop.xlane.xlu1 %6793 }
0x1e6e   :  { %v6545_v16 = vadd.f32 %v6544_v27, %v6274_v42 }
0x1e6f   :  { %v7956_v53 = vpop.eup %7955 }
0x1e70   :  { %v6787_v2 = vmul.f32 0.6931472, %v7956_v53 }
0x1e72   :  { %v6788_v39 = vadd.f32 %v6787_v2, %v11571_v7 }
0x1e74   :  { %v6795_v6 = vsub.f32 %v6788_v39, %v6794_v33 }
0x1e76   :  { %v6796_v44 = vadd.f32 %v6795_v6, %v6545_v16 }
0x1e78   :  { %6798 = vst.msk [vmem:[#allocation9] sm:$0x1] %vm6797_vm2, %v6796_v44 }
0x1e79   :  { %8159 = shalt.err (!%p8156_p5)
}
0x1e7a   :  { %6808 = dma.vmem_to_hbm [thread:$0]  %s6806_s12, 16, %s11603_s11, [#allocation6]  }
0x1e7b   :  { %8174 = dma.done.wait [#allocation6], 16  }
0x1e7c   :  { %8175 = vsyncadd [#allocation6], 4294967280 }
0x1e7d   :  { %6812 = vsyncpa [#allocation5], 1 }
0x1e7e   :  { %6813 = vsyncpa [#allocation8], 1 }
0x1e7f   :  { %6814 = vsyncpa [#allocation6], 1 }

</bundles_post_ra>
